<compile_context>
chip_gen: v5e
topology: v5e:2x2
jax: 0.10.0
libtpu: 0.0.40
codegen_flags: <defaults>
</compile_context>

<pallas_src>
import jax
import jax.numpy as jnp
from jax.experimental import pallas as pl
from jax.experimental.pallas import tpu as pltpu

# ---------------- geometry (LeNet on 3x32x32) ----------------
H_IN, W_IN, C_IN = 32, 32, 3
K = 5
H1, W1 = 28, 28             # conv1 valid output
HP1, WP1 = 14, 14           # after pool1
H2, W2 = 10, 10             # conv2 valid output
HP2, WP2 = 5, 5             # after pool2
C1, C2 = 6, 16
F1, F2, F3 = 120, 84, 10

CP = 128                    # padded output-lane width of every matmul
KWC = K * C_IN              # 15: conv1 (kw, cin) stacked on input lanes (host)
KWC_P = 16                  # padded to 16 lanes
C1P = 8                     # pooled1 channel lanes kept (6 real + 2 zero)

IMG_ROWS = H_IN * W_IN      # 1024 flattened input rows per image
Y1_ROWS = H1 * W_IN         # 896  conv1 rows computed (valid cols: w < 28)
L2 = (H2 - 1) * WP1 + W2    # 136  conv2 rows on the 14-wide pooled grid
P1_ROWS = HP1 * WP1 + 4     # 200  pooled1 rows (196 valid)
P2_PITCH = 32               # per-image row pitch in the pooled2 buffer

B_TILE = 8                  # images per grid step
CHUNK = 128                 # conv1 M-chunk (register accumulated)
N_CHUNKS = Y1_ROWS // CHUNK  # 7


# ---------------- the fused kernel (B_TILE images per grid step) ----------------
def lenet_kernel(x_ref, w1_ref, b1_ref, w2_ref, b2_ref,
                 wf1_ref, bf1_ref, wf2_ref, bf2_ref, wf3_ref, bf3_ref,
                 o_ref, y1_ref, p1_ref, y2_ref, p2_ref):
    f32 = jnp.float32

    # ---- per-image conv / pool pipeline (dynamic loop keeps code size small)
    @pl.loop(0, B_TILE)
    def _(b):
        xb = b * IMG_ROWS

        # conv1 + bias + ReLU.  kw taps & channels are pre-stacked on the 16
        # input lanes, so only the 5 kh taps remain; accumulate them in
        # registers per 128-row chunk and store ReLU(acc + b) once per chunk.
        for c in range(N_CHUNKS):
            acc = jnp.zeros((CHUNK, CP), dtype=f32)
            for kh in range(K):
                start = pl.multiple_of(xb + c * CHUNK + kh * W_IN, 32)
                acc = acc + jnp.dot(x_ref[pl.ds(start, CHUNK), :], w1_ref[kh],
                                    preferred_element_type=f32)
            y1_ref[pl.ds(c * CHUNK, CHUNK), :] = jnp.maximum(acc + b1_ref[...], 0.0)

        # pool1 (2x2/2): direct 4-way max via stride-2 sublane reads; only the
        # 196 selected rows are read (garbage wrap-around rows never touched).
        for i in range(HP1):
            base = 2 * i * W_IN
            m = jnp.maximum(
                jnp.maximum(y1_ref[pl.ds(base, HP1, 2), :],
                            y1_ref[pl.ds(base + 1, HP1, 2), :]),
                jnp.maximum(y1_ref[pl.ds(base + W_IN, HP1, 2), :],
                            y1_ref[pl.ds(base + W_IN + 1, HP1, 2), :]))
            p1_ref[pl.ds(i * WP1, WP1), :] = m[:, :C1P]      # keep 8 lanes

        # conv2 + bias + ReLU: 25 taps (K=8), register-accumulated over the
        # whole 136-row grid, single store (no VMEM RMW).
        acc2 = jnp.zeros((L2, CP), dtype=f32)
        for kh in range(K):
            for kw in range(K):
                acc2 = acc2 + jnp.dot(p1_ref[pl.ds(kh * WP1 + kw, L2), :],
                                      w2_ref[kh * K + kw],
                                      preferred_element_type=f32)
        y2_ref[...] = jnp.maximum(acc2 + b2_ref[...], 0.0)

        # pool2 -> rows [b*32, b*32+25) of the tile-wide pooled2 buffer
        # (row = b*32 + i*5 + j, 16 real channel lanes).
        for i in range(HP2):
            base = 2 * i * WP1
            m = jnp.maximum(
                jnp.maximum(y2_ref[pl.ds(base, HP2, 2), :],
                            y2_ref[pl.ds(base + 1, HP2, 2), :]),
                jnp.maximum(y2_ref[pl.ds(base + WP1, HP2, 2), :],
                            y2_ref[pl.ds(base + WP1 + 1, HP2, 2), :]))
            p2_ref[pl.ds(b * P2_PITCH + i * WP2, WP2), :] = m[:, :C2]

    # ---- batched fully-connected head over the whole tile (M = B_TILE) ----
    acc = jnp.zeros((B_TILE, CP), dtype=jnp.float32)
    for s in range(HP2 * WP2):                           # torch index = c*25+s
        acc = acc + jnp.dot(p2_ref[pl.ds(s, B_TILE, P2_PITCH), :], wf1_ref[s],
                            preferred_element_type=jnp.float32)
    h = jnp.maximum(acc + bf1_ref[...], 0.0)
    h = jnp.maximum(jnp.dot(h, wf2_ref[...], preferred_element_type=jnp.float32)
                    + bf2_ref[...], 0.0)
    o_ref[...] = (jnp.dot(h, wf3_ref[...], preferred_element_type=jnp.float32)
                  + bf3_ref[...]).astype(o_ref.dtype)


# ---------------- host-side one-time weight preparation ----------------
def prepare_params(p):
    def pad2(a, r, c):
        return jnp.pad(a, ((0, r - a.shape[0]), (0, c - a.shape[1])))

    # conv1: OIHW -> w1[kh, kw*3+cin, cout], padded to (5, 16, 128)
    w1 = jnp.transpose(p["conv1_w"], (2, 3, 1, 0)).reshape(K, K * C_IN, C1)
    w1 = jnp.pad(w1, ((0, 0), (0, KWC_P - KWC), (0, CP - C1)))
    b1 = pad2(p["conv1_b"].reshape(1, C1), 1, CP)

    # conv2: OIHW -> w2[kh*5+kw, cin, cout], padded to (25, 8, 128)
    w2 = jnp.transpose(p["conv2_w"], (2, 3, 1, 0)).reshape(K * K, C1, C2)
    w2 = jnp.pad(w2, ((0, 0), (0, C1P - C1), (0, CP - C2)))
    b2 = pad2(p["conv2_b"].reshape(1, C2), 1, CP)

    # fc1: torch feature index = c*25 + s  ->  wf1[s, c, n], padded to (25,16,128)
    wf1 = p["fc1_w"].reshape(F1, C2, HP2 * WP2)          # (120, 16, 25) [n,c,s]
    wf1 = jnp.transpose(wf1, (2, 1, 0))                  # (25, 16, 120) [s,c,n]
    wf1 = jnp.pad(wf1, ((0, 0), (0, 0), (0, CP - F1)))
    bf1 = pad2(p["fc1_b"].reshape(1, F1), 1, CP)

    wf2 = pad2(p["fc2_w"].T, CP, CP)
    bf2 = pad2(p["fc2_b"].reshape(1, F2), 1, CP)
    wf3 = pad2(p["fc3_w"].T, CP, CP)
    bf3 = pad2(p["fc3_b"].reshape(1, F3), 1, CP)

    return dict(w1=w1, b1=b1, w2=w2, b2=b2,
                wf1=wf1, bf1=bf1, wf2=wf2, bf2=bf2, wf3=wf3, bf3=bf3)


def _resident_spec(arr):
    # whole-array VMEM-resident block; constant index map => fetched once.
    zeros = (0,) * arr.ndim
    return pl.BlockSpec(arr.shape, lambda i: zeros)


# ---------------- full forward ----------------
@jax.jit
def net_forward(kp, x_nchw):
    n = x_nchw.shape[0]
    n_pad = ((n + B_TILE - 1) // B_TILE) * B_TILE
    if n_pad != n:
        x_nchw = jnp.pad(x_nchw, ((0, n_pad - n), (0, 0), (0, 0), (0, 0)))

    # NCHW -> NHWC, then stack the 5 kw taps (x 3 channels) onto 16 lanes so
    # the in-kernel conv1 contraction is K=16 per kh-tap instead of K=3/tap.
    xh = jnp.transpose(x_nchw, (0, 2, 3, 1))                       # (N,32,32,3)
    parts = [jnp.pad(xh[:, :, kw:, :], ((0, 0), (0, 0), (0, kw), (0, 0)))
             for kw in range(K)]
    xs = jnp.concatenate(parts, axis=-1)                           # (N,32,32,15)
    xs = jnp.pad(xs, ((0, 0), (0, 0), (0, 0), (0, KWC_P - KWC)))   # (N,32,32,16)
    xs = xs.reshape(n_pad * IMG_ROWS, KWC_P)                       # (N*1024, 16)

    nt = n_pad // B_TILE
    out = pl.pallas_call(
        lenet_kernel,
        out_shape=jax.ShapeDtypeStruct((n_pad, CP), jnp.float32),
        grid_spec=pltpu.PrefetchScalarGridSpec(
            num_scalar_prefetch=0,
            grid=(nt,),
            in_specs=[
                pl.BlockSpec((B_TILE * IMG_ROWS, KWC_P), lambda i: (i, 0)),
                _resident_spec(kp["w1"]), _resident_spec(kp["b1"]),
                _resident_spec(kp["w2"]), _resident_spec(kp["b2"]),
                _resident_spec(kp["wf1"]), _resident_spec(kp["bf1"]),
                _resident_spec(kp["wf2"]), _resident_spec(kp["bf2"]),
                _resident_spec(kp["wf3"]), _resident_spec(kp["bf3"]),
            ],
            out_specs=pl.BlockSpec((B_TILE, CP), lambda i: (i, 0)),
            scratch_shapes=[
                pltpu.VMEM((Y1_ROWS, CP), jnp.float32),             # conv1 grid
                pltpu.VMEM((P1_ROWS, C1P), jnp.float32),            # pooled1
                pltpu.VMEM((L2, CP), jnp.float32),                  # conv2 grid
                pltpu.VMEM((B_TILE * P2_PITCH, C2), jnp.float32),   # pooled2
            ],
        ),
        compiler_params=pltpu.CompilerParams(
            dimension_semantics=("parallel",),
            vmem_limit_bytes=32 * 1024 * 1024,
        ),
    )(xs, kp["w1"], kp["b1"], kp["w2"], kp["b2"],
      kp["wf1"], kp["bf1"], kp["wf2"], kp["bf2"], kp["wf3"], kp["bf3"])

    return out[:n, :F3]                                   # (N, 10) logits


# ---------------- parameters in PyTorch-native layouts ----------------
def init_params(key):
    def u(k_, shape, fan_in):
        bound = 1.0 / jnp.sqrt(jnp.float32(fan_in))
        return jax.random.uniform(k_, shape, jnp.float32, -bound, bound)
    ks = jax.random.split(key, 10)
    return {
        "conv1_w": u(ks[0], (C1, C_IN, K, K), C_IN * K * K),   # OIHW
        "conv1_b": u(ks[1], (C1,), C_IN * K * K),
        "conv2_w": u(ks[2], (C2, C1, K, K), C1 * K * K),
        "conv2_b": u(ks[3], (C2,), C1 * K * K),
        "fc1_w": u(ks[4], (F1, C2 * HP2 * WP2), C2 * HP2 * WP2),
        "fc1_b": u(ks[5], (F1,), C2 * HP2 * WP2),
        "fc2_w": u(ks[6], (F2, F1), F1),
        "fc2_b": u(ks[7], (F2,), F1),
        "fc3_w": u(ks[8], (F3, F2), F2),
        "fc3_b": u(ks[9], (F3,), F2),
    }


# ---------------- plain-JAX reference (PyTorch semantics) ----------------
def net_forward_reference(params, x_nchw):
    hi = jax.lax.Precision.HIGHEST

    def conv(x, w, b):
        y = jax.lax.conv_general_dilated(
            x, w, (1, 1), "VALID",
            dimension_numbers=("NCHW", "OIHW", "NCHW"), precision=hi)
        return jax.nn.relu(y + b[None, :, None, None])

    def pool(x):
        return jax.lax.reduce_window(x, -jnp.inf, jax.lax.max,
                                     (1, 1, 2, 2), (1, 1, 2, 2), "VALID")

    x = pool(conv(x_nchw, params["conv1_w"], params["conv1_b"]))
    x = pool(conv(x, params["conv2_w"], params["conv2_b"]))
    x = x.reshape(x.shape[0], -1)                      # torch.flatten(x, 1)
    x = jax.nn.relu(jnp.dot(x, params["fc1_w"].T, precision=hi) + params["fc1_b"])
    x = jax.nn.relu(jnp.dot(x, params["fc2_w"].T, precision=hi) + params["fc2_b"])
    return jnp.dot(x, params["fc3_w"].T, precision=hi) + params["fc3_b"]


if __name__ == "__main__":
    key = jax.random.PRNGKey(0)
    pkey, xkey = jax.random.split(key)
    params = init_params(pkey)
    kparams = prepare_params(params)                   # one-time layout transform

    # forward math requires 32x32 spatial (16*5*5 flatten); batch = 2 tiles
    x = jax.random.normal(xkey, (16, 3, 32, 32), jnp.float32)   # NCHW, like PyTorch

    out = net_forward(kparams, x)
    jax.block_until_ready(out)
    assert out.shape == (16, 10) and out.dtype == jnp.float32

    ref = net_forward_reference(params, x)
    assert jnp.allclose(out, ref, atol=5e-3, rtol=5e-3), "mismatch vs reference"

    print("KERNEL_OK")
</pallas_src>

<mosaic_0001>
module attributes {stable_mosaic.version = 11 : i64} {
  func.func @lenet_kernel(%arg0: i32, %arg1: memref<8192x16xf32, #tpu.memory_space<vmem>>, %arg2: memref<5x16x128xf32, #tpu.memory_space<vmem>>, %arg3: memref<1x128xf32, #tpu.memory_space<vmem>>, %arg4: memref<25x8x128xf32, #tpu.memory_space<vmem>>, %arg5: memref<1x128xf32, #tpu.memory_space<vmem>>, %arg6: memref<25x16x128xf32, #tpu.memory_space<vmem>>, %arg7: memref<1x128xf32, #tpu.memory_space<vmem>>, %arg8: memref<128x128xf32, #tpu.memory_space<vmem>>, %arg9: memref<1x128xf32, #tpu.memory_space<vmem>>, %arg10: memref<128x128xf32, #tpu.memory_space<vmem>>, %arg11: memref<1x128xf32, #tpu.memory_space<vmem>>, %arg12: memref<8x128xf32, #tpu.memory_space<vmem>>, %arg13: memref<896x128xf32, #tpu.memory_space<vmem>>, %arg14: memref<200x8xf32, #tpu.memory_space<vmem>>, %arg15: memref<136x128xf32, #tpu.memory_space<vmem>>, %arg16: memref<256x16xf32, #tpu.memory_space<vmem>>) attributes {dimension_semantics = [#tpu.dimension_semantics<parallel>], iteration_bounds = array<i64: 2>, scalar_prefetch = 0 : i64, scratch_operands = 4 : i64, tpu.core_type = #tpu.core_type<tc>, window_params = [{transform_indices = @transform_0, window_bounds = array<i64: 8192, 16>}, {pipeline_mode = #tpu.pipeline_mode<synchronous>, transform_indices = @transform_1, window_bounds = array<i64: 5, 16, 128>}, {pipeline_mode = #tpu.pipeline_mode<synchronous>, transform_indices = @transform_2, window_bounds = array<i64: 1, 128>}, {pipeline_mode = #tpu.pipeline_mode<synchronous>, transform_indices = @transform_3, window_bounds = array<i64: 25, 8, 128>}, {pipeline_mode = #tpu.pipeline_mode<synchronous>, transform_indices = @transform_4, window_bounds = array<i64: 1, 128>}, {pipeline_mode = #tpu.pipeline_mode<synchronous>, transform_indices = @transform_5, window_bounds = array<i64: 25, 16, 128>}, {pipeline_mode = #tpu.pipeline_mode<synchronous>, transform_indices = @transform_6, window_bounds = array<i64: 1, 128>}, {pipeline_mode = #tpu.pipeline_mode<synchronous>, transform_indices = @transform_7, window_bounds = array<i64: 128, 128>}, {pipeline_mode = #tpu.pipeline_mode<synchronous>, transform_indices = @transform_8, window_bounds = array<i64: 1, 128>}, {pipeline_mode = #tpu.pipeline_mode<synchronous>, transform_indices = @transform_9, window_bounds = array<i64: 128, 128>}, {pipeline_mode = #tpu.pipeline_mode<synchronous>, transform_indices = @transform_10, window_bounds = array<i64: 1, 128>}, {transform_indices = @transform_11, window_bounds = array<i64: 8, 128>}]} {
    %c0_i32 = arith.constant 0 : i32
    %c8_i32 = arith.constant 8 : i32
    %0 = arith.addi %c0_i32, %c8_i32 : i32
    %c1_i32 = arith.constant 1 : i32
    scf.for %arg17 = %c0_i32 to %0 step %c1_i32  : i32 {
      %c1_i32_142 = arith.constant 1 : i32
      %145 = arith.muli %arg17, %c1_i32_142 : i32
      %c0_i32_143 = arith.constant 0 : i32
      %146 = arith.addi %c0_i32_143, %145 : i32
      %c1024_i32 = arith.constant 1024 : i32
      %147 = arith.muli %146, %c1024_i32 : i32
      %cst_144 = arith.constant 0.000000e+00 : f32
      %148 = vector.broadcast %cst_144 : f32 to vector<128x128xf32>
      %c0_i32_145 = arith.constant 0 : i32
      %149 = arith.addi %147, %c0_i32_145 : i32
      %c0_i32_146 = arith.constant 0 : i32
      %150 = arith.addi %149, %c0_i32_146 : i32
      %151 = tpu.assume_multiple %150, 32 : i32
      %152 = arith.index_cast %151 : i32 to index
      %c0_147 = arith.constant 0 : index
      %153 = vector.load %arg1[%152, %c0_147] : memref<8192x16xf32, #tpu.memory_space<vmem>>, vector<128x16xf32>
      %c0_148 = arith.constant 0 : index
      %c0_149 = arith.constant 0 : index
      %c0_150 = arith.constant 0 : index
      %154 = vector.load %arg2[%c0_148, %c0_149, %c0_150] : memref<5x16x128xf32, #tpu.memory_space<vmem>>, vector<1x16x128xf32>
      %155 = vector.shape_cast %154 : vector<1x16x128xf32> to vector<16x128xf32>
      %cst_151 = arith.constant dense<0.000000e+00> : vector<128x128xf32>
      %156 = tpu.matmul %153, %155, %cst_151 {dimension_numbers = #tpu.dot_dimension_numbers<[1], [0], [0], [1], [0, 0, 1, 1], [], []>} : vector<128x16xf32>, vector<16x128xf32>, vector<128x128xf32> -> vector<128x128xf32>
      %157 = arith.addf %148, %156 : vector<128x128xf32>
      %c0_i32_152 = arith.constant 0 : i32
      %158 = arith.addi %147, %c0_i32_152 : i32
      %c32_i32 = arith.constant 32 : i32
      %159 = arith.addi %158, %c32_i32 : i32
      %160 = tpu.assume_multiple %159, 32 : i32
      %161 = arith.index_cast %160 : i32 to index
      %c0_153 = arith.constant 0 : index
      %162 = vector.load %arg1[%161, %c0_153] : memref<8192x16xf32, #tpu.memory_space<vmem>>, vector<128x16xf32>
      %c1_154 = arith.constant 1 : index
      %c0_155 = arith.constant 0 : index
      %c0_156 = arith.constant 0 : index
      %163 = vector.load %arg2[%c1_154, %c0_155, %c0_156] : memref<5x16x128xf32, #tpu.memory_space<vmem>>, vector<1x16x128xf32>
      %164 = vector.shape_cast %163 : vector<1x16x128xf32> to vector<16x128xf32>
      %cst_157 = arith.constant dense<0.000000e+00> : vector<128x128xf32>
      %165 = tpu.matmul %162, %164, %cst_157 {dimension_numbers = #tpu.dot_dimension_numbers<[1], [0], [0], [1], [0, 0, 1, 1], [], []>} : vector<128x16xf32>, vector<16x128xf32>, vector<128x128xf32> -> vector<128x128xf32>
      %166 = arith.addf %157, %165 : vector<128x128xf32>
      %c0_i32_158 = arith.constant 0 : i32
      %167 = arith.addi %147, %c0_i32_158 : i32
      %c64_i32 = arith.constant 64 : i32
      %168 = arith.addi %167, %c64_i32 : i32
      %169 = tpu.assume_multiple %168, 32 : i32
      %170 = arith.index_cast %169 : i32 to index
      %c0_159 = arith.constant 0 : index
      %171 = vector.load %arg1[%170, %c0_159] : memref<8192x16xf32, #tpu.memory_space<vmem>>, vector<128x16xf32>
      %c2_160 = arith.constant 2 : index
      %c0_161 = arith.constant 0 : index
      %c0_162 = arith.constant 0 : index
      %172 = vector.load %arg2[%c2_160, %c0_161, %c0_162] : memref<5x16x128xf32, #tpu.memory_space<vmem>>, vector<1x16x128xf32>
      %173 = vector.shape_cast %172 : vector<1x16x128xf32> to vector<16x128xf32>
      %cst_163 = arith.constant dense<0.000000e+00> : vector<128x128xf32>
      %174 = tpu.matmul %171, %173, %cst_163 {dimension_numbers = #tpu.dot_dimension_numbers<[1], [0], [0], [1], [0, 0, 1, 1], [], []>} : vector<128x16xf32>, vector<16x128xf32>, vector<128x128xf32> -> vector<128x128xf32>
      %175 = arith.addf %166, %174 : vector<128x128xf32>
      %c0_i32_164 = arith.constant 0 : i32
      %176 = arith.addi %147, %c0_i32_164 : i32
      %c96_i32 = arith.constant 96 : i32
      %177 = arith.addi %176, %c96_i32 : i32
      %178 = tpu.assume_multiple %177, 32 : i32
      %179 = arith.index_cast %178 : i32 to index
      %c0_165 = arith.constant 0 : index
      %180 = vector.load %arg1[%179, %c0_165] : memref<8192x16xf32, #tpu.memory_space<vmem>>, vector<128x16xf32>
      %c3_166 = arith.constant 3 : index
      %c0_167 = arith.constant 0 : index
      %c0_168 = arith.constant 0 : index
      %181 = vector.load %arg2[%c3_166, %c0_167, %c0_168] : memref<5x16x128xf32, #tpu.memory_space<vmem>>, vector<1x16x128xf32>
      %182 = vector.shape_cast %181 : vector<1x16x128xf32> to vector<16x128xf32>
      %cst_169 = arith.constant dense<0.000000e+00> : vector<128x128xf32>
      %183 = tpu.matmul %180, %182, %cst_169 {dimension_numbers = #tpu.dot_dimension_numbers<[1], [0], [0], [1], [0, 0, 1, 1], [], []>} : vector<128x16xf32>, vector<16x128xf32>, vector<128x128xf32> -> vector<128x128xf32>
      %184 = arith.addf %175, %183 : vector<128x128xf32>
      %c0_i32_170 = arith.constant 0 : i32
      %185 = arith.addi %147, %c0_i32_170 : i32
      %c128_i32 = arith.constant 128 : i32
      %186 = arith.addi %185, %c128_i32 : i32
      %187 = tpu.assume_multiple %186, 32 : i32
      %188 = arith.index_cast %187 : i32 to index
      %c0_171 = arith.constant 0 : index
      %189 = vector.load %arg1[%188, %c0_171] : memref<8192x16xf32, #tpu.memory_space<vmem>>, vector<128x16xf32>
      %c4_172 = arith.constant 4 : index
      %c0_173 = arith.constant 0 : index
      %c0_174 = arith.constant 0 : index
      %190 = vector.load %arg2[%c4_172, %c0_173, %c0_174] : memref<5x16x128xf32, #tpu.memory_space<vmem>>, vector<1x16x128xf32>
      %191 = vector.shape_cast %190 : vector<1x16x128xf32> to vector<16x128xf32>
      %cst_175 = arith.constant dense<0.000000e+00> : vector<128x128xf32>
      %192 = tpu.matmul %189, %191, %cst_175 {dimension_numbers = #tpu.dot_dimension_numbers<[1], [0], [0], [1], [0, 0, 1, 1], [], []>} : vector<128x16xf32>, vector<16x128xf32>, vector<128x128xf32> -> vector<128x128xf32>
      %193 = arith.addf %184, %192 : vector<128x128xf32>
      %c0_176 = arith.constant 0 : index
      %c0_177 = arith.constant 0 : index
      %194 = vector.load %arg3[%c0_176, %c0_177] : memref<1x128xf32, #tpu.memory_space<vmem>>, vector<1x128xf32>
      %195 = vector.broadcast %194 : vector<1x128xf32> to vector<128x128xf32>
      %196 = arith.addf %193, %195 : vector<128x128xf32>
      %cst_178 = arith.constant 0.000000e+00 : f32
      %197 = vector.broadcast %cst_178 : f32 to vector<128x128xf32>
      %198 = arith.maximumf %196, %197 : vector<128x128xf32>
      %c0_179 = arith.constant 0 : index
      %c0_180 = arith.constant 0 : index
      %199 = vector.load %arg13[%c0_179, %c0_180] : memref<896x128xf32, #tpu.memory_space<vmem>>, vector<128x128xf32>
      tpu.vector_store %arg13[%c0_179, %c0_180], %198 {strides = array<i32>} : memref<896x128xf32, #tpu.memory_space<vmem>>, vector<128x128xf32>,
      %cst_181 = arith.constant 0.000000e+00 : f32
      %200 = vector.broadcast %cst_181 : f32 to vector<128x128xf32>
      %c128_i32_182 = arith.constant 128 : i32
      %201 = arith.addi %147, %c128_i32_182 : i32
      %c0_i32_183 = arith.constant 0 : i32
      %202 = arith.addi %201, %c0_i32_183 : i32
      %203 = tpu.assume_multiple %202, 32 : i32
      %204 = arith.index_cast %203 : i32 to index
      %c0_184 = arith.constant 0 : index
      %205 = vector.load %arg1[%204, %c0_184] : memref<8192x16xf32, #tpu.memory_space<vmem>>, vector<128x16xf32>
      %c0_185 = arith.constant 0 : index
      %c0_186 = arith.constant 0 : index
      %c0_187 = arith.constant 0 : index
      %206 = vector.load %arg2[%c0_185, %c0_186, %c0_187] : memref<5x16x128xf32, #tpu.memory_space<vmem>>, vector<1x16x128xf32>
      %207 = vector.shape_cast %206 : vector<1x16x128xf32> to vector<16x128xf32>
      %cst_188 = arith.constant dense<0.000000e+00> : vector<128x128xf32>
      %208 = tpu.matmul %205, %207, %cst_188 {dimension_numbers = #tpu.dot_dimension_numbers<[1], [0], [0], [1], [0, 0, 1, 1], [], []>} : vector<128x16xf32>, vector<16x128xf32>, vector<128x128xf32> -> vector<128x128xf32>
      %209 = arith.addf %200, %208 : vector<128x128xf32>
      %c128_i32_189 = arith.constant 128 : i32
      %210 = arith.addi %147, %c128_i32_189 : i32
      %c32_i32_190 = arith.constant 32 : i32
      %211 = arith.addi %210, %c32_i32_190 : i32
      %212 = tpu.assume_multiple %211, 32 : i32
      %213 = arith.index_cast %212 : i32 to index
      %c0_191 = arith.constant 0 : index
      %214 = vector.load %arg1[%213, %c0_191] : memref<8192x16xf32, #tpu.memory_space<vmem>>, vector<128x16xf32>
      %c1_192 = arith.constant 1 : index
      %c0_193 = arith.constant 0 : index
      %c0_194 = arith.constant 0 : index
      %215 = vector.load %arg2[%c1_192, %c0_193, %c0_194] : memref<5x16x128xf32, #tpu.memory_space<vmem>>, vector<1x16x128xf32>
      %216 = vector.shape_cast %215 : vector<1x16x128xf32> to vector<16x128xf32>
      %cst_195 = arith.constant dense<0.000000e+00> : vector<128x128xf32>
      %217 = tpu.matmul %214, %216, %cst_195 {dimension_numbers = #tpu.dot_dimension_numbers<[1], [0], [0], [1], [0, 0, 1, 1], [], []>} : vector<128x16xf32>, vector<16x128xf32>, vector<128x128xf32> -> vector<128x128xf32>
      %218 = arith.addf %209, %217 : vector<128x128xf32>
      %c128_i32_196 = arith.constant 128 : i32
      %219 = arith.addi %147, %c128_i32_196 : i32
      %c64_i32_197 = arith.constant 64 : i32
      %220 = arith.addi %219, %c64_i32_197 : i32
      %221 = tpu.assume_multiple %220, 32 : i32
      %222 = arith.index_cast %221 : i32 to index
      %c0_198 = arith.constant 0 : index
      %223 = vector.load %arg1[%222, %c0_198] : memref<8192x16xf32, #tpu.memory_space<vmem>>, vector<128x16xf32>
      %c2_199 = arith.constant 2 : index
      %c0_200 = arith.constant 0 : index
      %c0_201 = arith.constant 0 : index
      %224 = vector.load %arg2[%c2_199, %c0_200, %c0_201] : memref<5x16x128xf32, #tpu.memory_space<vmem>>, vector<1x16x128xf32>
      %225 = vector.shape_cast %224 : vector<1x16x128xf32> to vector<16x128xf32>
      %cst_202 = arith.constant dense<0.000000e+00> : vector<128x128xf32>
      %226 = tpu.matmul %223, %225, %cst_202 {dimension_numbers = #tpu.dot_dimension_numbers<[1], [0], [0], [1], [0, 0, 1, 1], [], []>} : vector<128x16xf32>, vector<16x128xf32>, vector<128x128xf32> -> vector<128x128xf32>
      %227 = arith.addf %218, %226 : vector<128x128xf32>
      %c128_i32_203 = arith.constant 128 : i32
      %228 = arith.addi %147, %c128_i32_203 : i32
      %c96_i32_204 = arith.constant 96 : i32
      %229 = arith.addi %228, %c96_i32_204 : i32
      %230 = tpu.assume_multiple %229, 32 : i32
      %231 = arith.index_cast %230 : i32 to index
      %c0_205 = arith.constant 0 : index
      %232 = vector.load %arg1[%231, %c0_205] : memref<8192x16xf32, #tpu.memory_space<vmem>>, vector<128x16xf32>
      %c3_206 = arith.constant 3 : index
      %c0_207 = arith.constant 0 : index
      %c0_208 = arith.constant 0 : index
      %233 = vector.load %arg2[%c3_206, %c0_207, %c0_208] : memref<5x16x128xf32, #tpu.memory_space<vmem>>, vector<1x16x128xf32>
      %234 = vector.shape_cast %233 : vector<1x16x128xf32> to vector<16x128xf32>
      %cst_209 = arith.constant dense<0.000000e+00> : vector<128x128xf32>
      %235 = tpu.matmul %232, %234, %cst_209 {dimension_numbers = #tpu.dot_dimension_numbers<[1], [0], [0], [1], [0, 0, 1, 1], [], []>} : vector<128x16xf32>, vector<16x128xf32>, vector<128x128xf32> -> vector<128x128xf32>
      %236 = arith.addf %227, %235 : vector<128x128xf32>
      %c128_i32_210 = arith.constant 128 : i32
      %237 = arith.addi %147, %c128_i32_210 : i32
      %c128_i32_211 = arith.constant 128 : i32
      %238 = arith.addi %237, %c128_i32_211 : i32
      %239 = tpu.assume_multiple %238, 32 : i32
      %240 = arith.index_cast %239 : i32 to index
      %c0_212 = arith.constant 0 : index
      %241 = vector.load %arg1[%240, %c0_212] : memref<8192x16xf32, #tpu.memory_space<vmem>>, vector<128x16xf32>
      %c4_213 = arith.constant 4 : index
      %c0_214 = arith.constant 0 : index
      %c0_215 = arith.constant 0 : index
      %242 = vector.load %arg2[%c4_213, %c0_214, %c0_215] : memref<5x16x128xf32, #tpu.memory_space<vmem>>, vector<1x16x128xf32>
      %243 = vector.shape_cast %242 : vector<1x16x128xf32> to vector<16x128xf32>
      %cst_216 = arith.constant dense<0.000000e+00> : vector<128x128xf32>
      %244 = tpu.matmul %241, %243, %cst_216 {dimension_numbers = #tpu.dot_dimension_numbers<[1], [0], [0], [1], [0, 0, 1, 1], [], []>} : vector<128x16xf32>, vector<16x128xf32>, vector<128x128xf32> -> vector<128x128xf32>
      %245 = arith.addf %236, %244 : vector<128x128xf32>
      %c0_217 = arith.constant 0 : index
      %c0_218 = arith.constant 0 : index
      %246 = vector.load %arg3[%c0_217, %c0_218] : memref<1x128xf32, #tpu.memory_space<vmem>>, vector<1x128xf32>
      %247 = vector.broadcast %246 : vector<1x128xf32> to vector<128x128xf32>
      %248 = arith.addf %245, %247 : vector<128x128xf32>
      %cst_219 = arith.constant 0.000000e+00 : f32
      %249 = vector.broadcast %cst_219 : f32 to vector<128x128xf32>
      %250 = arith.maximumf %248, %249 : vector<128x128xf32>
      %c128 = arith.constant 128 : index
      %c0_220 = arith.constant 0 : index
      %251 = vector.load %arg13[%c128, %c0_220] : memref<896x128xf32, #tpu.memory_space<vmem>>, vector<128x128xf32>
      tpu.vector_store %arg13[%c128, %c0_220], %250 {strides = array<i32>} : memref<896x128xf32, #tpu.memory_space<vmem>>, vector<128x128xf32>,
      %cst_221 = arith.constant 0.000000e+00 : f32
      %252 = vector.broadcast %cst_221 : f32 to vector<128x128xf32>
      %c256_i32 = arith.constant 256 : i32
      %253 = arith.addi %147, %c256_i32 : i32
      %c0_i32_222 = arith.constant 0 : i32
      %254 = arith.addi %253, %c0_i32_222 : i32
      %255 = tpu.assume_multiple %254, 32 : i32
      %256 = arith.index_cast %255 : i32 to index
      %c0_223 = arith.constant 0 : index
      %257 = vector.load %arg1[%256, %c0_223] : memref<8192x16xf32, #tpu.memory_space<vmem>>, vector<128x16xf32>
      %c0_224 = arith.constant 0 : index
      %c0_225 = arith.constant 0 : index
      %c0_226 = arith.constant 0 : index
      %258 = vector.load %arg2[%c0_224, %c0_225, %c0_226] : memref<5x16x128xf32, #tpu.memory_space<vmem>>, vector<1x16x128xf32>
      %259 = vector.shape_cast %258 : vector<1x16x128xf32> to vector<16x128xf32>
      %cst_227 = arith.constant dense<0.000000e+00> : vector<128x128xf32>
      %260 = tpu.matmul %257, %259, %cst_227 {dimension_numbers = #tpu.dot_dimension_numbers<[1], [0], [0], [1], [0, 0, 1, 1], [], []>} : vector<128x16xf32>, vector<16x128xf32>, vector<128x128xf32> -> vector<128x128xf32>
      %261 = arith.addf %252, %260 : vector<128x128xf32>
      %c256_i32_228 = arith.constant 256 : i32
      %262 = arith.addi %147, %c256_i32_228 : i32
      %c32_i32_229 = arith.constant 32 : i32
      %263 = arith.addi %262, %c32_i32_229 : i32
      %264 = tpu.assume_multiple %263, 32 : i32
      %265 = arith.index_cast %264 : i32 to index
      %c0_230 = arith.constant 0 : index
      %266 = vector.load %arg1[%265, %c0_230] : memref<8192x16xf32, #tpu.memory_space<vmem>>, vector<128x16xf32>
      %c1_231 = arith.constant 1 : index
      %c0_232 = arith.constant 0 : index
      %c0_233 = arith.constant 0 : index
      %267 = vector.load %arg2[%c1_231, %c0_232, %c0_233] : memref<5x16x128xf32, #tpu.memory_space<vmem>>, vector<1x16x128xf32>
      %268 = vector.shape_cast %267 : vector<1x16x128xf32> to vector<16x128xf32>
      %cst_234 = arith.constant dense<0.000000e+00> : vector<128x128xf32>
      %269 = tpu.matmul %266, %268, %cst_234 {dimension_numbers = #tpu.dot_dimension_numbers<[1], [0], [0], [1], [0, 0, 1, 1], [], []>} : vector<128x16xf32>, vector<16x128xf32>, vector<128x128xf32> -> vector<128x128xf32>
      %270 = arith.addf %261, %269 : vector<128x128xf32>
      %c256_i32_235 = arith.constant 256 : i32
      %271 = arith.addi %147, %c256_i32_235 : i32
      %c64_i32_236 = arith.constant 64 : i32
      %272 = arith.addi %271, %c64_i32_236 : i32
      %273 = tpu.assume_multiple %272, 32 : i32
      %274 = arith.index_cast %273 : i32 to index
      %c0_237 = arith.constant 0 : index
      %275 = vector.load %arg1[%274, %c0_237] : memref<8192x16xf32, #tpu.memory_space<vmem>>, vector<128x16xf32>
      %c2_238 = arith.constant 2 : index
      %c0_239 = arith.constant 0 : index
      %c0_240 = arith.constant 0 : index
      %276 = vector.load %arg2[%c2_238, %c0_239, %c0_240] : memref<5x16x128xf32, #tpu.memory_space<vmem>>, vector<1x16x128xf32>
      %277 = vector.shape_cast %276 : vector<1x16x128xf32> to vector<16x128xf32>
      %cst_241 = arith.constant dense<0.000000e+00> : vector<128x128xf32>
      %278 = tpu.matmul %275, %277, %cst_241 {dimension_numbers = #tpu.dot_dimension_numbers<[1], [0], [0], [1], [0, 0, 1, 1], [], []>} : vector<128x16xf32>, vector<16x128xf32>, vector<128x128xf32> -> vector<128x128xf32>
      %279 = arith.addf %270, %278 : vector<128x128xf32>
      %c256_i32_242 = arith.constant 256 : i32
      %280 = arith.addi %147, %c256_i32_242 : i32
      %c96_i32_243 = arith.constant 96 : i32
      %281 = arith.addi %280, %c96_i32_243 : i32
      %282 = tpu.assume_multiple %281, 32 : i32
      %283 = arith.index_cast %282 : i32 to index
      %c0_244 = arith.constant 0 : index
      %284 = vector.load %arg1[%283, %c0_244] : memref<8192x16xf32, #tpu.memory_space<vmem>>, vector<128x16xf32>
      %c3_245 = arith.constant 3 : index
      %c0_246 = arith.constant 0 : index
      %c0_247 = arith.constant 0 : index
      %285 = vector.load %arg2[%c3_245, %c0_246, %c0_247] : memref<5x16x128xf32, #tpu.memory_space<vmem>>, vector<1x16x128xf32>
      %286 = vector.shape_cast %285 : vector<1x16x128xf32> to vector<16x128xf32>
      %cst_248 = arith.constant dense<0.000000e+00> : vector<128x128xf32>
      %287 = tpu.matmul %284, %286, %cst_248 {dimension_numbers = #tpu.dot_dimension_numbers<[1], [0], [0], [1], [0, 0, 1, 1], [], []>} : vector<128x16xf32>, vector<16x128xf32>, vector<128x128xf32> -> vector<128x128xf32>
      %288 = arith.addf %279, %287 : vector<128x128xf32>
      %c256_i32_249 = arith.constant 256 : i32
      %289 = arith.addi %147, %c256_i32_249 : i32
      %c128_i32_250 = arith.constant 128 : i32
      %290 = arith.addi %289, %c128_i32_250 : i32
      %291 = tpu.assume_multiple %290, 32 : i32
      %292 = arith.index_cast %291 : i32 to index
      %c0_251 = arith.constant 0 : index
      %293 = vector.load %arg1[%292, %c0_251] : memref<8192x16xf32, #tpu.memory_space<vmem>>, vector<128x16xf32>
      %c4_252 = arith.constant 4 : index
      %c0_253 = arith.constant 0 : index
      %c0_254 = arith.constant 0 : index
      %294 = vector.load %arg2[%c4_252, %c0_253, %c0_254] : memref<5x16x128xf32, #tpu.memory_space<vmem>>, vector<1x16x128xf32>
      %295 = vector.shape_cast %294 : vector<1x16x128xf32> to vector<16x128xf32>
      %cst_255 = arith.constant dense<0.000000e+00> : vector<128x128xf32>
      %296 = tpu.matmul %293, %295, %cst_255 {dimension_numbers = #tpu.dot_dimension_numbers<[1], [0], [0], [1], [0, 0, 1, 1], [], []>} : vector<128x16xf32>, vector<16x128xf32>, vector<128x128xf32> -> vector<128x128xf32>
      %297 = arith.addf %288, %296 : vector<128x128xf32>
      %c0_256 = arith.constant 0 : index
      %c0_257 = arith.constant 0 : index
      %298 = vector.load %arg3[%c0_256, %c0_257] : memref<1x128xf32, #tpu.memory_space<vmem>>, vector<1x128xf32>
      %299 = vector.broadcast %298 : vector<1x128xf32> to vector<128x128xf32>
      %300 = arith.addf %297, %299 : vector<128x128xf32>
      %cst_258 = arith.constant 0.000000e+00 : f32
      %301 = vector.broadcast %cst_258 : f32 to vector<128x128xf32>
      %302 = arith.maximumf %300, %301 : vector<128x128xf32>
      %c256 = arith.constant 256 : index
      %c0_259 = arith.constant 0 : index
      %303 = vector.load %arg13[%c256, %c0_259] : memref<896x128xf32, #tpu.memory_space<vmem>>, vector<128x128xf32>
      tpu.vector_store %arg13[%c256, %c0_259], %302 {strides = array<i32>} : memref<896x128xf32, #tpu.memory_space<vmem>>, vector<128x128xf32>,
      %cst_260 = arith.constant 0.000000e+00 : f32
      %304 = vector.broadcast %cst_260 : f32 to vector<128x128xf32>
      %c384_i32 = arith.constant 384 : i32
      %305 = arith.addi %147, %c384_i32 : i32
      %c0_i32_261 = arith.constant 0 : i32
      %306 = arith.addi %305, %c0_i32_261 : i32
      %307 = tpu.assume_multiple %306, 32 : i32
      %308 = arith.index_cast %307 : i32 to index
      %c0_262 = arith.constant 0 : index
      %309 = vector.load %arg1[%308, %c0_262] : memref<8192x16xf32, #tpu.memory_space<vmem>>, vector<128x16xf32>
      %c0_263 = arith.constant 0 : index
      %c0_264 = arith.constant 0 : index
      %c0_265 = arith.constant 0 : index
      %310 = vector.load %arg2[%c0_263, %c0_264, %c0_265] : memref<5x16x128xf32, #tpu.memory_space<vmem>>, vector<1x16x128xf32>
      %311 = vector.shape_cast %310 : vector<1x16x128xf32> to vector<16x128xf32>
      %cst_266 = arith.constant dense<0.000000e+00> : vector<128x128xf32>
      %312 = tpu.matmul %309, %311, %cst_266 {dimension_numbers = #tpu.dot_dimension_numbers<[1], [0], [0], [1], [0, 0, 1, 1], [], []>} : vector<128x16xf32>, vector<16x128xf32>, vector<128x128xf32> -> vector<128x128xf32>
      %313 = arith.addf %304, %312 : vector<128x128xf32>
      %c384_i32_267 = arith.constant 384 : i32
      %314 = arith.addi %147, %c384_i32_267 : i32
      %c32_i32_268 = arith.constant 32 : i32
      %315 = arith.addi %314, %c32_i32_268 : i32
      %316 = tpu.assume_multiple %315, 32 : i32
      %317 = arith.index_cast %316 : i32 to index
      %c0_269 = arith.constant 0 : index
      %318 = vector.load %arg1[%317, %c0_269] : memref<8192x16xf32, #tpu.memory_space<vmem>>, vector<128x16xf32>
      %c1_270 = arith.constant 1 : index
      %c0_271 = arith.constant 0 : index
      %c0_272 = arith.constant 0 : index
      %319 = vector.load %arg2[%c1_270, %c0_271, %c0_272] : memref<5x16x128xf32, #tpu.memory_space<vmem>>, vector<1x16x128xf32>
      %320 = vector.shape_cast %319 : vector<1x16x128xf32> to vector<16x128xf32>
      %cst_273 = arith.constant dense<0.000000e+00> : vector<128x128xf32>
      %321 = tpu.matmul %318, %320, %cst_273 {dimension_numbers = #tpu.dot_dimension_numbers<[1], [0], [0], [1], [0, 0, 1, 1], [], []>} : vector<128x16xf32>, vector<16x128xf32>, vector<128x128xf32> -> vector<128x128xf32>
      %322 = arith.addf %313, %321 : vector<128x128xf32>
      %c384_i32_274 = arith.constant 384 : i32
      %323 = arith.addi %147, %c384_i32_274 : i32
      %c64_i32_275 = arith.constant 64 : i32
      %324 = arith.addi %323, %c64_i32_275 : i32
      %325 = tpu.assume_multiple %324, 32 : i32
      %326 = arith.index_cast %325 : i32 to index
      %c0_276 = arith.constant 0 : index
      %327 = vector.load %arg1[%326, %c0_276] : memref<8192x16xf32, #tpu.memory_space<vmem>>, vector<128x16xf32>
      %c2_277 = arith.constant 2 : index
      %c0_278 = arith.constant 0 : index
      %c0_279 = arith.constant 0 : index
      %328 = vector.load %arg2[%c2_277, %c0_278, %c0_279] : memref<5x16x128xf32, #tpu.memory_space<vmem>>, vector<1x16x128xf32>
      %329 = vector.shape_cast %328 : vector<1x16x128xf32> to vector<16x128xf32>
      %cst_280 = arith.constant dense<0.000000e+00> : vector<128x128xf32>
      %330 = tpu.matmul %327, %329, %cst_280 {dimension_numbers = #tpu.dot_dimension_numbers<[1], [0], [0], [1], [0, 0, 1, 1], [], []>} : vector<128x16xf32>, vector<16x128xf32>, vector<128x128xf32> -> vector<128x128xf32>
      %331 = arith.addf %322, %330 : vector<128x128xf32>
      %c384_i32_281 = arith.constant 384 : i32
      %332 = arith.addi %147, %c384_i32_281 : i32
      %c96_i32_282 = arith.constant 96 : i32
      %333 = arith.addi %332, %c96_i32_282 : i32
      %334 = tpu.assume_multiple %333, 32 : i32
      %335 = arith.index_cast %334 : i32 to index
      %c0_283 = arith.constant 0 : index
      %336 = vector.load %arg1[%335, %c0_283] : memref<8192x16xf32, #tpu.memory_space<vmem>>, vector<128x16xf32>
      %c3_284 = arith.constant 3 : index
      %c0_285 = arith.constant 0 : index
      %c0_286 = arith.constant 0 : index
      %337 = vector.load %arg2[%c3_284, %c0_285, %c0_286] : memref<5x16x128xf32, #tpu.memory_space<vmem>>, vector<1x16x128xf32>
      %338 = vector.shape_cast %337 : vector<1x16x128xf32> to vector<16x128xf32>
      %cst_287 = arith.constant dense<0.000000e+00> : vector<128x128xf32>
      %339 = tpu.matmul %336, %338, %cst_287 {dimension_numbers = #tpu.dot_dimension_numbers<[1], [0], [0], [1], [0, 0, 1, 1], [], []>} : vector<128x16xf32>, vector<16x128xf32>, vector<128x128xf32> -> vector<128x128xf32>
      %340 = arith.addf %331, %339 : vector<128x128xf32>
      %c384_i32_288 = arith.constant 384 : i32
      %341 = arith.addi %147, %c384_i32_288 : i32
      %c128_i32_289 = arith.constant 128 : i32
      %342 = arith.addi %341, %c128_i32_289 : i32
      %343 = tpu.assume_multiple %342, 32 : i32
      %344 = arith.index_cast %343 : i32 to index
      %c0_290 = arith.constant 0 : index
      %345 = vector.load %arg1[%344, %c0_290] : memref<8192x16xf32, #tpu.memory_space<vmem>>, vector<128x16xf32>
      %c4_291 = arith.constant 4 : index
      %c0_292 = arith.constant 0 : index
      %c0_293 = arith.constant 0 : index
      %346 = vector.load %arg2[%c4_291, %c0_292, %c0_293] : memref<5x16x128xf32, #tpu.memory_space<vmem>>, vector<1x16x128xf32>
      %347 = vector.shape_cast %346 : vector<1x16x128xf32> to vector<16x128xf32>
      %cst_294 = arith.constant dense<0.000000e+00> : vector<128x128xf32>
      %348 = tpu.matmul %345, %347, %cst_294 {dimension_numbers = #tpu.dot_dimension_numbers<[1], [0], [0], [1], [0, 0, 1, 1], [], []>} : vector<128x16xf32>, vector<16x128xf32>, vector<128x128xf32> -> vector<128x128xf32>
      %349 = arith.addf %340, %348 : vector<128x128xf32>
      %c0_295 = arith.constant 0 : index
      %c0_296 = arith.constant 0 : index
      %350 = vector.load %arg3[%c0_295, %c0_296] : memref<1x128xf32, #tpu.memory_space<vmem>>, vector<1x128xf32>
      %351 = vector.broadcast %350 : vector<1x128xf32> to vector<128x128xf32>
      %352 = arith.addf %349, %351 : vector<128x128xf32>
      %cst_297 = arith.constant 0.000000e+00 : f32
      %353 = vector.broadcast %cst_297 : f32 to vector<128x128xf32>
      %354 = arith.maximumf %352, %353 : vector<128x128xf32>
      %c384 = arith.constant 384 : index
      %c0_298 = arith.constant 0 : index
      %355 = vector.load %arg13[%c384, %c0_298] : memref<896x128xf32, #tpu.memory_space<vmem>>, vector<128x128xf32>
      tpu.vector_store %arg13[%c384, %c0_298], %354 {strides = array<i32>} : memref<896x128xf32, #tpu.memory_space<vmem>>, vector<128x128xf32>,
      %cst_299 = arith.constant 0.000000e+00 : f32
      %356 = vector.broadcast %cst_299 : f32 to vector<128x128xf32>
      %c512_i32 = arith.constant 512 : i32
      %357 = arith.addi %147, %c512_i32 : i32
      %c0_i32_300 = arith.constant 0 : i32
      %358 = arith.addi %357, %c0_i32_300 : i32
      %359 = tpu.assume_multiple %358, 32 : i32
      %360 = arith.index_cast %359 : i32 to index
      %c0_301 = arith.constant 0 : index
      %361 = vector.load %arg1[%360, %c0_301] : memref<8192x16xf32, #tpu.memory_space<vmem>>, vector<128x16xf32>
      %c0_302 = arith.constant 0 : index
      %c0_303 = arith.constant 0 : index
      %c0_304 = arith.constant 0 : index
      %362 = vector.load %arg2[%c0_302, %c0_303, %c0_304] : memref<5x16x128xf32, #tpu.memory_space<vmem>>, vector<1x16x128xf32>
      %363 = vector.shape_cast %362 : vector<1x16x128xf32> to vector<16x128xf32>
      %cst_305 = arith.constant dense<0.000000e+00> : vector<128x128xf32>
      %364 = tpu.matmul %361, %363, %cst_305 {dimension_numbers = #tpu.dot_dimension_numbers<[1], [0], [0], [1], [0, 0, 1, 1], [], []>} : vector<128x16xf32>, vector<16x128xf32>, vector<128x128xf32> -> vector<128x128xf32>
      %365 = arith.addf %356, %364 : vector<128x128xf32>
      %c512_i32_306 = arith.constant 512 : i32
      %366 = arith.addi %147, %c512_i32_306 : i32
      %c32_i32_307 = arith.constant 32 : i32
      %367 = arith.addi %366, %c32_i32_307 : i32
      %368 = tpu.assume_multiple %367, 32 : i32
      %369 = arith.index_cast %368 : i32 to index
      %c0_308 = arith.constant 0 : index
      %370 = vector.load %arg1[%369, %c0_308] : memref<8192x16xf32, #tpu.memory_space<vmem>>, vector<128x16xf32>
      %c1_309 = arith.constant 1 : index
      %c0_310 = arith.constant 0 : index
      %c0_311 = arith.constant 0 : index
      %371 = vector.load %arg2[%c1_309, %c0_310, %c0_311] : memref<5x16x128xf32, #tpu.memory_space<vmem>>, vector<1x16x128xf32>
      %372 = vector.shape_cast %371 : vector<1x16x128xf32> to vector<16x128xf32>
      %cst_312 = arith.constant dense<0.000000e+00> : vector<128x128xf32>
      %373 = tpu.matmul %370, %372, %cst_312 {dimension_numbers = #tpu.dot_dimension_numbers<[1], [0], [0], [1], [0, 0, 1, 1], [], []>} : vector<128x16xf32>, vector<16x128xf32>, vector<128x128xf32> -> vector<128x128xf32>
      %374 = arith.addf %365, %373 : vector<128x128xf32>
      %c512_i32_313 = arith.constant 512 : i32
      %375 = arith.addi %147, %c512_i32_313 : i32
      %c64_i32_314 = arith.constant 64 : i32
      %376 = arith.addi %375, %c64_i32_314 : i32
      %377 = tpu.assume_multiple %376, 32 : i32
      %378 = arith.index_cast %377 : i32 to index
      %c0_315 = arith.constant 0 : index
      %379 = vector.load %arg1[%378, %c0_315] : memref<8192x16xf32, #tpu.memory_space<vmem>>, vector<128x16xf32>
      %c2_316 = arith.constant 2 : index
      %c0_317 = arith.constant 0 : index
      %c0_318 = arith.constant 0 : index
      %380 = vector.load %arg2[%c2_316, %c0_317, %c0_318] : memref<5x16x128xf32, #tpu.memory_space<vmem>>, vector<1x16x128xf32>
      %381 = vector.shape_cast %380 : vector<1x16x128xf32> to vector<16x128xf32>
      %cst_319 = arith.constant dense<0.000000e+00> : vector<128x128xf32>
      %382 = tpu.matmul %379, %381, %cst_319 {dimension_numbers = #tpu.dot_dimension_numbers<[1], [0], [0], [1], [0, 0, 1, 1], [], []>} : vector<128x16xf32>, vector<16x128xf32>, vector<128x128xf32> -> vector<128x128xf32>
      %383 = arith.addf %374, %382 : vector<128x128xf32>
      %c512_i32_320 = arith.constant 512 : i32
      %384 = arith.addi %147, %c512_i32_320 : i32
      %c96_i32_321 = arith.constant 96 : i32
      %385 = arith.addi %384, %c96_i32_321 : i32
      %386 = tpu.assume_multiple %385, 32 : i32
      %387 = arith.index_cast %386 : i32 to index
      %c0_322 = arith.constant 0 : index
      %388 = vector.load %arg1[%387, %c0_322] : memref<8192x16xf32, #tpu.memory_space<vmem>>, vector<128x16xf32>
      %c3_323 = arith.constant 3 : index
      %c0_324 = arith.constant 0 : index
      %c0_325 = arith.constant 0 : index
      %389 = vector.load %arg2[%c3_323, %c0_324, %c0_325] : memref<5x16x128xf32, #tpu.memory_space<vmem>>, vector<1x16x128xf32>
      %390 = vector.shape_cast %389 : vector<1x16x128xf32> to vector<16x128xf32>
      %cst_326 = arith.constant dense<0.000000e+00> : vector<128x128xf32>
      %391 = tpu.matmul %388, %390, %cst_326 {dimension_numbers = #tpu.dot_dimension_numbers<[1], [0], [0], [1], [0, 0, 1, 1], [], []>} : vector<128x16xf32>, vector<16x128xf32>, vector<128x128xf32> -> vector<128x128xf32>
      %392 = arith.addf %383, %391 : vector<128x128xf32>
      %c512_i32_327 = arith.constant 512 : i32
      %393 = arith.addi %147, %c512_i32_327 : i32
      %c128_i32_328 = arith.constant 128 : i32
      %394 = arith.addi %393, %c128_i32_328 : i32
      %395 = tpu.assume_multiple %394, 32 : i32
      %396 = arith.index_cast %395 : i32 to index
      %c0_329 = arith.constant 0 : index
      %397 = vector.load %arg1[%396, %c0_329] : memref<8192x16xf32, #tpu.memory_space<vmem>>, vector<128x16xf32>
      %c4_330 = arith.constant 4 : index
      %c0_331 = arith.constant 0 : index
      %c0_332 = arith.constant 0 : index
      %398 = vector.load %arg2[%c4_330, %c0_331, %c0_332] : memref<5x16x128xf32, #tpu.memory_space<vmem>>, vector<1x16x128xf32>
      %399 = vector.shape_cast %398 : vector<1x16x128xf32> to vector<16x128xf32>
      %cst_333 = arith.constant dense<0.000000e+00> : vector<128x128xf32>
      %400 = tpu.matmul %397, %399, %cst_333 {dimension_numbers = #tpu.dot_dimension_numbers<[1], [0], [0], [1], [0, 0, 1, 1], [], []>} : vector<128x16xf32>, vector<16x128xf32>, vector<128x128xf32> -> vector<128x128xf32>
      %401 = arith.addf %392, %400 : vector<128x128xf32>
      %c0_334 = arith.constant 0 : index
      %c0_335 = arith.constant 0 : index
      %402 = vector.load %arg3[%c0_334, %c0_335] : memref<1x128xf32, #tpu.memory_space<vmem>>, vector<1x128xf32>
      %403 = vector.broadcast %402 : vector<1x128xf32> to vector<128x128xf32>
      %404 = arith.addf %401, %403 : vector<128x128xf32>
      %cst_336 = arith.constant 0.000000e+00 : f32
      %405 = vector.broadcast %cst_336 : f32 to vector<128x128xf32>
      %406 = arith.maximumf %404, %405 : vector<128x128xf32>
      %c512 = arith.constant 512 : index
      %c0_337 = arith.constant 0 : index
      %407 = vector.load %arg13[%c512, %c0_337] : memref<896x128xf32, #tpu.memory_space<vmem>>, vector<128x128xf32>
      tpu.vector_store %arg13[%c512, %c0_337], %406 {strides = array<i32>} : memref<896x128xf32, #tpu.memory_space<vmem>>, vector<128x128xf32>,
      %cst_338 = arith.constant 0.000000e+00 : f32
      %408 = vector.broadcast %cst_338 : f32 to vector<128x128xf32>
      %c640_i32 = arith.constant 640 : i32
      %409 = arith.addi %147, %c640_i32 : i32
      %c0_i32_339 = arith.constant 0 : i32
      %410 = arith.addi %409, %c0_i32_339 : i32
      %411 = tpu.assume_multiple %410, 32 : i32
      %412 = arith.index_cast %411 : i32 to index
      %c0_340 = arith.constant 0 : index
      %413 = vector.load %arg1[%412, %c0_340] : memref<8192x16xf32, #tpu.memory_space<vmem>>, vector<128x16xf32>
      %c0_341 = arith.constant 0 : index
      %c0_342 = arith.constant 0 : index
      %c0_343 = arith.constant 0 : index
      %414 = vector.load %arg2[%c0_341, %c0_342, %c0_343] : memref<5x16x128xf32, #tpu.memory_space<vmem>>, vector<1x16x128xf32>
      %415 = vector.shape_cast %414 : vector<1x16x128xf32> to vector<16x128xf32>
      %cst_344 = arith.constant dense<0.000000e+00> : vector<128x128xf32>
      %416 = tpu.matmul %413, %415, %cst_344 {dimension_numbers = #tpu.dot_dimension_numbers<[1], [0], [0], [1], [0, 0, 1, 1], [], []>} : vector<128x16xf32>, vector<16x128xf32>, vector<128x128xf32> -> vector<128x128xf32>
      %417 = arith.addf %408, %416 : vector<128x128xf32>
      %c640_i32_345 = arith.constant 640 : i32
      %418 = arith.addi %147, %c640_i32_345 : i32
      %c32_i32_346 = arith.constant 32 : i32
      %419 = arith.addi %418, %c32_i32_346 : i32
      %420 = tpu.assume_multiple %419, 32 : i32
      %421 = arith.index_cast %420 : i32 to index
      %c0_347 = arith.constant 0 : index
      %422 = vector.load %arg1[%421, %c0_347] : memref<8192x16xf32, #tpu.memory_space<vmem>>, vector<128x16xf32>
      %c1_348 = arith.constant 1 : index
      %c0_349 = arith.constant 0 : index
      %c0_350 = arith.constant 0 : index
      %423 = vector.load %arg2[%c1_348, %c0_349, %c0_350] : memref<5x16x128xf32, #tpu.memory_space<vmem>>, vector<1x16x128xf32>
      %424 = vector.shape_cast %423 : vector<1x16x128xf32> to vector<16x128xf32>
      %cst_351 = arith.constant dense<0.000000e+00> : vector<128x128xf32>
      %425 = tpu.matmul %422, %424, %cst_351 {dimension_numbers = #tpu.dot_dimension_numbers<[1], [0], [0], [1], [0, 0, 1, 1], [], []>} : vector<128x16xf32>, vector<16x128xf32>, vector<128x128xf32> -> vector<128x128xf32>
      %426 = arith.addf %417, %425 : vector<128x128xf32>
      %c640_i32_352 = arith.constant 640 : i32
      %427 = arith.addi %147, %c640_i32_352 : i32
      %c64_i32_353 = arith.constant 64 : i32
      %428 = arith.addi %427, %c64_i32_353 : i32
      %429 = tpu.assume_multiple %428, 32 : i32
      %430 = arith.index_cast %429 : i32 to index
      %c0_354 = arith.constant 0 : index
      %431 = vector.load %arg1[%430, %c0_354] : memref<8192x16xf32, #tpu.memory_space<vmem>>, vector<128x16xf32>
      %c2_355 = arith.constant 2 : index
      %c0_356 = arith.constant 0 : index
      %c0_357 = arith.constant 0 : index
      %432 = vector.load %arg2[%c2_355, %c0_356, %c0_357] : memref<5x16x128xf32, #tpu.memory_space<vmem>>, vector<1x16x128xf32>
      %433 = vector.shape_cast %432 : vector<1x16x128xf32> to vector<16x128xf32>
      %cst_358 = arith.constant dense<0.000000e+00> : vector<128x128xf32>
      %434 = tpu.matmul %431, %433, %cst_358 {dimension_numbers = #tpu.dot_dimension_numbers<[1], [0], [0], [1], [0, 0, 1, 1], [], []>} : vector<128x16xf32>, vector<16x128xf32>, vector<128x128xf32> -> vector<128x128xf32>
      %435 = arith.addf %426, %434 : vector<128x128xf32>
      %c640_i32_359 = arith.constant 640 : i32
      %436 = arith.addi %147, %c640_i32_359 : i32
      %c96_i32_360 = arith.constant 96 : i32
      %437 = arith.addi %436, %c96_i32_360 : i32
      %438 = tpu.assume_multiple %437, 32 : i32
      %439 = arith.index_cast %438 : i32 to index
      %c0_361 = arith.constant 0 : index
      %440 = vector.load %arg1[%439, %c0_361] : memref<8192x16xf32, #tpu.memory_space<vmem>>, vector<128x16xf32>
      %c3_362 = arith.constant 3 : index
      %c0_363 = arith.constant 0 : index
      %c0_364 = arith.constant 0 : index
      %441 = vector.load %arg2[%c3_362, %c0_363, %c0_364] : memref<5x16x128xf32, #tpu.memory_space<vmem>>, vector<1x16x128xf32>
      %442 = vector.shape_cast %441 : vector<1x16x128xf32> to vector<16x128xf32>
      %cst_365 = arith.constant dense<0.000000e+00> : vector<128x128xf32>
      %443 = tpu.matmul %440, %442, %cst_365 {dimension_numbers = #tpu.dot_dimension_numbers<[1], [0], [0], [1], [0, 0, 1, 1], [], []>} : vector<128x16xf32>, vector<16x128xf32>, vector<128x128xf32> -> vector<128x128xf32>
      %444 = arith.addf %435, %443 : vector<128x128xf32>
      %c640_i32_366 = arith.constant 640 : i32
      %445 = arith.addi %147, %c640_i32_366 : i32
      %c128_i32_367 = arith.constant 128 : i32
      %446 = arith.addi %445, %c128_i32_367 : i32
      %447 = tpu.assume_multiple %446, 32 : i32
      %448 = arith.index_cast %447 : i32 to index
      %c0_368 = arith.constant 0 : index
      %449 = vector.load %arg1[%448, %c0_368] : memref<8192x16xf32, #tpu.memory_space<vmem>>, vector<128x16xf32>
      %c4_369 = arith.constant 4 : index
      %c0_370 = arith.constant 0 : index
      %c0_371 = arith.constant 0 : index
      %450 = vector.load %arg2[%c4_369, %c0_370, %c0_371] : memref<5x16x128xf32, #tpu.memory_space<vmem>>, vector<1x16x128xf32>
      %451 = vector.shape_cast %450 : vector<1x16x128xf32> to vector<16x128xf32>
      %cst_372 = arith.constant dense<0.000000e+00> : vector<128x128xf32>
      %452 = tpu.matmul %449, %451, %cst_372 {dimension_numbers = #tpu.dot_dimension_numbers<[1], [0], [0], [1], [0, 0, 1, 1], [], []>} : vector<128x16xf32>, vector<16x128xf32>, vector<128x128xf32> -> vector<128x128xf32>
      %453 = arith.addf %444, %452 : vector<128x128xf32>
      %c0_373 = arith.constant 0 : index
      %c0_374 = arith.constant 0 : index
      %454 = vector.load %arg3[%c0_373, %c0_374] : memref<1x128xf32, #tpu.memory_space<vmem>>, vector<1x128xf32>
      %455 = vector.broadcast %454 : vector<1x128xf32> to vector<128x128xf32>
      %456 = arith.addf %453, %455 : vector<128x128xf32>
      %cst_375 = arith.constant 0.000000e+00 : f32
      %457 = vector.broadcast %cst_375 : f32 to vector<128x128xf32>
      %458 = arith.maximumf %456, %457 : vector<128x128xf32>
      %c640 = arith.constant 640 : index
      %c0_376 = arith.constant 0 : index
      %459 = vector.load %arg13[%c640, %c0_376] : memref<896x128xf32, #tpu.memory_space<vmem>>, vector<128x128xf32>
      tpu.vector_store %arg13[%c640, %c0_376], %458 {strides = array<i32>} : memref<896x128xf32, #tpu.memory_space<vmem>>, vector<128x128xf32>,
      %cst_377 = arith.constant 0.000000e+00 : f32
      %460 = vector.broadcast %cst_377 : f32 to vector<128x128xf32>
      %c768_i32 = arith.constant 768 : i32
      %461 = arith.addi %147, %c768_i32 : i32
      %c0_i32_378 = arith.constant 0 : i32
      %462 = arith.addi %461, %c0_i32_378 : i32
      %463 = tpu.assume_multiple %462, 32 : i32
      %464 = arith.index_cast %463 : i32 to index
      %c0_379 = arith.constant 0 : index
      %465 = vector.load %arg1[%464, %c0_379] : memref<8192x16xf32, #tpu.memory_space<vmem>>, vector<128x16xf32>
      %c0_380 = arith.constant 0 : index
      %c0_381 = arith.constant 0 : index
      %c0_382 = arith.constant 0 : index
      %466 = vector.load %arg2[%c0_380, %c0_381, %c0_382] : memref<5x16x128xf32, #tpu.memory_space<vmem>>, vector<1x16x128xf32>
      %467 = vector.shape_cast %466 : vector<1x16x128xf32> to vector<16x128xf32>
      %cst_383 = arith.constant dense<0.000000e+00> : vector<128x128xf32>
      %468 = tpu.matmul %465, %467, %cst_383 {dimension_numbers = #tpu.dot_dimension_numbers<[1], [0], [0], [1], [0, 0, 1, 1], [], []>} : vector<128x16xf32>, vector<16x128xf32>, vector<128x128xf32> -> vector<128x128xf32>
      %469 = arith.addf %460, %468 : vector<128x128xf32>
      %c768_i32_384 = arith.constant 768 : i32
      %470 = arith.addi %147, %c768_i32_384 : i32
      %c32_i32_385 = arith.constant 32 : i32
      %471 = arith.addi %470, %c32_i32_385 : i32
      %472 = tpu.assume_multiple %471, 32 : i32
      %473 = arith.index_cast %472 : i32 to index
      %c0_386 = arith.constant 0 : index
      %474 = vector.load %arg1[%473, %c0_386] : memref<8192x16xf32, #tpu.memory_space<vmem>>, vector<128x16xf32>
      %c1_387 = arith.constant 1 : index
      %c0_388 = arith.constant 0 : index
      %c0_389 = arith.constant 0 : index
      %475 = vector.load %arg2[%c1_387, %c0_388, %c0_389] : memref<5x16x128xf32, #tpu.memory_space<vmem>>, vector<1x16x128xf32>
      %476 = vector.shape_cast %475 : vector<1x16x128xf32> to vector<16x128xf32>
      %cst_390 = arith.constant dense<0.000000e+00> : vector<128x128xf32>
      %477 = tpu.matmul %474, %476, %cst_390 {dimension_numbers = #tpu.dot_dimension_numbers<[1], [0], [0], [1], [0, 0, 1, 1], [], []>} : vector<128x16xf32>, vector<16x128xf32>, vector<128x128xf32> -> vector<128x128xf32>
      %478 = arith.addf %469, %477 : vector<128x128xf32>
      %c768_i32_391 = arith.constant 768 : i32
      %479 = arith.addi %147, %c768_i32_391 : i32
      %c64_i32_392 = arith.constant 64 : i32
      %480 = arith.addi %479, %c64_i32_392 : i32
      %481 = tpu.assume_multiple %480, 32 : i32
      %482 = arith.index_cast %481 : i32 to index
      %c0_393 = arith.constant 0 : index
      %483 = vector.load %arg1[%482, %c0_393] : memref<8192x16xf32, #tpu.memory_space<vmem>>, vector<128x16xf32>
      %c2_394 = arith.constant 2 : index
      %c0_395 = arith.constant 0 : index
      %c0_396 = arith.constant 0 : index
      %484 = vector.load %arg2[%c2_394, %c0_395, %c0_396] : memref<5x16x128xf32, #tpu.memory_space<vmem>>, vector<1x16x128xf32>
      %485 = vector.shape_cast %484 : vector<1x16x128xf32> to vector<16x128xf32>
      %cst_397 = arith.constant dense<0.000000e+00> : vector<128x128xf32>
      %486 = tpu.matmul %483, %485, %cst_397 {dimension_numbers = #tpu.dot_dimension_numbers<[1], [0], [0], [1], [0, 0, 1, 1], [], []>} : vector<128x16xf32>, vector<16x128xf32>, vector<128x128xf32> -> vector<128x128xf32>
      %487 = arith.addf %478, %486 : vector<128x128xf32>
      %c768_i32_398 = arith.constant 768 : i32
      %488 = arith.addi %147, %c768_i32_398 : i32
      %c96_i32_399 = arith.constant 96 : i32
      %489 = arith.addi %488, %c96_i32_399 : i32
      %490 = tpu.assume_multiple %489, 32 : i32
      %491 = arith.index_cast %490 : i32 to index
      %c0_400 = arith.constant 0 : index
      %492 = vector.load %arg1[%491, %c0_400] : memref<8192x16xf32, #tpu.memory_space<vmem>>, vector<128x16xf32>
      %c3_401 = arith.constant 3 : index
      %c0_402 = arith.constant 0 : index
      %c0_403 = arith.constant 0 : index
      %493 = vector.load %arg2[%c3_401, %c0_402, %c0_403] : memref<5x16x128xf32, #tpu.memory_space<vmem>>, vector<1x16x128xf32>
      %494 = vector.shape_cast %493 : vector<1x16x128xf32> to vector<16x128xf32>
      %cst_404 = arith.constant dense<0.000000e+00> : vector<128x128xf32>
      %495 = tpu.matmul %492, %494, %cst_404 {dimension_numbers = #tpu.dot_dimension_numbers<[1], [0], [0], [1], [0, 0, 1, 1], [], []>} : vector<128x16xf32>, vector<16x128xf32>, vector<128x128xf32> -> vector<128x128xf32>
      %496 = arith.addf %487, %495 : vector<128x128xf32>
      %c768_i32_405 = arith.constant 768 : i32
      %497 = arith.addi %147, %c768_i32_405 : i32
      %c128_i32_406 = arith.constant 128 : i32
      %498 = arith.addi %497, %c128_i32_406 : i32
      %499 = tpu.assume_multiple %498, 32 : i32
      %500 = arith.index_cast %499 : i32 to index
      %c0_407 = arith.constant 0 : index
      %501 = vector.load %arg1[%500, %c0_407] : memref<8192x16xf32, #tpu.memory_space<vmem>>, vector<128x16xf32>
      %c4_408 = arith.constant 4 : index
      %c0_409 = arith.constant 0 : index
      %c0_410 = arith.constant 0 : index
      %502 = vector.load %arg2[%c4_408, %c0_409, %c0_410] : memref<5x16x128xf32, #tpu.memory_space<vmem>>, vector<1x16x128xf32>
      %503 = vector.shape_cast %502 : vector<1x16x128xf32> to vector<16x128xf32>
      %cst_411 = arith.constant dense<0.000000e+00> : vector<128x128xf32>
      %504 = tpu.matmul %501, %503, %cst_411 {dimension_numbers = #tpu.dot_dimension_numbers<[1], [0], [0], [1], [0, 0, 1, 1], [], []>} : vector<128x16xf32>, vector<16x128xf32>, vector<128x128xf32> -> vector<128x128xf32>
      %505 = arith.addf %496, %504 : vector<128x128xf32>
      %c0_412 = arith.constant 0 : index
      %c0_413 = arith.constant 0 : index
      %506 = vector.load %arg3[%c0_412, %c0_413] : memref<1x128xf32, #tpu.memory_space<vmem>>, vector<1x128xf32>
      %507 = vector.broadcast %506 : vector<1x128xf32> to vector<128x128xf32>
      %508 = arith.addf %505, %507 : vector<128x128xf32>
      %cst_414 = arith.constant 0.000000e+00 : f32
      %509 = vector.broadcast %cst_414 : f32 to vector<128x128xf32>
      %510 = arith.maximumf %508, %509 : vector<128x128xf32>
      %c768 = arith.constant 768 : index
      %c0_415 = arith.constant 0 : index
      %511 = vector.load %arg13[%c768, %c0_415] : memref<896x128xf32, #tpu.memory_space<vmem>>, vector<128x128xf32>
      tpu.vector_store %arg13[%c768, %c0_415], %510 {strides = array<i32>} : memref<896x128xf32, #tpu.memory_space<vmem>>, vector<128x128xf32>,
      %c0_416 = arith.constant 0 : index
      %c0_417 = arith.constant 0 : index
      %512 = tpu.strided_load %arg13[%c0_416, %c0_417] {strides = array<i32: 2, 1>} : memref<896x128xf32, #tpu.memory_space<vmem>>, vector<14x128xf32>
      %c1_418 = arith.constant 1 : index
      %c0_419 = arith.constant 0 : index
      %513 = tpu.strided_load %arg13[%c1_418, %c0_419] {strides = array<i32: 2, 1>} : memref<896x128xf32, #tpu.memory_space<vmem>>, vector<14x128xf32>
      %514 = arith.maximumf %512, %513 : vector<14x128xf32>
      %c32 = arith.constant 32 : index
      %c0_420 = arith.constant 0 : index
      %515 = tpu.strided_load %arg13[%c32, %c0_420] {strides = array<i32: 2, 1>} : memref<896x128xf32, #tpu.memory_space<vmem>>, vector<14x128xf32>
      %c33 = arith.constant 33 : index
      %c0_421 = arith.constant 0 : index
      %516 = tpu.strided_load %arg13[%c33, %c0_421] {strides = array<i32: 2, 1>} : memref<896x128xf32, #tpu.memory_space<vmem>>, vector<14x128xf32>
      %517 = arith.maximumf %515, %516 : vector<14x128xf32>
      %518 = arith.maximumf %514, %517 : vector<14x128xf32>
      %519 = vector.extract_strided_slice %518 {offsets = [0, 0], sizes = [14, 8], strides = [1, 1]} : vector<14x128xf32> to vector<14x8xf32>
      %c0_422 = arith.constant 0 : index
      %c0_423 = arith.constant 0 : index
      %520 = vector.load %arg14[%c0_422, %c0_423] : memref<200x8xf32, #tpu.memory_space<vmem>>, vector<14x8xf32>
      tpu.vector_store %arg14[%c0_422, %c0_423], %519 {strides = array<i32>} : memref<200x8xf32, #tpu.memory_space<vmem>>, vector<14x8xf32>,
      %c64 = arith.constant 64 : index
      %c0_424 = arith.constant 0 : index
      %521 = tpu.strided_load %arg13[%c64, %c0_424] {strides = array<i32: 2, 1>} : memref<896x128xf32, #tpu.memory_space<vmem>>, vector<14x128xf32>
      %c65 = arith.constant 65 : index
      %c0_425 = arith.constant 0 : index
      %522 = tpu.strided_load %arg13[%c65, %c0_425] {strides = array<i32: 2, 1>} : memref<896x128xf32, #tpu.memory_space<vmem>>, vector<14x128xf32>
      %523 = arith.maximumf %521, %522 : vector<14x128xf32>
      %c96 = arith.constant 96 : index
      %c0_426 = arith.constant 0 : index
      %524 = tpu.strided_load %arg13[%c96, %c0_426] {strides = array<i32: 2, 1>} : memref<896x128xf32, #tpu.memory_space<vmem>>, vector<14x128xf32>
      %c97 = arith.constant 97 : index
      %c0_427 = arith.constant 0 : index
      %525 = tpu.strided_load %arg13[%c97, %c0_427] {strides = array<i32: 2, 1>} : memref<896x128xf32, #tpu.memory_space<vmem>>, vector<14x128xf32>
      %526 = arith.maximumf %524, %525 : vector<14x128xf32>
      %527 = arith.maximumf %523, %526 : vector<14x128xf32>
      %528 = vector.extract_strided_slice %527 {offsets = [0, 0], sizes = [14, 8], strides = [1, 1]} : vector<14x128xf32> to vector<14x8xf32>
      %c14_428 = arith.constant 14 : index
      %c0_429 = arith.constant 0 : index
      %529 = vector.load %arg14[%c14_428, %c0_429] : memref<200x8xf32, #tpu.memory_space<vmem>>, vector<14x8xf32>
      tpu.vector_store %arg14[%c14_428, %c0_429], %528 {strides = array<i32>} : memref<200x8xf32, #tpu.memory_space<vmem>>, vector<14x8xf32>,
      %c128_430 = arith.constant 128 : index
      %c0_431 = arith.constant 0 : index
      %530 = tpu.strided_load %arg13[%c128_430, %c0_431] {strides = array<i32: 2, 1>} : memref<896x128xf32, #tpu.memory_space<vmem>>, vector<14x128xf32>
      %c129 = arith.constant 129 : index
      %c0_432 = arith.constant 0 : index
      %531 = tpu.strided_load %arg13[%c129, %c0_432] {strides = array<i32: 2, 1>} : memref<896x128xf32, #tpu.memory_space<vmem>>, vector<14x128xf32>
      %532 = arith.maximumf %530, %531 : vector<14x128xf32>
      %c160 = arith.constant 160 : index
      %c0_433 = arith.constant 0 : index
      %533 = tpu.strided_load %arg13[%c160, %c0_433] {strides = array<i32: 2, 1>} : memref<896x128xf32, #tpu.memory_space<vmem>>, vector<14x128xf32>
      %c161 = arith.constant 161 : index
      %c0_434 = arith.constant 0 : index
      %534 = tpu.strided_load %arg13[%c161, %c0_434] {strides = array<i32: 2, 1>} : memref<896x128xf32, #tpu.memory_space<vmem>>, vector<14x128xf32>
      %535 = arith.maximumf %533, %534 : vector<14x128xf32>
      %536 = arith.maximumf %532, %535 : vector<14x128xf32>
      %537 = vector.extract_strided_slice %536 {offsets = [0, 0], sizes = [14, 8], strides = [1, 1]} : vector<14x128xf32> to vector<14x8xf32>
      %c28 = arith.constant 28 : index
      %c0_435 = arith.constant 0 : index
      %538 = vector.load %arg14[%c28, %c0_435] : memref<200x8xf32, #tpu.memory_space<vmem>>, vector<14x8xf32>
      tpu.vector_store %arg14[%c28, %c0_435], %537 {strides = array<i32>} : memref<200x8xf32, #tpu.memory_space<vmem>>, vector<14x8xf32>,
      %c192 = arith.constant 192 : index
      %c0_436 = arith.constant 0 : index
      %539 = tpu.strided_load %arg13[%c192, %c0_436] {strides = array<i32: 2, 1>} : memref<896x128xf32, #tpu.memory_space<vmem>>, vector<14x128xf32>
      %c193 = arith.constant 193 : index
      %c0_437 = arith.constant 0 : index
      %540 = tpu.strided_load %arg13[%c193, %c0_437] {strides = array<i32: 2, 1>} : memref<896x128xf32, #tpu.memory_space<vmem>>, vector<14x128xf32>
      %541 = arith.maximumf %539, %540 : vector<14x128xf32>
      %c224 = arith.constant 224 : index
      %c0_438 = arith.constant 0 : index
      %542 = tpu.strided_load %arg13[%c224, %c0_438] {strides = array<i32: 2, 1>} : memref<896x128xf32, #tpu.memory_space<vmem>>, vector<14x128xf32>
      %c225 = arith.constant 225 : index
      %c0_439 = arith.constant 0 : index
      %543 = tpu.strided_load %arg13[%c225, %c0_439] {strides = array<i32: 2, 1>} : memref<896x128xf32, #tpu.memory_space<vmem>>, vector<14x128xf32>
      %544 = arith.maximumf %542, %543 : vector<14x128xf32>
      %545 = arith.maximumf %541, %544 : vector<14x128xf32>
      %546 = vector.extract_strided_slice %545 {offsets = [0, 0], sizes = [14, 8], strides = [1, 1]} : vector<14x128xf32> to vector<14x8xf32>
      %c42 = arith.constant 42 : index
      %c0_440 = arith.constant 0 : index
      %547 = vector.load %arg14[%c42, %c0_440] : memref<200x8xf32, #tpu.memory_space<vmem>>, vector<14x8xf32>
      tpu.vector_store %arg14[%c42, %c0_440], %546 {strides = array<i32>} : memref<200x8xf32, #tpu.memory_space<vmem>>, vector<14x8xf32>,
      %c256_441 = arith.constant 256 : index
      %c0_442 = arith.constant 0 : index
      %548 = tpu.strided_load %arg13[%c256_441, %c0_442] {strides = array<i32: 2, 1>} : memref<896x128xf32, #tpu.memory_space<vmem>>, vector<14x128xf32>
      %c257 = arith.constant 257 : index
      %c0_443 = arith.constant 0 : index
      %549 = tpu.strided_load %arg13[%c257, %c0_443] {strides = array<i32: 2, 1>} : memref<896x128xf32, #tpu.memory_space<vmem>>, vector<14x128xf32>
      %550 = arith.maximumf %548, %549 : vector<14x128xf32>
      %c288 = arith.constant 288 : index
      %c0_444 = arith.constant 0 : index
      %551 = tpu.strided_load %arg13[%c288, %c0_444] {strides = array<i32: 2, 1>} : memref<896x128xf32, #tpu.memory_space<vmem>>, vector<14x128xf32>
      %c289 = arith.constant 289 : index
      %c0_445 = arith.constant 0 : index
      %552 = tpu.strided_load %arg13[%c289, %c0_445] {strides = array<i32: 2, 1>} : memref<896x128xf32, #tpu.memory_space<vmem>>, vector<14x128xf32>
      %553 = arith.maximumf %551, %552 : vector<14x128xf32>
      %554 = arith.maximumf %550, %553 : vector<14x128xf32>
      %555 = vector.extract_strided_slice %554 {offsets = [0, 0], sizes = [14, 8], strides = [1, 1]} : vector<14x128xf32> to vector<14x8xf32>
      %c56 = arith.constant 56 : index
      %c0_446 = arith.constant 0 : index
      %556 = vector.load %arg14[%c56, %c0_446] : memref<200x8xf32, #tpu.memory_space<vmem>>, vector<14x8xf32>
      tpu.vector_store %arg14[%c56, %c0_446], %555 {strides = array<i32>} : memref<200x8xf32, #tpu.memory_space<vmem>>, vector<14x8xf32>,
      %c320 = arith.constant 320 : index
      %c0_447 = arith.constant 0 : index
      %557 = tpu.strided_load %arg13[%c320, %c0_447] {strides = array<i32: 2, 1>} : memref<896x128xf32, #tpu.memory_space<vmem>>, vector<14x128xf32>
      %c321 = arith.constant 321 : index
      %c0_448 = arith.constant 0 : index
      %558 = tpu.strided_load %arg13[%c321, %c0_448] {strides = array<i32: 2, 1>} : memref<896x128xf32, #tpu.memory_space<vmem>>, vector<14x128xf32>
      %559 = arith.maximumf %557, %558 : vector<14x128xf32>
      %c352 = arith.constant 352 : index
      %c0_449 = arith.constant 0 : index
      %560 = tpu.strided_load %arg13[%c352, %c0_449] {strides = array<i32: 2, 1>} : memref<896x128xf32, #tpu.memory_space<vmem>>, vector<14x128xf32>
      %c353 = arith.constant 353 : index
      %c0_450 = arith.constant 0 : index
      %561 = tpu.strided_load %arg13[%c353, %c0_450] {strides = array<i32: 2, 1>} : memref<896x128xf32, #tpu.memory_space<vmem>>, vector<14x128xf32>
      %562 = arith.maximumf %560, %561 : vector<14x128xf32>
      %563 = arith.maximumf %559, %562 : vector<14x128xf32>
      %564 = vector.extract_strided_slice %563 {offsets = [0, 0], sizes = [14, 8], strides = [1, 1]} : vector<14x128xf32> to vector<14x8xf32>
      %c70 = arith.constant 70 : index
      %c0_451 = arith.constant 0 : index
      %565 = vector.load %arg14[%c70, %c0_451] : memref<200x8xf32, #tpu.memory_space<vmem>>, vector<14x8xf32>
      tpu.vector_store %arg14[%c70, %c0_451], %564 {strides = array<i32>} : memref<200x8xf32, #tpu.memory_space<vmem>>, vector<14x8xf32>,
      %c384_452 = arith.constant 384 : index
      %c0_453 = arith.constant 0 : index
      %566 = tpu.strided_load %arg13[%c384_452, %c0_453] {strides = array<i32: 2, 1>} : memref<896x128xf32, #tpu.memory_space<vmem>>, vector<14x128xf32>
      %c385 = arith.constant 385 : index
      %c0_454 = arith.constant 0 : index
      %567 = tpu.strided_load %arg13[%c385, %c0_454] {strides = array<i32: 2, 1>} : memref<896x128xf32, #tpu.memory_space<vmem>>, vector<14x128xf32>
      %568 = arith.maximumf %566, %567 : vector<14x128xf32>
      %c416 = arith.constant 416 : index
      %c0_455 = arith.constant 0 : index
      %569 = tpu.strided_load %arg13[%c416, %c0_455] {strides = array<i32: 2, 1>} : memref<896x128xf32, #tpu.memory_space<vmem>>, vector<14x128xf32>
      %c417 = arith.constant 417 : index
      %c0_456 = arith.constant 0 : index
      %570 = tpu.strided_load %arg13[%c417, %c0_456] {strides = array<i32: 2, 1>} : memref<896x128xf32, #tpu.memory_space<vmem>>, vector<14x128xf32>
      %571 = arith.maximumf %569, %570 : vector<14x128xf32>
      %572 = arith.maximumf %568, %571 : vector<14x128xf32>
      %573 = vector.extract_strided_slice %572 {offsets = [0, 0], sizes = [14, 8], strides = [1, 1]} : vector<14x128xf32> to vector<14x8xf32>
      %c84 = arith.constant 84 : index
      %c0_457 = arith.constant 0 : index
      %574 = vector.load %arg14[%c84, %c0_457] : memref<200x8xf32, #tpu.memory_space<vmem>>, vector<14x8xf32>
      tpu.vector_store %arg14[%c84, %c0_457], %573 {strides = array<i32>} : memref<200x8xf32, #tpu.memory_space<vmem>>, vector<14x8xf32>,
      %c448 = arith.constant 448 : index
      %c0_458 = arith.constant 0 : index
      %575 = tpu.strided_load %arg13[%c448, %c0_458] {strides = array<i32: 2, 1>} : memref<896x128xf32, #tpu.memory_space<vmem>>, vector<14x128xf32>
      %c449 = arith.constant 449 : index
      %c0_459 = arith.constant 0 : index
      %576 = tpu.strided_load %arg13[%c449, %c0_459] {strides = array<i32: 2, 1>} : memref<896x128xf32, #tpu.memory_space<vmem>>, vector<14x128xf32>
      %577 = arith.maximumf %575, %576 : vector<14x128xf32>
      %c480 = arith.constant 480 : index
      %c0_460 = arith.constant 0 : index
      %578 = tpu.strided_load %arg13[%c480, %c0_460] {strides = array<i32: 2, 1>} : memref<896x128xf32, #tpu.memory_space<vmem>>, vector<14x128xf32>
      %c481 = arith.constant 481 : index
      %c0_461 = arith.constant 0 : index
      %579 = tpu.strided_load %arg13[%c481, %c0_461] {strides = array<i32: 2, 1>} : memref<896x128xf32, #tpu.memory_space<vmem>>, vector<14x128xf32>
      %580 = arith.maximumf %578, %579 : vector<14x128xf32>
      %581 = arith.maximumf %577, %580 : vector<14x128xf32>
      %582 = vector.extract_strided_slice %581 {offsets = [0, 0], sizes = [14, 8], strides = [1, 1]} : vector<14x128xf32> to vector<14x8xf32>
      %c98 = arith.constant 98 : index
      %c0_462 = arith.constant 0 : index
      %583 = vector.load %arg14[%c98, %c0_462] : memref<200x8xf32, #tpu.memory_space<vmem>>, vector<14x8xf32>
      tpu.vector_store %arg14[%c98, %c0_462], %582 {strides = array<i32>} : memref<200x8xf32, #tpu.memory_space<vmem>>, vector<14x8xf32>,
      %c512_463 = arith.constant 512 : index
      %c0_464 = arith.constant 0 : index
      %584 = tpu.strided_load %arg13[%c512_463, %c0_464] {strides = array<i32: 2, 1>} : memref<896x128xf32, #tpu.memory_space<vmem>>, vector<14x128xf32>
      %c513 = arith.constant 513 : index
      %c0_465 = arith.constant 0 : index
      %585 = tpu.strided_load %arg13[%c513, %c0_465] {strides = array<i32: 2, 1>} : memref<896x128xf32, #tpu.memory_space<vmem>>, vector<14x128xf32>
      %586 = arith.maximumf %584, %585 : vector<14x128xf32>
      %c544 = arith.constant 544 : index
      %c0_466 = arith.constant 0 : index
      %587 = tpu.strided_load %arg13[%c544, %c0_466] {strides = array<i32: 2, 1>} : memref<896x128xf32, #tpu.memory_space<vmem>>, vector<14x128xf32>
      %c545 = arith.constant 545 : index
      %c0_467 = arith.constant 0 : index
      %588 = tpu.strided_load %arg13[%c545, %c0_467] {strides = array<i32: 2, 1>} : memref<896x128xf32, #tpu.memory_space<vmem>>, vector<14x128xf32>
      %589 = arith.maximumf %587, %588 : vector<14x128xf32>
      %590 = arith.maximumf %586, %589 : vector<14x128xf32>
      %591 = vector.extract_strided_slice %590 {offsets = [0, 0], sizes = [14, 8], strides = [1, 1]} : vector<14x128xf32> to vector<14x8xf32>
      %c112 = arith.constant 112 : index
      %c0_468 = arith.constant 0 : index
      %592 = vector.load %arg14[%c112, %c0_468] : memref<200x8xf32, #tpu.memory_space<vmem>>, vector<14x8xf32>
      tpu.vector_store %arg14[%c112, %c0_468], %591 {strides = array<i32>} : memref<200x8xf32, #tpu.memory_space<vmem>>, vector<14x8xf32>,
      %c576 = arith.constant 576 : index
      %c0_469 = arith.constant 0 : index
      %593 = tpu.strided_load %arg13[%c576, %c0_469] {strides = array<i32: 2, 1>} : memref<896x128xf32, #tpu.memory_space<vmem>>, vector<14x128xf32>
      %c577 = arith.constant 577 : index
      %c0_470 = arith.constant 0 : index
      %594 = tpu.strided_load %arg13[%c577, %c0_470] {strides = array<i32: 2, 1>} : memref<896x128xf32, #tpu.memory_space<vmem>>, vector<14x128xf32>
      %595 = arith.maximumf %593, %594 : vector<14x128xf32>
      %c608 = arith.constant 608 : index
      %c0_471 = arith.constant 0 : index
      %596 = tpu.strided_load %arg13[%c608, %c0_471] {strides = array<i32: 2, 1>} : memref<896x128xf32, #tpu.memory_space<vmem>>, vector<14x128xf32>
      %c609 = arith.constant 609 : index
      %c0_472 = arith.constant 0 : index
      %597 = tpu.strided_load %arg13[%c609, %c0_472] {strides = array<i32: 2, 1>} : memref<896x128xf32, #tpu.memory_space<vmem>>, vector<14x128xf32>
      %598 = arith.maximumf %596, %597 : vector<14x128xf32>
      %599 = arith.maximumf %595, %598 : vector<14x128xf32>
      %600 = vector.extract_strided_slice %599 {offsets = [0, 0], sizes = [14, 8], strides = [1, 1]} : vector<14x128xf32> to vector<14x8xf32>
      %c126 = arith.constant 126 : index
      %c0_473 = arith.constant 0 : index
      %601 = vector.load %arg14[%c126, %c0_473] : memref<200x8xf32, #tpu.memory_space<vmem>>, vector<14x8xf32>
      tpu.vector_store %arg14[%c126, %c0_473], %600 {strides = array<i32>} : memref<200x8xf32, #tpu.memory_space<vmem>>, vector<14x8xf32>,
      %c640_474 = arith.constant 640 : index
      %c0_475 = arith.constant 0 : index
      %602 = tpu.strided_load %arg13[%c640_474, %c0_475] {strides = array<i32: 2, 1>} : memref<896x128xf32, #tpu.memory_space<vmem>>, vector<14x128xf32>
      %c641 = arith.constant 641 : index
      %c0_476 = arith.constant 0 : index
      %603 = tpu.strided_load %arg13[%c641, %c0_476] {strides = array<i32: 2, 1>} : memref<896x128xf32, #tpu.memory_space<vmem>>, vector<14x128xf32>
      %604 = arith.maximumf %602, %603 : vector<14x128xf32>
      %c672 = arith.constant 672 : index
      %c0_477 = arith.constant 0 : index
      %605 = tpu.strided_load %arg13[%c672, %c0_477] {strides = array<i32: 2, 1>} : memref<896x128xf32, #tpu.memory_space<vmem>>, vector<14x128xf32>
      %c673 = arith.constant 673 : index
      %c0_478 = arith.constant 0 : index
      %606 = tpu.strided_load %arg13[%c673, %c0_478] {strides = array<i32: 2, 1>} : memref<896x128xf32, #tpu.memory_space<vmem>>, vector<14x128xf32>
      %607 = arith.maximumf %605, %606 : vector<14x128xf32>
      %608 = arith.maximumf %604, %607 : vector<14x128xf32>
      %609 = vector.extract_strided_slice %608 {offsets = [0, 0], sizes = [14, 8], strides = [1, 1]} : vector<14x128xf32> to vector<14x8xf32>
      %c140 = arith.constant 140 : index
      %c0_479 = arith.constant 0 : index
      %610 = vector.load %arg14[%c140, %c0_479] : memref<200x8xf32, #tpu.memory_space<vmem>>, vector<14x8xf32>
      tpu.vector_store %arg14[%c140, %c0_479], %609 {strides = array<i32>} : memref<200x8xf32, #tpu.memory_space<vmem>>, vector<14x8xf32>,
      %c704 = arith.constant 704 : index
      %c0_480 = arith.constant 0 : index
      %611 = tpu.strided_load %arg13[%c704, %c0_480] {strides = array<i32: 2, 1>} : memref<896x128xf32, #tpu.memory_space<vmem>>, vector<14x128xf32>
      %c705 = arith.constant 705 : index
      %c0_481 = arith.constant 0 : index
      %612 = tpu.strided_load %arg13[%c705, %c0_481] {strides = array<i32: 2, 1>} : memref<896x128xf32, #tpu.memory_space<vmem>>, vector<14x128xf32>
      %613 = arith.maximumf %611, %612 : vector<14x128xf32>
      %c736 = arith.constant 736 : index
      %c0_482 = arith.constant 0 : index
      %614 = tpu.strided_load %arg13[%c736, %c0_482] {strides = array<i32: 2, 1>} : memref<896x128xf32, #tpu.memory_space<vmem>>, vector<14x128xf32>
      %c737 = arith.constant 737 : index
      %c0_483 = arith.constant 0 : index
      %615 = tpu.strided_load %arg13[%c737, %c0_483] {strides = array<i32: 2, 1>} : memref<896x128xf32, #tpu.memory_space<vmem>>, vector<14x128xf32>
      %616 = arith.maximumf %614, %615 : vector<14x128xf32>
      %617 = arith.maximumf %613, %616 : vector<14x128xf32>
      %618 = vector.extract_strided_slice %617 {offsets = [0, 0], sizes = [14, 8], strides = [1, 1]} : vector<14x128xf32> to vector<14x8xf32>
      %c154 = arith.constant 154 : index
      %c0_484 = arith.constant 0 : index
      %619 = vector.load %arg14[%c154, %c0_484] : memref<200x8xf32, #tpu.memory_space<vmem>>, vector<14x8xf32>
      tpu.vector_store %arg14[%c154, %c0_484], %618 {strides = array<i32>} : memref<200x8xf32, #tpu.memory_space<vmem>>, vector<14x8xf32>,
      %c768_485 = arith.constant 768 : index
      %c0_486 = arith.constant 0 : index
      %620 = tpu.strided_load %arg13[%c768_485, %c0_486] {strides = array<i32: 2, 1>} : memref<896x128xf32, #tpu.memory_space<vmem>>, vector<14x128xf32>
      %c769 = arith.constant 769 : index
      %c0_487 = arith.constant 0 : index
      %621 = tpu.strided_load %arg13[%c769, %c0_487] {strides = array<i32: 2, 1>} : memref<896x128xf32, #tpu.memory_space<vmem>>, vector<14x128xf32>
      %622 = arith.maximumf %620, %621 : vector<14x128xf32>
      %c800 = arith.constant 800 : index
      %c0_488 = arith.constant 0 : index
      %623 = tpu.strided_load %arg13[%c800, %c0_488] {strides = array<i32: 2, 1>} : memref<896x128xf32, #tpu.memory_space<vmem>>, vector<14x128xf32>
      %c801 = arith.constant 801 : index
      %c0_489 = arith.constant 0 : index
      %624 = tpu.strided_load %arg13[%c801, %c0_489] {strides = array<i32: 2, 1>} : memref<896x128xf32, #tpu.memory_space<vmem>>, vector<14x128xf32>
      %625 = arith.maximumf %623, %624 : vector<14x128xf32>
      %626 = arith.maximumf %622, %625 : vector<14x128xf32>
      %627 = vector.extract_strided_slice %626 {offsets = [0, 0], sizes = [14, 8], strides = [1, 1]} : vector<14x128xf32> to vector<14x8xf32>
      %c168 = arith.constant 168 : index
      %c0_490 = arith.constant 0 : index
      %628 = vector.load %arg14[%c168, %c0_490] : memref<200x8xf32, #tpu.memory_space<vmem>>, vector<14x8xf32>
      tpu.vector_store %arg14[%c168, %c0_490], %627 {strides = array<i32>} : memref<200x8xf32, #tpu.memory_space<vmem>>, vector<14x8xf32>,
      %c832 = arith.constant 832 : index
      %c0_491 = arith.constant 0 : index
      %629 = tpu.strided_load %arg13[%c832, %c0_491] {strides = array<i32: 2, 1>} : memref<896x128xf32, #tpu.memory_space<vmem>>, vector<14x128xf32>
      %c833 = arith.constant 833 : index
      %c0_492 = arith.constant 0 : index
      %630 = tpu.strided_load %arg13[%c833, %c0_492] {strides = array<i32: 2, 1>} : memref<896x128xf32, #tpu.memory_space<vmem>>, vector<14x128xf32>
      %631 = arith.maximumf %629, %630 : vector<14x128xf32>
      %c864 = arith.constant 864 : index
      %c0_493 = arith.constant 0 : index
      %632 = tpu.strided_load %arg13[%c864, %c0_493] {strides = array<i32: 2, 1>} : memref<896x128xf32, #tpu.memory_space<vmem>>, vector<14x128xf32>
      %c865 = arith.constant 865 : index
      %c0_494 = arith.constant 0 : index
      %633 = tpu.strided_load %arg13[%c865, %c0_494] {strides = array<i32: 2, 1>} : memref<896x128xf32, #tpu.memory_space<vmem>>, vector<14x128xf32>
      %634 = arith.maximumf %632, %633 : vector<14x128xf32>
      %635 = arith.maximumf %631, %634 : vector<14x128xf32>
      %636 = vector.extract_strided_slice %635 {offsets = [0, 0], sizes = [14, 8], strides = [1, 1]} : vector<14x128xf32> to vector<14x8xf32>
      %c182 = arith.constant 182 : index
      %c0_495 = arith.constant 0 : index
      %637 = vector.load %arg14[%c182, %c0_495] : memref<200x8xf32, #tpu.memory_space<vmem>>, vector<14x8xf32>
      tpu.vector_store %arg14[%c182, %c0_495], %636 {strides = array<i32>} : memref<200x8xf32, #tpu.memory_space<vmem>>, vector<14x8xf32>,
      %cst_496 = arith.constant 0.000000e+00 : f32
      %638 = vector.broadcast %cst_496 : f32 to vector<136x128xf32>
      %c0_497 = arith.constant 0 : index
      %c0_498 = arith.constant 0 : index
      %639 = vector.load %arg14[%c0_497, %c0_498] : memref<200x8xf32, #tpu.memory_space<vmem>>, vector<136x8xf32>
      %c0_499 = arith.constant 0 : index
      %c0_500 = arith.constant 0 : index
      %c0_501 = arith.constant 0 : index
      %640 = vector.load %arg4[%c0_499, %c0_500, %c0_501] : memref<25x8x128xf32, #tpu.memory_space<vmem>>, vector<1x8x128xf32>
      %641 = vector.shape_cast %640 : vector<1x8x128xf32> to vector<8x128xf32>
      %cst_502 = arith.constant dense<0.000000e+00> : vector<136x128xf32>
      %642 = tpu.matmul %639, %641, %cst_502 {dimension_numbers = #tpu.dot_dimension_numbers<[1], [0], [0], [1], [0, 0, 1, 1], [], []>} : vector<136x8xf32>, vector<8x128xf32>, vector<136x128xf32> -> vector<136x128xf32>
      %643 = arith.addf %638, %642 : vector<136x128xf32>
      %c1_503 = arith.constant 1 : index
      %c0_504 = arith.constant 0 : index
      %644 = vector.load %arg14[%c1_503, %c0_504] : memref<200x8xf32, #tpu.memory_space<vmem>>, vector<136x8xf32>
      %c1_505 = arith.constant 1 : index
      %c0_506 = arith.constant 0 : index
      %c0_507 = arith.constant 0 : index
      %645 = vector.load %arg4[%c1_505, %c0_506, %c0_507] : memref<25x8x128xf32, #tpu.memory_space<vmem>>, vector<1x8x128xf32>
      %646 = vector.shape_cast %645 : vector<1x8x128xf32> to vector<8x128xf32>
      %cst_508 = arith.constant dense<0.000000e+00> : vector<136x128xf32>
      %647 = tpu.matmul %644, %646, %cst_508 {dimension_numbers = #tpu.dot_dimension_numbers<[1], [0], [0], [1], [0, 0, 1, 1], [], []>} : vector<136x8xf32>, vector<8x128xf32>, vector<136x128xf32> -> vector<136x128xf32>
      %648 = arith.addf %643, %647 : vector<136x128xf32>
      %c2_509 = arith.constant 2 : index
      %c0_510 = arith.constant 0 : index
      %649 = vector.load %arg14[%c2_509, %c0_510] : memref<200x8xf32, #tpu.memory_space<vmem>>, vector<136x8xf32>
      %c2_511 = arith.constant 2 : index
      %c0_512 = arith.constant 0 : index
      %c0_513 = arith.constant 0 : index
      %650 = vector.load %arg4[%c2_511, %c0_512, %c0_513] : memref<25x8x128xf32, #tpu.memory_space<vmem>>, vector<1x8x128xf32>
      %651 = vector.shape_cast %650 : vector<1x8x128xf32> to vector<8x128xf32>
      %cst_514 = arith.constant dense<0.000000e+00> : vector<136x128xf32>
      %652 = tpu.matmul %649, %651, %cst_514 {dimension_numbers = #tpu.dot_dimension_numbers<[1], [0], [0], [1], [0, 0, 1, 1], [], []>} : vector<136x8xf32>, vector<8x128xf32>, vector<136x128xf32> -> vector<136x128xf32>
      %653 = arith.addf %648, %652 : vector<136x128xf32>
      %c3_515 = arith.constant 3 : index
      %c0_516 = arith.constant 0 : index
      %654 = vector.load %arg14[%c3_515, %c0_516] : memref<200x8xf32, #tpu.memory_space<vmem>>, vector<136x8xf32>
      %c3_517 = arith.constant 3 : index
      %c0_518 = arith.constant 0 : index
      %c0_519 = arith.constant 0 : index
      %655 = vector.load %arg4[%c3_517, %c0_518, %c0_519] : memref<25x8x128xf32, #tpu.memory_space<vmem>>, vector<1x8x128xf32>
      %656 = vector.shape_cast %655 : vector<1x8x128xf32> to vector<8x128xf32>
      %cst_520 = arith.constant dense<0.000000e+00> : vector<136x128xf32>
      %657 = tpu.matmul %654, %656, %cst_520 {dimension_numbers = #tpu.dot_dimension_numbers<[1], [0], [0], [1], [0, 0, 1, 1], [], []>} : vector<136x8xf32>, vector<8x128xf32>, vector<136x128xf32> -> vector<136x128xf32>
      %658 = arith.addf %653, %657 : vector<136x128xf32>
      %c4_521 = arith.constant 4 : index
      %c0_522 = arith.constant 0 : index
      %659 = vector.load %arg14[%c4_521, %c0_522] : memref<200x8xf32, #tpu.memory_space<vmem>>, vector<136x8xf32>
      %c4_523 = arith.constant 4 : index
      %c0_524 = arith.constant 0 : index
      %c0_525 = arith.constant 0 : index
      %660 = vector.load %arg4[%c4_523, %c0_524, %c0_525] : memref<25x8x128xf32, #tpu.memory_space<vmem>>, vector<1x8x128xf32>
      %661 = vector.shape_cast %660 : vector<1x8x128xf32> to vector<8x128xf32>
      %cst_526 = arith.constant dense<0.000000e+00> : vector<136x128xf32>
      %662 = tpu.matmul %659, %661, %cst_526 {dimension_numbers = #tpu.dot_dimension_numbers<[1], [0], [0], [1], [0, 0, 1, 1], [], []>} : vector<136x8xf32>, vector<8x128xf32>, vector<136x128xf32> -> vector<136x128xf32>
      %663 = arith.addf %658, %662 : vector<136x128xf32>
      %c14_527 = arith.constant 14 : index
      %c0_528 = arith.constant 0 : index
      %664 = vector.load %arg14[%c14_527, %c0_528] : memref<200x8xf32, #tpu.memory_space<vmem>>, vector<136x8xf32>
      %c5_529 = arith.constant 5 : index
      %c0_530 = arith.constant 0 : index
      %c0_531 = arith.constant 0 : index
      %665 = vector.load %arg4[%c5_529, %c0_530, %c0_531] : memref<25x8x128xf32, #tpu.memory_space<vmem>>, vector<1x8x128xf32>
      %666 = vector.shape_cast %665 : vector<1x8x128xf32> to vector<8x128xf32>
      %cst_532 = arith.constant dense<0.000000e+00> : vector<136x128xf32>
      %667 = tpu.matmul %664, %666, %cst_532 {dimension_numbers = #tpu.dot_dimension_numbers<[1], [0], [0], [1], [0, 0, 1, 1], [], []>} : vector<136x8xf32>, vector<8x128xf32>, vector<136x128xf32> -> vector<136x128xf32>
      %668 = arith.addf %663, %667 : vector<136x128xf32>
      %c15_533 = arith.constant 15 : index
      %c0_534 = arith.constant 0 : index
      %669 = vector.load %arg14[%c15_533, %c0_534] : memref<200x8xf32, #tpu.memory_space<vmem>>, vector<136x8xf32>
      %c6_535 = arith.constant 6 : index
      %c0_536 = arith.constant 0 : index
      %c0_537 = arith.constant 0 : index
      %670 = vector.load %arg4[%c6_535, %c0_536, %c0_537] : memref<25x8x128xf32, #tpu.memory_space<vmem>>, vector<1x8x128xf32>
      %671 = vector.shape_cast %670 : vector<1x8x128xf32> to vector<8x128xf32>
      %cst_538 = arith.constant dense<0.000000e+00> : vector<136x128xf32>
      %672 = tpu.matmul %669, %671, %cst_538 {dimension_numbers = #tpu.dot_dimension_numbers<[1], [0], [0], [1], [0, 0, 1, 1], [], []>} : vector<136x8xf32>, vector<8x128xf32>, vector<136x128xf32> -> vector<136x128xf32>
      %673 = arith.addf %668, %672 : vector<136x128xf32>
      %c16_539 = arith.constant 16 : index
      %c0_540 = arith.constant 0 : index
      %674 = vector.load %arg14[%c16_539, %c0_540] : memref<200x8xf32, #tpu.memory_space<vmem>>, vector<136x8xf32>
      %c7_541 = arith.constant 7 : index
      %c0_542 = arith.constant 0 : index
      %c0_543 = arith.constant 0 : index
      %675 = vector.load %arg4[%c7_541, %c0_542, %c0_543] : memref<25x8x128xf32, #tpu.memory_space<vmem>>, vector<1x8x128xf32>
      %676 = vector.shape_cast %675 : vector<1x8x128xf32> to vector<8x128xf32>
      %cst_544 = arith.constant dense<0.000000e+00> : vector<136x128xf32>
      %677 = tpu.matmul %674, %676, %cst_544 {dimension_numbers = #tpu.dot_dimension_numbers<[1], [0], [0], [1], [0, 0, 1, 1], [], []>} : vector<136x8xf32>, vector<8x128xf32>, vector<136x128xf32> -> vector<136x128xf32>
      %678 = arith.addf %673, %677 : vector<136x128xf32>
      %c17_545 = arith.constant 17 : index
      %c0_546 = arith.constant 0 : index
      %679 = vector.load %arg14[%c17_545, %c0_546] : memref<200x8xf32, #tpu.memory_space<vmem>>, vector<136x8xf32>
      %c8_547 = arith.constant 8 : index
      %c0_548 = arith.constant 0 : index
      %c0_549 = arith.constant 0 : index
      %680 = vector.load %arg4[%c8_547, %c0_548, %c0_549] : memref<25x8x128xf32, #tpu.memory_space<vmem>>, vector<1x8x128xf32>
      %681 = vector.shape_cast %680 : vector<1x8x128xf32> to vector<8x128xf32>
      %cst_550 = arith.constant dense<0.000000e+00> : vector<136x128xf32>
      %682 = tpu.matmul %679, %681, %cst_550 {dimension_numbers = #tpu.dot_dimension_numbers<[1], [0], [0], [1], [0, 0, 1, 1], [], []>} : vector<136x8xf32>, vector<8x128xf32>, vector<136x128xf32> -> vector<136x128xf32>
      %683 = arith.addf %678, %682 : vector<136x128xf32>
      %c18_551 = arith.constant 18 : index
      %c0_552 = arith.constant 0 : index
      %684 = vector.load %arg14[%c18_551, %c0_552] : memref<200x8xf32, #tpu.memory_space<vmem>>, vector<136x8xf32>
      %c9_553 = arith.constant 9 : index
      %c0_554 = arith.constant 0 : index
      %c0_555 = arith.constant 0 : index
      %685 = vector.load %arg4[%c9_553, %c0_554, %c0_555] : memref<25x8x128xf32, #tpu.memory_space<vmem>>, vector<1x8x128xf32>
      %686 = vector.shape_cast %685 : vector<1x8x128xf32> to vector<8x128xf32>
      %cst_556 = arith.constant dense<0.000000e+00> : vector<136x128xf32>
      %687 = tpu.matmul %684, %686, %cst_556 {dimension_numbers = #tpu.dot_dimension_numbers<[1], [0], [0], [1], [0, 0, 1, 1], [], []>} : vector<136x8xf32>, vector<8x128xf32>, vector<136x128xf32> -> vector<136x128xf32>
      %688 = arith.addf %683, %687 : vector<136x128xf32>
      %c28_557 = arith.constant 28 : index
      %c0_558 = arith.constant 0 : index
      %689 = vector.load %arg14[%c28_557, %c0_558] : memref<200x8xf32, #tpu.memory_space<vmem>>, vector<136x8xf32>
      %c10_559 = arith.constant 10 : index
      %c0_560 = arith.constant 0 : index
      %c0_561 = arith.constant 0 : index
      %690 = vector.load %arg4[%c10_559, %c0_560, %c0_561] : memref<25x8x128xf32, #tpu.memory_space<vmem>>, vector<1x8x128xf32>
      %691 = vector.shape_cast %690 : vector<1x8x128xf32> to vector<8x128xf32>
      %cst_562 = arith.constant dense<0.000000e+00> : vector<136x128xf32>
      %692 = tpu.matmul %689, %691, %cst_562 {dimension_numbers = #tpu.dot_dimension_numbers<[1], [0], [0], [1], [0, 0, 1, 1], [], []>} : vector<136x8xf32>, vector<8x128xf32>, vector<136x128xf32> -> vector<136x128xf32>
      %693 = arith.addf %688, %692 : vector<136x128xf32>
      %c29 = arith.constant 29 : index
      %c0_563 = arith.constant 0 : index
      %694 = vector.load %arg14[%c29, %c0_563] : memref<200x8xf32, #tpu.memory_space<vmem>>, vector<136x8xf32>
      %c11_564 = arith.constant 11 : index
      %c0_565 = arith.constant 0 : index
      %c0_566 = arith.constant 0 : index
      %695 = vector.load %arg4[%c11_564, %c0_565, %c0_566] : memref<25x8x128xf32, #tpu.memory_space<vmem>>, vector<1x8x128xf32>
      %696 = vector.shape_cast %695 : vector<1x8x128xf32> to vector<8x128xf32>
      %cst_567 = arith.constant dense<0.000000e+00> : vector<136x128xf32>
      %697 = tpu.matmul %694, %696, %cst_567 {dimension_numbers = #tpu.dot_dimension_numbers<[1], [0], [0], [1], [0, 0, 1, 1], [], []>} : vector<136x8xf32>, vector<8x128xf32>, vector<136x128xf32> -> vector<136x128xf32>
      %698 = arith.addf %693, %697 : vector<136x128xf32>
      %c30 = arith.constant 30 : index
      %c0_568 = arith.constant 0 : index
      %699 = vector.load %arg14[%c30, %c0_568] : memref<200x8xf32, #tpu.memory_space<vmem>>, vector<136x8xf32>
      %c12_569 = arith.constant 12 : index
      %c0_570 = arith.constant 0 : index
      %c0_571 = arith.constant 0 : index
      %700 = vector.load %arg4[%c12_569, %c0_570, %c0_571] : memref<25x8x128xf32, #tpu.memory_space<vmem>>, vector<1x8x128xf32>
      %701 = vector.shape_cast %700 : vector<1x8x128xf32> to vector<8x128xf32>
      %cst_572 = arith.constant dense<0.000000e+00> : vector<136x128xf32>
      %702 = tpu.matmul %699, %701, %cst_572 {dimension_numbers = #tpu.dot_dimension_numbers<[1], [0], [0], [1], [0, 0, 1, 1], [], []>} : vector<136x8xf32>, vector<8x128xf32>, vector<136x128xf32> -> vector<136x128xf32>
      %703 = arith.addf %698, %702 : vector<136x128xf32>
      %c31 = arith.constant 31 : index
      %c0_573 = arith.constant 0 : index
      %704 = vector.load %arg14[%c31, %c0_573] : memref<200x8xf32, #tpu.memory_space<vmem>>, vector<136x8xf32>
      %c13_574 = arith.constant 13 : index
      %c0_575 = arith.constant 0 : index
      %c0_576 = arith.constant 0 : index
      %705 = vector.load %arg4[%c13_574, %c0_575, %c0_576] : memref<25x8x128xf32, #tpu.memory_space<vmem>>, vector<1x8x128xf32>
      %706 = vector.shape_cast %705 : vector<1x8x128xf32> to vector<8x128xf32>
      %cst_577 = arith.constant dense<0.000000e+00> : vector<136x128xf32>
      %707 = tpu.matmul %704, %706, %cst_577 {dimension_numbers = #tpu.dot_dimension_numbers<[1], [0], [0], [1], [0, 0, 1, 1], [], []>} : vector<136x8xf32>, vector<8x128xf32>, vector<136x128xf32> -> vector<136x128xf32>
      %708 = arith.addf %703, %707 : vector<136x128xf32>
      %c32_578 = arith.constant 32 : index
      %c0_579 = arith.constant 0 : index
      %709 = vector.load %arg14[%c32_578, %c0_579] : memref<200x8xf32, #tpu.memory_space<vmem>>, vector<136x8xf32>
      %c14_580 = arith.constant 14 : index
      %c0_581 = arith.constant 0 : index
      %c0_582 = arith.constant 0 : index
      %710 = vector.load %arg4[%c14_580, %c0_581, %c0_582] : memref<25x8x128xf32, #tpu.memory_space<vmem>>, vector<1x8x128xf32>
      %711 = vector.shape_cast %710 : vector<1x8x128xf32> to vector<8x128xf32>
      %cst_583 = arith.constant dense<0.000000e+00> : vector<136x128xf32>
      %712 = tpu.matmul %709, %711, %cst_583 {dimension_numbers = #tpu.dot_dimension_numbers<[1], [0], [0], [1], [0, 0, 1, 1], [], []>} : vector<136x8xf32>, vector<8x128xf32>, vector<136x128xf32> -> vector<136x128xf32>
      %713 = arith.addf %708, %712 : vector<136x128xf32>
      %c42_584 = arith.constant 42 : index
      %c0_585 = arith.constant 0 : index
      %714 = vector.load %arg14[%c42_584, %c0_585] : memref<200x8xf32, #tpu.memory_space<vmem>>, vector<136x8xf32>
      %c15_586 = arith.constant 15 : index
      %c0_587 = arith.constant 0 : index
      %c0_588 = arith.constant 0 : index
      %715 = vector.load %arg4[%c15_586, %c0_587, %c0_588] : memref<25x8x128xf32, #tpu.memory_space<vmem>>, vector<1x8x128xf32>
      %716 = vector.shape_cast %715 : vector<1x8x128xf32> to vector<8x128xf32>
      %cst_589 = arith.constant dense<0.000000e+00> : vector<136x128xf32>
      %717 = tpu.matmul %714, %716, %cst_589 {dimension_numbers = #tpu.dot_dimension_numbers<[1], [0], [0], [1], [0, 0, 1, 1], [], []>} : vector<136x8xf32>, vector<8x128xf32>, vector<136x128xf32> -> vector<136x128xf32>
      %718 = arith.addf %713, %717 : vector<136x128xf32>
      %c43 = arith.constant 43 : index
      %c0_590 = arith.constant 0 : index
      %719 = vector.load %arg14[%c43, %c0_590] : memref<200x8xf32, #tpu.memory_space<vmem>>, vector<136x8xf32>
      %c16_591 = arith.constant 16 : index
      %c0_592 = arith.constant 0 : index
      %c0_593 = arith.constant 0 : index
      %720 = vector.load %arg4[%c16_591, %c0_592, %c0_593] : memref<25x8x128xf32, #tpu.memory_space<vmem>>, vector<1x8x128xf32>
      %721 = vector.shape_cast %720 : vector<1x8x128xf32> to vector<8x128xf32>
      %cst_594 = arith.constant dense<0.000000e+00> : vector<136x128xf32>
      %722 = tpu.matmul %719, %721, %cst_594 {dimension_numbers = #tpu.dot_dimension_numbers<[1], [0], [0], [1], [0, 0, 1, 1], [], []>} : vector<136x8xf32>, vector<8x128xf32>, vector<136x128xf32> -> vector<136x128xf32>
      %723 = arith.addf %718, %722 : vector<136x128xf32>
      %c44 = arith.constant 44 : index
      %c0_595 = arith.constant 0 : index
      %724 = vector.load %arg14[%c44, %c0_595] : memref<200x8xf32, #tpu.memory_space<vmem>>, vector<136x8xf32>
      %c17_596 = arith.constant 17 : index
      %c0_597 = arith.constant 0 : index
      %c0_598 = arith.constant 0 : index
      %725 = vector.load %arg4[%c17_596, %c0_597, %c0_598] : memref<25x8x128xf32, #tpu.memory_space<vmem>>, vector<1x8x128xf32>
      %726 = vector.shape_cast %725 : vector<1x8x128xf32> to vector<8x128xf32>
      %cst_599 = arith.constant dense<0.000000e+00> : vector<136x128xf32>
      %727 = tpu.matmul %724, %726, %cst_599 {dimension_numbers = #tpu.dot_dimension_numbers<[1], [0], [0], [1], [0, 0, 1, 1], [], []>} : vector<136x8xf32>, vector<8x128xf32>, vector<136x128xf32> -> vector<136x128xf32>
      %728 = arith.addf %723, %727 : vector<136x128xf32>
      %c45 = arith.constant 45 : index
      %c0_600 = arith.constant 0 : index
      %729 = vector.load %arg14[%c45, %c0_600] : memref<200x8xf32, #tpu.memory_space<vmem>>, vector<136x8xf32>
      %c18_601 = arith.constant 18 : index
      %c0_602 = arith.constant 0 : index
      %c0_603 = arith.constant 0 : index
      %730 = vector.load %arg4[%c18_601, %c0_602, %c0_603] : memref<25x8x128xf32, #tpu.memory_space<vmem>>, vector<1x8x128xf32>
      %731 = vector.shape_cast %730 : vector<1x8x128xf32> to vector<8x128xf32>
      %cst_604 = arith.constant dense<0.000000e+00> : vector<136x128xf32>
      %732 = tpu.matmul %729, %731, %cst_604 {dimension_numbers = #tpu.dot_dimension_numbers<[1], [0], [0], [1], [0, 0, 1, 1], [], []>} : vector<136x8xf32>, vector<8x128xf32>, vector<136x128xf32> -> vector<136x128xf32>
      %733 = arith.addf %728, %732 : vector<136x128xf32>
      %c46 = arith.constant 46 : index
      %c0_605 = arith.constant 0 : index
      %734 = vector.load %arg14[%c46, %c0_605] : memref<200x8xf32, #tpu.memory_space<vmem>>, vector<136x8xf32>
      %c19_606 = arith.constant 19 : index
      %c0_607 = arith.constant 0 : index
      %c0_608 = arith.constant 0 : index
      %735 = vector.load %arg4[%c19_606, %c0_607, %c0_608] : memref<25x8x128xf32, #tpu.memory_space<vmem>>, vector<1x8x128xf32>
      %736 = vector.shape_cast %735 : vector<1x8x128xf32> to vector<8x128xf32>
      %cst_609 = arith.constant dense<0.000000e+00> : vector<136x128xf32>
      %737 = tpu.matmul %734, %736, %cst_609 {dimension_numbers = #tpu.dot_dimension_numbers<[1], [0], [0], [1], [0, 0, 1, 1], [], []>} : vector<136x8xf32>, vector<8x128xf32>, vector<136x128xf32> -> vector<136x128xf32>
      %738 = arith.addf %733, %737 : vector<136x128xf32>
      %c56_610 = arith.constant 56 : index
      %c0_611 = arith.constant 0 : index
      %739 = vector.load %arg14[%c56_610, %c0_611] : memref<200x8xf32, #tpu.memory_space<vmem>>, vector<136x8xf32>
      %c20_612 = arith.constant 20 : index
      %c0_613 = arith.constant 0 : index
      %c0_614 = arith.constant 0 : index
      %740 = vector.load %arg4[%c20_612, %c0_613, %c0_614] : memref<25x8x128xf32, #tpu.memory_space<vmem>>, vector<1x8x128xf32>
      %741 = vector.shape_cast %740 : vector<1x8x128xf32> to vector<8x128xf32>
      %cst_615 = arith.constant dense<0.000000e+00> : vector<136x128xf32>
      %742 = tpu.matmul %739, %741, %cst_615 {dimension_numbers = #tpu.dot_dimension_numbers<[1], [0], [0], [1], [0, 0, 1, 1], [], []>} : vector<136x8xf32>, vector<8x128xf32>, vector<136x128xf32> -> vector<136x128xf32>
      %743 = arith.addf %738, %742 : vector<136x128xf32>
      %c57 = arith.constant 57 : index
      %c0_616 = arith.constant 0 : index
      %744 = vector.load %arg14[%c57, %c0_616] : memref<200x8xf32, #tpu.memory_space<vmem>>, vector<136x8xf32>
      %c21_617 = arith.constant 21 : index
      %c0_618 = arith.constant 0 : index
      %c0_619 = arith.constant 0 : index
      %745 = vector.load %arg4[%c21_617, %c0_618, %c0_619] : memref<25x8x128xf32, #tpu.memory_space<vmem>>, vector<1x8x128xf32>
      %746 = vector.shape_cast %745 : vector<1x8x128xf32> to vector<8x128xf32>
      %cst_620 = arith.constant dense<0.000000e+00> : vector<136x128xf32>
      %747 = tpu.matmul %744, %746, %cst_620 {dimension_numbers = #tpu.dot_dimension_numbers<[1], [0], [0], [1], [0, 0, 1, 1], [], []>} : vector<136x8xf32>, vector<8x128xf32>, vector<136x128xf32> -> vector<136x128xf32>
      %748 = arith.addf %743, %747 : vector<136x128xf32>
      %c58 = arith.constant 58 : index
      %c0_621 = arith.constant 0 : index
      %749 = vector.load %arg14[%c58, %c0_621] : memref<200x8xf32, #tpu.memory_space<vmem>>, vector<136x8xf32>
      %c22_622 = arith.constant 22 : index
      %c0_623 = arith.constant 0 : index
      %c0_624 = arith.constant 0 : index
      %750 = vector.load %arg4[%c22_622, %c0_623, %c0_624] : memref<25x8x128xf32, #tpu.memory_space<vmem>>, vector<1x8x128xf32>
      %751 = vector.shape_cast %750 : vector<1x8x128xf32> to vector<8x128xf32>
      %cst_625 = arith.constant dense<0.000000e+00> : vector<136x128xf32>
      %752 = tpu.matmul %749, %751, %cst_625 {dimension_numbers = #tpu.dot_dimension_numbers<[1], [0], [0], [1], [0, 0, 1, 1], [], []>} : vector<136x8xf32>, vector<8x128xf32>, vector<136x128xf32> -> vector<136x128xf32>
      %753 = arith.addf %748, %752 : vector<136x128xf32>
      %c59 = arith.constant 59 : index
      %c0_626 = arith.constant 0 : index
      %754 = vector.load %arg14[%c59, %c0_626] : memref<200x8xf32, #tpu.memory_space<vmem>>, vector<136x8xf32>
      %c23_627 = arith.constant 23 : index
      %c0_628 = arith.constant 0 : index
      %c0_629 = arith.constant 0 : index
      %755 = vector.load %arg4[%c23_627, %c0_628, %c0_629] : memref<25x8x128xf32, #tpu.memory_space<vmem>>, vector<1x8x128xf32>
      %756 = vector.shape_cast %755 : vector<1x8x128xf32> to vector<8x128xf32>
      %cst_630 = arith.constant dense<0.000000e+00> : vector<136x128xf32>
      %757 = tpu.matmul %754, %756, %cst_630 {dimension_numbers = #tpu.dot_dimension_numbers<[1], [0], [0], [1], [0, 0, 1, 1], [], []>} : vector<136x8xf32>, vector<8x128xf32>, vector<136x128xf32> -> vector<136x128xf32>
      %758 = arith.addf %753, %757 : vector<136x128xf32>
      %c60 = arith.constant 60 : index
      %c0_631 = arith.constant 0 : index
      %759 = vector.load %arg14[%c60, %c0_631] : memref<200x8xf32, #tpu.memory_space<vmem>>, vector<136x8xf32>
      %c24_632 = arith.constant 24 : index
      %c0_633 = arith.constant 0 : index
      %c0_634 = arith.constant 0 : index
      %760 = vector.load %arg4[%c24_632, %c0_633, %c0_634] : memref<25x8x128xf32, #tpu.memory_space<vmem>>, vector<1x8x128xf32>
      %761 = vector.shape_cast %760 : vector<1x8x128xf32> to vector<8x128xf32>
      %cst_635 = arith.constant dense<0.000000e+00> : vector<136x128xf32>
      %762 = tpu.matmul %759, %761, %cst_635 {dimension_numbers = #tpu.dot_dimension_numbers<[1], [0], [0], [1], [0, 0, 1, 1], [], []>} : vector<136x8xf32>, vector<8x128xf32>, vector<136x128xf32> -> vector<136x128xf32>
      %763 = arith.addf %758, %762 : vector<136x128xf32>
      %c0_636 = arith.constant 0 : index
      %c0_637 = arith.constant 0 : index
      %764 = vector.load %arg5[%c0_636, %c0_637] : memref<1x128xf32, #tpu.memory_space<vmem>>, vector<1x128xf32>
      %765 = vector.broadcast %764 : vector<1x128xf32> to vector<136x128xf32>
      %766 = arith.addf %763, %765 : vector<136x128xf32>
      %cst_638 = arith.constant 0.000000e+00 : f32
      %767 = vector.broadcast %cst_638 : f32 to vector<136x128xf32>
      %768 = arith.maximumf %766, %767 : vector<136x128xf32>
      %c0_639 = arith.constant 0 : index
      %c0_640 = arith.constant 0 : index
      %769 = vector.load %arg15[%c0_639, %c0_640] : memref<136x128xf32, #tpu.memory_space<vmem>>, vector<136x128xf32>
      tpu.vector_store %arg15[%c0_639, %c0_640], %768 {strides = array<i32>} : memref<136x128xf32, #tpu.memory_space<vmem>>, vector<136x128xf32>,
      %c0_641 = arith.constant 0 : index
      %c0_642 = arith.constant 0 : index
      %770 = tpu.strided_load %arg15[%c0_641, %c0_642] {strides = array<i32: 2, 1>} : memref<136x128xf32, #tpu.memory_space<vmem>>, vector<5x128xf32>
      %c1_643 = arith.constant 1 : index
      %c0_644 = arith.constant 0 : index
      %771 = tpu.strided_load %arg15[%c1_643, %c0_644] {strides = array<i32: 2, 1>} : memref<136x128xf32, #tpu.memory_space<vmem>>, vector<5x128xf32>
      %772 = arith.maximumf %770, %771 : vector<5x128xf32>
      %c14_645 = arith.constant 14 : index
      %c0_646 = arith.constant 0 : index
      %773 = tpu.strided_load %arg15[%c14_645, %c0_646] {strides = array<i32: 2, 1>} : memref<136x128xf32, #tpu.memory_space<vmem>>, vector<5x128xf32>
      %c15_647 = arith.constant 15 : index
      %c0_648 = arith.constant 0 : index
      %774 = tpu.strided_load %arg15[%c15_647, %c0_648] {strides = array<i32: 2, 1>} : memref<136x128xf32, #tpu.memory_space<vmem>>, vector<5x128xf32>
      %775 = arith.maximumf %773, %774 : vector<5x128xf32>
      %776 = arith.maximumf %772, %775 : vector<5x128xf32>
      %777 = vector.extract_strided_slice %776 {offsets = [0, 0], sizes = [5, 16], strides = [1, 1]} : vector<5x128xf32> to vector<5x16xf32>
      %c32_i32_649 = arith.constant 32 : i32
      %778 = arith.muli %146, %c32_i32_649 : i32
      %c0_i32_650 = arith.constant 0 : i32
      %779 = arith.addi %778, %c0_i32_650 : i32
      %780 = arith.index_cast %779 : i32 to index
      %c0_651 = arith.constant 0 : index
      %781 = vector.load %arg16[%780, %c0_651] : memref<256x16xf32, #tpu.memory_space<vmem>>, vector<5x16xf32>
      tpu.vector_store %arg16[%780, %c0_651], %777 {strides = array<i32>} : memref<256x16xf32, #tpu.memory_space<vmem>>, vector<5x16xf32>,
      %c28_652 = arith.constant 28 : index
      %c0_653 = arith.constant 0 : index
      %782 = tpu.strided_load %arg15[%c28_652, %c0_653] {strides = array<i32: 2, 1>} : memref<136x128xf32, #tpu.memory_space<vmem>>, vector<5x128xf32>
      %c29_654 = arith.constant 29 : index
      %c0_655 = arith.constant 0 : index
      %783 = tpu.strided_load %arg15[%c29_654, %c0_655] {strides = array<i32: 2, 1>} : memref<136x128xf32, #tpu.memory_space<vmem>>, vector<5x128xf32>
      %784 = arith.maximumf %782, %783 : vector<5x128xf32>
      %c42_656 = arith.constant 42 : index
      %c0_657 = arith.constant 0 : index
      %785 = tpu.strided_load %arg15[%c42_656, %c0_657] {strides = array<i32: 2, 1>} : memref<136x128xf32, #tpu.memory_space<vmem>>, vector<5x128xf32>
      %c43_658 = arith.constant 43 : index
      %c0_659 = arith.constant 0 : index
      %786 = tpu.strided_load %arg15[%c43_658, %c0_659] {strides = array<i32: 2, 1>} : memref<136x128xf32, #tpu.memory_space<vmem>>, vector<5x128xf32>
      %787 = arith.maximumf %785, %786 : vector<5x128xf32>
      %788 = arith.maximumf %784, %787 : vector<5x128xf32>
      %789 = vector.extract_strided_slice %788 {offsets = [0, 0], sizes = [5, 16], strides = [1, 1]} : vector<5x128xf32> to vector<5x16xf32>
      %c32_i32_660 = arith.constant 32 : i32
      %790 = arith.muli %146, %c32_i32_660 : i32
      %c5_i32 = arith.constant 5 : i32
      %791 = arith.addi %790, %c5_i32 : i32
      %792 = arith.index_cast %791 : i32 to index
      %c0_661 = arith.constant 0 : index
      %793 = vector.load %arg16[%792, %c0_661] : memref<256x16xf32, #tpu.memory_space<vmem>>, vector<5x16xf32>
      tpu.vector_store %arg16[%792, %c0_661], %789 {strides = array<i32>} : memref<256x16xf32, #tpu.memory_space<vmem>>, vector<5x16xf32>,
      %c56_662 = arith.constant 56 : index
      %c0_663 = arith.constant 0 : index
      %794 = tpu.strided_load %arg15[%c56_662, %c0_663] {strides = array<i32: 2, 1>} : memref<136x128xf32, #tpu.memory_space<vmem>>, vector<5x128xf32>
      %c57_664 = arith.constant 57 : index
      %c0_665 = arith.constant 0 : index
      %795 = tpu.strided_load %arg15[%c57_664, %c0_665] {strides = array<i32: 2, 1>} : memref<136x128xf32, #tpu.memory_space<vmem>>, vector<5x128xf32>
      %796 = arith.maximumf %794, %795 : vector<5x128xf32>
      %c70_666 = arith.constant 70 : index
      %c0_667 = arith.constant 0 : index
      %797 = tpu.strided_load %arg15[%c70_666, %c0_667] {strides = array<i32: 2, 1>} : memref<136x128xf32, #tpu.memory_space<vmem>>, vector<5x128xf32>
      %c71 = arith.constant 71 : index
      %c0_668 = arith.constant 0 : index
      %798 = tpu.strided_load %arg15[%c71, %c0_668] {strides = array<i32: 2, 1>} : memref<136x128xf32, #tpu.memory_space<vmem>>, vector<5x128xf32>
      %799 = arith.maximumf %797, %798 : vector<5x128xf32>
      %800 = arith.maximumf %796, %799 : vector<5x128xf32>
      %801 = vector.extract_strided_slice %800 {offsets = [0, 0], sizes = [5, 16], strides = [1, 1]} : vector<5x128xf32> to vector<5x16xf32>
      %c32_i32_669 = arith.constant 32 : i32
      %802 = arith.muli %146, %c32_i32_669 : i32
      %c10_i32 = arith.constant 10 : i32
      %803 = arith.addi %802, %c10_i32 : i32
      %804 = arith.index_cast %803 : i32 to index
      %c0_670 = arith.constant 0 : index
      %805 = vector.load %arg16[%804, %c0_670] : memref<256x16xf32, #tpu.memory_space<vmem>>, vector<5x16xf32>
      tpu.vector_store %arg16[%804, %c0_670], %801 {strides = array<i32>} : memref<256x16xf32, #tpu.memory_space<vmem>>, vector<5x16xf32>,
      %c84_671 = arith.constant 84 : index
      %c0_672 = arith.constant 0 : index
      %806 = tpu.strided_load %arg15[%c84_671, %c0_672] {strides = array<i32: 2, 1>} : memref<136x128xf32, #tpu.memory_space<vmem>>, vector<5x128xf32>
      %c85 = arith.constant 85 : index
      %c0_673 = arith.constant 0 : index
      %807 = tpu.strided_load %arg15[%c85, %c0_673] {strides = array<i32: 2, 1>} : memref<136x128xf32, #tpu.memory_space<vmem>>, vector<5x128xf32>
      %808 = arith.maximumf %806, %807 : vector<5x128xf32>
      %c98_674 = arith.constant 98 : index
      %c0_675 = arith.constant 0 : index
      %809 = tpu.strided_load %arg15[%c98_674, %c0_675] {strides = array<i32: 2, 1>} : memref<136x128xf32, #tpu.memory_space<vmem>>, vector<5x128xf32>
      %c99 = arith.constant 99 : index
      %c0_676 = arith.constant 0 : index
      %810 = tpu.strided_load %arg15[%c99, %c0_676] {strides = array<i32: 2, 1>} : memref<136x128xf32, #tpu.memory_space<vmem>>, vector<5x128xf32>
      %811 = arith.maximumf %809, %810 : vector<5x128xf32>
      %812 = arith.maximumf %808, %811 : vector<5x128xf32>
      %813 = vector.extract_strided_slice %812 {offsets = [0, 0], sizes = [5, 16], strides = [1, 1]} : vector<5x128xf32> to vector<5x16xf32>
      %c32_i32_677 = arith.constant 32 : i32
      %814 = arith.muli %146, %c32_i32_677 : i32
      %c15_i32 = arith.constant 15 : i32
      %815 = arith.addi %814, %c15_i32 : i32
      %816 = arith.index_cast %815 : i32 to index
      %c0_678 = arith.constant 0 : index
      %817 = vector.load %arg16[%816, %c0_678] : memref<256x16xf32, #tpu.memory_space<vmem>>, vector<5x16xf32>
      tpu.vector_store %arg16[%816, %c0_678], %813 {strides = array<i32>} : memref<256x16xf32, #tpu.memory_space<vmem>>, vector<5x16xf32>,
      %c112_679 = arith.constant 112 : index
      %c0_680 = arith.constant 0 : index
      %818 = tpu.strided_load %arg15[%c112_679, %c0_680] {strides = array<i32: 2, 1>} : memref<136x128xf32, #tpu.memory_space<vmem>>, vector<5x128xf32>
      %c113 = arith.constant 113 : index
      %c0_681 = arith.constant 0 : index
      %819 = tpu.strided_load %arg15[%c113, %c0_681] {strides = array<i32: 2, 1>} : memref<136x128xf32, #tpu.memory_space<vmem>>, vector<5x128xf32>
      %820 = arith.maximumf %818, %819 : vector<5x128xf32>
      %c126_682 = arith.constant 126 : index
      %c0_683 = arith.constant 0 : index
      %821 = tpu.strided_load %arg15[%c126_682, %c0_683] {strides = array<i32: 2, 1>} : memref<136x128xf32, #tpu.memory_space<vmem>>, vector<5x128xf32>
      %c127 = arith.constant 127 : index
      %c0_684 = arith.constant 0 : index
      %822 = tpu.strided_load %arg15[%c127, %c0_684] {strides = array<i32: 2, 1>} : memref<136x128xf32, #tpu.memory_space<vmem>>, vector<5x128xf32>
      %823 = arith.maximumf %821, %822 : vector<5x128xf32>
      %824 = arith.maximumf %820, %823 : vector<5x128xf32>
      %825 = vector.extract_strided_slice %824 {offsets = [0, 0], sizes = [5, 16], strides = [1, 1]} : vector<5x128xf32> to vector<5x16xf32>
      %c32_i32_685 = arith.constant 32 : i32
      %826 = arith.muli %146, %c32_i32_685 : i32
      %c20_i32 = arith.constant 20 : i32
      %827 = arith.addi %826, %c20_i32 : i32
      %828 = arith.index_cast %827 : i32 to index
      %c0_686 = arith.constant 0 : index
      %829 = vector.load %arg16[%828, %c0_686] : memref<256x16xf32, #tpu.memory_space<vmem>>, vector<5x16xf32>
      tpu.vector_store %arg16[%828, %c0_686], %825 {strides = array<i32>} : memref<256x16xf32, #tpu.memory_space<vmem>>, vector<5x16xf32>,
    }
    %c8_i32_0 = arith.constant 8 : i32
    %cst = arith.constant 0.000000e+00 : f32
    %1 = vector.broadcast %cst : f32 to vector<8x128xf32>
    %c0 = arith.constant 0 : index
    %c0_1 = arith.constant 0 : index
    %2 = tpu.strided_load %arg16[%c0, %c0_1] {strides = array<i32: 32, 1>} : memref<256x16xf32, #tpu.memory_space<vmem>>, vector<8x16xf32>
    %c0_2 = arith.constant 0 : index
    %c0_3 = arith.constant 0 : index
    %c0_4 = arith.constant 0 : index
    %3 = vector.load %arg6[%c0_2, %c0_3, %c0_4] : memref<25x16x128xf32, #tpu.memory_space<vmem>>, vector<1x16x128xf32>
    %4 = vector.shape_cast %3 : vector<1x16x128xf32> to vector<16x128xf32>
    %cst_5 = arith.constant dense<0.000000e+00> : vector<8x128xf32>
    %5 = tpu.matmul %2, %4, %cst_5 {dimension_numbers = #tpu.dot_dimension_numbers<[1], [0], [0], [1], [0, 0, 1, 1], [], []>} : vector<8x16xf32>, vector<16x128xf32>, vector<8x128xf32> -> vector<8x128xf32>
    %6 = arith.addf %1, %5 : vector<8x128xf32>
    %c1 = arith.constant 1 : index
    %c0_6 = arith.constant 0 : index
    %7 = tpu.strided_load %arg16[%c1, %c0_6] {strides = array<i32: 32, 1>} : memref<256x16xf32, #tpu.memory_space<vmem>>, vector<8x16xf32>
    %c1_7 = arith.constant 1 : index
    %c0_8 = arith.constant 0 : index
    %c0_9 = arith.constant 0 : index
    %8 = vector.load %arg6[%c1_7, %c0_8, %c0_9] : memref<25x16x128xf32, #tpu.memory_space<vmem>>, vector<1x16x128xf32>
    %9 = vector.shape_cast %8 : vector<1x16x128xf32> to vector<16x128xf32>
    %cst_10 = arith.constant dense<0.000000e+00> : vector<8x128xf32>
    %10 = tpu.matmul %7, %9, %cst_10 {dimension_numbers = #tpu.dot_dimension_numbers<[1], [0], [0], [1], [0, 0, 1, 1], [], []>} : vector<8x16xf32>, vector<16x128xf32>, vector<8x128xf32> -> vector<8x128xf32>
    %11 = arith.addf %6, %10 : vector<8x128xf32>
    %c2 = arith.constant 2 : index
    %c0_11 = arith.constant 0 : index
    %12 = tpu.strided_load %arg16[%c2, %c0_11] {strides = array<i32: 32, 1>} : memref<256x16xf32, #tpu.memory_space<vmem>>, vector<8x16xf32>
    %c2_12 = arith.constant 2 : index
    %c0_13 = arith.constant 0 : index
    %c0_14 = arith.constant 0 : index
    %13 = vector.load %arg6[%c2_12, %c0_13, %c0_14] : memref<25x16x128xf32, #tpu.memory_space<vmem>>, vector<1x16x128xf32>
    %14 = vector.shape_cast %13 : vector<1x16x128xf32> to vector<16x128xf32>
    %cst_15 = arith.constant dense<0.000000e+00> : vector<8x128xf32>
    %15 = tpu.matmul %12, %14, %cst_15 {dimension_numbers = #tpu.dot_dimension_numbers<[1], [0], [0], [1], [0, 0, 1, 1], [], []>} : vector<8x16xf32>, vector<16x128xf32>, vector<8x128xf32> -> vector<8x128xf32>
    %16 = arith.addf %11, %15 : vector<8x128xf32>
    %c3 = arith.constant 3 : index
    %c0_16 = arith.constant 0 : index
    %17 = tpu.strided_load %arg16[%c3, %c0_16] {strides = array<i32: 32, 1>} : memref<256x16xf32, #tpu.memory_space<vmem>>, vector<8x16xf32>
    %c3_17 = arith.constant 3 : index
    %c0_18 = arith.constant 0 : index
    %c0_19 = arith.constant 0 : index
    %18 = vector.load %arg6[%c3_17, %c0_18, %c0_19] : memref<25x16x128xf32, #tpu.memory_space<vmem>>, vector<1x16x128xf32>
    %19 = vector.shape_cast %18 : vector<1x16x128xf32> to vector<16x128xf32>
    %cst_20 = arith.constant dense<0.000000e+00> : vector<8x128xf32>
    %20 = tpu.matmul %17, %19, %cst_20 {dimension_numbers = #tpu.dot_dimension_numbers<[1], [0], [0], [1], [0, 0, 1, 1], [], []>} : vector<8x16xf32>, vector<16x128xf32>, vector<8x128xf32> -> vector<8x128xf32>
    %21 = arith.addf %16, %20 : vector<8x128xf32>
    %c4 = arith.constant 4 : index
    %c0_21 = arith.constant 0 : index
    %22 = tpu.strided_load %arg16[%c4, %c0_21] {strides = array<i32: 32, 1>} : memref<256x16xf32, #tpu.memory_space<vmem>>, vector<8x16xf32>
    %c4_22 = arith.constant 4 : index
    %c0_23 = arith.constant 0 : index
    %c0_24 = arith.constant 0 : index
    %23 = vector.load %arg6[%c4_22, %c0_23, %c0_24] : memref<25x16x128xf32, #tpu.memory_space<vmem>>, vector<1x16x128xf32>
    %24 = vector.shape_cast %23 : vector<1x16x128xf32> to vector<16x128xf32>
    %cst_25 = arith.constant dense<0.000000e+00> : vector<8x128xf32>
    %25 = tpu.matmul %22, %24, %cst_25 {dimension_numbers = #tpu.dot_dimension_numbers<[1], [0], [0], [1], [0, 0, 1, 1], [], []>} : vector<8x16xf32>, vector<16x128xf32>, vector<8x128xf32> -> vector<8x128xf32>
    %26 = arith.addf %21, %25 : vector<8x128xf32>
    %c5 = arith.constant 5 : index
    %c0_26 = arith.constant 0 : index
    %27 = tpu.strided_load %arg16[%c5, %c0_26] {strides = array<i32: 32, 1>} : memref<256x16xf32, #tpu.memory_space<vmem>>, vector<8x16xf32>
    %c5_27 = arith.constant 5 : index
    %c0_28 = arith.constant 0 : index
    %c0_29 = arith.constant 0 : index
    %28 = vector.load %arg6[%c5_27, %c0_28, %c0_29] : memref<25x16x128xf32, #tpu.memory_space<vmem>>, vector<1x16x128xf32>
    %29 = vector.shape_cast %28 : vector<1x16x128xf32> to vector<16x128xf32>
    %cst_30 = arith.constant dense<0.000000e+00> : vector<8x128xf32>
    %30 = tpu.matmul %27, %29, %cst_30 {dimension_numbers = #tpu.dot_dimension_numbers<[1], [0], [0], [1], [0, 0, 1, 1], [], []>} : vector<8x16xf32>, vector<16x128xf32>, vector<8x128xf32> -> vector<8x128xf32>
    %31 = arith.addf %26, %30 : vector<8x128xf32>
    %c6 = arith.constant 6 : index
    %c0_31 = arith.constant 0 : index
    %32 = tpu.strided_load %arg16[%c6, %c0_31] {strides = array<i32: 32, 1>} : memref<256x16xf32, #tpu.memory_space<vmem>>, vector<8x16xf32>
    %c6_32 = arith.constant 6 : index
    %c0_33 = arith.constant 0 : index
    %c0_34 = arith.constant 0 : index
    %33 = vector.load %arg6[%c6_32, %c0_33, %c0_34] : memref<25x16x128xf32, #tpu.memory_space<vmem>>, vector<1x16x128xf32>
    %34 = vector.shape_cast %33 : vector<1x16x128xf32> to vector<16x128xf32>
    %cst_35 = arith.constant dense<0.000000e+00> : vector<8x128xf32>
    %35 = tpu.matmul %32, %34, %cst_35 {dimension_numbers = #tpu.dot_dimension_numbers<[1], [0], [0], [1], [0, 0, 1, 1], [], []>} : vector<8x16xf32>, vector<16x128xf32>, vector<8x128xf32> -> vector<8x128xf32>
    %36 = arith.addf %31, %35 : vector<8x128xf32>
    %c7 = arith.constant 7 : index
    %c0_36 = arith.constant 0 : index
    %37 = tpu.strided_load %arg16[%c7, %c0_36] {strides = array<i32: 32, 1>} : memref<256x16xf32, #tpu.memory_space<vmem>>, vector<8x16xf32>
    %c7_37 = arith.constant 7 : index
    %c0_38 = arith.constant 0 : index
    %c0_39 = arith.constant 0 : index
    %38 = vector.load %arg6[%c7_37, %c0_38, %c0_39] : memref<25x16x128xf32, #tpu.memory_space<vmem>>, vector<1x16x128xf32>
    %39 = vector.shape_cast %38 : vector<1x16x128xf32> to vector<16x128xf32>
    %cst_40 = arith.constant dense<0.000000e+00> : vector<8x128xf32>
    %40 = tpu.matmul %37, %39, %cst_40 {dimension_numbers = #tpu.dot_dimension_numbers<[1], [0], [0], [1], [0, 0, 1, 1], [], []>} : vector<8x16xf32>, vector<16x128xf32>, vector<8x128xf32> -> vector<8x128xf32>
    %41 = arith.addf %36, %40 : vector<8x128xf32>
    %c8 = arith.constant 8 : index
    %c0_41 = arith.constant 0 : index
    %42 = tpu.strided_load %arg16[%c8, %c0_41] {strides = array<i32: 32, 1>} : memref<256x16xf32, #tpu.memory_space<vmem>>, vector<8x16xf32>
    %c8_42 = arith.constant 8 : index
    %c0_43 = arith.constant 0 : index
    %c0_44 = arith.constant 0 : index
    %43 = vector.load %arg6[%c8_42, %c0_43, %c0_44] : memref<25x16x128xf32, #tpu.memory_space<vmem>>, vector<1x16x128xf32>
    %44 = vector.shape_cast %43 : vector<1x16x128xf32> to vector<16x128xf32>
    %cst_45 = arith.constant dense<0.000000e+00> : vector<8x128xf32>
    %45 = tpu.matmul %42, %44, %cst_45 {dimension_numbers = #tpu.dot_dimension_numbers<[1], [0], [0], [1], [0, 0, 1, 1], [], []>} : vector<8x16xf32>, vector<16x128xf32>, vector<8x128xf32> -> vector<8x128xf32>
    %46 = arith.addf %41, %45 : vector<8x128xf32>
    %c9 = arith.constant 9 : index
    %c0_46 = arith.constant 0 : index
    %47 = tpu.strided_load %arg16[%c9, %c0_46] {strides = array<i32: 32, 1>} : memref<256x16xf32, #tpu.memory_space<vmem>>, vector<8x16xf32>
    %c9_47 = arith.constant 9 : index
    %c0_48 = arith.constant 0 : index
    %c0_49 = arith.constant 0 : index
    %48 = vector.load %arg6[%c9_47, %c0_48, %c0_49] : memref<25x16x128xf32, #tpu.memory_space<vmem>>, vector<1x16x128xf32>
    %49 = vector.shape_cast %48 : vector<1x16x128xf32> to vector<16x128xf32>
    %cst_50 = arith.constant dense<0.000000e+00> : vector<8x128xf32>
    %50 = tpu.matmul %47, %49, %cst_50 {dimension_numbers = #tpu.dot_dimension_numbers<[1], [0], [0], [1], [0, 0, 1, 1], [], []>} : vector<8x16xf32>, vector<16x128xf32>, vector<8x128xf32> -> vector<8x128xf32>
    %51 = arith.addf %46, %50 : vector<8x128xf32>
    %c10 = arith.constant 10 : index
    %c0_51 = arith.constant 0 : index
    %52 = tpu.strided_load %arg16[%c10, %c0_51] {strides = array<i32: 32, 1>} : memref<256x16xf32, #tpu.memory_space<vmem>>, vector<8x16xf32>
    %c10_52 = arith.constant 10 : index
    %c0_53 = arith.constant 0 : index
    %c0_54 = arith.constant 0 : index
    %53 = vector.load %arg6[%c10_52, %c0_53, %c0_54] : memref<25x16x128xf32, #tpu.memory_space<vmem>>, vector<1x16x128xf32>
    %54 = vector.shape_cast %53 : vector<1x16x128xf32> to vector<16x128xf32>
    %cst_55 = arith.constant dense<0.000000e+00> : vector<8x128xf32>
    %55 = tpu.matmul %52, %54, %cst_55 {dimension_numbers = #tpu.dot_dimension_numbers<[1], [0], [0], [1], [0, 0, 1, 1], [], []>} : vector<8x16xf32>, vector<16x128xf32>, vector<8x128xf32> -> vector<8x128xf32>
    %56 = arith.addf %51, %55 : vector<8x128xf32>
    %c11 = arith.constant 11 : index
    %c0_56 = arith.constant 0 : index
    %57 = tpu.strided_load %arg16[%c11, %c0_56] {strides = array<i32: 32, 1>} : memref<256x16xf32, #tpu.memory_space<vmem>>, vector<8x16xf32>
    %c11_57 = arith.constant 11 : index
    %c0_58 = arith.constant 0 : index
    %c0_59 = arith.constant 0 : index
    %58 = vector.load %arg6[%c11_57, %c0_58, %c0_59] : memref<25x16x128xf32, #tpu.memory_space<vmem>>, vector<1x16x128xf32>
    %59 = vector.shape_cast %58 : vector<1x16x128xf32> to vector<16x128xf32>
    %cst_60 = arith.constant dense<0.000000e+00> : vector<8x128xf32>
    %60 = tpu.matmul %57, %59, %cst_60 {dimension_numbers = #tpu.dot_dimension_numbers<[1], [0], [0], [1], [0, 0, 1, 1], [], []>} : vector<8x16xf32>, vector<16x128xf32>, vector<8x128xf32> -> vector<8x128xf32>
    %61 = arith.addf %56, %60 : vector<8x128xf32>
    %c12 = arith.constant 12 : index
    %c0_61 = arith.constant 0 : index
    %62 = tpu.strided_load %arg16[%c12, %c0_61] {strides = array<i32: 32, 1>} : memref<256x16xf32, #tpu.memory_space<vmem>>, vector<8x16xf32>
    %c12_62 = arith.constant 12 : index
    %c0_63 = arith.constant 0 : index
    %c0_64 = arith.constant 0 : index
    %63 = vector.load %arg6[%c12_62, %c0_63, %c0_64] : memref<25x16x128xf32, #tpu.memory_space<vmem>>, vector<1x16x128xf32>
    %64 = vector.shape_cast %63 : vector<1x16x128xf32> to vector<16x128xf32>
    %cst_65 = arith.constant dense<0.000000e+00> : vector<8x128xf32>
    %65 = tpu.matmul %62, %64, %cst_65 {dimension_numbers = #tpu.dot_dimension_numbers<[1], [0], [0], [1], [0, 0, 1, 1], [], []>} : vector<8x16xf32>, vector<16x128xf32>, vector<8x128xf32> -> vector<8x128xf32>
    %66 = arith.addf %61, %65 : vector<8x128xf32>
    %c13 = arith.constant 13 : index
    %c0_66 = arith.constant 0 : index
    %67 = tpu.strided_load %arg16[%c13, %c0_66] {strides = array<i32: 32, 1>} : memref<256x16xf32, #tpu.memory_space<vmem>>, vector<8x16xf32>
    %c13_67 = arith.constant 13 : index
    %c0_68 = arith.constant 0 : index
    %c0_69 = arith.constant 0 : index
    %68 = vector.load %arg6[%c13_67, %c0_68, %c0_69] : memref<25x16x128xf32, #tpu.memory_space<vmem>>, vector<1x16x128xf32>
    %69 = vector.shape_cast %68 : vector<1x16x128xf32> to vector<16x128xf32>
    %cst_70 = arith.constant dense<0.000000e+00> : vector<8x128xf32>
    %70 = tpu.matmul %67, %69, %cst_70 {dimension_numbers = #tpu.dot_dimension_numbers<[1], [0], [0], [1], [0, 0, 1, 1], [], []>} : vector<8x16xf32>, vector<16x128xf32>, vector<8x128xf32> -> vector<8x128xf32>
    %71 = arith.addf %66, %70 : vector<8x128xf32>
    %c14 = arith.constant 14 : index
    %c0_71 = arith.constant 0 : index
    %72 = tpu.strided_load %arg16[%c14, %c0_71] {strides = array<i32: 32, 1>} : memref<256x16xf32, #tpu.memory_space<vmem>>, vector<8x16xf32>
    %c14_72 = arith.constant 14 : index
    %c0_73 = arith.constant 0 : index
    %c0_74 = arith.constant 0 : index
    %73 = vector.load %arg6[%c14_72, %c0_73, %c0_74] : memref<25x16x128xf32, #tpu.memory_space<vmem>>, vector<1x16x128xf32>
    %74 = vector.shape_cast %73 : vector<1x16x128xf32> to vector<16x128xf32>
    %cst_75 = arith.constant dense<0.000000e+00> : vector<8x128xf32>
    %75 = tpu.matmul %72, %74, %cst_75 {dimension_numbers = #tpu.dot_dimension_numbers<[1], [0], [0], [1], [0, 0, 1, 1], [], []>} : vector<8x16xf32>, vector<16x128xf32>, vector<8x128xf32> -> vector<8x128xf32>
    %76 = arith.addf %71, %75 : vector<8x128xf32>
    %c15 = arith.constant 15 : index
    %c0_76 = arith.constant 0 : index
    %77 = tpu.strided_load %arg16[%c15, %c0_76] {strides = array<i32: 32, 1>} : memref<256x16xf32, #tpu.memory_space<vmem>>, vector<8x16xf32>
    %c15_77 = arith.constant 15 : index
    %c0_78 = arith.constant 0 : index
    %c0_79 = arith.constant 0 : index
    %78 = vector.load %arg6[%c15_77, %c0_78, %c0_79] : memref<25x16x128xf32, #tpu.memory_space<vmem>>, vector<1x16x128xf32>
    %79 = vector.shape_cast %78 : vector<1x16x128xf32> to vector<16x128xf32>
    %cst_80 = arith.constant dense<0.000000e+00> : vector<8x128xf32>
    %80 = tpu.matmul %77, %79, %cst_80 {dimension_numbers = #tpu.dot_dimension_numbers<[1], [0], [0], [1], [0, 0, 1, 1], [], []>} : vector<8x16xf32>, vector<16x128xf32>, vector<8x128xf32> -> vector<8x128xf32>
    %81 = arith.addf %76, %80 : vector<8x128xf32>
    %c16 = arith.constant 16 : index
    %c0_81 = arith.constant 0 : index
    %82 = tpu.strided_load %arg16[%c16, %c0_81] {strides = array<i32: 32, 1>} : memref<256x16xf32, #tpu.memory_space<vmem>>, vector<8x16xf32>
    %c16_82 = arith.constant 16 : index
    %c0_83 = arith.constant 0 : index
    %c0_84 = arith.constant 0 : index
    %83 = vector.load %arg6[%c16_82, %c0_83, %c0_84] : memref<25x16x128xf32, #tpu.memory_space<vmem>>, vector<1x16x128xf32>
    %84 = vector.shape_cast %83 : vector<1x16x128xf32> to vector<16x128xf32>
    %cst_85 = arith.constant dense<0.000000e+00> : vector<8x128xf32>
    %85 = tpu.matmul %82, %84, %cst_85 {dimension_numbers = #tpu.dot_dimension_numbers<[1], [0], [0], [1], [0, 0, 1, 1], [], []>} : vector<8x16xf32>, vector<16x128xf32>, vector<8x128xf32> -> vector<8x128xf32>
    %86 = arith.addf %81, %85 : vector<8x128xf32>
    %c17 = arith.constant 17 : index
    %c0_86 = arith.constant 0 : index
    %87 = tpu.strided_load %arg16[%c17, %c0_86] {strides = array<i32: 32, 1>} : memref<256x16xf32, #tpu.memory_space<vmem>>, vector<8x16xf32>
    %c17_87 = arith.constant 17 : index
    %c0_88 = arith.constant 0 : index
    %c0_89 = arith.constant 0 : index
    %88 = vector.load %arg6[%c17_87, %c0_88, %c0_89] : memref<25x16x128xf32, #tpu.memory_space<vmem>>, vector<1x16x128xf32>
    %89 = vector.shape_cast %88 : vector<1x16x128xf32> to vector<16x128xf32>
    %cst_90 = arith.constant dense<0.000000e+00> : vector<8x128xf32>
    %90 = tpu.matmul %87, %89, %cst_90 {dimension_numbers = #tpu.dot_dimension_numbers<[1], [0], [0], [1], [0, 0, 1, 1], [], []>} : vector<8x16xf32>, vector<16x128xf32>, vector<8x128xf32> -> vector<8x128xf32>
    %91 = arith.addf %86, %90 : vector<8x128xf32>
    %c18 = arith.constant 18 : index
    %c0_91 = arith.constant 0 : index
    %92 = tpu.strided_load %arg16[%c18, %c0_91] {strides = array<i32: 32, 1>} : memref<256x16xf32, #tpu.memory_space<vmem>>, vector<8x16xf32>
    %c18_92 = arith.constant 18 : index
    %c0_93 = arith.constant 0 : index
    %c0_94 = arith.constant 0 : index
    %93 = vector.load %arg6[%c18_92, %c0_93, %c0_94] : memref<25x16x128xf32, #tpu.memory_space<vmem>>, vector<1x16x128xf32>
    %94 = vector.shape_cast %93 : vector<1x16x128xf32> to vector<16x128xf32>
    %cst_95 = arith.constant dense<0.000000e+00> : vector<8x128xf32>
    %95 = tpu.matmul %92, %94, %cst_95 {dimension_numbers = #tpu.dot_dimension_numbers<[1], [0], [0], [1], [0, 0, 1, 1], [], []>} : vector<8x16xf32>, vector<16x128xf32>, vector<8x128xf32> -> vector<8x128xf32>
    %96 = arith.addf %91, %95 : vector<8x128xf32>
    %c19 = arith.constant 19 : index
    %c0_96 = arith.constant 0 : index
    %97 = tpu.strided_load %arg16[%c19, %c0_96] {strides = array<i32: 32, 1>} : memref<256x16xf32, #tpu.memory_space<vmem>>, vector<8x16xf32>
    %c19_97 = arith.constant 19 : index
    %c0_98 = arith.constant 0 : index
    %c0_99 = arith.constant 0 : index
    %98 = vector.load %arg6[%c19_97, %c0_98, %c0_99] : memref<25x16x128xf32, #tpu.memory_space<vmem>>, vector<1x16x128xf32>
    %99 = vector.shape_cast %98 : vector<1x16x128xf32> to vector<16x128xf32>
    %cst_100 = arith.constant dense<0.000000e+00> : vector<8x128xf32>
    %100 = tpu.matmul %97, %99, %cst_100 {dimension_numbers = #tpu.dot_dimension_numbers<[1], [0], [0], [1], [0, 0, 1, 1], [], []>} : vector<8x16xf32>, vector<16x128xf32>, vector<8x128xf32> -> vector<8x128xf32>
    %101 = arith.addf %96, %100 : vector<8x128xf32>
    %c20 = arith.constant 20 : index
    %c0_101 = arith.constant 0 : index
    %102 = tpu.strided_load %arg16[%c20, %c0_101] {strides = array<i32: 32, 1>} : memref<256x16xf32, #tpu.memory_space<vmem>>, vector<8x16xf32>
    %c20_102 = arith.constant 20 : index
    %c0_103 = arith.constant 0 : index
    %c0_104 = arith.constant 0 : index
    %103 = vector.load %arg6[%c20_102, %c0_103, %c0_104] : memref<25x16x128xf32, #tpu.memory_space<vmem>>, vector<1x16x128xf32>
    %104 = vector.shape_cast %103 : vector<1x16x128xf32> to vector<16x128xf32>
    %cst_105 = arith.constant dense<0.000000e+00> : vector<8x128xf32>
    %105 = tpu.matmul %102, %104, %cst_105 {dimension_numbers = #tpu.dot_dimension_numbers<[1], [0], [0], [1], [0, 0, 1, 1], [], []>} : vector<8x16xf32>, vector<16x128xf32>, vector<8x128xf32> -> vector<8x128xf32>
    %106 = arith.addf %101, %105 : vector<8x128xf32>
    %c21 = arith.constant 21 : index
    %c0_106 = arith.constant 0 : index
    %107 = tpu.strided_load %arg16[%c21, %c0_106] {strides = array<i32: 32, 1>} : memref<256x16xf32, #tpu.memory_space<vmem>>, vector<8x16xf32>
    %c21_107 = arith.constant 21 : index
    %c0_108 = arith.constant 0 : index
    %c0_109 = arith.constant 0 : index
    %108 = vector.load %arg6[%c21_107, %c0_108, %c0_109] : memref<25x16x128xf32, #tpu.memory_space<vmem>>, vector<1x16x128xf32>
    %109 = vector.shape_cast %108 : vector<1x16x128xf32> to vector<16x128xf32>
    %cst_110 = arith.constant dense<0.000000e+00> : vector<8x128xf32>
    %110 = tpu.matmul %107, %109, %cst_110 {dimension_numbers = #tpu.dot_dimension_numbers<[1], [0], [0], [1], [0, 0, 1, 1], [], []>} : vector<8x16xf32>, vector<16x128xf32>, vector<8x128xf32> -> vector<8x128xf32>
    %111 = arith.addf %106, %110 : vector<8x128xf32>
    %c22 = arith.constant 22 : index
    %c0_111 = arith.constant 0 : index
    %112 = tpu.strided_load %arg16[%c22, %c0_111] {strides = array<i32: 32, 1>} : memref<256x16xf32, #tpu.memory_space<vmem>>, vector<8x16xf32>
    %c22_112 = arith.constant 22 : index
    %c0_113 = arith.constant 0 : index
    %c0_114 = arith.constant 0 : index
    %113 = vector.load %arg6[%c22_112, %c0_113, %c0_114] : memref<25x16x128xf32, #tpu.memory_space<vmem>>, vector<1x16x128xf32>
    %114 = vector.shape_cast %113 : vector<1x16x128xf32> to vector<16x128xf32>
    %cst_115 = arith.constant dense<0.000000e+00> : vector<8x128xf32>
    %115 = tpu.matmul %112, %114, %cst_115 {dimension_numbers = #tpu.dot_dimension_numbers<[1], [0], [0], [1], [0, 0, 1, 1], [], []>} : vector<8x16xf32>, vector<16x128xf32>, vector<8x128xf32> -> vector<8x128xf32>
    %116 = arith.addf %111, %115 : vector<8x128xf32>
    %c23 = arith.constant 23 : index
    %c0_116 = arith.constant 0 : index
    %117 = tpu.strided_load %arg16[%c23, %c0_116] {strides = array<i32: 32, 1>} : memref<256x16xf32, #tpu.memory_space<vmem>>, vector<8x16xf32>
    %c23_117 = arith.constant 23 : index
    %c0_118 = arith.constant 0 : index
    %c0_119 = arith.constant 0 : index
    %118 = vector.load %arg6[%c23_117, %c0_118, %c0_119] : memref<25x16x128xf32, #tpu.memory_space<vmem>>, vector<1x16x128xf32>
    %119 = vector.shape_cast %118 : vector<1x16x128xf32> to vector<16x128xf32>
    %cst_120 = arith.constant dense<0.000000e+00> : vector<8x128xf32>
    %120 = tpu.matmul %117, %119, %cst_120 {dimension_numbers = #tpu.dot_dimension_numbers<[1], [0], [0], [1], [0, 0, 1, 1], [], []>} : vector<8x16xf32>, vector<16x128xf32>, vector<8x128xf32> -> vector<8x128xf32>
    %121 = arith.addf %116, %120 : vector<8x128xf32>
    %c24 = arith.constant 24 : index
    %c0_121 = arith.constant 0 : index
    %122 = tpu.strided_load %arg16[%c24, %c0_121] {strides = array<i32: 32, 1>} : memref<256x16xf32, #tpu.memory_space<vmem>>, vector<8x16xf32>
    %c24_122 = arith.constant 24 : index
    %c0_123 = arith.constant 0 : index
    %c0_124 = arith.constant 0 : index
    %123 = vector.load %arg6[%c24_122, %c0_123, %c0_124] : memref<25x16x128xf32, #tpu.memory_space<vmem>>, vector<1x16x128xf32>
    %124 = vector.shape_cast %123 : vector<1x16x128xf32> to vector<16x128xf32>
    %cst_125 = arith.constant dense<0.000000e+00> : vector<8x128xf32>
    %125 = tpu.matmul %122, %124, %cst_125 {dimension_numbers = #tpu.dot_dimension_numbers<[1], [0], [0], [1], [0, 0, 1, 1], [], []>} : vector<8x16xf32>, vector<16x128xf32>, vector<8x128xf32> -> vector<8x128xf32>
    %126 = arith.addf %121, %125 : vector<8x128xf32>
    %c0_126 = arith.constant 0 : index
    %c0_127 = arith.constant 0 : index
    %127 = vector.load %arg7[%c0_126, %c0_127] : memref<1x128xf32, #tpu.memory_space<vmem>>, vector<1x128xf32>
    %128 = vector.broadcast %127 : vector<1x128xf32> to vector<8x128xf32>
    %129 = arith.addf %126, %128 : vector<8x128xf32>
    %cst_128 = arith.constant 0.000000e+00 : f32
    %130 = vector.broadcast %cst_128 : f32 to vector<8x128xf32>
    %131 = arith.maximumf %129, %130 : vector<8x128xf32>
    %c0_129 = arith.constant 0 : index
    %c0_130 = arith.constant 0 : index
    %132 = vector.load %arg8[%c0_129, %c0_130] : memref<128x128xf32, #tpu.memory_space<vmem>>, vector<128x128xf32>
    %cst_131 = arith.constant dense<0.000000e+00> : vector<8x128xf32>
    %133 = tpu.matmul %131, %132, %cst_131 {dimension_numbers = #tpu.dot_dimension_numbers<[1], [0], [0], [1], [0, 0, 1, 1], [], []>} : vector<8x128xf32>, vector<128x128xf32>, vector<8x128xf32> -> vector<8x128xf32>
    %c0_132 = arith.constant 0 : index
    %c0_133 = arith.constant 0 : index
    %134 = vector.load %arg9[%c0_132, %c0_133] : memref<1x128xf32, #tpu.memory_space<vmem>>, vector<1x128xf32>
    %135 = vector.broadcast %134 : vector<1x128xf32> to vector<8x128xf32>
    %136 = arith.addf %133, %135 : vector<8x128xf32>
    %cst_134 = arith.constant 0.000000e+00 : f32
    %137 = vector.broadcast %cst_134 : f32 to vector<8x128xf32>
    %138 = arith.maximumf %136, %137 : vector<8x128xf32>
    %c0_135 = arith.constant 0 : index
    %c0_136 = arith.constant 0 : index
    %139 = vector.load %arg10[%c0_135, %c0_136] : memref<128x128xf32, #tpu.memory_space<vmem>>, vector<128x128xf32>
    %cst_137 = arith.constant dense<0.000000e+00> : vector<8x128xf32>
    %140 = tpu.matmul %138, %139, %cst_137 {dimension_numbers = #tpu.dot_dimension_numbers<[1], [0], [0], [1], [0, 0, 1, 1], [], []>} : vector<8x128xf32>, vector<128x128xf32>, vector<8x128xf32> -> vector<8x128xf32>
    %c0_138 = arith.constant 0 : index
    %c0_139 = arith.constant 0 : index
    %141 = vector.load %arg11[%c0_138, %c0_139] : memref<1x128xf32, #tpu.memory_space<vmem>>, vector<1x128xf32>
    %142 = vector.broadcast %141 : vector<1x128xf32> to vector<8x128xf32>
    %143 = arith.addf %140, %142 : vector<8x128xf32>
    %c0_140 = arith.constant 0 : index
    %c0_141 = arith.constant 0 : index
    %144 = vector.load %arg12[%c0_140, %c0_141] : memref<8x128xf32, #tpu.memory_space<vmem>>, vector<8x128xf32>
    tpu.vector_store %arg12[%c0_140, %c0_141], %143 {strides = array<i32>} : memref<8x128xf32, #tpu.memory_space<vmem>>, vector<8x128xf32>,
    return
  }
  func.func @transform_0(%arg0: i32) -> (i32, i32) {
    %c0_i32 = arith.constant 0 : i32
    %c0_i32_0 = arith.constant 0 : i32
    return %arg0, %c0_i32 : i32, i32
  }
  func.func @transform_1(%arg0: i32) -> (i32, i32, i32) {
    %c0_i32 = arith.constant 0 : i32
    %c0_i32_0 = arith.constant 0 : i32
    %c0_i32_1 = arith.constant 0 : i32
    %c0_i32_2 = arith.constant 0 : i32
    return %c0_i32, %c0_i32_0, %c0_i32_1 : i32, i32, i32
  }
  func.func @transform_2(%arg0: i32) -> (i32, i32) {
    %c0_i32 = arith.constant 0 : i32
    %c0_i32_0 = arith.constant 0 : i32
    %c0_i32_1 = arith.constant 0 : i32
    return %c0_i32, %c0_i32_0 : i32, i32
  }
  func.func @transform_3(%arg0: i32) -> (i32, i32, i32) {
    %c0_i32 = arith.constant 0 : i32
    %c0_i32_0 = arith.constant 0 : i32
    %c0_i32_1 = arith.constant 0 : i32
    %c0_i32_2 = arith.constant 0 : i32
    return %c0_i32, %c0_i32_0, %c0_i32_1 : i32, i32, i32
  }
  func.func @transform_4(%arg0: i32) -> (i32, i32) {
    %c0_i32 = arith.constant 0 : i32
    %c0_i32_0 = arith.constant 0 : i32
    %c0_i32_1 = arith.constant 0 : i32
    return %c0_i32, %c0_i32_0 : i32, i32
  }
  func.func @transform_5(%arg0: i32) -> (i32, i32, i32) {
    %c0_i32 = arith.constant 0 : i32
    %c0_i32_0 = arith.constant 0 : i32
    %c0_i32_1 = arith.constant 0 : i32
    %c0_i32_2 = arith.constant 0 : i32
    return %c0_i32, %c0_i32_0, %c0_i32_1 : i32, i32, i32
  }
  func.func @transform_6(%arg0: i32) -> (i32, i32) {
    %c0_i32 = arith.constant 0 : i32
    %c0_i32_0 = arith.constant 0 : i32
    %c0_i32_1 = arith.constant 0 : i32
    return %c0_i32, %c0_i32_0 : i32, i32
  }
  func.func @transform_7(%arg0: i32) -> (i32, i32) {
    %c0_i32 = arith.constant 0 : i32
    %c0_i32_0 = arith.constant 0 : i32
    %c0_i32_1 = arith.constant 0 : i32
    return %c0_i32, %c0_i32_0 : i32, i32
  }
  func.func @transform_8(%arg0: i32) -> (i32, i32) {
    %c0_i32 = arith.constant 0 : i32
    %c0_i32_0 = arith.constant 0 : i32
    %c0_i32_1 = arith.constant 0 : i32
    return %c0_i32, %c0_i32_0 : i32, i32
  }
  func.func @transform_9(%arg0: i32) -> (i32, i32) {
    %c0_i32 = arith.constant 0 : i32
    %c0_i32_0 = arith.constant 0 : i32
    %c0_i32_1 = arith.constant 0 : i32
    return %c0_i32, %c0_i32_0 : i32, i32
  }
  func.func @transform_10(%arg0: i32) -> (i32, i32) {
    %c0_i32 = arith.constant 0 : i32
    %c0_i32_0 = arith.constant 0 : i32
    %c0_i32_1 = arith.constant 0 : i32
    return %c0_i32, %c0_i32_0 : i32, i32
  }
  func.func @transform_11(%arg0: i32) -> (i32, i32) {
    %c0_i32 = arith.constant 0 : i32
    %c0_i32_0 = arith.constant 0 : i32
    return %arg0, %c0_i32 : i32, i32
  }
}

</mosaic_0001>

<bundles_post_ra>
// kernel: net_forward.1
= control target key start
LH: loop header
LB: loop body
LE: loop exit
PB: predicated region body
PF: predicated region fallthrough
CT: control target
= control target key end

     0   :  { %s17024_s0 = inlined_call_operand.vmem [shape: f32[16384,16], index: 0, kind: input, shape index: {}]   ;;  %s17025_s1 = inlined_call_operand.vmem [shape: f32[5,16,128], index: 1, kind: input, shape index: {}]   ;;  %s17026_s2 = inlined_call_operand.vmem [shape: f32[1,128], index: 2, kind: input, shape index: {}]   ;;  %s17027_s3 = inlined_call_operand.vmem [shape: f32[25,8,128], index: 3, kind: input, shape index: {}]   ;;  %s17028_s4 = inlined_call_operand.vmem [shape: f32[1,128], index: 4, kind: input, shape index: {}]   ;;  %s17029_s5 = inlined_call_operand.vmem [shape: f32[25,16,128], index: 5, kind: input, shape index: {}]   ;;  %s17030_s6 = inlined_call_operand.vmem [shape: f32[1,128], index: 6, kind: input, shape index: {}]   ;;  %s17031_s7 = inlined_call_operand.vmem [shape: f32[128,128], index: 7, kind: input, shape index: {}]   ;;  %s17032_s8 = inlined_call_operand.vmem [shape: f32[1,128], index: 8, kind: input, shape index: {}]   ;;  %s17033_s9 = inlined_call_operand.vmem [shape: f32[128,128], index: 9, kind: input, shape index: {}]   ;;  %s17034_s10 = inlined_call_operand.vmem [shape: f32[1,128], index: 10, kind: input, shape index: {}]   ;;  %s17035_s11 = inlined_call_operand.hbm [shape: f32[16,128], index: 11, kind: output, shape index: {}]  }
   0x1   :  { %17037 = sst [smem:[#allocation10_spill]] %s17024_s0 }
   0x2   :  { %17038 = sst [smem:[#allocation11_spill]] %s17025_s1 }
   0x3   :  { %17039 = sst [smem:[#allocation12_spill]] %s17026_s2 }
   0x4   :  { %16 = vsyncpa [#allocation7], 0 }
   0x5   :  { %18 = vsyncpa [#allocation7 + $0x1], 0  ;;  %s13304_s17 = smov 0   ;;  %s13306_s18 = smov 0  }
   0x6   :  { %s13308_s19 = smov 0   ;;  %s13310_s20 = smov 0  }
   0x7 LB: > { %s13325_s21 = sadd.s32 4294967295, %s13238_s20   ;;  %s11383_s22 = sadd.s32 4294967294, %s13238_s20   ;;  %s13238_s20 = sphi %s13310_s20, %s17053_s20   ;;  %s13234_s19 = sphi %s13308_s19, %s17052_s19   ;;  %s13230_s18 = sphi %s13306_s18, %s17051_s18   ;;  %s13226_s17 = sphi %s13304_s17, %s17050_s17  }
   0x8   : > { %s13329_s23 = sadd.s32 1, %s13238_s20   ;;  %s267_s24 = sadd.s32 1, %s13234_s19 }
   0x9   : > { %s264_s25 = ssub.s32 %s13238_s20, %s13329_s23  ;;  %p277_p0 = scmp.ne.s32.totalorder %s13234_s19, %s13230_s18 }
   0xa   : > { %p265_p1 = scmp.eq.s32.totalorder %s264_s25, 0  ;;  %p278_p2 = scmp.eq.s32.totalorder %s13325_s21, 1 }
   0xb   : > { %p283_p3 = scmp.ne.s32.totalorder %s13230_s18, %s13226_s17  ;;  %p284_p4 = scmp.eq.s32.totalorder %s11383_s22, 1 }
   0xc   : > { %s13340_s26 = scalar_select %p265_p1, %s13234_s19, %s267_s24  }
   0xd   : > { %p13342_p5 = por %p278_p2, %p277_p0  ;;  %p13346_p6 = por %p284_p4, %p283_p3 }
   0xe   : > { %17040 = sst [smem:[#allocation9_spill]] %s13340_s26  ;;  %p11386_p7 = scmp.ge.s32.totalorder %s13238_s20, 1 }
   0xf   : > { %p341_p8 = scmp.lt.s32.totalorder %s13238_s20, 3 }
  0x11   : > { %p342_p9 = pnand %p11386_p7, %p341_p8 }
  0x12   : > { %s17036_s29 = sand.u32 (!%p342_p9), 1, %s13230_s18   ;;  %s11388_s30 = sshll.u32 (!%p342_p9), %s13325_s21, 10 }
  0x13   : > { %345 = sbr.rel (%p342_p9) target bundleno = 2688 (0xa80), region = 64  ;;  %s13356_s12 = sshll.u32 (!%p342_p9), %s17036_s29, 3 }
  0x14   : > { %p382_p10 = scmp.lt.s32.totalorder (!%p342_p9), %s11388_s30, 2047  ;;  %s17043_s0 = sld [smem:[#allocation10_spill]] (!%p342_p9) }
  0x15   : > { %s13364_s24 = smov (!%p342_p9), 0  }
  0x18   : > { %s17055_s30 = smov (!%p382_p10, %s11388_s30), 2047 }
  0x19   : > { %s11389_s13 = sshll.u32 %s17055_s30, 3 }
  0x1a   : > { %s13361_s16 = scalar_lea.vmem %s17043_s0, %s11389_s13 }
  0x1b LB: >> { %s17044_s1 = sld [smem:[#allocation11_spill]]  ;;  %s11390_s15 = sshll.u32 %s13242_s24, 10  ;;  %vm434_vm0 = vcmask 130048   ;;  %vm5762_vm1 = vcmask 64512   ;;  %vm5764_vm2 = vcmask 62464   ;;  %vm9985_vm3 = vcmask 126976   ;;  %s13242_s24 = sphi %s13364_s24, %s392_s24  }
  0x1c   : >> { %s13406_s29 = scalar_lea.vmem %s13361_s16, %s11390_s15  ;;  %s17045_s2 = sld [smem:[#allocation12_spill]] }
  0x1d   : >> { %v11392_v8 = vld [vmem:[%s13406_s29 + $0x20] sm:$0xff]  ;;  %v11393_v13 = vld [vmem:[%s13406_s29 + $0x28] sm:$0xff]  ;;  %v11394_v17 = vld [vmem:[%s13406_s29 + $0x30] sm:$0xff] }
  0x1e   : >> { %v395_v9 = vld [vmem:[%s13406_s29] sm:$0xff]  ;;  %v396_v14 = vld [vmem:[%s13406_s29 + $0x8] sm:$0xff]  ;;  %v397_v18 = vld [vmem:[%s13406_s29 + $0x10] sm:$0xff] }
  0x1f   : >> { %v13412_v10 = vld [vmem:[%s13406_s29 + $0x40] sm:$0xff]  ;;  %v11444_v15 = vld [vmem:[%s13406_s29 + $0x48] sm:$0xff]  ;;  %v11445_v19 = vld [vmem:[%s13406_s29 + $0x50] sm:$0xff] }
  0x20   : >> { %v13417_v11 = vld [vmem:[%s13406_s29 + $0x60] sm:$0xff]  ;;  %v13435_v16 = vld [vmem:[%s13406_s29 + $0x68] sm:$0xff]  ;;  %v13448_v20 = vld [vmem:[%s13406_s29 + $0x70] sm:$0xff] }
  0x21   : >> { %v13372_v0 = vld [vmem:[%s17044_s1 + $0x18] sm:$0xff]  ;;  %v412_v1 = vld [vmem:[%s17044_s1 + $0x8] sm:$0xff]  ;;  %v11408_v4 = vld [vmem:[%s17044_s1 + $0x10] sm:$0xff] }
  0x22   : >> { %v13380_v2 = vld [vmem:[%s17044_s1 + $0x28] sm:$0xff]  ;;  %497 = vmatpush.msra.mxu0 %v13372_v0  ;;  %610 = vmatpush.msra.mxu1 %v412_v1  ;;  %v13386_v3 = vld [vmem:[%s17044_s1 + $0x38] sm:$0xff]  ;;  %v411_v5 = vld [vmem:[%s17044_s1] sm:$0xff] }
  0x23   : >> { %744 = vmatpush.msra.mxu2 %v13380_v2  ;;  %894 = vmatpush.msra.mxu3 %v13386_v3  ;;  %v11459_v6 = vld [vmem:[%s17044_s1 + $0x20] sm:$0xff]  ;;  %v13402_v7 = vld [vmem:[%s17044_s1 + $0x30] sm:$0xff]  ;;  %v13422_v12 = vld [vmem:[%s17044_s1 + $0x48] sm:$0xff] }
  0x24   : >> { %498 = vmatpush.msra.mxu0 %v11408_v4  ;;  %611 = vmatpush.msra.mxu1 %v411_v5  ;;  %v11395_v21 = vld [vmem:[%s13406_s29 + $0x38] sm:$0xff]  ;;  %v13467_v25 = vld [vmem:[%s13406_s29 + $0x80] sm:$0xff]  ;;  %v13477_v26 = vld [vmem:[%s13406_s29 + $0x88] sm:$0xff] }
  0x25   : >> { %745 = vmatpush.msra.mxu2 %v11459_v6  ;;  %895 = vmatpush.msra.mxu3 %v13402_v7  ;;  %v398_v22 = vld [vmem:[%s13406_s29 + $0x18] sm:$0xff]  ;;  %v13488_v27 = vld [vmem:[%s17044_s1 + $0x40] sm:$0xff]  ;;  %v13495_v28 = vld [vmem:[%s13406_s29 + $0x90] sm:$0xff] }
  0x26   : >> { %11410 = vmatmul.msk.f32.vlgmr.msra.gmra.mxu0 %vm434_vm0, %v11392_v8  ;;  %11426 = vmatmul.msk.f32.vlgmr.msra.gmra.mxu1 %vm434_vm0, %v395_v9  ;;  %v11446_v23 = vld [vmem:[%s13406_s29 + $0x58] sm:$0xff]  ;;  %v13513_v30 = vld [vmem:[%s13406_s29 + $0xa0] sm:$0xff]  ;;  %v13524_v31 = vld [vmem:[%s13406_s29 + $0xa8] sm:$0xff] }
  0x27   : >> { %11461 = vmatmul.msk.f32.vlgmr.msra.gmra.mxu2 %vm434_vm0, %v13412_v10  ;;  %11496 = vmatmul.msk.f32.vlgmr.msra.gmra.mxu3 %vm434_vm0, %v13417_v11  ;;  %v13459_v24 = vld [vmem:[%s13406_s29 + $0x78] sm:$0xff]  ;;  %v13534_v32 = vld [vmem:[%s13406_s29 + $0xb0] sm:$0xff]  ;;  %v13554_v34 = vld [vmem:[%s13406_s29 + $0xc0] sm:$0xff] }
  0x28   : >> { %1509 = vmatpush.msrb.mxu3 %v13380_v2  ;;  %1376 = vmatpush.msrb.mxu2 %v412_v1  ;;  %v13504_v29 = vld [vmem:[%s13406_s29 + $0x98] sm:$0xff]  ;;  %v13565_v35 = vld [vmem:[%s13406_s29 + $0xc8] sm:$0xff]  ;;  %v13576_v36 = vld [vmem:[%s13406_s29 + $0xd0] sm:$0xff] }
  0x29   : >> { %1044 = vmatpush.msrb.mxu0 %v13422_v12  ;;  %1263 = vmatpush.msrb.mxu1 %v13372_v0  ;;  %v13544_v33 = vld [vmem:[%s13406_s29 + $0xb8] sm:$0xff] }
  0x2a   : >> { %1510 = vmatpush.msrb.mxu3 %v11459_v6  ;;  %1377 = vmatpush.msrb.mxu2 %v411_v5  ;;  %v13587_v37 = vld [vmem:[%s13406_s29 + $0xd8] sm:$0xff] }
  0x2b   : >> { %1264 = vmatpush.msrb.mxu1 %v11408_v4  ;;  %1045 = vmatpush.msrb.mxu0 %v13488_v27 }
  0x2c   : >> { %2139 = vmatpush.msra.mxu3 %v412_v1  ;;  %2026 = vmatpush.msra.mxu2 %v13372_v0 }
  0x2d   : >> { %1807 = vmatpush.msra.mxu1 %v13422_v12  ;;  %1658 = vmatpush.msra.mxu0 %v13386_v3 }
  0x2e   : >> { %2140 = vmatpush.msra.mxu3 %v411_v5  ;;  %11411 = vmatmul.msk.f32.gmra.mxu0 %vm434_vm0, %v11393_v13 }
  0x2f   : >> { %11427 = vmatmul.msk.f32.gmra.mxu1 %vm434_vm0, %v396_v14  ;;  %11462 = vmatmul.msk.f32.gmra.mxu2 %vm434_vm0, %v11444_v15 }
  0x30   : >> { %11497 = vmatmul.msk.f32.gmra.mxu3 %vm434_vm0, %v13435_v16  ;;  %2027 = vmatpush.msra.mxu2 %v11408_v4 }
  0x31   : >> { %1808 = vmatpush.msra.mxu1 %v13488_v27  ;;  %1659 = vmatpush.msra.mxu0 %v13402_v7 }
  0x36   : >> { %11412 = vmatmul.msk.f32.gmra.mxu0 %vm434_vm0, %v11394_v17 }
  0x37   : >> { %11428 = vmatmul.msk.f32.gmra.mxu1 %vm434_vm0, %v397_v18  ;;  %11463 = vmatmul.msk.f32.gmra.mxu2 %vm434_vm0, %v11445_v19 }
  0x38   : >> { %11498 = vmatmul.msk.f32.gmra.mxu3 %vm434_vm0, %v13448_v20 }
  0x3e   : >> { %11413 = vmatmul.msk.f32.gmra.mxu0 %vm434_vm0, %v11395_v21 }
  0x3f   : >> { %11429 = vmatmul.msk.f32.gmra.mxu1 %vm434_vm0, %v398_v22  ;;  %11464 = vmatmul.msk.f32.gmra.mxu2 %vm434_vm0, %v11446_v23 }
  0x40   : >> { %11499 = vmatmul.msk.f32.gmra.mxu3 %vm434_vm0, %v13459_v24 }
  0x46   : >> { %11414 = vmatmul.msk.f32.gmra.mxu0 %vm434_vm0, %v13412_v10 }
  0x47   : >> { %11430 = vmatmul.msk.f32.gmra.mxu1 %vm434_vm0, %v11392_v8  ;;  %11465 = vmatmul.msk.f32.gmra.mxu2 %vm434_vm0, %v13417_v11 }
  0x48   : >> { %11500 = vmatmul.msk.f32.gmra.mxu3 %vm434_vm0, %v13467_v25 }
  0x4e   : >> { %11415 = vmatmul.msk.f32.gmra.mxu0 %vm434_vm0, %v11444_v15 }
  0x4f   : >> { %11431 = vmatmul.msk.f32.gmra.mxu1 %vm434_vm0, %v11393_v13  ;;  %11466 = vmatmul.msk.f32.gmra.mxu2 %vm434_vm0, %v13435_v16 }
  0x50   : >> { %11501 = vmatmul.msk.f32.gmra.mxu3 %vm434_vm0, %v13477_v26 }
  0x56   : >> { %11416 = vmatmul.msk.f32.gmra.mxu0 %vm434_vm0, %v11445_v19 }
  0x57   : >> { %11432 = vmatmul.msk.f32.gmra.mxu1 %vm434_vm0, %v11394_v17  ;;  %11467 = vmatmul.msk.f32.gmra.mxu2 %vm434_vm0, %v13448_v20 }
  0x58   : >> { %11502 = vmatmul.msk.f32.gmra.mxu3 %vm434_vm0, %v13495_v28 }
  0x5e   : >> { %11417 = vmatmul.msk.f32.gmra.mxu0 %vm434_vm0, %v11446_v23 }
  0x5f   : >> { %11433 = vmatmul.msk.f32.gmra.mxu1 %vm434_vm0, %v11395_v21  ;;  %11468 = vmatmul.msk.f32.gmra.mxu2 %vm434_vm0, %v13459_v24 }
  0x60   : >> { %11503 = vmatmul.msk.f32.gmra.mxu3 %vm434_vm0, %v13504_v29 }
  0x66   : >> { %11418 = vmatmul.msk.f32.gmra.mxu0 %vm434_vm0, %v13417_v11 }
  0x67   : >> { %11434 = vmatmul.msk.f32.gmra.mxu1 %vm434_vm0, %v13412_v10  ;;  %11469 = vmatmul.msk.f32.gmra.mxu2 %vm434_vm0, %v13467_v25 }
  0x68   : >> { %11504 = vmatmul.msk.f32.gmra.mxu3 %vm434_vm0, %v13513_v30 }
  0x6e   : >> { %11419 = vmatmul.msk.f32.gmra.mxu0 %vm434_vm0, %v13435_v16 }
  0x6f   : >> { %11435 = vmatmul.msk.f32.gmra.mxu1 %vm434_vm0, %v11444_v15  ;;  %11470 = vmatmul.msk.f32.gmra.mxu2 %vm434_vm0, %v13477_v26 }
  0x70   : >> { %11505 = vmatmul.msk.f32.gmra.mxu3 %vm434_vm0, %v13524_v31 }
  0x76   : >> { %11420 = vmatmul.msk.f32.gmra.mxu0 %vm434_vm0, %v13448_v20 }
  0x77   : >> { %11436 = vmatmul.msk.f32.gmra.mxu1 %vm434_vm0, %v11445_v19  ;;  %11471 = vmatmul.msk.f32.gmra.mxu2 %vm434_vm0, %v13495_v28  ;;  %v13667_v19 = vld [vmem:[%s13406_s29 + $0xf0] sm:$0xff] }
  0x78   : >> { %11506 = vmatmul.msk.f32.gmra.mxu3 %vm434_vm0, %v13534_v32 }
  0x7e   : >> { %11421 = vmatmul.msk.f32.gmra.mxu0 %vm434_vm0, %v13459_v24 }
  0x7f   : >> { %11437 = vmatmul.msk.f32.gmra.mxu1 %vm434_vm0, %v11446_v23  ;;  %11472 = vmatmul.msk.f32.gmra.mxu2 %vm434_vm0, %v13504_v29 }
  0x80   : >> { %11507 = vmatmul.msk.f32.gmra.mxu3 %vm434_vm0, %v13544_v33 }
  0x86   : >> { %11422 = vmatmul.msk.f32.gmra.mxu0 %vm434_vm0, %v13467_v25 }
  0x87   : >> { %11438 = vmatmul.msk.f32.gmra.mxu1 %vm434_vm0, %v13417_v11  ;;  %11473 = vmatmul.msk.f32.gmra.mxu2 %vm434_vm0, %v13513_v30  ;;  %v13654_v11 = vld [vmem:[%s13406_s29 + $0xe8] sm:$0xff] }
  0x88   : >> { %11508 = vmatmul.msk.f32.gmra.mxu3 %vm434_vm0, %v13554_v34 }
  0x8e   : >> { %11423 = vmatmul.msk.f32.gmra.mxu0 %vm434_vm0, %v13477_v26 }
  0x8f   : >> { %11439 = vmatmul.msk.f32.gmra.mxu1 %vm434_vm0, %v13435_v16  ;;  %11474 = vmatmul.msk.f32.gmra.mxu2 %vm434_vm0, %v13524_v31 }
  0x90   : >> { %11509 = vmatmul.msk.f32.gmra.mxu3 %vm434_vm0, %v13565_v35 }
  0x96   : >> { %11424 = vmatmul.msk.f32.gmra.mxu0 %vm434_vm0, %v13495_v28 }
  0x97   : >> { %11440 = vmatmul.msk.f32.gmra.mxu1 %vm434_vm0, %v13448_v20  ;;  %11475 = vmatmul.msk.f32.gmra.mxu2 %vm434_vm0, %v13534_v32 }
  0x98   : >> { %11510 = vmatmul.msk.f32.gmra.mxu3 %vm434_vm0, %v13576_v36 }
  0x9e   : >> { %11425 = vmatmul.msk.f32.gmra.mxu0 %vm434_vm0, %v13504_v29 }
  0x9f   : >> { %11441 = vmatmul.msk.f32.gmra.mxu1 %vm434_vm0, %v13459_v24  ;;  %11476 = vmatmul.msk.f32.gmra.mxu2 %vm434_vm0, %v13544_v33 }
  0xa0   : >> { %11511 = vmatmul.msk.f32.gmra.mxu3 %vm434_vm0, %v13587_v37 }
  0xa3   : >> { %v500_v38 = vpop.f32.mrf.mxu0  ;;  %v613_v39 = vpop.f32.mrf.mxu1 }
  0xa4   : >> { %v614_v40 = vadd.f32 %v613_v39, %v500_v38 }
  0xa6   : >> { %11531 = vmatmul.msk.f32.vlgmr.msrb.gmra.mxu0 %vm434_vm0, %v13467_v25 }
  0xa7   : >> { %11582 = vmatmul.msk.f32.vlgmr.msrb.gmra.mxu1 %vm434_vm0, %v13513_v30  ;;  %11598 = vmatmul.msk.f32.vlgmr.msrb.gmra.mxu2 %vm434_vm0, %v13467_v25 }
  0xa8   : >> { %11633 = vmatmul.msk.f32.vlgmr.msrb.gmra.mxu3 %vm434_vm0, %v13554_v34  ;;  %2570 = vmatpush.msrb.mxu2 %v13422_v12 }
  0xa9   : >> { %2789 = vmatpush.msrb.mxu3 %v13372_v0  ;;  %2272 = vmatpush.msrb.mxu0 %v13380_v2 }
  0xaa   : >> { %2421 = vmatpush.msrb.mxu1 %v13386_v3  ;;  %v747_v41 = vpop.f32.mrf.mxu2  ;;  %v897_v42 = vpop.f32.mrf.mxu3  ;;  %2571 = vmatpush.msrb.mxu2 %v13488_v27  ;;  %v13641_v3 = vld [vmem:[%s13406_s29 + $0xe0] sm:$0xff]  ;;  %v13680_v27 = vld [vmem:[%s13406_s29 + $0xf8] sm:$0xff] }
  0xab   : >> { %v795_v43 = vadd.f32 %v747_v41, %v614_v40  ;;  %v503_v44 = vpop.f32.mrf.mxu0  ;;  %v13693_v40 = vld [vmem:[%s13406_s29 + $0x100] sm:$0xff] }
  0xac   : >> { %v616_v45 = vpop.f32.mrf.mxu1 }
  0xad   : >> { %v13610_v46 = vadd.f32 %v897_v42, %v795_v43  ;;  %v617_v47 = vadd.f32 %v616_v45, %v503_v44 }
  0xae   : >> { %11532 = vmatmul.msk.f32.gmra.mxu0 %vm434_vm0, %v13477_v26 }
  0xaf   : >> { %11583 = vmatmul.msk.f32.gmra.mxu1 %vm434_vm0, %v13524_v31  ;;  %11599 = vmatmul.msk.f32.gmra.mxu2 %vm434_vm0, %v13477_v26 }
  0xb0   : >> { %11634 = vmatmul.msk.f32.gmra.mxu3 %vm434_vm0, %v13565_v35 }
  0xb2   : >> { %v750_v48 = vpop.f32.mrf.mxu2 }
  0xb3   : >> { %v900_v49 = vpop.f32.mrf.mxu3  ;;  %v796_v50 = vadd.f32 %v750_v48, %v617_v47  ;;  %v506_v51 = vpop.f32.mrf.mxu0  ;;  %v13706_v48 = vld [vmem:[%s13406_s29 + $0x108] sm:$0xff] }
  0xb4   : >> { %v619_v52 = vpop.f32.mrf.mxu1 }
  0xb5   : >> { %v13620_v53 = vadd.f32 %v900_v49, %v796_v50  ;;  %v620_v54 = vadd.f32 %v619_v52, %v506_v51 }
  0xb6   : >> { %11533 = vmatmul.msk.f32.gmra.mxu0 %vm434_vm0, %v13495_v28 }
  0xb7   : >> { %11584 = vmatmul.msk.f32.gmra.mxu1 %vm434_vm0, %v13534_v32  ;;  %11600 = vmatmul.msk.f32.gmra.mxu2 %vm434_vm0, %v13495_v28 }
  0xb8   : >> { %11635 = vmatmul.msk.f32.gmra.mxu3 %vm434_vm0, %v13576_v36 }
  0xba   : >> { %v753_v55 = vpop.f32.mrf.mxu2 }
  0xbb   : >> { %v903_v56 = vpop.f32.mrf.mxu3  ;;  %v797_v57 = vadd.f32 %v753_v55, %v620_v54  ;;  %v509_v58 = vpop.f32.mrf.mxu0 }
  0xbc   : >> { %v622_v59 = vpop.f32.mrf.mxu1 }
  0xbd   : >> { %v13630_v60 = vadd.f32 %v903_v56, %v797_v57  ;;  %v623_v61 = vadd.f32 %v622_v59, %v509_v58  ;;  %v13719_v56 = vld [vmem:[%s13406_s29 + $0x110] sm:$0xff] }
  0xbe   : >> { %11534 = vmatmul.msk.f32.gmra.mxu0 %vm434_vm0, %v13504_v29 }
  0xbf   : >> { %11585 = vmatmul.msk.f32.gmra.mxu1 %vm434_vm0, %v13544_v33  ;;  %11601 = vmatmul.msk.f32.gmra.mxu2 %vm434_vm0, %v13504_v29 }
  0xc0   : >> { %11636 = vmatmul.msk.f32.gmra.mxu3 %vm434_vm0, %v13587_v37 }
  0xc2   : >> { %v756_v62 = vpop.f32.mrf.mxu2 }
  0xc3   : >> { %v906_v63 = vpop.f32.mrf.mxu3  ;;  %v798_v0 = vadd.f32 %v756_v62, %v623_v61  ;;  %v512_v1 = vpop.f32.mrf.mxu0 }
  0xc4   : >> { %v625_v2 = vpop.f32.mrf.mxu1 }
  0xc5   : >> { %v13643_v4 = vadd.f32 %v906_v63, %v798_v0  ;;  %v626_v5 = vadd.f32 %v625_v2, %v512_v1  ;;  %v13732_v0 = vld [vmem:[%s13406_s29 + $0x118] sm:$0xff] }
  0xc6   : >> { %11535 = vmatmul.msk.f32.gmra.mxu0 %vm434_vm0, %v13513_v30 }
  0xc7   : >> { %11586 = vmatmul.msk.f32.gmra.mxu1 %vm434_vm0, %v13554_v34  ;;  %11602 = vmatmul.msk.f32.gmra.mxu2 %vm434_vm0, %v13513_v30 }
  0xc8   : >> { %11637 = vmatmul.msk.f32.gmra.mxu3 %vm434_vm0, %v13641_v3 }
  0xca   : >> { %v759_v6 = vpop.f32.mrf.mxu2 }
  0xcb   : >> { %v909_v7 = vpop.f32.mrf.mxu3  ;;  %v799_v8 = vadd.f32 %v759_v6, %v626_v5  ;;  %v515_v9 = vpop.f32.mrf.mxu0 }
  0xcc   : >> { %v628_v10 = vpop.f32.mrf.mxu1 }
  0xcd   : >> { %v13656_v12 = vadd.f32 %v909_v7, %v799_v8  ;;  %v629_v13 = vadd.f32 %v628_v10, %v515_v9  ;;  %v13745_v9 = vld [vmem:[%s13406_s29 + $0x120] sm:$0xff] }
  0xce   : >> { %11536 = vmatmul.msk.f32.gmra.mxu0 %vm434_vm0, %v13524_v31 }
  0xcf   : >> { %11587 = vmatmul.msk.f32.gmra.mxu1 %vm434_vm0, %v13565_v35  ;;  %11603 = vmatmul.msk.f32.gmra.mxu2 %vm434_vm0, %v13524_v31 }
  0xd0   : >> { %11638 = vmatmul.msk.f32.gmra.mxu3 %vm434_vm0, %v13654_v11 }
  0xd2   : >> { %v762_v14 = vpop.f32.mrf.mxu2 }
  0xd3   : >> { %v912_v15 = vpop.f32.mrf.mxu3  ;;  %v800_v16 = vadd.f32 %v762_v14, %v629_v13  ;;  %v518_v17 = vpop.f32.mrf.mxu0 }
  0xd4   : >> { %v631_v18 = vpop.f32.mrf.mxu1 }
  0xd5   : >> { %v13669_v20 = vadd.f32 %v912_v15, %v800_v16  ;;  %v632_v21 = vadd.f32 %v631_v18, %v518_v17  ;;  %v13758_v18 = vld [vmem:[%s13406_s29 + $0x128] sm:$0xff] }
  0xd6   : >> { %11537 = vmatmul.msk.f32.gmra.mxu0 %vm434_vm0, %v13534_v32 }
  0xd7   : >> { %11588 = vmatmul.msk.f32.gmra.mxu1 %vm434_vm0, %v13576_v36  ;;  %11604 = vmatmul.msk.f32.gmra.mxu2 %vm434_vm0, %v13534_v32 }
  0xd8   : >> { %11639 = vmatmul.msk.f32.gmra.mxu3 %vm434_vm0, %v13667_v19 }
  0xda   : >> { %v765_v22 = vpop.f32.mrf.mxu2 }
  0xdb   : >> { %v915_v23 = vpop.f32.mrf.mxu3  ;;  %v801_v24 = vadd.f32 %v765_v22, %v632_v21  ;;  %v521_v25 = vpop.f32.mrf.mxu0 }
  0xdc   : >> { %v634_v26 = vpop.f32.mrf.mxu1 }
  0xdd   : >> { %v13682_v28 = vadd.f32 %v915_v23, %v801_v24  ;;  %v635_v29 = vadd.f32 %v634_v26, %v521_v25 }
  0xde   : >> { %11538 = vmatmul.msk.f32.gmra.mxu0 %vm434_vm0, %v13544_v33 }
  0xdf   : >> { %11589 = vmatmul.msk.f32.gmra.mxu1 %vm434_vm0, %v13587_v37  ;;  %11605 = vmatmul.msk.f32.gmra.mxu2 %vm434_vm0, %v13544_v33 }
  0xe0   : >> { %11640 = vmatmul.msk.f32.gmra.mxu3 %vm434_vm0, %v13680_v27 }
  0xe2   : >> { %v768_v30 = vpop.f32.mrf.mxu2 }
  0xe3   : >> { %v918_v31 = vpop.f32.mrf.mxu3  ;;  %v802_v32 = vadd.f32 %v768_v30, %v635_v29  ;;  %v524_v38 = vpop.f32.mrf.mxu0  ;;  %v13771_v30 = vld [vmem:[%s13406_s29 + $0x130] sm:$0xff] }
  0xe4   : >> { %v637_v39 = vpop.f32.mrf.mxu1 }
  0xe5   : >> { %v13695_v41 = vadd.f32 %v918_v31, %v802_v32  ;;  %v638_v33 = vadd.f32 %v637_v39, %v524_v38 }
  0xe6   : >> { %11539 = vmatmul.msk.f32.gmra.mxu0 %vm434_vm0, %v13554_v34 }
  0xe7   : >> { %11590 = vmatmul.msk.f32.gmra.mxu1 %vm434_vm0, %v13641_v3  ;;  %11606 = vmatmul.msk.f32.gmra.mxu2 %vm434_vm0, %v13554_v34 }
  0xe8   : >> { %11641 = vmatmul.msk.f32.gmra.mxu3 %vm434_vm0, %v13693_v40 }
  0xea   : >> { %v771_v42 = vpop.f32.mrf.mxu2 }
  0xeb   : >> { %v921_v43 = vpop.f32.mrf.mxu3  ;;  %v803_v44 = vadd.f32 %v771_v42, %v638_v33  ;;  %v527_v45 = vpop.f32.mrf.mxu0 }
  0xec   : >> { %v640_v47 = vpop.f32.mrf.mxu1 }
  0xed   : >> { %v13708_v49 = vadd.f32 %v921_v43, %v803_v44  ;;  %v641_v34 = vadd.f32 %v640_v47, %v527_v45  ;;  %v13784_v44 = vld [vmem:[%s13406_s29 + $0x138] sm:$0xff] }
  0xee   : >> { %11540 = vmatmul.msk.f32.gmra.mxu0 %vm434_vm0, %v13565_v35 }
  0xef   : >> { %11591 = vmatmul.msk.f32.gmra.mxu1 %vm434_vm0, %v13654_v11  ;;  %11607 = vmatmul.msk.f32.gmra.mxu2 %vm434_vm0, %v13565_v35 }
  0xf0   : >> { %11642 = vmatmul.msk.f32.gmra.mxu3 %vm434_vm0, %v13706_v48 }
  0xf2   : >> { %v774_v50 = vpop.f32.mrf.mxu2 }
  0xf3   : >> { %v924_v51 = vpop.f32.mrf.mxu3  ;;  %v804_v52 = vadd.f32 %v774_v50, %v641_v34  ;;  %v530_v54 = vpop.f32.mrf.mxu0 }
  0xf4   : >> { %v643_v55 = vpop.f32.mrf.mxu1 }
  0xf5   : >> { %v13721_v57 = vadd.f32 %v924_v51, %v804_v52  ;;  %v644_v35 = vadd.f32 %v643_v55, %v530_v54  ;;  %v13799_v51 = vld [vmem:[%s17045_s2] ss:$0 sm:$0xff] }
  0xf6   : >> { %11541 = vmatmul.msk.f32.gmra.mxu0 %vm434_vm0, %v13576_v36 }
  0xf7   : >> { %11592 = vmatmul.msk.f32.gmra.mxu1 %vm434_vm0, %v13667_v19  ;;  %11608 = vmatmul.msk.f32.gmra.mxu2 %vm434_vm0, %v13576_v36 }
  0xf8   : >> { %11643 = vmatmul.msk.f32.gmra.mxu3 %vm434_vm0, %v13719_v56 }
  0xfa   : >> { %v777_v58 = vpop.f32.mrf.mxu2 }
  0xfb   : >> { %v927_v59 = vpop.f32.mrf.mxu3  ;;  %v805_v61 = vadd.f32 %v777_v58, %v644_v35  ;;  %v533_v62 = vpop.f32.mrf.mxu0 }
  0xfc   : >> { %v646_v63 = vpop.f32.mrf.mxu1 }
  0xfd   : >> { %v13734_v1 = vadd.f32 %v927_v59, %v805_v61  ;;  %v647_v36 = vadd.f32 %v646_v63, %v533_v62 }
  0xfe   : >> { %11542 = vmatmul.msk.f32.gmra.mxu0 %vm434_vm0, %v13587_v37 }
  0xff   : >> { %11593 = vmatmul.msk.f32.gmra.mxu1 %vm434_vm0, %v13680_v27  ;;  %11609 = vmatmul.msk.f32.gmra.mxu2 %vm434_vm0, %v13587_v37 }
 0x100   : >> { %11644 = vmatmul.msk.f32.gmra.mxu3 %vm434_vm0, %v13732_v0 }
 0x102   : >> { %v780_v2 = vpop.f32.mrf.mxu2 }
 0x103   : >> { %v930_v5 = vpop.f32.mrf.mxu3  ;;  %v806_v6 = vadd.f32 %v780_v2, %v647_v36  ;;  %v536_v7 = vpop.f32.mrf.mxu0 }
 0x104   : >> { %v649_v8 = vpop.f32.mrf.mxu1 }
 0x105   : >> { %v13747_v10 = vadd.f32 %v930_v5, %v806_v6  ;;  %v650_v37 = vadd.f32 %v649_v8, %v536_v7 }
 0x106   : >> { %11543 = vmatmul.msk.f32.gmra.mxu0 %vm434_vm0, %v13641_v3 }
 0x107   : >> { %11594 = vmatmul.msk.f32.gmra.mxu1 %vm434_vm0, %v13693_v40  ;;  %11610 = vmatmul.msk.f32.gmra.mxu2 %vm434_vm0, %v13641_v3 }
 0x108   : >> { %11645 = vmatmul.msk.f32.gmra.mxu3 %vm434_vm0, %v13745_v9 }
 0x10a   : >> { %v783_v13 = vpop.f32.mrf.mxu2 }
 0x10b   : >> { %v933_v14 = vpop.f32.mrf.mxu3  ;;  %v807_v15 = vadd.f32 %v783_v13, %v650_v37  ;;  %v539_v16 = vpop.f32.mrf.mxu0 }
 0x10c   : >> { %v652_v17 = vpop.f32.mrf.mxu1 }
 0x10d   : >> { %v13760_v21 = vadd.f32 %v933_v14, %v807_v15  ;;  %v653_v22 = vadd.f32 %v652_v17, %v539_v16 }
 0x10e   : >> { %11544 = vmatmul.msk.f32.gmra.mxu0 %vm434_vm0, %v13654_v11 }
 0x10f   : >> { %11595 = vmatmul.msk.f32.gmra.mxu1 %vm434_vm0, %v13706_v48  ;;  %11611 = vmatmul.msk.f32.gmra.mxu2 %vm434_vm0, %v13654_v11 }
 0x110   : >> { %11646 = vmatmul.msk.f32.gmra.mxu3 %vm434_vm0, %v13758_v18 }
 0x112   : >> { %v786_v23 = vpop.f32.mrf.mxu2 }
 0x113   : >> { %v936_v24 = vpop.f32.mrf.mxu3  ;;  %v808_v25 = vadd.f32 %v786_v23, %v653_v22  ;;  %v542_v26 = vpop.f32.mrf.mxu0 }
 0x114   : >> { %v655_v29 = vpop.f32.mrf.mxu1 }
 0x115   : >> { %v13773_v31 = vadd.f32 %v936_v24, %v808_v25  ;;  %v656_v32 = vadd.f32 %v655_v29, %v542_v26 }
 0x116   : >> { %11545 = vmatmul.msk.f32.gmra.mxu0 %vm434_vm0, %v13667_v19 }
 0x117   : >> { %11596 = vmatmul.msk.f32.gmra.mxu1 %vm434_vm0, %v13719_v56  ;;  %11612 = vmatmul.msk.f32.gmra.mxu2 %vm434_vm0, %v13667_v19 }
 0x118   : >> { %11647 = vmatmul.msk.f32.gmra.mxu3 %vm434_vm0, %v13771_v30 }
 0x11a   : >> { %v789_v38 = vpop.f32.mrf.mxu2 }
 0x11b   : >> { %v939_v39 = vpop.f32.mrf.mxu3  ;;  %v809_v33 = vadd.f32 %v789_v38, %v656_v32  ;;  %v545_v42 = vpop.f32.mrf.mxu0 }
 0x11c   : >> { %v658_v43 = vpop.f32.mrf.mxu1 }
 0x11d   : >> { %v13786_v45 = vadd.f32 %v939_v39, %v809_v33  ;;  %v659_v47 = vadd.f32 %v658_v43, %v545_v42 }
 0x11e   : >> { %11546 = vmatmul.msk.f32.gmra.mxu0 %vm434_vm0, %v13680_v27 }
 0x11f   : >> { %11597 = vmatmul.msk.f32.gmra.mxu1 %vm434_vm0, %v13732_v0  ;;  %11613 = vmatmul.msk.f32.gmra.mxu2 %vm434_vm0, %v13680_v27 }
 0x120   : >> { %11648 = vmatmul.msk.f32.gmra.mxu3 %vm434_vm0, %v13784_v44 }
 0x122   : >> { %v792_v34 = vpop.f32.mrf.mxu2 }
 0x123   : >> { %v942_v50 = vpop.f32.mrf.mxu3  ;;  %v810_v52 = vadd.f32 %v792_v34, %v659_v47  ;;  %v1047_v54 = vpop.f32.mrf.mxu0 }
 0x124   : >> { %v1266_v55 = vpop.f32.mrf.mxu1  ;;  %v1095_v35 = vadd.f32 %v1047_v54, %v13610_v46 }
 0x125   : >> { %v13802_v58 = vadd.f32 %v942_v50, %v810_v52 }
 0x126   : >> { %v1115_v59 = vadd.f32 %v13799_v51, %v1095_v35  ;;  %11668 = vmatmul.msk.f32.vlgmr.msra.gmra.mxu0 %vm434_vm0, %v13641_v3 }
 0x127   : >> { %11703 = vmatmul.msk.f32.vlgmr.msra.gmra.mxu1 %vm434_vm0, %v13693_v40  ;;  %11754 = vmatmul.msk.f32.vlgmr.msra.gmra.mxu2 %vm434_vm0, %v13745_v9 }
 0x128   : >> { %11770 = vmatmul.msk.f32.vlgmr.msra.gmra.mxu3 %vm434_vm0, %v13693_v40  ;;  %v1131_v61 = vmax.f32 %v1115_v59, 0.0 }
 0x12a   : >> { %1147 = vst [vmem:[#allocation2] sm:$0xff] %v1131_v61  ;;  %v1379_v62 = vpop.f32.mrf.mxu2  ;;  %v13866_v61 = vld [vmem:[%s13406_s29 + $0x148] sm:$0xff] }
 0x12b   : >> { %v1512_v46 = vpop.f32.mrf.mxu3  ;;  %v1380_v63 = vadd.f32 %v1379_v62, %v1266_v55  ;;  %v1050_v36 = vpop.f32.mrf.mxu0 }
 0x12c   : >> { %v1269_v2 = vpop.f32.mrf.mxu1  ;;  %v1096_v5 = vadd.f32 %v1050_v36, %v13620_v53 }
 0x12d   : >> { %v13814_v6 = vadd.f32 %v1512_v46, %v1380_v63 }
 0x12e   : >> { %v1116_v3 = vadd.f32 %v13799_v51, %v1096_v5  ;;  %11669 = vmatmul.msk.f32.gmra.mxu0 %vm434_vm0, %v13654_v11 }
 0x12f   : >> { %11704 = vmatmul.msk.f32.gmra.mxu1 %vm434_vm0, %v13706_v48  ;;  %11755 = vmatmul.msk.f32.gmra.mxu2 %vm434_vm0, %v13758_v18 }
 0x130   : >> { %11771 = vmatmul.msk.f32.gmra.mxu3 %vm434_vm0, %v13706_v48  ;;  %v1132_v7 = vmax.f32 %v1116_v3, 0.0 }
 0x132   : >> { %1148 = vst [vmem:[#allocation2 + $0x8] sm:$0xff] %v1132_v7  ;;  %v1382_v8 = vpop.f32.mrf.mxu2 }
 0x133   : >> { %v1515_v53 = vpop.f32.mrf.mxu3  ;;  %v1383_v37 = vadd.f32 %v1382_v8, %v1269_v2  ;;  %v1053_v13 = vpop.f32.mrf.mxu0  ;;  %v13884_v8 = vld [vmem:[%s13406_s29 + $0x150] sm:$0xff] }
 0x134   : >> { %v1272_v14 = vpop.f32.mrf.mxu1  ;;  %v1097_v15 = vadd.f32 %v1053_v13, %v13630_v60 }
 0x135   : >> { %v13826_v16 = vadd.f32 %v1515_v53, %v1383_v37 }
 0x136   : >> { %v1117_v11 = vadd.f32 %v13799_v51, %v1097_v15  ;;  %11670 = vmatmul.msk.f32.gmra.mxu0 %vm434_vm0, %v13667_v19 }
 0x137   : >> { %11705 = vmatmul.msk.f32.gmra.mxu1 %vm434_vm0, %v13719_v56  ;;  %11756 = vmatmul.msk.f32.gmra.mxu2 %vm434_vm0, %v13771_v30 }
 0x138   : >> { %11772 = vmatmul.msk.f32.gmra.mxu3 %vm434_vm0, %v13719_v56  ;;  %v1133_v17 = vmax.f32 %v1117_v11, 0.0 }
 0x139   : >> { %v5741_v37 = vld [vmem:[#allocation2] ss:$2 sm:$0xff]  ;;  %v5745_v13 = vld [vmem:[#allocation2 + $0x1] ss:$2 sm:$0xff] }
 0x13a   : >> { %1149 = vst [vmem:[#allocation2 + $0x10] sm:$0xff] %v1133_v17  ;;  %v1385_v22 = vpop.f32.mrf.mxu2  ;;  %v5748_v11 = vmax.f32 %v5741_v37, %v5745_v13 }
 0x13b   : >> { %v1518_v60 = vpop.f32.mrf.mxu3  ;;  %v1386_v23 = vadd.f32 %v1385_v22, %v1272_v14  ;;  %v1056_v24 = vpop.f32.mrf.mxu0 }
 0x13c   : >> { %v1275_v25 = vpop.f32.mrf.mxu1  ;;  %v1098_v26 = vadd.f32 %v1056_v24, %v13643_v4 }
 0x13d   : >> { %v13838_v19 = vadd.f32 %v1518_v60, %v1386_v23  ;;  %v13900_v60 = vld [vmem:[%s17044_s1 + $0x20] sm:$0xff]  ;;  %v13905_v23 = vld [vmem:[%s17044_s1 + $0x30] sm:$0xff] }
 0x13e   : >> { %v1118_v29 = vadd.f32 %v13799_v51, %v1098_v26  ;;  %11671 = vmatmul.msk.f32.gmra.mxu0 %vm434_vm0, %v13680_v27  ;;  %v13851_v27 = vld [vmem:[%s13406_s29 + $0x140] sm:$0xff]  ;;  %2422 = vmatpush.msrb.mxu1 %v13905_v23 }
 0x13f   : >> { %11706 = vmatmul.msk.f32.gmra.mxu1 %vm434_vm0, %v13732_v0  ;;  %11757 = vmatmul.msk.f32.gmra.mxu2 %vm434_vm0, %v13784_v44 }
 0x140   : >> { %11773 = vmatmul.msk.f32.gmra.mxu3 %vm434_vm0, %v13732_v0  ;;  %v1134_v32 = vmax.f32 %v1118_v29, 0.0  ;;  %2273 = vmatpush.msrb.mxu0 %v13900_v60 }
 0x142   : >> { %1150 = vst [vmem:[#allocation2 + $0x18] sm:$0xff] %v1134_v32  ;;  %v1388_v38 = vpop.f32.mrf.mxu2 }
 0x143   : >> { %v1521_v4 = vpop.f32.mrf.mxu3  ;;  %v1389_v39 = vadd.f32 %v1388_v38, %v1275_v25  ;;  %v1059_v33 = vpop.f32.mrf.mxu0  ;;  %v13911_v38 = vld [vmem:[%s13406_s29 + $0x158] sm:$0xff] }
 0x144   : >> { %v1278_v42 = vpop.f32.mrf.mxu1  ;;  %v1099_v43 = vadd.f32 %v1059_v33, %v13656_v12 }
 0x145   : >> { %v13853_v47 = vadd.f32 %v1521_v4, %v1389_v39 }
 0x146   : >> { %v1119_v34 = vadd.f32 %v13799_v51, %v1099_v43  ;;  %11672 = vmatmul.msk.f32.gmra.mxu0 %vm434_vm0, %v13693_v40  ;;  %v11924_v40 = vld [vmem:[%s17044_s1 + $0x10] sm:$0xff] }
 0x147   : >> { %11707 = vmatmul.msk.f32.gmra.mxu1 %vm434_vm0, %v13745_v9  ;;  %11758 = vmatmul.msk.f32.gmra.mxu2 %vm434_vm0, %v13851_v27 }
 0x148   : >> { %11774 = vmatmul.msk.f32.gmra.mxu3 %vm434_vm0, %v13745_v9  ;;  %v1135_v12 = vmax.f32 %v1119_v34, 0.0 }
 0x149   : >> { %2790 = vmatpush.msrb.mxu3 %v11924_v40 }
 0x14a   : >> { %1151 = vst [vmem:[#allocation2 + $0x20] sm:$0xff] %v1135_v12  ;;  %v1391_v50 = vpop.f32.mrf.mxu2 }
 0x14b   : >> { %v1524_v52 = vpop.f32.mrf.mxu3  ;;  %v1392_v54 = vadd.f32 %v1391_v50, %v1278_v42  ;;  %v1062_v55 = vpop.f32.mrf.mxu0  ;;  %v13927_v50 = vld [vmem:[%s13406_s29 + $0x160] sm:$0xff] }
 0x14c   : >> { %v1281_v35 = vpop.f32.mrf.mxu1  ;;  %v1100_v59 = vadd.f32 %v1062_v55, %v13669_v20  ;;  %v5743_v55 = vld [vmem:[#allocation2 + $0x10] ss:$2 sm:$0x3f] }
 0x14d   : >> { %v13871_v62 = vadd.f32 %v1524_v52, %v1392_v54 }
 0x14e   : >> { %v1120_v46 = vadd.f32 %v13799_v51, %v1100_v59  ;;  %11673 = vmatmul.msk.f32.gmra.mxu0 %vm434_vm0, %v13706_v48 }
 0x14f   : >> { %11708 = vmatmul.msk.f32.gmra.mxu1 %vm434_vm0, %v13758_v18  ;;  %11759 = vmatmul.msk.f32.gmra.mxu2 %vm434_vm0, %v13866_v61 }
 0x150   : >> { %11775 = vmatmul.msk.f32.gmra.mxu3 %vm434_vm0, %v13758_v18  ;;  %v1136_v20 = vmax.f32 %v1120_v46, 0.0 }
 0x152   : >> { %1152 = vst [vmem:[#allocation2 + $0x28] sm:$0xff] %v1136_v20  ;;  %v1394_v63 = vpop.f32.mrf.mxu2 }
 0x153   : >> { %v1527_v36 = vpop.f32.mrf.mxu3  ;;  %v1395_v2 = vadd.f32 %v1394_v63, %v1281_v35  ;;  %v1065_v5 = vpop.f32.mrf.mxu0  ;;  %v5747_v35 = vld [vmem:[#allocation2 + $0x11] ss:$2 sm:$0x3f] }
 0x154   : >> { %v1284_v3 = vpop.f32.mrf.mxu1  ;;  %v1101_v7 = vadd.f32 %v1065_v5, %v13682_v28  ;;  %v5749_v46 = vmax.f32 %v5743_v55, %v5747_v35 }
 0x155   : >> { %v13886_v48 = vadd.f32 %v1527_v36, %v1395_v2 }
 0x156   : >> { %v1121_v53 = vadd.f32 %v13799_v51, %v1101_v7  ;;  %11674 = vmatmul.msk.f32.gmra.mxu0 %vm434_vm0, %v13719_v56 }
 0x157   : >> { %11709 = vmatmul.msk.f32.gmra.mxu1 %vm434_vm0, %v13771_v30  ;;  %11760 = vmatmul.msk.f32.gmra.mxu2 %vm434_vm0, %v13884_v8 }
 0x158   : >> { %11776 = vmatmul.msk.f32.gmra.mxu3 %vm434_vm0, %v13771_v30  ;;  %v1137_v28 = vmax.f32 %v1121_v53, 0.0  ;;  %v13942_v53 = vld [vmem:[%s13406_s29 + $0x168] sm:$0xff] }
 0x159   : >> { %v5751_v14 = vld [vmem:[#allocation2 + $0x20] ss:$2 sm:$0xff]  ;;  %v5755_v15 = vld [vmem:[#allocation2 + $0x21] ss:$2 sm:$0xff] }
 0x15a   : >> { %v5758_v17 = vmax.f32 %v5751_v14, %v5755_v15  ;;  %1153 = vst [vmem:[#allocation2 + $0x30] sm:$0xff] %v1137_v28  ;;  %v1397_v22 = vpop.f32.mrf.mxu2 }
 0x15b   : >> { %v1530_v56 = vpop.f32.mrf.mxu3  ;;  %v1398_v24 = vadd.f32 %v1397_v22, %v1284_v3  ;;  %v1068_v25 = vpop.f32.mrf.mxu0  ;;  %v13958_v22 = vld [vmem:[%s13406_s29 + $0x170] sm:$0xff] }
 0x15c   : >> { %v1287_v26 = vpop.f32.mrf.mxu1  ;;  %v5760_v29 = vmax.f32 %v5748_v11, %v5758_v17  ;;  %v1102_v32 = vadd.f32 %v1068_v25, %v13695_v41 }
 0x15d   : >> { %v13913_v4 = vadd.f32 %v1530_v56, %v1398_v24 }
 0x15e   : >> { %v1122_v39 = vadd.f32 %v13799_v51, %v1102_v32  ;;  %11675 = vmatmul.msk.f32.gmra.mxu0 %vm434_vm0, %v13732_v0  ;;  %5763 = vst.msk [vmem:[#allocation3] sm:$0xff] %vm5762_vm1, %v5760_v29 }
 0x15f   : >> { %11710 = vmatmul.msk.f32.gmra.mxu1 %vm434_vm0, %v13784_v44  ;;  %11761 = vmatmul.msk.f32.gmra.mxu2 %vm434_vm0, %v13911_v38 }
 0x160   : >> { %11777 = vmatmul.msk.f32.gmra.mxu3 %vm434_vm0, %v13784_v44  ;;  %v1138_v41 = vmax.f32 %v1122_v39, 0.0 }
 0x162   : >> { %1154 = vst [vmem:[#allocation2 + $0x38] sm:$0xff] %v1138_v41  ;;  %v1400_v33 = vpop.f32.mrf.mxu2 }
 0x163   : >> { %v1533_v42 = vpop.f32.mrf.mxu3  ;;  %v1401_v43 = vadd.f32 %v1400_v33, %v1287_v26  ;;  %v1071_v34 = vpop.f32.mrf.mxu0 }
 0x164   : >> { %v1290_v12 = vpop.f32.mrf.mxu1  ;;  %v1103_v0 = vadd.f32 %v1071_v34, %v13708_v49 }
 0x165   : >> { %v13929_v52 = vadd.f32 %v1533_v42, %v1401_v43 }
 0x166   : >> { %v1123_v54 = vadd.f32 %v13799_v51, %v1103_v0  ;;  %11676 = vmatmul.msk.f32.gmra.mxu0 %vm434_vm0, %v13745_v9 }
 0x167   : >> { %11711 = vmatmul.msk.f32.gmra.mxu1 %vm434_vm0, %v13851_v27  ;;  %11762 = vmatmul.msk.f32.gmra.mxu2 %vm434_vm0, %v13927_v50 }
 0x168   : >> { %11778 = vmatmul.msk.f32.gmra.mxu3 %vm434_vm0, %v13851_v27  ;;  %v1139_v49 = vmax.f32 %v1123_v54, 0.0 }
 0x169   : >> { %v5753_v59 = vld [vmem:[#allocation2 + $0x30] ss:$2 sm:$0x3f]  ;;  %v5757_v40 = vld [vmem:[#allocation2 + $0x31] ss:$2 sm:$0x3f] }
 0x16a   : >> { %v5759_v20 = vmax.f32 %v5753_v59, %v5757_v40  ;;  %1155 = vst [vmem:[#allocation2 + $0x40] sm:$0xff] %v1139_v49  ;;  %v1403_v63 = vpop.f32.mrf.mxu2 }
 0x16b   : >> { %v1536_v9 = vpop.f32.mrf.mxu3  ;;  %v1404_v36 = vadd.f32 %v1403_v63, %v1290_v12  ;;  %v1074_v2 = vpop.f32.mrf.mxu0 }
 0x16c   : >> { %v1293_v5 = vpop.f32.mrf.mxu1  ;;  %v5761_v3 = vmax.f32 %v5749_v46, %v5759_v20  ;;  %v1104_v7 = vadd.f32 %v1074_v2, %v13721_v57  ;;  %v12046_v2 = vld [vmem:[%s17044_s1 + $0x48] sm:$0xff] }
 0x16d   : >> { %v13944_v37 = vadd.f32 %v1536_v9, %v1404_v36  ;;  %v14003_v36 = vld [vmem:[%s13406_s29 + $0x188] sm:$0xff]  ;;  %3333 = vmatpush.msra.mxu3 %v12046_v2  ;;  %v14068_v2 = vld [vmem:[%s17045_s2] ss:$0 sm:$0xff] }
 0x16e   : >> { %v1124_v13 = vadd.f32 %v13799_v51, %v1104_v7  ;;  %11677 = vmatmul.msk.f32.gmra.mxu0 %vm434_vm0, %v13758_v18  ;;  %5765 = vst.msk [vmem:[#allocation3 + $0x8] sm:$0x3f] %vm5764_vm2, %v5761_v3 }
 0x16f   : >> { %11712 = vmatmul.msk.f32.gmra.mxu1 %vm434_vm0, %v13866_v61  ;;  %11763 = vmatmul.msk.f32.gmra.mxu2 %vm434_vm0, %v13942_v53 }
 0x170   : >> { %11779 = vmatmul.msk.f32.gmra.mxu3 %vm434_vm0, %v13866_v61  ;;  %v1140_v57 = vmax.f32 %v1124_v13, 0.0 }
 0x172   : >> { %1156 = vst [vmem:[#allocation2 + $0x48] sm:$0xff] %v1140_v57  ;;  %v1406_v28 = vpop.f32.mrf.mxu2 }
 0x173   : >> { %v1539_v14 = vpop.f32.mrf.mxu3  ;;  %v1407_v15 = vadd.f32 %v1406_v28, %v1293_v5  ;;  %v1077_v11 = vpop.f32.mrf.mxu0 }
 0x174   : >> { %v1296_v17 = vpop.f32.mrf.mxu1  ;;  %v1105_v18 = vadd.f32 %v1077_v11, %v13734_v1  ;;  %v14021_v11 = vld [vmem:[%s13406_s29 + $0x190] sm:$0xff] }
 0x175   : >> { %v13960_v56 = vadd.f32 %v1539_v14, %v1407_v15 }
 0x176   : >> { %v1125_v24 = vadd.f32 %v13799_v51, %v1105_v18  ;;  %11678 = vmatmul.msk.f32.gmra.mxu0 %vm434_vm0, %v13771_v30  ;;  %v13973_v30 = vld [vmem:[%s13406_s29 + $0x178] sm:$0xff] }
 0x177   : >> { %11713 = vmatmul.msk.f32.gmra.mxu1 %vm434_vm0, %v13884_v8  ;;  %11764 = vmatmul.msk.f32.gmra.mxu2 %vm434_vm0, %v13958_v22 }
 0x178   : >> { %11780 = vmatmul.msk.f32.gmra.mxu3 %vm434_vm0, %v13884_v8  ;;  %v1141_v1 = vmax.f32 %v1125_v24, 0.0 }
 0x179   : >> { %v5767_v24 = vld [vmem:[#allocation2 + $0x40] ss:$2 sm:$0xff] }
 0x17a   : >> { %1157 = vst [vmem:[#allocation2 + $0x50] sm:$0xff] %v1141_v1  ;;  %v1409_v25 = vpop.f32.mrf.mxu2  ;;  %v5771_v1 = vld [vmem:[#allocation2 + $0x41] ss:$2 sm:$0xff] }
 0x17b   : >> { %v1542_v26 = vpop.f32.mrf.mxu3  ;;  %v1410_v29 = vadd.f32 %v1409_v25, %v1296_v17  ;;  %v1080_v32 = vpop.f32.mrf.mxu0 }
 0x17c   : >> { %v1299_v39 = vpop.f32.mrf.mxu1  ;;  %v1106_v41 = vadd.f32 %v1080_v32, %v13747_v10 }
 0x17d   : >> { %v13975_v33 = vadd.f32 %v1542_v26, %v1410_v29  ;;  %v5774_v29 = vmax.f32 %v5767_v24, %v5771_v1 }
 0x17e   : >> { %v1126_v42 = vadd.f32 %v13799_v51, %v1106_v41  ;;  %11679 = vmatmul.msk.f32.gmra.mxu0 %vm434_vm0, %v13784_v44  ;;  %v13988_v44 = vld [vmem:[%s13406_s29 + $0x180] sm:$0xff] }
 0x17f   : >> { %11714 = vmatmul.msk.f32.gmra.mxu1 %vm434_vm0, %v13911_v38  ;;  %11765 = vmatmul.msk.f32.gmra.mxu2 %vm434_vm0, %v13973_v30 }
 0x180   : >> { %11781 = vmatmul.msk.f32.gmra.mxu3 %vm434_vm0, %v13911_v38  ;;  %v1142_v10 = vmax.f32 %v1126_v42, 0.0 }
 0x182   : >> { %1158 = vst [vmem:[#allocation2 + $0x58] sm:$0xff] %v1142_v10  ;;  %v1412_v43 = vpop.f32.mrf.mxu2 }
 0x183   : >> { %v1545_v34 = vpop.f32.mrf.mxu3  ;;  %v1413_v12 = vadd.f32 %v1412_v43, %v1299_v39  ;;  %v1083_v0 = vpop.f32.mrf.mxu0 }
 0x184   : >> { %v1302_v54 = vpop.f32.mrf.mxu1  ;;  %v1107_v55 = vadd.f32 %v1083_v0, %v13760_v21  ;;  %v14041_v0 = vld [vmem:[%s17044_s1 + $0x38] sm:$0xff] }
 0x185   : >> { %v13990_v35 = vadd.f32 %v1545_v34, %v1413_v12  ;;  %v14036_v12 = vld [vmem:[%s13406_s29 + $0x198] sm:$0xff]  ;;  %3184 = vmatpush.msra.mxu2 %v14041_v0 }
 0x186   : >> { %v1127_v49 = vadd.f32 %v13799_v51, %v1107_v55  ;;  %11680 = vmatmul.msk.f32.gmra.mxu0 %vm434_vm0, %v13851_v27 }
 0x187   : >> { %11715 = vmatmul.msk.f32.gmra.mxu1 %vm434_vm0, %v13927_v50  ;;  %11766 = vmatmul.msk.f32.gmra.mxu2 %vm434_vm0, %v13988_v44 }
 0x188   : >> { %11782 = vmatmul.msk.f32.gmra.mxu3 %vm434_vm0, %v13927_v50  ;;  %v1143_v21 = vmax.f32 %v1127_v49, 0.0  ;;  %3185 = vmatpush.msra.mxu2 %v13905_v23 }
 0x18a   : >> { %1159 = vst [vmem:[#allocation2 + $0x60] sm:$0xff] %v1143_v21  ;;  %v1415_v59 = vpop.f32.mrf.mxu2 }
 0x18b   : >> { %v1548_v40 = vpop.f32.mrf.mxu3  ;;  %v1416_v46 = vadd.f32 %v1415_v59, %v1302_v54  ;;  %v1086_v20 = vpop.f32.mrf.mxu0  ;;  %v2706_v54 = vld [vmem:[%s17044_s1 + $0x8] sm:$0xff] }
 0x18c   : >> { %v1305_v63 = vpop.f32.mrf.mxu1  ;;  %v1108_v9 = vadd.f32 %v1086_v20, %v13773_v31  ;;  %2902 = vmatpush.msra.mxu0 %v2706_v54 }
 0x18d   : >> { %v14008_v5 = vadd.f32 %v1548_v40, %v1416_v46 }
 0x18e   : >> { %v1128_v3 = vadd.f32 %v13799_v51, %v1108_v9  ;;  %11681 = vmatmul.msk.f32.gmra.mxu0 %vm434_vm0, %v13866_v61 }
 0x18f   : >> { %11716 = vmatmul.msk.f32.gmra.mxu1 %vm434_vm0, %v13942_v53  ;;  %11767 = vmatmul.msk.f32.gmra.mxu2 %vm434_vm0, %v14003_v36 }
 0x190   : >> { %11783 = vmatmul.msk.f32.gmra.mxu3 %vm434_vm0, %v13942_v53  ;;  %v1144_v31 = vmax.f32 %v1128_v3, 0.0  ;;  %v14071_v3 = vld [vmem:[%s13406_s29 + $0x1a0] sm:$0xff] }
 0x192   : >> { %1160 = vst [vmem:[#allocation2 + $0x68] sm:$0xff] %v1144_v31  ;;  %v1418_v7 = vpop.f32.mrf.mxu2 }
 0x193   : >> { %v1551_v13 = vpop.f32.mrf.mxu3  ;;  %v1419_v57 = vadd.f32 %v1418_v7, %v1305_v63  ;;  %v1089_v28 = vpop.f32.mrf.mxu0  ;;  %v5773_v7 = vld [vmem:[#allocation2 + $0x51] ss:$2 sm:$0x3f] }
 0x194   : >> { %v1308_v14 = vpop.f32.mrf.mxu1  ;;  %v1109_v15 = vadd.f32 %v1089_v28, %v13786_v45 }
 0x195   : >> { %v14023_v17 = vadd.f32 %v1551_v13, %v1419_v57 }
 0x196   : >> { %v1129_v18 = vadd.f32 %v13799_v51, %v1109_v15  ;;  %11682 = vmatmul.msk.f32.gmra.mxu0 %vm434_vm0, %v13884_v8 }
 0x197   : >> { %11717 = vmatmul.msk.f32.gmra.mxu1 %vm434_vm0, %v13958_v22  ;;  %11768 = vmatmul.msk.f32.gmra.mxu2 %vm434_vm0, %v14021_v11 }
 0x198   : >> { %11784 = vmatmul.msk.f32.gmra.mxu3 %vm434_vm0, %v13958_v22  ;;  %v1145_v45 = vmax.f32 %v1129_v18, 0.0 }
 0x199   : >> { %v5777_v25 = vld [vmem:[#allocation2 + $0x60] ss:$2 sm:$0xff]  ;;  %v5781_v26 = vld [vmem:[#allocation2 + $0x61] ss:$2 sm:$0xff] }
 0x19a   : >> { %v5784_v32 = vmax.f32 %v5777_v25, %v5781_v26  ;;  %1161 = vst [vmem:[#allocation2 + $0x70] sm:$0xff] %v1145_v45  ;;  %v1421_v39 = vpop.f32.mrf.mxu2  ;;  %v14088_v26 = vld [vmem:[%s13406_s29 + $0x1a8] sm:$0xff] }
 0x19b   : >> { %v1554_v41 = vpop.f32.mrf.mxu3  ;;  %v1422_v42 = vadd.f32 %v1421_v39, %v1308_v14  ;;  %v1092_v10 = vpop.f32.mrf.mxu0 }
 0x19c   : >> { %v1311_v43 = vpop.f32.mrf.mxu1  ;;  %v1110_v34 = vadd.f32 %v1092_v10, %v13802_v58  ;;  %v5786_v55 = vmax.f32 %v5774_v29, %v5784_v32  ;;  %v11976_v58 = vld [vmem:[%s17044_s1 + $0x28] sm:$0xff] }
 0x19d   : >> { %v14046_v49 = vadd.f32 %v1554_v41, %v1422_v42  ;;  %3035 = vmatpush.msra.mxu1 %v11976_v58 }
 0x19e   : >> { %v1130_v21 = vadd.f32 %v13799_v51, %v1110_v34  ;;  %11683 = vmatmul.msk.f32.gmra.mxu0 %vm434_vm0, %v13911_v38  ;;  %5788 = vst.msk [vmem:[#allocation3 + $0xe] sm:$0xff] %vm5762_vm1, %v5786_v55 }
 0x19f   : >> { %11718 = vmatmul.msk.f32.gmra.mxu1 %vm434_vm0, %v13973_v30  ;;  %11769 = vmatmul.msk.f32.gmra.mxu2 %vm434_vm0, %v14036_v12 }
 0x1a0   : >> { %11785 = vmatmul.msk.f32.gmra.mxu3 %vm434_vm0, %v13973_v30  ;;  %v1146_v59 = vmax.f32 %v1130_v21, 0.0  ;;  %3036 = vmatpush.msra.mxu1 %v13900_v60  ;;  %v5769_v60 = vld [vmem:[#allocation2 + $0x50] ss:$2 sm:$0x3f] }
 0x1a1   : >> { %v5775_v28 = vmax.f32 %v5769_v60, %v5773_v7 }
 0x1a2   : >> { %1162 = vst [vmem:[#allocation2 + $0x78] sm:$0xff] %v1146_v59  ;;  %v1424_v51 = vpop.f32.mrf.mxu2 }
 0x1a3   : >> { %v1557_v40 = vpop.f32.mrf.mxu3  ;;  %v1425_v46 = vadd.f32 %v1424_v51, %v1311_v43  ;;  %v1661_v20 = vpop.f32.mrf.mxu0 }
 0x1a4   : >> { %v1810_v63 = vpop.f32.mrf.mxu1  ;;  %v1709_v9 = vadd.f32 %v1661_v20, %v13814_v6  ;;  %v14119_v20 = vld [vmem:[%s13406_s29 + $0x1b8] sm:$0xff] }
 0x1a5   : >> { %v14073_v31 = vadd.f32 %v1557_v40, %v1425_v46 }
 0x1a6   : >> { %v1858_v23 = vadd.f32 %v1810_v63, %v1709_v9  ;;  %11805 = vmatmul.msk.f32.vlgmr.msrb.gmra.mxu0 %vm434_vm0, %v13851_v27 }
 0x1a7   : >> { %11840 = vmatmul.msk.f32.vlgmr.msrb.gmra.mxu1 %vm434_vm0, %v13927_v50  ;;  %11875 = vmatmul.msk.f32.vlgmr.msrb.gmra.mxu2 %vm434_vm0, %v13988_v44 }
 0x1a8   : >> { %11926 = vmatmul.msk.f32.vlgmr.msrb.gmra.mxu3 %vm434_vm0, %v14071_v3  ;;  %v1878_v6 = vadd.f32 %v14068_v2, %v1858_v23  ;;  %3798 = vmatpush.msrb.mxu2 %v11976_v58 }
 0x1a9   : >> { %3665 = vmatpush.msrb.mxu1 %v2706_v54  ;;  %v5779_v13 = vld [vmem:[#allocation2 + $0x70] ss:$2 sm:$0x3f]  ;;  %v5783_v57 = vld [vmem:[#allocation2 + $0x71] ss:$2 sm:$0x3f] }
 0x1aa   : >> { %v5785_v27 = vmax.f32 %v5779_v13, %v5783_v57  ;;  %v1894_v14 = vmax.f32 %v1878_v6, 0.0  ;;  %v2029_v15 = vpop.f32.mrf.mxu2  ;;  %v14104_v54 = vld [vmem:[%s13406_s29 + $0x1b0] sm:$0xff]  ;;  %v14134_v57 = vld [vmem:[%s13406_s29 + $0x1c0] sm:$0xff] }
 0x1ab   : >> { %v2142_v18 = vpop.f32.mrf.mxu3  ;;  %v1664_v1 = vpop.f32.mrf.mxu0 }
 0x1ac   : >> { %v14084_v24 = vadd.f32 %v2142_v18, %v2029_v15  ;;  %v1813_v45 = vpop.f32.mrf.mxu1  ;;  %1910 = vst [vmem:[#allocation2 + $0x80] sm:$0xff] %v1894_v14  ;;  %v1710_v25 = vadd.f32 %v1664_v1, %v13826_v16  ;;  %v5787_v29 = vmax.f32 %v5775_v28, %v5785_v27 }
 0x1ae   : >> { %v1859_v32 = vadd.f32 %v1813_v45, %v1710_v25  ;;  %11806 = vmatmul.msk.f32.gmra.mxu0 %vm434_vm0, %v13866_v61  ;;  %5789 = vst.msk [vmem:[#allocation3 + $0x16] sm:$0x3f] %vm5764_vm2, %v5787_v29  ;;  %v14149_v25 = vld [vmem:[%s13406_s29 + $0x1c8] sm:$0xff]  ;;  %v12045_v29 = vld [vmem:[%s17044_s1 + $0x40] sm:$0xff] }
 0x1af   : >> { %11841 = vmatmul.msk.f32.gmra.mxu1 %vm434_vm0, %v13942_v53  ;;  %11876 = vmatmul.msk.f32.gmra.mxu2 %vm434_vm0, %v14003_v36 }
 0x1b0   : >> { %11927 = vmatmul.msk.f32.gmra.mxu3 %vm434_vm0, %v14088_v26  ;;  %v1879_v16 = vadd.f32 %v14068_v2, %v1859_v32 }
 0x1b1   : >> { %3334 = vmatpush.msra.mxu3 %v12045_v29 }
 0x1b2   : >> { %v1895_v39 = vmax.f32 %v1879_v16, 0.0  ;;  %v2032_v41 = vpop.f32.mrf.mxu2 }
 0x1b3   : >> { %v2145_v42 = vpop.f32.mrf.mxu3  ;;  %v1667_v43 = vpop.f32.mrf.mxu0  ;;  %3947 = vmatpush.msrb.mxu3 %v14041_v0 }
 0x1b4   : >> { %v14100_v10 = vadd.f32 %v2145_v42, %v2032_v41  ;;  %v1816_v61 = vpop.f32.mrf.mxu1  ;;  %1911 = vst [vmem:[#allocation2 + $0x88] sm:$0xff] %v1895_v39  ;;  %v1711_v34 = vadd.f32 %v1667_v43, %v13838_v19 }
 0x1b6   : >> { %v1860_v55 = vadd.f32 %v1816_v61, %v1711_v34  ;;  %11807 = vmatmul.msk.f32.gmra.mxu0 %vm434_vm0, %v13884_v8  ;;  %v14168_v34 = vld [vmem:[%s13406_s29 + $0x1d0] sm:$0xff] }
 0x1b7   : >> { %11842 = vmatmul.msk.f32.gmra.mxu1 %vm434_vm0, %v13958_v22  ;;  %11877 = vmatmul.msk.f32.gmra.mxu2 %vm434_vm0, %v14021_v11 }
 0x1b8   : >> { %11928 = vmatmul.msk.f32.gmra.mxu3 %vm434_vm0, %v14104_v54  ;;  %v1880_v58 = vadd.f32 %v14068_v2, %v1860_v55 }
 0x1ba   : >> { %v1896_v21 = vmax.f32 %v1880_v58, 0.0  ;;  %v2035_v19 = vpop.f32.mrf.mxu2 }
 0x1bb   : >> { %v2148_v59 = vpop.f32.mrf.mxu3  ;;  %v1670_v40 = vpop.f32.mrf.mxu0  ;;  %v5791_v58 = vld [vmem:[#allocation2 + $0x80] ss:$2 sm:$0xff] }
 0x1bc   : >> { %v14115_v51 = vadd.f32 %v2148_v59, %v2035_v19  ;;  %v1819_v46 = vpop.f32.mrf.mxu1  ;;  %1912 = vst [vmem:[#allocation2 + $0x90] sm:$0xff] %v1896_v21  ;;  %v1712_v8 = vadd.f32 %v1670_v40, %v13853_v47 }
 0x1be   : >> { %v1861_v63 = vadd.f32 %v1819_v46, %v1712_v8  ;;  %11808 = vmatmul.msk.f32.gmra.mxu0 %vm434_vm0, %v13911_v38 }
 0x1bf   : >> { %11843 = vmatmul.msk.f32.gmra.mxu1 %vm434_vm0, %v13973_v30  ;;  %11878 = vmatmul.msk.f32.gmra.mxu2 %vm434_vm0, %v14036_v12 }
 0x1c0   : >> { %11929 = vmatmul.msk.f32.gmra.mxu3 %vm434_vm0, %v14119_v20  ;;  %v1881_v9 = vadd.f32 %v14068_v2, %v1861_v63 }
 0x1c2   : >> { %v1897_v23 = vmax.f32 %v1881_v9, 0.0  ;;  %v2038_v47 = vpop.f32.mrf.mxu2 }
 0x1c3   : >> { %v2151_v60 = vpop.f32.mrf.mxu3  ;;  %v1673_v6 = vpop.f32.mrf.mxu0 }
 0x1c4   : >> { %v14130_v7 = vadd.f32 %v2151_v60, %v2038_v47  ;;  %v1822_v13 = vpop.f32.mrf.mxu1  ;;  %1913 = vst [vmem:[#allocation2 + $0x98] sm:$0xff] %v1897_v23  ;;  %v1713_v38 = vadd.f32 %v1673_v6, %v13871_v62  ;;  %v14183_v60 = vld [vmem:[%s13406_s29 + $0x1d8] sm:$0xff]  ;;  %v2705_v6 = vld [vmem:[%s17044_s1] sm:$0xff] }
 0x1c5   : >> { %2903 = vmatpush.msra.mxu0 %v2705_v6  ;;  %3666 = vmatpush.msrb.mxu1 %v2705_v6  ;;  %v14233_v6 = vld [vmem:[%s13406_s29 + $0x1f0] sm:$0xff] }
 0x1c6   : >> { %v1862_v28 = vadd.f32 %v1822_v13, %v1713_v38  ;;  %11809 = vmatmul.msk.f32.gmra.mxu0 %vm434_vm0, %v13927_v50 }
 0x1c7   : >> { %11844 = vmatmul.msk.f32.gmra.mxu1 %vm434_vm0, %v13988_v44  ;;  %11879 = vmatmul.msk.f32.gmra.mxu2 %vm434_vm0, %v14071_v3 }
 0x1c8   : >> { %11930 = vmatmul.msk.f32.gmra.mxu3 %vm434_vm0, %v14134_v57  ;;  %v1882_v27 = vadd.f32 %v14068_v2, %v1862_v28 }
 0x1ca   : >> { %v1898_v14 = vmax.f32 %v1882_v27, 0.0  ;;  %v2041_v62 = vpop.f32.mrf.mxu2 }
 0x1cb   : >> { %v2154_v15 = vpop.f32.mrf.mxu3  ;;  %v1676_v1 = vpop.f32.mrf.mxu0 }
 0x1cc   : >> { %v14145_v18 = vadd.f32 %v2154_v15, %v2041_v62  ;;  %v1825_v45 = vpop.f32.mrf.mxu1  ;;  %1914 = vst [vmem:[#allocation2 + $0xa0] sm:$0xff] %v1898_v14  ;;  %v1714_v50 = vadd.f32 %v1676_v1, %v13886_v48 }
 0x1ce   : >> { %v1863_v32 = vadd.f32 %v1825_v45, %v1714_v50  ;;  %11810 = vmatmul.msk.f32.gmra.mxu0 %vm434_vm0, %v13942_v53  ;;  %v14202_v45 = vld [vmem:[%s13406_s29 + $0x1e0] sm:$0xff] }
 0x1cf   : >> { %11845 = vmatmul.msk.f32.gmra.mxu1 %vm434_vm0, %v14003_v36  ;;  %11880 = vmatmul.msk.f32.gmra.mxu2 %vm434_vm0, %v14088_v26 }
 0x1d0   : >> { %11931 = vmatmul.msk.f32.gmra.mxu3 %vm434_vm0, %v14149_v25  ;;  %v1883_v48 = vadd.f32 %v14068_v2, %v1863_v32  ;;  %v5793_v32 = vld [vmem:[#allocation2 + $0x90] ss:$2 sm:$0x3f] }
 0x1d2   : >> { %v1899_v16 = vmax.f32 %v1883_v48, 0.0  ;;  %v2044_v39 = vpop.f32.mrf.mxu2 }
 0x1d3   : >> { %v2157_v41 = vpop.f32.mrf.mxu3  ;;  %v1679_v43 = vpop.f32.mrf.mxu0 }
 0x1d4   : >> { %v14164_v42 = vadd.f32 %v2157_v41, %v2044_v39  ;;  %v1828_v53 = vpop.f32.mrf.mxu1  ;;  %1915 = vst [vmem:[#allocation2 + $0xa8] sm:$0xff] %v1899_v16  ;;  %v1715_v61 = vadd.f32 %v1679_v43, %v13913_v4  ;;  %v5795_v4 = vld [vmem:[#allocation2 + $0x81] ss:$2 sm:$0xff] }
 0x1d5   : >> { %v5798_v9 = vmax.f32 %v5791_v58, %v5795_v4 }
 0x1d6   : >> { %v1864_v55 = vadd.f32 %v1828_v53, %v1715_v61  ;;  %11811 = vmatmul.msk.f32.gmra.mxu0 %vm434_vm0, %v13958_v22 }
 0x1d7   : >> { %11846 = vmatmul.msk.f32.gmra.mxu1 %vm434_vm0, %v14021_v11  ;;  %11881 = vmatmul.msk.f32.gmra.mxu2 %vm434_vm0, %v14104_v54 }
 0x1d8   : >> { %11932 = vmatmul.msk.f32.gmra.mxu3 %vm434_vm0, %v14168_v34  ;;  %v1884_v0 = vadd.f32 %v14068_v2, %v1864_v55 }
 0x1da   : >> { %v1900_v21 = vmax.f32 %v1884_v0, 0.0  ;;  %v2047_v19 = vpop.f32.mrf.mxu2 }
 0x1db   : >> { %v2160_v59 = vpop.f32.mrf.mxu3  ;;  %v5801_v40 = vld [vmem:[#allocation2 + $0xa0] ss:$2 sm:$0xff]  ;;  %v5805_v46 = vld [vmem:[#allocation2 + $0xa1] ss:$2 sm:$0xff]  ;;  %v1682_v8 = vpop.f32.mrf.mxu0 }
 0x1dc   : >> { %v14179_v22 = vadd.f32 %v2160_v59, %v2047_v19  ;;  %v1831_v63 = vpop.f32.mrf.mxu1  ;;  %v5808_v23 = vmax.f32 %v5801_v40, %v5805_v46  ;;  %1916 = vst [vmem:[#allocation2 + $0xb0] sm:$0xff] %v1900_v21  ;;  %v1716_v47 = vadd.f32 %v1682_v8, %v13929_v52  ;;  %v14217_v21 = vld [vmem:[%s13406_s29 + $0x1e8] sm:$0xff] }
 0x1de   : >> { %v1865_v13 = vadd.f32 %v1831_v63, %v1716_v47  ;;  %11812 = vmatmul.msk.f32.gmra.mxu0 %vm434_vm0, %v13973_v30  ;;  %v5810_v38 = vmax.f32 %v5798_v9, %v5808_v23 }
 0x1df   : >> { %11847 = vmatmul.msk.f32.gmra.mxu1 %vm434_vm0, %v14036_v12  ;;  %11882 = vmatmul.msk.f32.gmra.mxu2 %vm434_vm0, %v14119_v20 }
 0x1e0   : >> { %11933 = vmatmul.msk.f32.gmra.mxu3 %vm434_vm0, %v14183_v60  ;;  %v1885_v52 = vadd.f32 %v14068_v2, %v1865_v13  ;;  %5812 = vst.msk [vmem:[#allocation3 + $0x1c] sm:$0xff] %vm5762_vm1, %v5810_v38 }
 0x1e2   : >> { %v1901_v28 = vmax.f32 %v1885_v52, 0.0  ;;  %v2050_v27 = vpop.f32.mrf.mxu2 }
 0x1e3   : >> { %v2163_v14 = vpop.f32.mrf.mxu3  ;;  %v1685_v30 = vpop.f32.mrf.mxu0 }
 0x1e4   : >> { %v14198_v62 = vadd.f32 %v2163_v14, %v2050_v27  ;;  %v1834_v15 = vpop.f32.mrf.mxu1  ;;  %1917 = vst [vmem:[#allocation2 + $0xb8] sm:$0xff] %v1901_v28  ;;  %v1717_v1 = vadd.f32 %v1685_v30, %v13944_v37  ;;  %v5797_v37 = vld [vmem:[#allocation2 + $0x91] ss:$2 sm:$0x3f] }
 0x1e5   : >> { %v5799_v0 = vmax.f32 %v5793_v32, %v5797_v37 }
 0x1e6   : >> { %v1866_v50 = vadd.f32 %v1834_v15, %v1717_v1  ;;  %11813 = vmatmul.msk.f32.gmra.mxu0 %vm434_vm0, %v13988_v44  ;;  %v14248_v1 = vld [vmem:[%s13406_s29 + $0x1f8] sm:$0xff] }
 0x1e7   : >> { %11848 = vmatmul.msk.f32.gmra.mxu1 %vm434_vm0, %v14071_v3  ;;  %11883 = vmatmul.msk.f32.gmra.mxu2 %vm434_vm0, %v14134_v57 }
 0x1e8   : >> { %11934 = vmatmul.msk.f32.gmra.mxu3 %vm434_vm0, %v14202_v45  ;;  %v1886_v29 = vadd.f32 %v14068_v2, %v1866_v50 }
 0x1ea   : >> { %v1902_v48 = vmax.f32 %v1886_v29, 0.0  ;;  %v2053_v16 = vpop.f32.mrf.mxu2 }
 0x1eb   : >> { %v2166_v39 = vpop.f32.mrf.mxu3  ;;  %v5803_v41 = vld [vmem:[#allocation2 + $0xb0] ss:$2 sm:$0x3f]  ;;  %v5807_v43 = vld [vmem:[#allocation2 + $0xb1] ss:$2 sm:$0x3f]  ;;  %v1688_v61 = vpop.f32.mrf.mxu0 }
 0x1ec   : >> { %v14213_v53 = vadd.f32 %v2166_v39, %v2053_v16  ;;  %v1837_v55 = vpop.f32.mrf.mxu1  ;;  %v5809_v58 = vmax.f32 %v5803_v41, %v5807_v43  ;;  %1918 = vst [vmem:[#allocation2 + $0xc0] sm:$0xff] %v1902_v48  ;;  %v1718_v4 = vadd.f32 %v1688_v61, %v13960_v56  ;;  %v14263_v43 = vld [vmem:[%s13406_s29 + $0x200] sm:$0xff] }
 0x1ee   : >> { %v1867_v19 = vadd.f32 %v1837_v55, %v1718_v4  ;;  %11814 = vmatmul.msk.f32.gmra.mxu0 %vm434_vm0, %v14003_v36  ;;  %v5811_v59 = vmax.f32 %v5799_v0, %v5809_v58 }
 0x1ef   : >> { %11849 = vmatmul.msk.f32.gmra.mxu1 %vm434_vm0, %v14088_v26  ;;  %11884 = vmatmul.msk.f32.gmra.mxu2 %vm434_vm0, %v14149_v25 }
 0x1f0   : >> { %11935 = vmatmul.msk.f32.gmra.mxu3 %vm434_vm0, %v14217_v21  ;;  %v1887_v40 = vadd.f32 %v14068_v2, %v1867_v19  ;;  %5813 = vst.msk [vmem:[#allocation3 + $0x24] sm:$0x3f] %vm5764_vm2, %v5811_v59 }
 0x1f2   : >> { %v1903_v56 = vmax.f32 %v1887_v40, 0.0  ;;  %v2056_v46 = vpop.f32.mrf.mxu2 }
 0x1f3   : >> { %v2169_v8 = vpop.f32.mrf.mxu3  ;;  %v1691_v9 = vpop.f32.mrf.mxu0 }
 0x1f4   : >> { %v14229_v63 = vadd.f32 %v2169_v8, %v2056_v46  ;;  %v1840_v23 = vpop.f32.mrf.mxu1  ;;  %1919 = vst [vmem:[#allocation2 + $0xc8] sm:$0xff] %v1903_v56  ;;  %v1719_v47 = vadd.f32 %v1691_v9, %v13975_v33  ;;  %v14278_v56 = vld [vmem:[%s13406_s29 + $0x208] sm:$0xff] }
 0x1f6   : >> { %v1868_v13 = vadd.f32 %v1840_v23, %v1719_v47  ;;  %11815 = vmatmul.msk.f32.gmra.mxu0 %vm434_vm0, %v14021_v11 }
 0x1f7   : >> { %11850 = vmatmul.msk.f32.gmra.mxu1 %vm434_vm0, %v14104_v54  ;;  %11885 = vmatmul.msk.f32.gmra.mxu2 %vm434_vm0, %v14168_v34 }
 0x1f8   : >> { %11936 = vmatmul.msk.f32.gmra.mxu3 %vm434_vm0, %v14233_v6  ;;  %v1888_v38 = vadd.f32 %v14068_v2, %v1868_v13 }
 0x1fa   : >> { %v1904_v52 = vmax.f32 %v1888_v38, 0.0  ;;  %v2059_v33 = vpop.f32.mrf.mxu2 }
 0x1fb   : >> { %v2172_v28 = vpop.f32.mrf.mxu3  ;;  %v1694_v14 = vpop.f32.mrf.mxu0 }
 0x1fc   : >> { %v14244_v27 = vadd.f32 %v2172_v28, %v2059_v33  ;;  %v1843_v30 = vpop.f32.mrf.mxu1  ;;  %1920 = vst [vmem:[#allocation2 + $0xd0] sm:$0xff] %v1904_v52  ;;  %v1720_v15 = vadd.f32 %v1694_v14, %v13990_v35  ;;  %v14296_v28 = vld [vmem:[%s13406_s29 + $0x210] sm:$0xff] }
 0x1fe   : >> { %v1869_v50 = vadd.f32 %v1843_v30, %v1720_v15  ;;  %11816 = vmatmul.msk.f32.gmra.mxu0 %vm434_vm0, %v14036_v12  ;;  %v5815_v15 = vld [vmem:[#allocation2 + $0xc0] ss:$2 sm:$0xff] }
 0x1ff   : >> { %11851 = vmatmul.msk.f32.gmra.mxu1 %vm434_vm0, %v14119_v20  ;;  %11886 = vmatmul.msk.f32.gmra.mxu2 %vm434_vm0, %v14183_v60 }
 0x200   : >> { %11937 = vmatmul.msk.f32.gmra.mxu3 %vm434_vm0, %v14248_v1  ;;  %v1889_v29 = vadd.f32 %v14068_v2, %v1869_v50 }
 0x202   : >> { %v1905_v32 = vmax.f32 %v1889_v29, 0.0  ;;  %v2062_v35 = vpop.f32.mrf.mxu2 }
 0x203   : >> { %v2175_v37 = vpop.f32.mrf.mxu3  ;;  %v1697_v16 = vpop.f32.mrf.mxu0 }
 0x204   : >> { %v14259_v48 = vadd.f32 %v2175_v37, %v2062_v35  ;;  %v1846_v39 = vpop.f32.mrf.mxu1  ;;  %1921 = vst [vmem:[#allocation2 + $0xd8] sm:$0xff] %v1905_v32  ;;  %v1721_v41 = vadd.f32 %v1697_v16, %v14008_v5 }
 0x206   : >> { %v1870_v61 = vadd.f32 %v1846_v39, %v1721_v41  ;;  %11817 = vmatmul.msk.f32.gmra.mxu0 %vm434_vm0, %v14071_v3 }
 0x207   : >> { %11852 = vmatmul.msk.f32.gmra.mxu1 %vm434_vm0, %v14134_v57  ;;  %11887 = vmatmul.msk.f32.gmra.mxu2 %vm434_vm0, %v14202_v45 }
 0x208   : >> { %11938 = vmatmul.msk.f32.gmra.mxu3 %vm434_vm0, %v14263_v43  ;;  %v1890_v55 = vadd.f32 %v14068_v2, %v1870_v61 }
 0x20a   : >> { %v1906_v0 = vmax.f32 %v1890_v55, 0.0  ;;  %v2065_v5 = vpop.f32.mrf.mxu2 }
 0x20b   : >> { %v2178_v58 = vpop.f32.mrf.mxu3  ;;  %v1700_v19 = vpop.f32.mrf.mxu0 }
 0x20c   : >> { %v14274_v4 = vadd.f32 %v2178_v58, %v2065_v5  ;;  %v1849_v59 = vpop.f32.mrf.mxu1  ;;  %1922 = vst [vmem:[#allocation2 + $0xe0] sm:$0xff] %v1906_v0  ;;  %v1722_v40 = vadd.f32 %v1700_v19, %v14023_v17  ;;  %v12097_v17 = vld [vmem:[%s17044_s1 + $0x18] sm:$0xff] }
 0x20d   : >> { %3552 = vmatpush.msrb.mxu0 %v12097_v17  ;;  %v14311_v5 = vld [vmem:[%s13406_s29 + $0x218] sm:$0xff] }
 0x20e   : >> { %v1871_v46 = vadd.f32 %v1849_v59, %v1722_v40  ;;  %11818 = vmatmul.msk.f32.gmra.mxu0 %vm434_vm0, %v14088_v26 }
 0x20f   : >> { %11853 = vmatmul.msk.f32.gmra.mxu1 %vm434_vm0, %v14149_v25  ;;  %11888 = vmatmul.msk.f32.gmra.mxu2 %vm434_vm0, %v14217_v21 }
 0x210   : >> { %11939 = vmatmul.msk.f32.gmra.mxu3 %vm434_vm0, %v14278_v56  ;;  %v1891_v8 = vadd.f32 %v14068_v2, %v1871_v46 }
 0x212   : >> { %v1907_v9 = vmax.f32 %v1891_v8, 0.0  ;;  %v2068_v23 = vpop.f32.mrf.mxu2 }
 0x213   : >> { %v2181_v47 = vpop.f32.mrf.mxu3  ;;  %v1703_v38 = vpop.f32.mrf.mxu0 }
 0x214   : >> { %v14292_v13 = vadd.f32 %v2181_v47, %v2068_v23  ;;  %v1852_v52 = vpop.f32.mrf.mxu1  ;;  %1923 = vst [vmem:[#allocation2 + $0xe8] sm:$0xff] %v1907_v9  ;;  %v1723_v33 = vadd.f32 %v1703_v38, %v14046_v49  ;;  %v5819_v49 = vld [vmem:[#allocation2 + $0xc1] ss:$2 sm:$0xff]  ;;  %v5821_v38 = vld [vmem:[#allocation2 + $0xd1] ss:$2 sm:$0x3f] }
 0x215   : >> { %v5822_v61 = vmax.f32 %v5815_v15, %v5819_v49 }
 0x216   : >> { %v1872_v14 = vadd.f32 %v1852_v52, %v1723_v33  ;;  %11819 = vmatmul.msk.f32.gmra.mxu0 %vm434_vm0, %v14104_v54 }
 0x217   : >> { %11854 = vmatmul.msk.f32.gmra.mxu1 %vm434_vm0, %v14168_v34  ;;  %11889 = vmatmul.msk.f32.gmra.mxu2 %vm434_vm0, %v14233_v6 }
 0x218   : >> { %11940 = vmatmul.msk.f32.gmra.mxu3 %vm434_vm0, %v14296_v28  ;;  %v1892_v30 = vadd.f32 %v14068_v2, %v1872_v14 }
 0x21a   : >> { %v1908_v50 = vmax.f32 %v1892_v30, 0.0  ;;  %v2071_v29 = vpop.f32.mrf.mxu2 }
 0x21b   : >> { %v2184_v32 = vpop.f32.mrf.mxu3  ;;  %v5825_v35 = vld [vmem:[#allocation2 + $0xe0] ss:$2 sm:$0xff]  ;;  %v5829_v37 = vld [vmem:[#allocation2 + $0xe1] ss:$2 sm:$0xff]  ;;  %v1706_v39 = vpop.f32.mrf.mxu0 }
 0x21c   : >> { %v14307_v16 = vadd.f32 %v2184_v32, %v2071_v29  ;;  %v1855_v41 = vpop.f32.mrf.mxu1  ;;  %v5832_v55 = vmax.f32 %v5825_v35, %v5829_v37  ;;  %1924 = vst [vmem:[#allocation2 + $0xf0] sm:$0xff] %v1908_v50  ;;  %v1724_v0 = vadd.f32 %v1706_v39, %v14073_v31 }
 0x21e   : >> { %v1873_v58 = vadd.f32 %v1855_v41, %v1724_v0  ;;  %11820 = vmatmul.msk.f32.gmra.mxu0 %vm434_vm0, %v14119_v20  ;;  %v5834_v19 = vmax.f32 %v5822_v61, %v5832_v55 }
 0x21f   : >> { %11855 = vmatmul.msk.f32.gmra.mxu1 %vm434_vm0, %v14183_v60  ;;  %11890 = vmatmul.msk.f32.gmra.mxu2 %vm434_vm0, %v14248_v1 }
 0x220   : >> { %11941 = vmatmul.msk.f32.gmra.mxu3 %vm434_vm0, %v14311_v5  ;;  %v1893_v59 = vadd.f32 %v14068_v2, %v1873_v58  ;;  %5836 = vst.msk [vmem:[#allocation3 + $0x2a] sm:$0xff] %vm5762_vm1, %v5834_v19  ;;  %v5817_v2 = vld [vmem:[#allocation2 + $0xd0] ss:$2 sm:$0x3f] }
 0x221   : >> { %v5823_v29 = vmax.f32 %v5817_v2, %v5821_v38 }
 0x222   : >> { %v1909_v31 = vmax.f32 %v1893_v59, 0.0  ;;  %v2074_v40 = vpop.f32.mrf.mxu2 }
 0x223   : >> { %v2187_v46 = vpop.f32.mrf.mxu3  ;;  %v2275_v9 = vpop.f32.mrf.mxu0 }
 0x224   : >> { %v14323_v8 = vadd.f32 %v2187_v46, %v2074_v40  ;;  %v2424_v23 = vpop.f32.mrf.mxu1  ;;  %1925 = vst [vmem:[#allocation2 + $0xf8] sm:$0xff] %v1909_v31  ;;  %v2323_v47 = vadd.f32 %v2275_v9, %v14084_v24  ;;  %v14337_v24 = vld [vmem:[%s17045_s2] ss:$0 sm:$0xff] }
 0x226   : >> { %11942 = vmatmul.msk.f32.vlgmr.msra.gmra.mxu0 %vm434_vm0, %v13988_v44  ;;  %v2472_v52 = vadd.f32 %v2424_v23, %v2323_v47 }
 0x227   : >> { %11977 = vmatmul.msk.f32.vlgmr.msra.gmra.mxu1 %vm434_vm0, %v14134_v57  ;;  %12012 = vmatmul.msk.f32.vlgmr.msra.gmra.mxu2 %vm434_vm0, %v14202_v45 }
 0x228   : >> { %12047 = vmatmul.msk.f32.vlgmr.msra.gmra.mxu3 %vm434_vm0, %v14263_v43  ;;  %4315 = vmatpush.msra.mxu1 %v12097_v17 }
 0x22a   : >> { %v2573_v33 = vpop.f32.mrf.mxu2 }
 0x22b   : >> { %v14339_v44 = vpop.f32.mrf.mxu3  ;;  %v5827_v14 = vld [vmem:[#allocation2 + $0xf0] ss:$2 sm:$0x3f]  ;;  %v5831_v30 = vld [vmem:[#allocation2 + $0xf1] ss:$2 sm:$0x3f]  ;;  %v2621_v15 = vadd.f32 %v2573_v33, %v2472_v52  ;;  %v2278_v49 = vpop.f32.mrf.mxu0 }
 0x22c   : >> { %v2427_v50 = vpop.f32.mrf.mxu1  ;;  %v5833_v32 = vmax.f32 %v5827_v14, %v5831_v30  ;;  %v2324_v17 = vadd.f32 %v2278_v49, %v14100_v10 }
 0x22d   : >> { %v2641_v35 = vadd.f32 %v14337_v24, %v2621_v15 }
 0x22e   : >> { %11943 = vmatmul.msk.f32.gmra.mxu0 %vm434_vm0, %v14003_v36  ;;  %v5835_v37 = vmax.f32 %v5823_v29, %v5833_v32  ;;  %v2473_v41 = vadd.f32 %v2427_v50, %v2324_v17 }
 0x22f   : >> { %11978 = vmatmul.msk.f32.gmra.mxu1 %vm434_vm0, %v14149_v25  ;;  %v2657_v39 = vmax.f32 %v2641_v35, 0.0  ;;  %12013 = vmatmul.msk.f32.gmra.mxu2 %vm434_vm0, %v14217_v21 }
 0x230   : >> { %12048 = vmatmul.msk.f32.gmra.mxu3 %vm434_vm0, %v14278_v56  ;;  %5837 = vst.msk [vmem:[#allocation3 + $0x32] sm:$0x3f] %vm5764_vm2, %v5835_v37 }
 0x231   : >> { %2673 = vst [vmem:[#allocation2 + $0x100] sm:$0xff] %v2657_v39  ;;  %v14394_v39 = vld [vmem:[%s13406_s29 + $0x228] sm:$0xff] }
 0x232   : >> { %v2576_v61 = vpop.f32.mrf.mxu2 }
 0x233   : >> { %v14352_v10 = vpop.f32.mrf.mxu3  ;;  %v2622_v55 = vadd.f32 %v2576_v61, %v2473_v41  ;;  %v2281_v36 = vpop.f32.mrf.mxu0 }
 0x234   : >> { %v2430_v0 = vpop.f32.mrf.mxu1  ;;  %v2325_v19 = vadd.f32 %v2281_v36, %v14115_v51  ;;  %v12096_v36 = vld [vmem:[%s17044_s1 + $0x10] sm:$0xff] }
 0x235   : >> { %v2642_v58 = vadd.f32 %v14337_v24, %v2622_v55  ;;  %3553 = vmatpush.msrb.mxu0 %v12096_v36  ;;  %4316 = vmatpush.msra.mxu1 %v12096_v36 }
 0x236   : >> { %11944 = vmatmul.msk.f32.gmra.mxu0 %vm434_vm0, %v14021_v11  ;;  %v2474_v31 = vadd.f32 %v2430_v0, %v2325_v19 }
 0x237   : >> { %11979 = vmatmul.msk.f32.gmra.mxu1 %vm434_vm0, %v14168_v34  ;;  %v2658_v59 = vmax.f32 %v2642_v58, 0.0  ;;  %12014 = vmatmul.msk.f32.gmra.mxu2 %vm434_vm0, %v14233_v6 }
 0x238   : >> { %12049 = vmatmul.msk.f32.gmra.mxu3 %vm434_vm0, %v14296_v28 }
 0x239   : >> { %2674 = vst [vmem:[#allocation2 + $0x108] sm:$0xff] %v2658_v59 }
 0x23a   : >> { %v2579_v40 = vpop.f32.mrf.mxu2 }
 0x23b   : >> { %v14364_v46 = vpop.f32.mrf.mxu3  ;;  %v2623_v9 = vadd.f32 %v2579_v40, %v2474_v31  ;;  %v2284_v51 = vpop.f32.mrf.mxu0  ;;  %v14421_v40 = vld [vmem:[%s13406_s29 + $0x230] sm:$0xff] }
 0x23c   : >> { %v2433_v23 = vpop.f32.mrf.mxu1  ;;  %v2326_v47 = vadd.f32 %v2284_v51, %v14130_v7 }
 0x23d   : >> { %v2643_v11 = vadd.f32 %v14337_v24, %v2623_v9 }
 0x23e   : >> { %11945 = vmatmul.msk.f32.gmra.mxu0 %vm434_vm0, %v14036_v12  ;;  %v2475_v38 = vadd.f32 %v2433_v23, %v2326_v47  ;;  %v14379_v12 = vld [vmem:[%s13406_s29 + $0x220] sm:$0xff] }
 0x23f   : >> { %11980 = vmatmul.msk.f32.gmra.mxu1 %vm434_vm0, %v14183_v60  ;;  %v2659_v2 = vmax.f32 %v2643_v11, 0.0  ;;  %12015 = vmatmul.msk.f32.gmra.mxu2 %vm434_vm0, %v14248_v1 }
 0x240   : >> { %12050 = vmatmul.msk.f32.gmra.mxu3 %vm434_vm0, %v14311_v5 }
 0x241   : >> { %2675 = vst [vmem:[#allocation2 + $0x110] sm:$0xff] %v2659_v2 }
 0x242   : >> { %v2582_v52 = vpop.f32.mrf.mxu2 }
 0x243   : >> { %v14376_v33 = vpop.f32.mrf.mxu3  ;;  %v2624_v14 = vadd.f32 %v2582_v52, %v2475_v38  ;;  %v2287_v7 = vpop.f32.mrf.mxu0 }
 0x244   : >> { %v2436_v30 = vpop.f32.mrf.mxu1  ;;  %v2327_v49 = vadd.f32 %v2287_v7, %v14145_v18 }
 0x245   : >> { %v2644_v15 = vadd.f32 %v14337_v24, %v2624_v14  ;;  %v14436_v14 = vld [vmem:[%s13406_s29 + $0x238] sm:$0xff] }
 0x246   : >> { %11946 = vmatmul.msk.f32.gmra.mxu0 %vm434_vm0, %v14071_v3  ;;  %v2476_v29 = vadd.f32 %v2436_v30, %v2327_v49  ;;  %v5839_v30 = vld [vmem:[#allocation2 + $0x100] ss:$2 sm:$0xff] }
 0x247   : >> { %11981 = vmatmul.msk.f32.gmra.mxu1 %vm434_vm0, %v14202_v45  ;;  %v2660_v50 = vmax.f32 %v2644_v15, 0.0  ;;  %12016 = vmatmul.msk.f32.gmra.mxu2 %vm434_vm0, %v14263_v43  ;;  %v5843_v15 = vld [vmem:[#allocation2 + $0x101] ss:$2 sm:$0xff] }
 0x248   : >> { %12051 = vmatmul.msk.f32.gmra.mxu3 %vm434_vm0, %v14379_v12 }
 0x249   : >> { %2676 = vst [vmem:[#allocation2 + $0x118] sm:$0xff] %v2660_v50 }
 0x24a   : >> { %v2585_v32 = vpop.f32.mrf.mxu2 }
 0x24b   : >> { %v14391_v35 = vpop.f32.mrf.mxu3  ;;  %v2625_v17 = vadd.f32 %v2585_v32, %v2476_v29  ;;  %v2290_v18 = vpop.f32.mrf.mxu0  ;;  %v5846_v32 = vmax.f32 %v5839_v30, %v5843_v15 }
 0x24c   : >> { %v2439_v37 = vpop.f32.mrf.mxu1  ;;  %v2328_v41 = vadd.f32 %v2290_v18, %v14164_v42  ;;  %v12182_v42 = vld [vmem:[%s17044_s1 + $0x30] sm:$0xff] }
 0x24d   : >> { %v2645_v3 = vadd.f32 %v14337_v24, %v2625_v17  ;;  %3948 = vmatpush.msrb.mxu3 %v12182_v42 }
 0x24e   : >> { %11947 = vmatmul.msk.f32.gmra.mxu0 %vm434_vm0, %v14088_v26  ;;  %v2477_v55 = vadd.f32 %v2439_v37, %v2328_v41  ;;  %v14412_v26 = vld [vmem:[%s17044_s1 + $0x20] sm:$0xff] }
 0x24f   : >> { %11982 = vmatmul.msk.f32.gmra.mxu1 %vm434_vm0, %v14217_v21  ;;  %v2661_v61 = vmax.f32 %v2645_v3, 0.0  ;;  %12017 = vmatmul.msk.f32.gmra.mxu2 %vm434_vm0, %v14278_v56 }
 0x250   : >> { %12052 = vmatmul.msk.f32.gmra.mxu3 %vm434_vm0, %v14394_v39  ;;  %3799 = vmatpush.msrb.mxu2 %v14412_v26 }
 0x251   : >> { %2677 = vst [vmem:[#allocation2 + $0x120] sm:$0xff] %v2661_v61 }
 0x252   : >> { %v2588_v0 = vpop.f32.mrf.mxu2 }
 0x253   : >> { %v14417_v58 = vpop.f32.mrf.mxu3  ;;  %v2626_v19 = vadd.f32 %v2588_v0, %v2477_v55  ;;  %v2293_v59 = vpop.f32.mrf.mxu0  ;;  %v14451_v55 = vld [vmem:[%s13406_s29 + $0x240] sm:$0xff] }
 0x254   : >> { %v2442_v31 = vpop.f32.mrf.mxu1  ;;  %v2329_v51 = vadd.f32 %v2293_v59, %v14179_v22 }
 0x255   : >> { %v2646_v9 = vadd.f32 %v14337_v24, %v2626_v19 }
 0x256   : >> { %11948 = vmatmul.msk.f32.gmra.mxu0 %vm434_vm0, %v14104_v54  ;;  %v2478_v11 = vadd.f32 %v2442_v31, %v2329_v51 }
 0x257   : >> { %11983 = vmatmul.msk.f32.gmra.mxu1 %vm434_vm0, %v14233_v6  ;;  %v2662_v23 = vmax.f32 %v2646_v9, 0.0  ;;  %12018 = vmatmul.msk.f32.gmra.mxu2 %vm434_vm0, %v14296_v28 }
 0x258   : >> { %12053 = vmatmul.msk.f32.gmra.mxu3 %vm434_vm0, %v14421_v40 }
 0x259   : >> { %2678 = vst [vmem:[#allocation2 + $0x128] sm:$0xff] %v2662_v23  ;;  %v14467_v23 = vld [vmem:[%s13406_s29 + $0x248] sm:$0xff] }
 0x25a   : >> { %v2591_v47 = vpop.f32.mrf.mxu2 }
 0x25b   : >> { %v14433_v2 = vpop.f32.mrf.mxu3  ;;  %v2627_v38 = vadd.f32 %v2591_v47, %v2478_v11  ;;  %v2296_v22 = vpop.f32.mrf.mxu0  ;;  %v5841_v47 = vld [vmem:[#allocation2 + $0x110] ss:$2 sm:$0x3f] }
 0x25c   : >> { %v2445_v52 = vpop.f32.mrf.mxu1  ;;  %v2330_v7 = vadd.f32 %v2296_v22, %v14198_v62 }
 0x25d   : >> { %v2647_v54 = vadd.f32 %v14337_v24, %v2627_v38  ;;  %v5845_v38 = vld [vmem:[#allocation2 + $0x111] ss:$2 sm:$0x3f] }
 0x25e   : >> { %11949 = vmatmul.msk.f32.gmra.mxu0 %vm434_vm0, %v14119_v20  ;;  %v2479_v17 = vadd.f32 %v2445_v52, %v2330_v7  ;;  %v5847_v7 = vmax.f32 %v5841_v47, %v5845_v38 }
 0x25f   : >> { %11984 = vmatmul.msk.f32.gmra.mxu1 %vm434_vm0, %v14248_v1  ;;  %v2663_v49 = vmax.f32 %v2647_v54, 0.0  ;;  %12019 = vmatmul.msk.f32.gmra.mxu2 %vm434_vm0, %v14311_v5 }
 0x260   : >> { %12054 = vmatmul.msk.f32.gmra.mxu3 %vm434_vm0, %v14436_v14  ;;  %v5849_v50 = vld [vmem:[#allocation2 + $0x120] ss:$2 sm:$0xff]  ;;  %v5853_v29 = vld [vmem:[#allocation2 + $0x121] ss:$2 sm:$0xff] }
 0x261   : >> { %v5856_v62 = vmax.f32 %v5849_v50, %v5853_v29  ;;  %2679 = vst [vmem:[#allocation2 + $0x130] sm:$0xff] %v2663_v49 }
 0x262   : >> { %v2594_v18 = vpop.f32.mrf.mxu2 }
 0x263   : >> { %v14448_v37 = vpop.f32.mrf.mxu3  ;;  %v2628_v20 = vadd.f32 %v2594_v18, %v2479_v17  ;;  %v2299_v3 = vpop.f32.mrf.mxu0  ;;  %v5858_v61 = vmax.f32 %v5846_v32, %v5856_v62  ;;  %v14482_v62 = vld [vmem:[%s13406_s29 + $0x250] sm:$0xff] }
 0x264   : >> { %v2448_v41 = vpop.f32.mrf.mxu1  ;;  %v2331_v36 = vadd.f32 %v2299_v3, %v14213_v53 }
 0x265   : >> { %v2648_v42 = vadd.f32 %v14337_v24, %v2628_v20  ;;  %5860 = vst.msk [vmem:[#allocation3 + $0x38] sm:$0xff] %vm5762_vm1, %v5858_v61 }
 0x266   : >> { %11950 = vmatmul.msk.f32.gmra.mxu0 %vm434_vm0, %v14134_v57  ;;  %v2480_v19 = vadd.f32 %v2448_v41, %v2331_v36 }
 0x267   : >> { %11985 = vmatmul.msk.f32.gmra.mxu1 %vm434_vm0, %v14263_v43  ;;  %v2664_v0 = vmax.f32 %v2648_v42, 0.0  ;;  %12020 = vmatmul.msk.f32.gmra.mxu2 %vm434_vm0, %v14379_v12 }
 0x268   : >> { %12055 = vmatmul.msk.f32.gmra.mxu3 %vm434_vm0, %v14451_v55 }
 0x269   : >> { %2680 = vst [vmem:[#allocation2 + $0x138] sm:$0xff] %v2664_v0 }
 0x26a   : >> { %v2597_v59 = vpop.f32.mrf.mxu2 }
 0x26b   : >> { %v14464_v31 = vpop.f32.mrf.mxu3  ;;  %v2629_v53 = vadd.f32 %v2597_v59, %v2480_v19  ;;  %v2302_v9 = vpop.f32.mrf.mxu0 }
 0x26c   : >> { %v2451_v51 = vpop.f32.mrf.mxu1  ;;  %v2332_v11 = vadd.f32 %v2302_v9, %v14229_v63 }
 0x26d   : >> { %v2649_v57 = vadd.f32 %v14337_v24, %v2629_v53 }
 0x26e   : >> { %11951 = vmatmul.msk.f32.gmra.mxu0 %vm434_vm0, %v14149_v25  ;;  %v2481_v30 = vadd.f32 %v2451_v51, %v2332_v11 }
 0x26f   : >> { %11986 = vmatmul.msk.f32.gmra.mxu1 %vm434_vm0, %v14278_v56  ;;  %v2665_v22 = vmax.f32 %v2649_v57, 0.0  ;;  %12021 = vmatmul.msk.f32.gmra.mxu2 %vm434_vm0, %v14394_v39 }
 0x270   : >> { %12056 = vmatmul.msk.f32.gmra.mxu3 %vm434_vm0, %v14467_v23  ;;  %v5851_v52 = vld [vmem:[#allocation2 + $0x130] ss:$2 sm:$0x3f]  ;;  %v5855_v54 = vld [vmem:[#allocation2 + $0x131] ss:$2 sm:$0x3f] }
 0x271   : >> { %v5857_v63 = vmax.f32 %v5851_v52, %v5855_v54  ;;  %2681 = vst [vmem:[#allocation2 + $0x140] sm:$0xff] %v2665_v22 }
 0x272   : >> { %v2600_v15 = vpop.f32.mrf.mxu2 }
 0x273   : >> { %v14479_v49 = vpop.f32.mrf.mxu3  ;;  %v2630_v25 = vadd.f32 %v2600_v15, %v2481_v30  ;;  %v2305_v50 = vpop.f32.mrf.mxu0  ;;  %v5859_v32 = vmax.f32 %v5847_v7, %v5857_v63  ;;  %v14528_v15 = vld [vmem:[%s13406_s29 + $0x268] sm:$0xff] }
 0x274   : >> { %v2454_v29 = vpop.f32.mrf.mxu1  ;;  %v2333_v18 = vadd.f32 %v2305_v50, %v14244_v27 }
 0x275   : >> { %v2650_v17 = vadd.f32 %v14337_v24, %v2630_v25  ;;  %5861 = vst.msk [vmem:[#allocation3 + $0x40] sm:$0x3f] %vm5764_vm2, %v5859_v32 }
 0x276   : >> { %11952 = vmatmul.msk.f32.gmra.mxu0 %vm434_vm0, %v14168_v34  ;;  %v2482_v3 = vadd.f32 %v2454_v29, %v2333_v18  ;;  %v14498_v34 = vld [vmem:[%s13406_s29 + $0x258] sm:$0xff] }
 0x277   : >> { %11987 = vmatmul.msk.f32.gmra.mxu1 %vm434_vm0, %v14296_v28  ;;  %v2666_v20 = vmax.f32 %v2650_v17, 0.0  ;;  %12022 = vmatmul.msk.f32.gmra.mxu2 %vm434_vm0, %v14421_v40 }
 0x278   : >> { %12057 = vmatmul.msk.f32.gmra.mxu3 %vm434_vm0, %v14482_v62 }
 0x279   : >> { %2682 = vst [vmem:[#allocation2 + $0x148] sm:$0xff] %v2666_v20 }
 0x27a   : >> { %v2603_v41 = vpop.f32.mrf.mxu2 }
 0x27b   : >> { %v14495_v61 = vpop.f32.mrf.mxu3  ;;  %v2631_v27 = vadd.f32 %v2603_v41, %v2482_v3  ;;  %v2308_v42 = vpop.f32.mrf.mxu0  ;;  %v4232_v3 = vld [vmem:[%s17044_s1 + $0x8] sm:$0xff] }
 0x27c   : >> { %v2457_v36 = vpop.f32.mrf.mxu1  ;;  %v2334_v19 = vadd.f32 %v2308_v42, %v14259_v48  ;;  %v12218_v41 = vld [vmem:[%s17044_s1 + $0x48] sm:$0xff]  ;;  %4428 = vmatpush.msra.mxu2 %v4232_v3 }
 0x27d   : >> { %v2651_v0 = vadd.f32 %v14337_v24, %v2631_v27  ;;  %v14552_v27 = vld [vmem:[%s13406_s29 + $0x270] sm:$0xff]  ;;  %4096 = vmatpush.msra.mxu0 %v12218_v41 }
 0x27e   : >> { %11953 = vmatmul.msk.f32.gmra.mxu0 %vm434_vm0, %v14183_v60  ;;  %v2483_v53 = vadd.f32 %v2457_v36, %v2334_v19  ;;  %v14513_v60 = vld [vmem:[%s13406_s29 + $0x260] sm:$0xff] }
 0x27f   : >> { %11988 = vmatmul.msk.f32.gmra.mxu1 %vm434_vm0, %v14311_v5  ;;  %v2667_v59 = vmax.f32 %v2651_v0, 0.0  ;;  %12023 = vmatmul.msk.f32.gmra.mxu2 %vm434_vm0, %v14436_v14 }
 0x280   : >> { %12058 = vmatmul.msk.f32.gmra.mxu3 %vm434_vm0, %v14498_v34 }
 0x281   : >> { %2683 = vst [vmem:[#allocation2 + $0x150] sm:$0xff] %v2667_v59 }
 0x282   : >> { %v2606_v9 = vpop.f32.mrf.mxu2 }
 0x283   : >> { %v14510_v51 = vpop.f32.mrf.mxu3  ;;  %v2632_v57 = vadd.f32 %v2606_v9, %v2483_v53  ;;  %v2311_v48 = vpop.f32.mrf.mxu0 }
 0x284   : >> { %v2460_v11 = vpop.f32.mrf.mxu1  ;;  %v2335_v38 = vadd.f32 %v2311_v48, %v14274_v4 }
 0x285   : >> { %v2652_v47 = vadd.f32 %v14337_v24, %v2632_v57  ;;  %v14568_v57 = vld [vmem:[%s13406_s29 + $0x278] sm:$0xff] }
 0x286   : >> { %11954 = vmatmul.msk.f32.gmra.mxu0 %vm434_vm0, %v14202_v45  ;;  %v2484_v52 = vadd.f32 %v2460_v11, %v2335_v38  ;;  %v5863_v11 = vld [vmem:[#allocation2 + $0x140] ss:$2 sm:$0xff] }
 0x287   : >> { %11989 = vmatmul.msk.f32.gmra.mxu1 %vm434_vm0, %v14379_v12  ;;  %v2668_v22 = vmax.f32 %v2652_v47, 0.0  ;;  %12024 = vmatmul.msk.f32.gmra.mxu2 %vm434_vm0, %v14451_v55  ;;  %v5867_v47 = vld [vmem:[#allocation2 + $0x141] ss:$2 sm:$0xff] }
 0x288   : >> { %12059 = vmatmul.msk.f32.gmra.mxu3 %vm434_vm0, %v14513_v60 }
 0x289   : >> { %2684 = vst [vmem:[#allocation2 + $0x158] sm:$0xff] %v2668_v22 }
 0x28a   : >> { %v2609_v54 = vpop.f32.mrf.mxu2 }
 0x28b   : >> { %v14525_v7 = vpop.f32.mrf.mxu3  ;;  %v2633_v63 = vadd.f32 %v2609_v54, %v2484_v52  ;;  %v2314_v4 = vpop.f32.mrf.mxu0  ;;  %v5870_v54 = vmax.f32 %v5863_v11, %v5867_v47 }
 0x28c   : >> { %v2463_v30 = vpop.f32.mrf.mxu1  ;;  %v2336_v25 = vadd.f32 %v2314_v4, %v14292_v13  ;;  %v12320_v13 = vld [vmem:[%s17044_s1 + $0x28] sm:$0xff] }
 0x28d   : >> { %v2653_v45 = vadd.f32 %v14337_v24, %v2633_v63  ;;  %4561 = vmatpush.msra.mxu3 %v12320_v13 }
 0x28e   : >> { %11955 = vmatmul.msk.f32.gmra.mxu0 %vm434_vm0, %v14217_v21  ;;  %v2485_v29 = vadd.f32 %v2463_v30, %v2336_v25 }
 0x28f   : >> { %11990 = vmatmul.msk.f32.gmra.mxu1 %vm434_vm0, %v14394_v39  ;;  %v2669_v50 = vmax.f32 %v2653_v45, 0.0  ;;  %12025 = vmatmul.msk.f32.gmra.mxu2 %vm434_vm0, %v14467_v23 }
 0x290   : >> { %12060 = vmatmul.msk.f32.gmra.mxu3 %vm434_vm0, %v14528_v15 }
 0x291   : >> { %2685 = vst [vmem:[#allocation2 + $0x160] sm:$0xff] %v2669_v50  ;;  %4562 = vmatpush.msra.mxu3 %v14412_v26 }
 0x292   : >> { %v2612_v32 = vpop.f32.mrf.mxu2 }
 0x293   : >> { %v14543_v17 = vpop.f32.mrf.mxu3  ;;  %v2634_v21 = vadd.f32 %v2612_v32, %v2485_v29  ;;  %v2317_v18 = vpop.f32.mrf.mxu0 }
 0x294   : >> { %v2466_v20 = vpop.f32.mrf.mxu1  ;;  %v2337_v36 = vadd.f32 %v2317_v18, %v14307_v16 }
 0x295   : >> { %v2654_v42 = vadd.f32 %v14337_v24, %v2634_v21 }
 0x296   : >> { %11956 = vmatmul.msk.f32.gmra.mxu0 %vm434_vm0, %v14233_v6  ;;  %v2486_v19 = vadd.f32 %v2466_v20, %v2337_v36  ;;  %v14596_v20 = vld [vmem:[%s17045_s2] ss:$0 sm:$0xff] }
 0x297   : >> { %11991 = vmatmul.msk.f32.gmra.mxu1 %vm434_vm0, %v14421_v40  ;;  %v2670_v0 = vmax.f32 %v2654_v42, 0.0  ;;  %12026 = vmatmul.msk.f32.gmra.mxu2 %vm434_vm0, %v14482_v62 }
 0x298   : >> { %12061 = vmatmul.msk.f32.gmra.mxu3 %vm434_vm0, %v14552_v27 }
 0x299   : >> { %2686 = vst [vmem:[#allocation2 + $0x168] sm:$0xff] %v2670_v0 }
 0x29a   : >> { %v2615_v59 = vpop.f32.mrf.mxu2 }
 0x29b   : >> { %v14565_v53 = vpop.f32.mrf.mxu3  ;;  %v2635_v16 = vadd.f32 %v2615_v59, %v2486_v19  ;;  %v2320_v26 = vpop.f32.mrf.mxu0  ;;  %v5865_v19 = vld [vmem:[#allocation2 + $0x150] ss:$2 sm:$0x3f]  ;;  %v5869_v59 = vld [vmem:[#allocation2 + $0x151] ss:$2 sm:$0x3f] }
 0x29c   : >> { %v2469_v9 = vpop.f32.mrf.mxu1  ;;  %v2338_v48 = vadd.f32 %v2320_v26, %v14323_v8  ;;  %v5871_v26 = vmax.f32 %v5865_v19, %v5869_v59 }
 0x29d   : >> { %v2655_v6 = vadd.f32 %v14337_v24, %v2635_v16 }
 0x29e   : >> { %11957 = vmatmul.msk.f32.gmra.mxu0 %vm434_vm0, %v14248_v1  ;;  %v2487_v8 = vadd.f32 %v2469_v9, %v2338_v48 }
 0x29f   : >> { %11992 = vmatmul.msk.f32.gmra.mxu1 %vm434_vm0, %v14436_v14  ;;  %v2671_v38 = vmax.f32 %v2655_v6, 0.0  ;;  %12027 = vmatmul.msk.f32.gmra.mxu2 %vm434_vm0, %v14498_v34 }
 0x2a0   : >> { %12062 = vmatmul.msk.f32.gmra.mxu3 %vm434_vm0, %v14568_v57  ;;  %v5873_v22 = vld [vmem:[#allocation2 + $0x160] ss:$2 sm:$0xff]  ;;  %v5877_v52 = vld [vmem:[#allocation2 + $0x161] ss:$2 sm:$0xff] }
 0x2a1   : >> { %v5880_v63 = vmax.f32 %v5873_v22, %v5877_v52  ;;  %2687 = vst [vmem:[#allocation2 + $0x170] sm:$0xff] %v2671_v38 }
 0x2a2   : >> { %v2618_v4 = vpop.f32.mrf.mxu2 }
 0x2a3   : >> { %v14580_v30 = vpop.f32.mrf.mxu3  ;;  %v2636_v1 = vadd.f32 %v2618_v4, %v2487_v8  ;;  %v2905_v45 = vpop.f32.mrf.mxu0  ;;  %v5882_v50 = vmax.f32 %v5870_v54, %v5880_v63 }
 0x2a4   : >> { %v3038_v25 = vpop.f32.mrf.mxu1  ;;  %v2906_v13 = vadd.f32 %v2905_v45, %v14339_v44 }
 0x2a5   : >> { %v2656_v29 = vadd.f32 %v14337_v24, %v2636_v1  ;;  %5884 = vst.msk [vmem:[#allocation3 + $0x46] sm:$0xff] %vm5762_vm1, %v5882_v50 }
 0x2a6   : >> { %12098 = vmatmul.msk.f32.vlgmr.msrb.gmra.mxu0 %vm434_vm0, %v14379_v12  ;;  %v3086_v24 = vadd.f32 %v3038_v25, %v2906_v13 }
 0x2a7   : >> { %12114 = vmatmul.msk.f32.vlgmr.msrb.gmra.mxu1 %vm434_vm0, %v14263_v43  ;;  %v2672_v32 = vmax.f32 %v2656_v29, 0.0  ;;  %12149 = vmatmul.msk.f32.vlgmr.msrb.gmra.mxu2 %vm434_vm0, %v14451_v55 }
 0x2a8   : >> { %12184 = vmatmul.msk.f32.vlgmr.msrb.gmra.mxu3 %vm434_vm0, %v14513_v60  ;;  %4859 = vmatpush.msrb.mxu1 %v12218_v41 }
 0x2a9   : >> { %5191 = vmatpush.msrb.mxu3 %v4232_v3  ;;  %2688 = vst [vmem:[#allocation2 + $0x178] sm:$0xff] %v2672_v32 }
 0x2aa   : >> { %v3187_v44 = vpop.f32.mrf.mxu2 }
 0x2ab   : >> { %v3336_v21 = vpop.f32.mrf.mxu3  ;;  %v3235_v18 = vadd.f32 %v3187_v44, %v3086_v24  ;;  %v2908_v43 = vpop.f32.mrf.mxu0 }
 0x2ac   : >> { %v3041_v42 = vpop.f32.mrf.mxu1  ;;  %v2909_v0 = vadd.f32 %v2908_v43, %v14352_v10 }
 0x2ad   : >> { %v3384_v36 = vadd.f32 %v3336_v21, %v3235_v18 }
 0x2ae   : >> { %12099 = vmatmul.msk.f32.gmra.mxu0 %vm434_vm0, %v14394_v39  ;;  %v3087_v6 = vadd.f32 %v3041_v42, %v2909_v0  ;;  %v14630_v42 = vld [vmem:[%s13406_s29 + $0x280] sm:$0xff] }
 0x2af   : >> { %12115 = vmatmul.msk.f32.gmra.mxu1 %vm434_vm0, %v14278_v56  ;;  %v3404_v3 = vadd.f32 %v14596_v20, %v3384_v36  ;;  %12150 = vmatmul.msk.f32.gmra.mxu2 %vm434_vm0, %v14467_v23 }
 0x2b0   : >> { %12185 = vmatmul.msk.f32.gmra.mxu3 %vm434_vm0, %v14528_v15  ;;  %v5875_v41 = vld [vmem:[#allocation2 + $0x170] ss:$2 sm:$0x3f]  ;;  %v5879_v16 = vld [vmem:[#allocation2 + $0x171] ss:$2 sm:$0x3f] }
 0x2b1   : >> { %v5881_v10 = vmax.f32 %v5875_v41, %v5879_v16  ;;  %v3420_v9 = vmax.f32 %v3404_v3, 0.0 }
 0x2b2   : >> { %v3190_v48 = vpop.f32.mrf.mxu2 }
 0x2b3   : >> { %v3339_v11 = vpop.f32.mrf.mxu3  ;;  %3436 = vst [vmem:[#allocation2 + $0x180] sm:$0xff] %v3420_v9  ;;  %v3236_v47 = vadd.f32 %v3190_v48, %v3087_v6  ;;  %v2911_v38 = vpop.f32.mrf.mxu0  ;;  %v5883_v22 = vmax.f32 %v5871_v26, %v5881_v10  ;;  %v14643_v10 = vld [vmem:[%s13406_s29 + $0x288] sm:$0xff] }
 0x2b4   : >> { %v3044_v56 = vpop.f32.mrf.mxu1  ;;  %v2912_v54 = vadd.f32 %v2911_v38, %v14364_v46 }
 0x2b5   : >> { %v3385_v52 = vadd.f32 %v3339_v11, %v3236_v47  ;;  %5885 = vst.msk [vmem:[#allocation3 + $0x4e] sm:$0x3f] %vm5764_vm2, %v5883_v22 }
 0x2b6   : >> { %12100 = vmatmul.msk.f32.gmra.mxu0 %vm434_vm0, %v14421_v40  ;;  %v3088_v4 = vadd.f32 %v3044_v56, %v2912_v54  ;;  %v14662_v54 = vld [vmem:[%s13406_s29 + $0x290] sm:$0xff] }
 0x2b7   : >> { %12116 = vmatmul.msk.f32.gmra.mxu1 %vm434_vm0, %v14296_v28  ;;  %v3405_v63 = vadd.f32 %v14596_v20, %v3385_v52  ;;  %12151 = vmatmul.msk.f32.gmra.mxu2 %vm434_vm0, %v14482_v62  ;;  %v12217_v52 = vld [vmem:[%s17044_s1 + $0x40] sm:$0xff] }
 0x2b8   : >> { %12186 = vmatmul.msk.f32.gmra.mxu3 %vm434_vm0, %v14552_v27  ;;  %4097 = vmatpush.msra.mxu0 %v12217_v52 }
 0x2b9   : >> { %v3421_v8 = vmax.f32 %v3405_v63, 0.0  ;;  %4860 = vmatpush.msrb.mxu1 %v12217_v52 }
 0x2ba   : >> { %v3193_v1 = vpop.f32.mrf.mxu2 }
 0x2bb   : >> { %v3342_v46 = vpop.f32.mrf.mxu3  ;;  %3437 = vst [vmem:[#allocation2 + $0x188] sm:$0xff] %v3421_v8  ;;  %v3237_v45 = vadd.f32 %v3193_v1, %v3088_v4  ;;  %v2914_v25 = vpop.f32.mrf.mxu0 }
 0x2bc   : >> { %v3047_v50 = vpop.f32.mrf.mxu1  ;;  %v2915_v28 = vadd.f32 %v2914_v25, %v14376_v33 }
 0x2bd   : >> { %v3386_v29 = vadd.f32 %v3342_v46, %v3237_v45 }
 0x2be   : >> { %12101 = vmatmul.msk.f32.gmra.mxu0 %vm434_vm0, %v14436_v14  ;;  %v3089_v24 = vadd.f32 %v3047_v50, %v2915_v28  ;;  %v14675_v28 = vld [vmem:[%s13406_s29 + $0x298] sm:$0xff] }
 0x2bf   : >> { %12117 = vmatmul.msk.f32.gmra.mxu1 %vm434_vm0, %v14311_v5  ;;  %v3406_v13 = vadd.f32 %v14596_v20, %v3386_v29  ;;  %12152 = vmatmul.msk.f32.gmra.mxu2 %vm434_vm0, %v14498_v34 }
 0x2c0   : >> { %12187 = vmatmul.msk.f32.gmra.mxu3 %vm434_vm0, %v14568_v57 }
 0x2c1   : >> { %v3422_v32 = vmax.f32 %v3406_v13, 0.0 }
 0x2c2   : >> { %v3196_v44 = vpop.f32.mrf.mxu2 }
 0x2c3   : >> { %v3345_v21 = vpop.f32.mrf.mxu3  ;;  %3438 = vst [vmem:[#allocation2 + $0x190] sm:$0xff] %v3422_v32  ;;  %v3238_v33 = vadd.f32 %v3196_v44, %v3089_v24  ;;  %v2917_v18 = vpop.f32.mrf.mxu0  ;;  %v5887_v24 = vld [vmem:[#allocation2 + $0x180] ss:$2 sm:$0xff]  ;;  %v5891_v44 = vld [vmem:[#allocation2 + $0x181] ss:$2 sm:$0xff] }
 0x2c4   : >> { %v3050_v43 = vpop.f32.mrf.mxu1  ;;  %v2918_v36 = vadd.f32 %v2917_v18, %v14391_v35 }
 0x2c5   : >> { %v3387_v5 = vadd.f32 %v3345_v21, %v3238_v33 }
 0x2c6   : >> { %12102 = vmatmul.msk.f32.gmra.mxu0 %vm434_vm0, %v14451_v55  ;;  %v3090_v59 = vadd.f32 %v3050_v43, %v2918_v36  ;;  %v5894_v36 = vmax.f32 %v5887_v24, %v5891_v44 }
 0x2c7   : >> { %12118 = vmatmul.msk.f32.gmra.mxu1 %vm434_vm0, %v14379_v12  ;;  %v3407_v0 = vadd.f32 %v14596_v20, %v3387_v5  ;;  %12153 = vmatmul.msk.f32.gmra.mxu2 %vm434_vm0, %v14513_v60 }
 0x2c8   : >> { %12188 = vmatmul.msk.f32.gmra.mxu3 %vm434_vm0, %v14630_v42 }
 0x2c9   : >> { %v3423_v19 = vmax.f32 %v3407_v0, 0.0 }
 0x2ca   : >> { %v3199_v3 = vpop.f32.mrf.mxu2 }
 0x2cb   : >> { %v3348_v41 = vpop.f32.mrf.mxu3  ;;  %3439 = vst [vmem:[#allocation2 + $0x198] sm:$0xff] %v3423_v19  ;;  %v3239_v35 = vadd.f32 %v3199_v3, %v3090_v59  ;;  %v2920_v16 = vpop.f32.mrf.mxu0  ;;  %v14688_v3 = vld [vmem:[%s13406_s29 + $0x2a0] sm:$0xff] }
 0x2cc   : >> { %v3053_v26 = vpop.f32.mrf.mxu1  ;;  %v2921_v12 = vadd.f32 %v2920_v16, %v14417_v58 }
 0x2cd   : >> { %v3388_v9 = vadd.f32 %v3348_v41, %v3239_v35 }
 0x2ce   : >> { %12103 = vmatmul.msk.f32.gmra.mxu0 %vm434_vm0, %v14467_v23  ;;  %v3091_v11 = vadd.f32 %v3053_v26, %v2921_v12 }
 0x2cf   : >> { %12119 = vmatmul.msk.f32.gmra.mxu1 %vm434_vm0, %v14394_v39  ;;  %v3408_v6 = vadd.f32 %v14596_v20, %v3388_v9  ;;  %12154 = vmatmul.msk.f32.gmra.mxu2 %vm434_vm0, %v14528_v15  ;;  %v4231_v39 = vld [vmem:[%s17044_s1] sm:$0xff] }
 0x2d0   : >> { %12189 = vmatmul.msk.f32.gmra.mxu3 %vm434_vm0, %v14643_v10  ;;  %4429 = vmatpush.msra.mxu2 %v4231_v39 }
 0x2d1   : >> { %v3424_v48 = vmax.f32 %v3408_v6, 0.0  ;;  %5192 = vmatpush.msrb.mxu3 %v4231_v39 }
 0x2d2   : >> { %v3202_v47 = vpop.f32.mrf.mxu2  ;;  %v5893_v39 = vld [vmem:[#allocation2 + $0x191] ss:$2 sm:$0x3f] }
 0x2d3   : >> { %v3351_v38 = vpop.f32.mrf.mxu3  ;;  %3440 = vst [vmem:[#allocation2 + $0x1a0] sm:$0xff] %v3424_v48  ;;  %v3240_v58 = vadd.f32 %v3202_v47, %v3091_v11  ;;  %v2923_v56 = vpop.f32.mrf.mxu0 }
 0x2d4   : >> { %v3056_v22 = vpop.f32.mrf.mxu1  ;;  %v2924_v8 = vadd.f32 %v2923_v56, %v14433_v2 }
 0x2d5   : >> { %v3389_v63 = vadd.f32 %v3351_v38, %v3240_v58  ;;  %v14702_v38 = vld [vmem:[%s13406_s29 + $0x2a8] sm:$0xff] }
 0x2d6   : >> { %12104 = vmatmul.msk.f32.gmra.mxu0 %vm434_vm0, %v14482_v62  ;;  %v3092_v46 = vadd.f32 %v3056_v22, %v2924_v8  ;;  %v5889_v22 = vld [vmem:[#allocation2 + $0x190] ss:$2 sm:$0x3f] }
 0x2d7   : >> { %12120 = vmatmul.msk.f32.gmra.mxu1 %vm434_vm0, %v14421_v40  ;;  %v3409_v4 = vadd.f32 %v14596_v20, %v3389_v63  ;;  %12155 = vmatmul.msk.f32.gmra.mxu2 %vm434_vm0, %v14552_v27 }
 0x2d8   : >> { %12190 = vmatmul.msk.f32.gmra.mxu3 %vm434_vm0, %v14662_v54 }
 0x2d9   : >> { %v3425_v1 = vmax.f32 %v3409_v4, 0.0 }
 0x2da   : >> { %v3205_v2 = vpop.f32.mrf.mxu2 }
 0x2db   : >> { %v3354_v45 = vpop.f32.mrf.mxu3  ;;  %3441 = vst [vmem:[#allocation2 + $0x1a8] sm:$0xff] %v3425_v1  ;;  %v3241_v25 = vadd.f32 %v3205_v2, %v3092_v46  ;;  %v2926_v50 = vpop.f32.mrf.mxu0  ;;  %v5895_v46 = vmax.f32 %v5889_v22, %v5893_v39 }
 0x2dc   : >> { %v3059_v29 = vpop.f32.mrf.mxu1  ;;  %v2927_v40 = vadd.f32 %v2926_v50, %v14448_v37  ;;  %v14715_v50 = vld [vmem:[%s13406_s29 + $0x2b0] sm:$0xff] }
 0x2dd   : >> { %v3390_v13 = vadd.f32 %v3354_v45, %v3241_v25 }
 0x2de   : >> { %12105 = vmatmul.msk.f32.gmra.mxu0 %vm434_vm0, %v14498_v34  ;;  %v3093_v33 = vadd.f32 %v3059_v29, %v2927_v40 }
 0x2df   : >> { %12121 = vmatmul.msk.f32.gmra.mxu1 %vm434_vm0, %v14436_v14  ;;  %v3410_v32 = vadd.f32 %v14596_v20, %v3390_v13  ;;  %12156 = vmatmul.msk.f32.gmra.mxu2 %vm434_vm0, %v14568_v57 }
 0x2e0   : >> { %12191 = vmatmul.msk.f32.gmra.mxu3 %vm434_vm0, %v14675_v28 }
 0x2e1   : >> { %v3426_v21 = vmax.f32 %v3410_v32, 0.0 }
 0x2e2   : >> { %v5897_v37 = vld [vmem:[#allocation2 + $0x1a0] ss:$2 sm:$0xff]  ;;  %v5901_v18 = vld [vmem:[#allocation2 + $0x1a1] ss:$2 sm:$0xff]  ;;  %v3208_v43 = vpop.f32.mrf.mxu2 }
 0x2e3   : >> { %v3357_v5 = vpop.f32.mrf.mxu3  ;;  %v5904_v0 = vmax.f32 %v5897_v37, %v5901_v18  ;;  %3442 = vst [vmem:[#allocation2 + $0x1b0] sm:$0xff] %v3426_v21  ;;  %v3242_v14 = vadd.f32 %v3208_v43, %v3093_v33  ;;  %v2929_v19 = vpop.f32.mrf.mxu0  ;;  %v14729_v43 = vld [vmem:[%s13406_s29 + $0x2b8] sm:$0xff] }
 0x2e4   : >> { %v3062_v59 = vpop.f32.mrf.mxu1  ;;  %v2930_v35 = vadd.f32 %v2929_v19, %v14464_v31 }
 0x2e5   : >> { %v3391_v41 = vadd.f32 %v3357_v5, %v3242_v14  ;;  %v5906_v16 = vmax.f32 %v5894_v36, %v5904_v0 }
 0x2e6   : >> { %12106 = vmatmul.msk.f32.gmra.mxu0 %vm434_vm0, %v14513_v60  ;;  %v3094_v31 = vadd.f32 %v3062_v59, %v2930_v35 }
 0x2e7   : >> { %12122 = vmatmul.msk.f32.gmra.mxu1 %vm434_vm0, %v14451_v55  ;;  %v3411_v26 = vadd.f32 %v14596_v20, %v3391_v41  ;;  %12157 = vmatmul.msk.f32.gmra.mxu2 %vm434_vm0, %v14630_v42  ;;  %5908 = vst.msk [vmem:[#allocation3 + $0x54] sm:$0xff] %vm5762_vm1, %v5906_v16  ;;  %v14742_v16 = vld [vmem:[%s13406_s29 + $0x2c0] sm:$0xff] }
 0x2e8   : >> { %12192 = vmatmul.msk.f32.gmra.mxu3 %vm434_vm0, %v14688_v3 }
 0x2e9   : >> { %v3427_v9 = vmax.f32 %v3411_v26, 0.0 }
 0x2ea   : >> { %v3211_v12 = vpop.f32.mrf.mxu2 }
 0x2eb   : >> { %v3360_v6 = vpop.f32.mrf.mxu3  ;;  %3443 = vst [vmem:[#allocation2 + $0x1b8] sm:$0xff] %v3427_v9  ;;  %v3243_v48 = vadd.f32 %v3211_v12, %v3094_v31  ;;  %v2932_v11 = vpop.f32.mrf.mxu0 }
 0x2ec   : >> { %v3065_v47 = vpop.f32.mrf.mxu1  ;;  %v2933_v58 = vadd.f32 %v2932_v11, %v14479_v49 }
 0x2ed   : >> { %v3392_v55 = vadd.f32 %v3360_v6, %v3243_v48 }
 0x2ee   : >> { %12107 = vmatmul.msk.f32.gmra.mxu0 %vm434_vm0, %v14528_v15  ;;  %v3095_v63 = vadd.f32 %v3065_v47, %v2933_v58 }
 0x2ef   : >> { %12123 = vmatmul.msk.f32.gmra.mxu1 %vm434_vm0, %v14467_v23  ;;  %v3412_v56 = vadd.f32 %v14596_v20, %v3392_v55  ;;  %12158 = vmatmul.msk.f32.gmra.mxu2 %vm434_vm0, %v14643_v10  ;;  %v14755_v55 = vld [vmem:[%s13406_s29 + $0x2c8] sm:$0xff] }
 0x2f0   : >> { %12193 = vmatmul.msk.f32.gmra.mxu3 %vm434_vm0, %v14702_v38 }
 0x2f1   : >> { %v3428_v52 = vmax.f32 %v3412_v56, 0.0 }
 0x2f2   : >> { %v5899_v49 = vld [vmem:[#allocation2 + $0x1b0] ss:$2 sm:$0x3f]  ;;  %v5903_v8 = vld [vmem:[#allocation2 + $0x1b1] ss:$2 sm:$0x3f]  ;;  %v3214_v4 = vpop.f32.mrf.mxu2 }
 0x2f3   : >> { %v3363_v1 = vpop.f32.mrf.mxu3  ;;  %v5905_v2 = vmax.f32 %v5899_v49, %v5903_v8  ;;  %3444 = vst [vmem:[#allocation2 + $0x1c0] sm:$0xff] %v3428_v52  ;;  %v3244_v23 = vadd.f32 %v3214_v4, %v3095_v63  ;;  %v2935_v45 = vpop.f32.mrf.mxu0  ;;  %v12355_v4 = vld [vmem:[%s17044_s1 + $0x38] sm:$0xff] }
 0x2f4   : >> { %v3068_v25 = vpop.f32.mrf.mxu1  ;;  %v2936_v13 = vadd.f32 %v2935_v45, %v14495_v61  ;;  %4710 = vmatpush.msrb.mxu0 %v12355_v4 }
 0x2f5   : >> { %v3393_v29 = vadd.f32 %v3363_v1, %v3244_v23  ;;  %v5907_v40 = vmax.f32 %v5895_v46, %v5905_v2  ;;  %v14774_v1 = vld [vmem:[%s13406_s29 + $0x2d0] sm:$0xff] }
 0x2f6   : >> { %12108 = vmatmul.msk.f32.gmra.mxu0 %vm434_vm0, %v14552_v27  ;;  %v3096_v61 = vadd.f32 %v3068_v25, %v2936_v13 }
 0x2f7   : >> { %12124 = vmatmul.msk.f32.gmra.mxu1 %vm434_vm0, %v14482_v62  ;;  %v3413_v32 = vadd.f32 %v14596_v20, %v3393_v29  ;;  %12159 = vmatmul.msk.f32.gmra.mxu2 %vm434_vm0, %v14662_v54  ;;  %5909 = vst.msk [vmem:[#allocation3 + $0x5c] sm:$0x3f] %vm5764_vm2, %v5907_v40 }
 0x2f8   : >> { %12194 = vmatmul.msk.f32.gmra.mxu3 %vm434_vm0, %v14715_v50 }
 0x2f9   : >> { %v3429_v24 = vmax.f32 %v3413_v32, 0.0 }
 0x2fa   : >> { %v3217_v44 = vpop.f32.mrf.mxu2 }
 0x2fb   : >> { %v3366_v21 = vpop.f32.mrf.mxu3  ;;  %3445 = vst [vmem:[#allocation2 + $0x1c8] sm:$0xff] %v3429_v24  ;;  %v3245_v33 = vadd.f32 %v3217_v44, %v3096_v61  ;;  %v2938_v37 = vpop.f32.mrf.mxu0  ;;  %v14787_v24 = vld [vmem:[%s13406_s29 + $0x2d8] sm:$0xff] }
 0x2fc   : >> { %v3071_v18 = vpop.f32.mrf.mxu1  ;;  %v2939_v5 = vadd.f32 %v2938_v37, %v14510_v51 }
 0x2fd   : >> { %v3394_v62 = vadd.f32 %v3366_v21, %v3245_v33 }
 0x2fe   : >> { %12109 = vmatmul.msk.f32.gmra.mxu0 %vm434_vm0, %v14568_v57  ;;  %v3097_v14 = vadd.f32 %v3071_v18, %v2939_v5 }
 0x2ff   : >> { %12125 = vmatmul.msk.f32.gmra.mxu1 %vm434_vm0, %v14498_v34  ;;  %v3414_v36 = vadd.f32 %v14596_v20, %v3394_v62  ;;  %12160 = vmatmul.msk.f32.gmra.mxu2 %vm434_vm0, %v14675_v28 }
 0x300   : >> { %12195 = vmatmul.msk.f32.gmra.mxu3 %vm434_vm0, %v14729_v43 }
 0x301   : >> { %v3430_v0 = vmax.f32 %v3414_v36, 0.0 }
 0x302   : >> { %v3220_v19 = vpop.f32.mrf.mxu2  ;;  %v5911_v21 = vld [vmem:[#allocation2 + $0x1c0] ss:$2 sm:$0xff]  ;;  %v5915_v33 = vld [vmem:[#allocation2 + $0x1c1] ss:$2 sm:$0xff] }
 0x303   : >> { %v3369_v59 = vpop.f32.mrf.mxu3  ;;  %3446 = vst [vmem:[#allocation2 + $0x1d0] sm:$0xff] %v3430_v0  ;;  %v3246_v51 = vadd.f32 %v3220_v19, %v3097_v14  ;;  %v2941_v41 = vpop.f32.mrf.mxu0  ;;  %v5918_v0 = vmax.f32 %v5911_v21, %v5915_v33 }
 0x304   : >> { %v3074_v35 = vpop.f32.mrf.mxu1  ;;  %v2942_v26 = vadd.f32 %v2941_v41, %v14525_v7 }
 0x305   : >> { %v3395_v34 = vadd.f32 %v3369_v59, %v3246_v51 }
 0x306   : >> { %12110 = vmatmul.msk.f32.gmra.mxu0 %vm434_vm0, %v14630_v42  ;;  %v3098_v12 = vadd.f32 %v3074_v35, %v2942_v26 }
 0x307   : >> { %12126 = vmatmul.msk.f32.gmra.mxu1 %vm434_vm0, %v14513_v60  ;;  %v3415_v9 = vadd.f32 %v14596_v20, %v3395_v34  ;;  %12161 = vmatmul.msk.f32.gmra.mxu2 %vm434_vm0, %v14688_v3 }
 0x308   : >> { %12196 = vmatmul.msk.f32.gmra.mxu3 %vm434_vm0, %v14742_v16 }
 0x309   : >> { %v3431_v31 = vmax.f32 %v3415_v9, 0.0 }
 0x30a   : >> { %v3223_v6 = vpop.f32.mrf.mxu2 }
 0x30b   : >> { %v3372_v48 = vpop.f32.mrf.mxu3  ;;  %3447 = vst [vmem:[#allocation2 + $0x1d8] sm:$0xff] %v3431_v31  ;;  %v3247_v7 = vadd.f32 %v3223_v6, %v3098_v12  ;;  %v2944_v11 = vpop.f32.mrf.mxu0 }
 0x30c   : >> { %v3077_v47 = vpop.f32.mrf.mxu1  ;;  %v2945_v60 = vadd.f32 %v2944_v11, %v14543_v17 }
 0x30d   : >> { %v3396_v58 = vadd.f32 %v3372_v48, %v3247_v7 }
 0x30e   : >> { %12111 = vmatmul.msk.f32.gmra.mxu0 %vm434_vm0, %v14643_v10  ;;  %v3099_v39 = vadd.f32 %v3077_v47, %v2945_v60 }
 0x30f   : >> { %12127 = vmatmul.msk.f32.gmra.mxu1 %vm434_vm0, %v14528_v15  ;;  %v3416_v56 = vadd.f32 %v14596_v20, %v3396_v58  ;;  %12162 = vmatmul.msk.f32.gmra.mxu2 %vm434_vm0, %v14702_v38  ;;  %v12441_v15 = vld [vmem:[%s17044_s1 + $0x18] sm:$0xff] }
 0x310   : >> { %12197 = vmatmul.msk.f32.gmra.mxu3 %vm434_vm0, %v14755_v55  ;;  %5078 = vmatpush.msrb.mxu2 %v12441_v15 }
 0x311   : >> { %v3432_v22 = vmax.f32 %v3416_v56, 0.0 }
 0x312   : >> { %v3226_v52 = vpop.f32.mrf.mxu2  ;;  %v5917_v11 = vld [vmem:[#allocation2 + $0x1d1] ss:$2 sm:$0x3f] }
 0x313   : >> { %v3375_v63 = vpop.f32.mrf.mxu3  ;;  %3448 = vst [vmem:[#allocation2 + $0x1e0] sm:$0xff] %v3432_v22  ;;  %v3248_v17 = vadd.f32 %v3226_v52, %v3099_v39  ;;  %v2947_v49 = vpop.f32.mrf.mxu0 }
 0x314   : >> { %v3080_v8 = vpop.f32.mrf.mxu1  ;;  %v2948_v2 = vadd.f32 %v2947_v49, %v14565_v53 }
 0x315   : >> { %v3397_v46 = vadd.f32 %v3375_v63, %v3248_v17 }
 0x316   : >> { %12112 = vmatmul.msk.f32.gmra.mxu0 %vm434_vm0, %v14662_v54  ;;  %v3100_v25 = vadd.f32 %v3080_v8, %v2948_v2 }
 0x317   : >> { %12128 = vmatmul.msk.f32.gmra.mxu1 %vm434_vm0, %v14552_v27  ;;  %v3417_v23 = vadd.f32 %v14596_v20, %v3397_v46  ;;  %12163 = vmatmul.msk.f32.gmra.mxu2 %vm434_vm0, %v14715_v50 }
 0x318   : >> { %12198 = vmatmul.msk.f32.gmra.mxu3 %vm434_vm0, %v14774_v1 }
 0x319   : >> { %v3433_v45 = vmax.f32 %v3417_v23, 0.0 }
 0x31a   : >> { %v3229_v29 = vpop.f32.mrf.mxu2 }
 0x31b   : >> { %v3378_v13 = vpop.f32.mrf.mxu3  ;;  %3449 = vst [vmem:[#allocation2 + $0x1e8] sm:$0xff] %v3433_v45  ;;  %v3249_v53 = vadd.f32 %v3229_v29, %v3100_v25  ;;  %v2950_v40 = vpop.f32.mrf.mxu0 }
 0x31c   : >> { %v3083_v32 = vpop.f32.mrf.mxu1  ;;  %v2951_v27 = vadd.f32 %v2950_v40, %v14580_v30 }
 0x31d   : >> { %v3398_v61 = vadd.f32 %v3378_v13, %v3249_v53 }
 0x31e   : >> { %12113 = vmatmul.msk.f32.gmra.mxu0 %vm434_vm0, %v14675_v28  ;;  %v3101_v18 = vadd.f32 %v3083_v32, %v2951_v27  ;;  %v14841_v32 = vld [vmem:[%s13406_s29 + $0x2e0] sm:$0xff] }
 0x31f   : >> { %12129 = vmatmul.msk.f32.gmra.mxu1 %vm434_vm0, %v14568_v57  ;;  %v3418_v44 = vadd.f32 %v14596_v20, %v3398_v61  ;;  %12164 = vmatmul.msk.f32.gmra.mxu2 %vm434_vm0, %v14729_v43 }
 0x320   : >> { %12199 = vmatmul.msk.f32.gmra.mxu3 %vm434_vm0, %v14787_v24 }
 0x321   : >> { %v3434_v37 = vmax.f32 %v3418_v44, 0.0 }
 0x322   : >> { %v5921_v62 = vld [vmem:[#allocation2 + $0x1e0] ss:$2 sm:$0xff]  ;;  %v5925_v30 = vld [vmem:[#allocation2 + $0x1e1] ss:$2 sm:$0xff]  ;;  %v3232_v5 = vpop.f32.mrf.mxu2 }
 0x323   : >> { %v3381_v36 = vpop.f32.mrf.mxu3  ;;  %v5928_v14 = vmax.f32 %v5921_v62, %v5925_v30  ;;  %3450 = vst [vmem:[#allocation2 + $0x1f0] sm:$0xff] %v3434_v37  ;;  %v3250_v57 = vadd.f32 %v3232_v5, %v3101_v18  ;;  %v3555_v19 = vpop.f32.mrf.mxu0  ;;  %v14854_v18 = vld [vmem:[%s13406_s29 + $0x2e8] sm:$0xff]  ;;  %v12440_v30 = vld [vmem:[%s17044_s1 + $0x10] sm:$0xff] }
 0x324   : >> { %v3668_v59 = vpop.f32.mrf.mxu1  ;;  %v12354_v5 = vld [vmem:[%s17044_s1 + $0x30] sm:$0xff]  ;;  %5079 = vmatpush.msrb.mxu2 %v12440_v30  ;;  %v14951_v30 = vld [vmem:[%s13406_s29 + $0x320] sm:$0xff] }
 0x325   : >> { %v3399_v51 = vadd.f32 %v3381_v36, %v3250_v57  ;;  %v5930_v41 = vmax.f32 %v5918_v0, %v5928_v14  ;;  %v3669_v34 = vadd.f32 %v3668_v59, %v3555_v19  ;;  %4711 = vmatpush.msrb.mxu0 %v12354_v5  ;;  %v14873_v59 = vld [vmem:[%s13406_s29 + $0x2f0] sm:$0xff] }
 0x326   : >> { %12219 = vmatmul.msk.f32.vlgmr.msra.gmra.mxu0 %vm434_vm0, %v14630_v42 }
 0x327   : >> { %12270 = vmatmul.msk.f32.vlgmr.msra.gmra.mxu1 %vm434_vm0, %v14688_v3  ;;  %v3419_v35 = vadd.f32 %v14596_v20, %v3399_v51  ;;  %12286 = vmatmul.msk.f32.vlgmr.msra.gmra.mxu2 %vm434_vm0, %v14630_v42  ;;  %5932 = vst.msk [vmem:[#allocation3 + $0x62] sm:$0xff] %vm5762_vm1, %v5930_v41  ;;  %v5913_v42 = vld [vmem:[#allocation2 + $0x1d0] ss:$2 sm:$0x3f] }
 0x328   : >> { %12321 = vmatmul.msk.f32.vlgmr.msra.gmra.mxu3 %vm434_vm0, %v14742_v16  ;;  %5473 = vmatpush.msra.mxu1 %v12355_v4  ;;  %v5919_v22 = vmax.f32 %v5913_v42, %v5917_v11 }
 0x329   : >> { %v3435_v26 = vmax.f32 %v3419_v35, 0.0 }
 0x32a   : >> { %v3801_v9 = vpop.f32.mrf.mxu2  ;;  %5474 = vmatpush.msra.mxu1 %v12354_v5 }
 0x32b   : >> { %v3950_v31 = vpop.f32.mrf.mxu3  ;;  %3451 = vst [vmem:[#allocation2 + $0x1f8] sm:$0xff] %v3435_v26  ;;  %v3849_v12 = vadd.f32 %v3801_v9, %v3669_v34  ;;  %v3558_v6 = vpop.f32.mrf.mxu0 }
 0x32c   : >> { %v3671_v48 = vpop.f32.mrf.mxu1 }
 0x32d   : >> { %v14809_v7 = vadd.f32 %v3950_v31, %v3849_v12  ;;  %v3672_v20 = vadd.f32 %v3671_v48, %v3558_v6  ;;  %v14886_v31 = vld [vmem:[%s13406_s29 + $0x2f8] sm:$0xff] }
 0x32e   : >> { %12220 = vmatmul.msk.f32.gmra.mxu0 %vm434_vm0, %v14643_v10 }
 0x32f   : >> { %12271 = vmatmul.msk.f32.gmra.mxu1 %vm434_vm0, %v14702_v38  ;;  %12287 = vmatmul.msk.f32.gmra.mxu2 %vm434_vm0, %v14643_v10 }
 0x330   : >> { %12322 = vmatmul.msk.f32.gmra.mxu3 %vm434_vm0, %v14755_v55 }
 0x332   : >> { %v5923_v47 = vld [vmem:[#allocation2 + $0x1f0] ss:$2 sm:$0x3f]  ;;  %v5927_v58 = vld [vmem:[#allocation2 + $0x1f1] ss:$2 sm:$0x3f]  ;;  %v3804_v60 = vpop.f32.mrf.mxu2 }
 0x333   : >> { %v3953_v56 = vpop.f32.mrf.mxu3  ;;  %v5929_v39 = vmax.f32 %v5923_v47, %v5927_v58  ;;  %v3850_v52 = vadd.f32 %v3804_v60, %v3672_v20  ;;  %v3561_v63 = vpop.f32.mrf.mxu0  ;;  %v14899_v47 = vld [vmem:[%s13406_s29 + $0x300] sm:$0xff] }
 0x334   : >> { %v3674_v17 = vpop.f32.mrf.mxu1 }
 0x335   : >> { %v14819_v49 = vadd.f32 %v3953_v56, %v3850_v52  ;;  %v5931_v8 = vmax.f32 %v5919_v22, %v5929_v39  ;;  %v3675_v10 = vadd.f32 %v3674_v17, %v3561_v63  ;;  %v14912_v63 = vld [vmem:[%s13406_s29 + $0x308] sm:$0xff] }
 0x336   : >> { %12221 = vmatmul.msk.f32.gmra.mxu0 %vm434_vm0, %v14662_v54 }
 0x337   : >> { %12272 = vmatmul.msk.f32.gmra.mxu1 %vm434_vm0, %v14715_v50  ;;  %12288 = vmatmul.msk.f32.gmra.mxu2 %vm434_vm0, %v14662_v54  ;;  %5933 = vst.msk [vmem:[#allocation3 + $0x6a] sm:$0x3f] %vm5764_vm2, %v5931_v8 }
 0x338   : >> { %12323 = vmatmul.msk.f32.gmra.mxu3 %vm434_vm0, %v14774_v1 }
 0x33a   : >> { %v3807_v15 = vpop.f32.mrf.mxu2 }
 0x33b   : >> { %v3956_v4 = vpop.f32.mrf.mxu3  ;;  %v3851_v46 = vadd.f32 %v3807_v15, %v3675_v10  ;;  %v3564_v2 = vpop.f32.mrf.mxu0 }
 0x33c   : >> { %v3677_v23 = vpop.f32.mrf.mxu1 }
 0x33d   : >> { %v14830_v45 = vadd.f32 %v3956_v4, %v3851_v46  ;;  %v3678_v54 = vadd.f32 %v3677_v23, %v3564_v2  ;;  %v14925_v2 = vld [vmem:[%s13406_s29 + $0x310] sm:$0xff] }
 0x33e   : >> { %12222 = vmatmul.msk.f32.gmra.mxu0 %vm434_vm0, %v14675_v28 }
 0x33f   : >> { %12273 = vmatmul.msk.f32.gmra.mxu1 %vm434_vm0, %v14729_v43  ;;  %12289 = vmatmul.msk.f32.gmra.mxu2 %vm434_vm0, %v14675_v28 }
 0x340   : >> { %12324 = vmatmul.msk.f32.gmra.mxu3 %vm434_vm0, %v14787_v24 }
 0x342   : >> { %v3810_v25 = vpop.f32.mrf.mxu2 }
 0x343   : >> { %v3959_v29 = vpop.f32.mrf.mxu3  ;;  %v3852_v13 = vadd.f32 %v3810_v25, %v3678_v54  ;;  %v3567_v53 = vpop.f32.mrf.mxu0 }
 0x344   : >> { %v3680_v40 = vpop.f32.mrf.mxu1 }
 0x345   : >> { %v14843_v61 = vadd.f32 %v3959_v29, %v3852_v13  ;;  %v3681_v28 = vadd.f32 %v3680_v40, %v3567_v53  ;;  %v14938_v40 = vld [vmem:[%s13406_s29 + $0x318] sm:$0xff] }
 0x346   : >> { %12223 = vmatmul.msk.f32.gmra.mxu0 %vm434_vm0, %v14688_v3 }
 0x347   : >> { %12274 = vmatmul.msk.f32.gmra.mxu1 %vm434_vm0, %v14742_v16  ;;  %12290 = vmatmul.msk.f32.gmra.mxu2 %vm434_vm0, %v14688_v3 }
 0x348   : >> { %12325 = vmatmul.msk.f32.gmra.mxu3 %vm434_vm0, %v14841_v32 }
 0x34a   : >> { %v3813_v27 = vpop.f32.mrf.mxu2 }
 0x34b   : >> { %v3962_v44 = vpop.f32.mrf.mxu3  ;;  %v3853_v21 = vadd.f32 %v3813_v27, %v3681_v28  ;;  %v3570_v33 = vpop.f32.mrf.mxu0 }
 0x34c   : >> { %v3683_v37 = vpop.f32.mrf.mxu1 }
 0x34d   : >> { %v14856_v62 = vadd.f32 %v3962_v44, %v3853_v21  ;;  %v3684_v3 = vadd.f32 %v3683_v37, %v3570_v33 }
 0x34e   : >> { %12224 = vmatmul.msk.f32.gmra.mxu0 %vm434_vm0, %v14702_v38 }
 0x34f   : >> { %12275 = vmatmul.msk.f32.gmra.mxu1 %vm434_vm0, %v14755_v55  ;;  %12291 = vmatmul.msk.f32.gmra.mxu2 %vm434_vm0, %v14702_v38 }
 0x350   : >> { %12326 = vmatmul.msk.f32.gmra.mxu3 %vm434_vm0, %v14854_v18 }
 0x352   : >> { %v3816_v36 = vpop.f32.mrf.mxu2 }
 0x353   : >> { %v3965_v0 = vpop.f32.mrf.mxu3  ;;  %v3854_v14 = vadd.f32 %v3816_v36, %v3684_v3  ;;  %v3573_v57 = vpop.f32.mrf.mxu0 }
 0x354   : >> { %v3686_v19 = vpop.f32.mrf.mxu1 }
 0x355   : >> { %v14875_v51 = vadd.f32 %v3965_v0, %v3854_v14  ;;  %v3687_v38 = vadd.f32 %v3686_v19, %v3573_v57  ;;  %v12579_v0 = vld [vmem:[%s17027_s3 + $0x8] sm:$0xff] }
 0x356   : >> { %12225 = vmatmul.msk.f32.gmra.mxu0 %vm434_vm0, %v14715_v50  ;;  %6181 = vmatpush.msra.mxu3 %v12579_v0 }
 0x357   : >> { %12276 = vmatmul.msk.f32.gmra.mxu1 %vm434_vm0, %v14774_v1  ;;  %12292 = vmatmul.msk.f32.gmra.mxu2 %vm434_vm0, %v14715_v50 }
 0x358   : >> { %12327 = vmatmul.msk.f32.gmra.mxu3 %vm434_vm0, %v14873_v59 }
 0x35a   : >> { %v3819_v41 = vpop.f32.mrf.mxu2 }
 0x35b   : >> { %v3968_v35 = vpop.f32.mrf.mxu3  ;;  %v3855_v34 = vadd.f32 %v3819_v41, %v3687_v38  ;;  %v3576_v26 = vpop.f32.mrf.mxu0  ;;  %v14967_v38 = vld [vmem:[%s13406_s29 + $0x328] sm:$0xff] }
 0x35c   : >> { %v3689_v9 = vpop.f32.mrf.mxu1 }
 0x35d   : >> { %v14888_v12 = vadd.f32 %v3968_v35, %v3855_v34  ;;  %v3690_v50 = vadd.f32 %v3689_v9, %v3576_v26 }
 0x35e   : >> { %12226 = vmatmul.msk.f32.gmra.mxu0 %vm434_vm0, %v14729_v43 }
 0x35f   : >> { %12277 = vmatmul.msk.f32.gmra.mxu1 %vm434_vm0, %v14787_v24  ;;  %12293 = vmatmul.msk.f32.gmra.mxu2 %vm434_vm0, %v14729_v43 }
 0x360   : >> { %12328 = vmatmul.msk.f32.gmra.mxu3 %vm434_vm0, %v14886_v31 }
 0x362   : >> { %v3822_v6 = vpop.f32.mrf.mxu2 }
 0x363   : >> { %v3971_v48 = vpop.f32.mrf.mxu3  ;;  %v3856_v20 = vadd.f32 %v3822_v6, %v3690_v50  ;;  %v3579_v42 = vpop.f32.mrf.mxu0 }
 0x364   : >> { %v3692_v11 = vpop.f32.mrf.mxu1 }
 0x365   : >> { %v14901_v58 = vadd.f32 %v3971_v48, %v3856_v20  ;;  %v3693_v43 = vadd.f32 %v3692_v11, %v3579_v42  ;;  %v14980_v48 = vld [vmem:[%s13406_s29 + $0x330] sm:$0xff] }
 0x366   : >> { %12227 = vmatmul.msk.f32.gmra.mxu0 %vm434_vm0, %v14742_v16 }
 0x367   : >> { %12278 = vmatmul.msk.f32.gmra.mxu1 %vm434_vm0, %v14841_v32  ;;  %12294 = vmatmul.msk.f32.gmra.mxu2 %vm434_vm0, %v14742_v16 }
 0x368   : >> { %12329 = vmatmul.msk.f32.gmra.mxu3 %vm434_vm0, %v14899_v47 }
 0x36a   : >> { %v3825_v60 = vpop.f32.mrf.mxu2 }
 0x36b   : >> { %v3974_v56 = vpop.f32.mrf.mxu3  ;;  %v3857_v22 = vadd.f32 %v3825_v60, %v3693_v43  ;;  %v3582_v39 = vpop.f32.mrf.mxu0  ;;  %v12562_v60 = vld [vmem:[%s17044_s1 + $0x48] sm:$0xff] }
 0x36c   : >> { %v3695_v52 = vpop.f32.mrf.mxu1  ;;  %5622 = vmatpush.msra.mxu2 %v12562_v60 }
 0x36d   : >> { %v14914_v17 = vadd.f32 %v3974_v56, %v3857_v22  ;;  %v3696_v16 = vadd.f32 %v3695_v52, %v3582_v39  ;;  %v12492_v56 = vld [vmem:[%s17044_s1 + $0x28] sm:$0xff] }
 0x36e   : >> { %12228 = vmatmul.msk.f32.gmra.mxu0 %vm434_vm0, %v14755_v55 }
 0x36f   : >> { %12279 = vmatmul.msk.f32.gmra.mxu1 %vm434_vm0, %v14854_v18  ;;  %12295 = vmatmul.msk.f32.gmra.mxu2 %vm434_vm0, %v14755_v55 }
 0x370   : >> { %12330 = vmatmul.msk.f32.gmra.mxu3 %vm434_vm0, %v14912_v63  ;;  %5324 = vmatpush.msra.mxu0 %v12492_v56 }
 0x372   : >> { %v3828_v8 = vpop.f32.mrf.mxu2 }
 0x373   : >> { %v3977_v10 = vpop.f32.mrf.mxu3  ;;  %v3858_v15 = vadd.f32 %v3828_v8, %v3696_v16  ;;  %v3585_v4 = vpop.f32.mrf.mxu0  ;;  %v14999_v16 = vld [vmem:[%s13406_s29 + $0x338] sm:$0xff] }
 0x374   : >> { %v3698_v46 = vpop.f32.mrf.mxu1 }
 0x375   : >> { %v14927_v23 = vadd.f32 %v3977_v10, %v3858_v15  ;;  %v3699_v55 = vadd.f32 %v3698_v46, %v3585_v4  ;;  %v15014_v46 = vld [vmem:[%s17045_s2] ss:$0 sm:$0xff] }
 0x376   : >> { %12229 = vmatmul.msk.f32.gmra.mxu0 %vm434_vm0, %v14774_v1 }
 0x377   : >> { %12280 = vmatmul.msk.f32.gmra.mxu1 %vm434_vm0, %v14873_v59  ;;  %12296 = vmatmul.msk.f32.gmra.mxu2 %vm434_vm0, %v14774_v1 }
 0x378   : >> { %12331 = vmatmul.msk.f32.gmra.mxu3 %vm434_vm0, %v14925_v2 }
 0x37a   : >> { %v3831_v54 = vpop.f32.mrf.mxu2 }
 0x37b   : >> { %v3980_v25 = vpop.f32.mrf.mxu3  ;;  %v3859_v29 = vadd.f32 %v3831_v54, %v3699_v55  ;;  %v3588_v13 = vpop.f32.mrf.mxu0 }
 0x37c   : >> { %v3701_v53 = vpop.f32.mrf.mxu1 }
 0x37d   : >> { %v14940_v28 = vadd.f32 %v3980_v25, %v3859_v29  ;;  %v3702_v1 = vadd.f32 %v3701_v53, %v3588_v13 }
 0x37e   : >> { %12230 = vmatmul.msk.f32.gmra.mxu0 %vm434_vm0, %v14787_v24 }
 0x37f   : >> { %12281 = vmatmul.msk.f32.gmra.mxu1 %vm434_vm0, %v14886_v31  ;;  %12297 = vmatmul.msk.f32.gmra.mxu2 %vm434_vm0, %v14787_v24 }
 0x380   : >> { %12332 = vmatmul.msk.f32.gmra.mxu3 %vm434_vm0, %v14938_v40 }
 0x382   : >> { %v3834_v27 = vpop.f32.mrf.mxu2 }
 0x383   : >> { %v3983_v44 = vpop.f32.mrf.mxu3  ;;  %v3860_v21 = vadd.f32 %v3834_v27, %v3702_v1  ;;  %v3591_v33 = vpop.f32.mrf.mxu0 }
 0x384   : >> { %v3704_v37 = vpop.f32.mrf.mxu1 }
 0x385   : >> { %v14953_v3 = vadd.f32 %v3983_v44, %v3860_v21  ;;  %v3705_v24 = vadd.f32 %v3704_v37, %v3591_v33 }
 0x386   : >> { %12231 = vmatmul.msk.f32.gmra.mxu0 %vm434_vm0, %v14841_v32 }
 0x387   : >> { %12282 = vmatmul.msk.f32.gmra.mxu1 %vm434_vm0, %v14899_v47  ;;  %12298 = vmatmul.msk.f32.gmra.mxu2 %vm434_vm0, %v14841_v32 }
 0x388   : >> { %12333 = vmatmul.msk.f32.gmra.mxu3 %vm434_vm0, %v14951_v30 }
 0x38a   : >> { %v3837_v5 = vpop.f32.mrf.mxu2 }
 0x38b   : >> { %v3986_v36 = vpop.f32.mrf.mxu3  ;;  %v3861_v14 = vadd.f32 %v3837_v5, %v3705_v24  ;;  %v3594_v57 = vpop.f32.mrf.mxu0 }
 0x38c   : >> { %v3707_v19 = vpop.f32.mrf.mxu1 }
 0x38d   : >> { %v14969_v41 = vadd.f32 %v3986_v36, %v3861_v14  ;;  %v3708_v35 = vadd.f32 %v3707_v19, %v3594_v57 }
 0x38e   : >> { %12232 = vmatmul.msk.f32.gmra.mxu0 %vm434_vm0, %v14854_v18 }
 0x38f   : >> { %12283 = vmatmul.msk.f32.gmra.mxu1 %vm434_vm0, %v14912_v63  ;;  %12299 = vmatmul.msk.f32.gmra.mxu2 %vm434_vm0, %v14854_v18 }
 0x390   : >> { %12334 = vmatmul.msk.f32.gmra.mxu3 %vm434_vm0, %v14967_v38 }
 0x392   : >> { %v3840_v34 = vpop.f32.mrf.mxu2 }
 0x393   : >> { %v3989_v26 = vpop.f32.mrf.mxu3  ;;  %v3862_v9 = vadd.f32 %v3840_v34, %v3708_v35  ;;  %v3597_v50 = vpop.f32.mrf.mxu0 }
 0x394   : >> { %v3710_v6 = vpop.f32.mrf.mxu1 }
 0x395   : >> { %v14982_v20 = vadd.f32 %v3989_v26, %v3862_v9  ;;  %v3711_v42 = vadd.f32 %v3710_v6, %v3597_v50 }
 0x396   : >> { %12233 = vmatmul.msk.f32.gmra.mxu0 %vm434_vm0, %v14873_v59 }
 0x397   : >> { %12284 = vmatmul.msk.f32.gmra.mxu1 %vm434_vm0, %v14925_v2  ;;  %12300 = vmatmul.msk.f32.gmra.mxu2 %vm434_vm0, %v14873_v59 }
 0x398   : >> { %12335 = vmatmul.msk.f32.gmra.mxu3 %vm434_vm0, %v14980_v48 }
 0x39a   : >> { %v3843_v11 = vpop.f32.mrf.mxu2 }
 0x39b   : >> { %v3992_v43 = vpop.f32.mrf.mxu3  ;;  %v3863_v22 = vadd.f32 %v3843_v11, %v3711_v42  ;;  %v3600_v39 = vpop.f32.mrf.mxu0 }
 0x39c   : >> { %v3713_v52 = vpop.f32.mrf.mxu1 }
 0x39d   : >> { %v15001_v8 = vadd.f32 %v3992_v43, %v3863_v22  ;;  %v3714_v10 = vadd.f32 %v3713_v52, %v3600_v39 }
 0x39e   : >> { %12234 = vmatmul.msk.f32.gmra.mxu0 %vm434_vm0, %v14886_v31 }
 0x39f   : >> { %12285 = vmatmul.msk.f32.gmra.mxu1 %vm434_vm0, %v14938_v40  ;;  %12301 = vmatmul.msk.f32.gmra.mxu2 %vm434_vm0, %v14886_v31 }
 0x3a0   : >> { %12336 = vmatmul.msk.f32.gmra.mxu3 %vm434_vm0, %v14999_v16 }
 0x3a2   : >> { %v3846_v15 = vpop.f32.mrf.mxu2 }
 0x3a3   : >> { %v3995_v4 = vpop.f32.mrf.mxu3  ;;  %v3864_v55 = vadd.f32 %v3846_v15, %v3714_v10  ;;  %v4099_v54 = vpop.f32.mrf.mxu0 }
 0x3a4   : >> { %v4318_v25 = vpop.f32.mrf.mxu1  ;;  %v4147_v29 = vadd.f32 %v4099_v54, %v14809_v7 }
 0x3a5   : >> { %v15017_v13 = vadd.f32 %v3995_v4, %v3864_v55 }
 0x3a6   : >> { %v4167_v53 = vadd.f32 %v15014_v46, %v4147_v29  ;;  %12356 = vmatmul.msk.f32.vlgmr.msrb.gmra.mxu0 %vm434_vm0, %v14841_v32 }
 0x3a7   : >> { %12391 = vmatmul.msk.f32.vlgmr.msrb.gmra.mxu1 %vm434_vm0, %v14899_v47  ;;  %12442 = vmatmul.msk.f32.vlgmr.msrb.gmra.mxu2 %vm434_vm0, %v14951_v30 }
 0x3a8   : >> { %12458 = vmatmul.msk.f32.vlgmr.msrb.gmra.mxu3 %vm434_vm0, %v14899_v47  ;;  %v4183_v1 = vmax.f32 %v4167_v53, 0.0 }
 0x3aa   : >> { %4199 = vst [vmem:[#allocation2 + $0x200] sm:$0xff] %v4183_v1  ;;  %v4431_v27 = vpop.f32.mrf.mxu2 }
 0x3ab   : >> { %v4564_v7 = vpop.f32.mrf.mxu3  ;;  %v4432_v44 = vadd.f32 %v4431_v27, %v4318_v25  ;;  %v4102_v21 = vpop.f32.mrf.mxu0 }
 0x3ac   : >> { %v4321_v33 = vpop.f32.mrf.mxu1  ;;  %v4148_v37 = vadd.f32 %v4102_v21, %v14819_v49 }
 0x3ad   : >> { %v15029_v24 = vadd.f32 %v4564_v7, %v4432_v44 }
 0x3ae   : >> { %v4168_v32 = vadd.f32 %v15014_v46, %v4148_v37  ;;  %12357 = vmatmul.msk.f32.gmra.mxu0 %vm434_vm0, %v14854_v18 }
 0x3af   : >> { %12392 = vmatmul.msk.f32.gmra.mxu1 %vm434_vm0, %v14912_v63  ;;  %12443 = vmatmul.msk.f32.gmra.mxu2 %vm434_vm0, %v14967_v38 }
 0x3b0   : >> { %12459 = vmatmul.msk.f32.gmra.mxu3 %vm434_vm0, %v14912_v63  ;;  %v4184_v5 = vmax.f32 %v4168_v32, 0.0 }
 0x3b2   : >> { %4200 = vst [vmem:[#allocation2 + $0x208] sm:$0xff] %v4184_v5  ;;  %v4434_v36 = vpop.f32.mrf.mxu2  ;;  %v15096_v5 = vld [vmem:[%s13406_s29 + $0x350] sm:$0xff] }
 0x3b3   : >> { %v4567_v49 = vpop.f32.mrf.mxu3  ;;  %v4435_v0 = vadd.f32 %v4434_v36, %v4321_v33  ;;  %v4105_v14 = vpop.f32.mrf.mxu0 }
 0x3b4   : >> { %v4324_v57 = vpop.f32.mrf.mxu1  ;;  %v4149_v19 = vadd.f32 %v4105_v14, %v14830_v45 }
 0x3b5   : >> { %v15041_v35 = vadd.f32 %v4567_v49, %v4435_v0 }
 0x3b6   : >> { %v4169_v18 = vadd.f32 %v15014_v46, %v4149_v19  ;;  %12358 = vmatmul.msk.f32.gmra.mxu0 %vm434_vm0, %v14873_v59 }
 0x3b7   : >> { %12393 = vmatmul.msk.f32.gmra.mxu1 %vm434_vm0, %v14925_v2  ;;  %12444 = vmatmul.msk.f32.gmra.mxu2 %vm434_vm0, %v14980_v48 }
 0x3b8   : >> { %12460 = vmatmul.msk.f32.gmra.mxu3 %vm434_vm0, %v14925_v2  ;;  %v4185_v34 = vmax.f32 %v4169_v18, 0.0 }
 0x3b9   : >> { %v5935_v49 = vld [vmem:[#allocation2 + $0x200] ss:$2 sm:$0xff]  ;;  %v5939_v0 = vld [vmem:[#allocation2 + $0x201] ss:$2 sm:$0xff] }
 0x3ba   : >> { %4201 = vst [vmem:[#allocation2 + $0x210] sm:$0xff] %v4185_v34  ;;  %v4437_v26 = vpop.f32.mrf.mxu2  ;;  %v5942_v19 = vmax.f32 %v5935_v49, %v5939_v0 }
 0x3bb   : >> { %v4570_v45 = vpop.f32.mrf.mxu3  ;;  %v4438_v9 = vadd.f32 %v4437_v26, %v4324_v57  ;;  %v4108_v50 = vpop.f32.mrf.mxu0  ;;  %v12561_v26 = vld [vmem:[%s17044_s1 + $0x40] sm:$0xff] }
 0x3bc   : >> { %v4327_v6 = vpop.f32.mrf.mxu1  ;;  %v4150_v42 = vadd.f32 %v4108_v50, %v14843_v61  ;;  %5623 = vmatpush.msra.mxu2 %v12561_v26 }
 0x3bd   : >> { %v15053_v59 = vadd.f32 %v4570_v45, %v4438_v9  ;;  %v12491_v45 = vld [vmem:[%s17044_s1 + $0x20] sm:$0xff] }
 0x3be   : >> { %v4170_v11 = vadd.f32 %v15014_v46, %v4150_v42  ;;  %12359 = vmatmul.msk.f32.gmra.mxu0 %vm434_vm0, %v14886_v31  ;;  %v15066_v31 = vld [vmem:[%s13406_s29 + $0x340] sm:$0xff] }
 0x3bf   : >> { %12394 = vmatmul.msk.f32.gmra.mxu1 %vm434_vm0, %v14938_v40  ;;  %12445 = vmatmul.msk.f32.gmra.mxu2 %vm434_vm0, %v14999_v16 }
 0x3c0   : >> { %12461 = vmatmul.msk.f32.gmra.mxu3 %vm434_vm0, %v14938_v40  ;;  %v4186_v43 = vmax.f32 %v4170_v11, 0.0  ;;  %5325 = vmatpush.msra.mxu0 %v12491_v45  ;;  %v15117_v11 = vld [vmem:[%s13406_s29 + $0x358] sm:$0xff] }
 0x3c2   : >> { %4202 = vst [vmem:[#allocation2 + $0x218] sm:$0xff] %v4186_v43  ;;  %v4440_v60 = vpop.f32.mrf.mxu2 }
 0x3c3   : >> { %v4573_v61 = vpop.f32.mrf.mxu3  ;;  %v4441_v56 = vadd.f32 %v4440_v60, %v4327_v6  ;;  %v4111_v22 = vpop.f32.mrf.mxu0 }
 0x3c4   : >> { %v4330_v39 = vpop.f32.mrf.mxu1  ;;  %v4151_v52 = vadd.f32 %v4111_v22, %v14856_v62 }
 0x3c5   : >> { %v15068_v10 = vadd.f32 %v4573_v61, %v4441_v56 }
 0x3c6   : >> { %v4171_v15 = vadd.f32 %v15014_v46, %v4151_v52  ;;  %12360 = vmatmul.msk.f32.gmra.mxu0 %vm434_vm0, %v14899_v47  ;;  %v15081_v47 = vld [vmem:[%s13406_s29 + $0x348] sm:$0xff] }
 0x3c7   : >> { %12395 = vmatmul.msk.f32.gmra.mxu1 %vm434_vm0, %v14951_v30  ;;  %12446 = vmatmul.msk.f32.gmra.mxu2 %vm434_vm0, %v15066_v31 }
 0x3c8   : >> { %12462 = vmatmul.msk.f32.gmra.mxu3 %vm434_vm0, %v14951_v30  ;;  %v4187_v62 = vmax.f32 %v4171_v15, 0.0 }
 0x3ca   : >> { %4203 = vst [vmem:[#allocation2 + $0x220] sm:$0xff] %v4187_v62  ;;  %v4443_v4 = vpop.f32.mrf.mxu2  ;;  %v15133_v62 = vld [vmem:[%s13406_s29 + $0x360] sm:$0xff] }
 0x3cb   : >> { %v4576_v55 = vpop.f32.mrf.mxu3  ;;  %v4444_v54 = vadd.f32 %v4443_v4, %v4330_v39  ;;  %v4114_v25 = vpop.f32.mrf.mxu0 }
 0x3cc   : >> { %v4333_v29 = vpop.f32.mrf.mxu1  ;;  %v4152_v53 = vadd.f32 %v4114_v25, %v14875_v51  ;;  %v5941_v25 = vld [vmem:[#allocation2 + $0x211] ss:$2 sm:$0x3f] }
 0x3cd   : >> { %v15083_v1 = vadd.f32 %v4576_v55, %v4444_v54  ;;  %v5937_v54 = vld [vmem:[#allocation2 + $0x210] ss:$2 sm:$0x3f] }
 0x3ce   : >> { %v4172_v27 = vadd.f32 %v15014_v46, %v4152_v53  ;;  %12361 = vmatmul.msk.f32.gmra.mxu0 %vm434_vm0, %v14912_v63 }
 0x3cf   : >> { %12396 = vmatmul.msk.f32.gmra.mxu1 %vm434_vm0, %v14967_v38  ;;  %12447 = vmatmul.msk.f32.gmra.mxu2 %vm434_vm0, %v15081_v47 }
 0x3d0   : >> { %12463 = vmatmul.msk.f32.gmra.mxu3 %vm434_vm0, %v14967_v38  ;;  %v4188_v51 = vmax.f32 %v4172_v27, 0.0  ;;  %v5943_v27 = vmax.f32 %v5937_v54, %v5941_v25 }
 0x3d2   : >> { %4204 = vst [vmem:[#allocation2 + $0x228] sm:$0xff] %v4188_v51  ;;  %v4446_v7 = vpop.f32.mrf.mxu2 }
 0x3d3   : >> { %v4579_v44 = vpop.f32.mrf.mxu3  ;;  %v4447_v21 = vadd.f32 %v4446_v7, %v4333_v29  ;;  %v4117_v33 = vpop.f32.mrf.mxu0 }
 0x3d4   : >> { %v4336_v37 = vpop.f32.mrf.mxu1  ;;  %v4153_v32 = vadd.f32 %v4117_v33, %v14888_v12 }
 0x3d5   : >> { %v15098_v63 = vadd.f32 %v4579_v44, %v4447_v21 }
 0x3d6   : >> { %v4173_v36 = vadd.f32 %v15014_v46, %v4153_v32  ;;  %12362 = vmatmul.msk.f32.gmra.mxu0 %vm434_vm0, %v14925_v2  ;;  %v15148_v32 = vld [vmem:[%s13406_s29 + $0x368] sm:$0xff] }
 0x3d7   : >> { %12397 = vmatmul.msk.f32.gmra.mxu1 %vm434_vm0, %v14980_v48  ;;  %12448 = vmatmul.msk.f32.gmra.mxu2 %vm434_vm0, %v15096_v5 }
 0x3d8   : >> { %12464 = vmatmul.msk.f32.gmra.mxu3 %vm434_vm0, %v14980_v48  ;;  %v4189_v12 = vmax.f32 %v4173_v36, 0.0 }
 0x3d9   : >> { %v5945_v14 = vld [vmem:[#allocation2 + $0x220] ss:$2 sm:$0xff]  ;;  %v5949_v57 = vld [vmem:[#allocation2 + $0x221] ss:$2 sm:$0xff] }
 0x3da   : >> { %v5952_v18 = vmax.f32 %v5945_v14, %v5949_v57  ;;  %4205 = vst [vmem:[#allocation2 + $0x230] sm:$0xff] %v4189_v12  ;;  %v4449_v34 = vpop.f32.mrf.mxu2 }
 0x3db   : >> { %v4582_v2 = vpop.f32.mrf.mxu3  ;;  %v4450_v9 = vadd.f32 %v4449_v34, %v4336_v37  ;;  %v4120_v50 = vpop.f32.mrf.mxu0  ;;  %v15164_v34 = vld [vmem:[%s13406_s29 + $0x370] sm:$0xff] }
 0x3dc   : >> { %v4339_v6 = vpop.f32.mrf.mxu1  ;;  %v4154_v42 = vadd.f32 %v4120_v50, %v14901_v58  ;;  %v5954_v43 = vmax.f32 %v5942_v19, %v5952_v18 }
 0x3dd   : >> { %v15119_v60 = vadd.f32 %v4582_v2, %v4450_v9 }
 0x3de   : >> { %v4174_v61 = vadd.f32 %v15014_v46, %v4154_v42  ;;  %12363 = vmatmul.msk.f32.gmra.mxu0 %vm434_vm0, %v14938_v40  ;;  %5956 = vst.msk [vmem:[#allocation3 + $0x70] sm:$0xff] %vm5762_vm1, %v5954_v43 }
 0x3df   : >> { %12398 = vmatmul.msk.f32.gmra.mxu1 %vm434_vm0, %v14999_v16  ;;  %12449 = vmatmul.msk.f32.gmra.mxu2 %vm434_vm0, %v15117_v11 }
 0x3e0   : >> { %12465 = vmatmul.msk.f32.gmra.mxu3 %vm434_vm0, %v14999_v16  ;;  %v4190_v58 = vmax.f32 %v4174_v61, 0.0 }
 0x3e2   : >> { %4206 = vst [vmem:[#allocation2 + $0x238] sm:$0xff] %v4190_v58  ;;  %v4452_v56 = vpop.f32.mrf.mxu2 }
 0x3e3   : >> { %v4585_v22 = vpop.f32.mrf.mxu3  ;;  %v4453_v39 = vadd.f32 %v4452_v56, %v4339_v6  ;;  %v4123_v52 = vpop.f32.mrf.mxu0 }
 0x3e4   : >> { %v4342_v15 = vpop.f32.mrf.mxu1  ;;  %v4155_v40 = vadd.f32 %v4123_v52, %v14914_v17 }
 0x3e5   : >> { %v15135_v4 = vadd.f32 %v4585_v22, %v4453_v39 }
 0x3e6   : >> { %v4175_v55 = vadd.f32 %v15014_v46, %v4155_v40  ;;  %12364 = vmatmul.msk.f32.gmra.mxu0 %vm434_vm0, %v14951_v30 }
 0x3e7   : >> { %12399 = vmatmul.msk.f32.gmra.mxu1 %vm434_vm0, %v15066_v31  ;;  %12450 = vmatmul.msk.f32.gmra.mxu2 %vm434_vm0, %v15133_v62 }
 0x3e8   : >> { %12466 = vmatmul.msk.f32.gmra.mxu3 %vm434_vm0, %v15066_v31  ;;  %v4191_v17 = vmax.f32 %v4175_v55, 0.0 }
 0x3e9   : >> { %v5947_v29 = vld [vmem:[#allocation2 + $0x230] ss:$2 sm:$0x3f]  ;;  %v5951_v53 = vld [vmem:[#allocation2 + $0x231] ss:$2 sm:$0x3f] }
 0x3ea   : >> { %v5953_v51 = vmax.f32 %v5947_v29, %v5951_v53  ;;  %4207 = vst [vmem:[#allocation2 + $0x240] sm:$0xff] %v4191_v17  ;;  %v4455_v7 = vpop.f32.mrf.mxu2 }
 0x3eb   : >> { %v4588_v30 = vpop.f32.mrf.mxu3  ;;  %v4456_v44 = vadd.f32 %v4455_v7, %v4342_v15  ;;  %v4126_v21 = vpop.f32.mrf.mxu0  ;;  %v15209_v7 = vld [vmem:[%s13406_s29 + $0x388] sm:$0xff] }
 0x3ec   : >> { %v4345_v33 = vpop.f32.mrf.mxu1  ;;  %v4156_v37 = vadd.f32 %v4126_v21, %v14927_v23  ;;  %v5955_v36 = vmax.f32 %v5943_v27, %v5953_v51 }
 0x3ed   : >> { %v15150_v49 = vadd.f32 %v4588_v30, %v4456_v44  ;;  %v12650_v30 = vld [vmem:[%s17027_s3 + $0x20] sm:$0xff] }
 0x3ee   : >> { %v4176_v0 = vadd.f32 %v15014_v46, %v4156_v37  ;;  %12365 = vmatmul.msk.f32.gmra.mxu0 %vm434_vm0, %v14967_v38  ;;  %5957 = vst.msk [vmem:[#allocation3 + $0x78] sm:$0x3f] %vm5764_vm2, %v5955_v36  ;;  %6748 = vmatpush.msrb.mxu3 %v12650_v30 }
 0x3ef   : >> { %12400 = vmatmul.msk.f32.gmra.mxu1 %vm434_vm0, %v15081_v47  ;;  %12451 = vmatmul.msk.f32.gmra.mxu2 %vm434_vm0, %v15148_v32 }
 0x3f0   : >> { %12467 = vmatmul.msk.f32.gmra.mxu3 %vm434_vm0, %v15081_v47  ;;  %v4192_v23 = vmax.f32 %v4176_v0, 0.0 }
 0x3f2   : >> { %4208 = vst [vmem:[#allocation2 + $0x248] sm:$0xff] %v4192_v23  ;;  %v4458_v12 = vpop.f32.mrf.mxu2 }
 0x3f3   : >> { %v4591_v14 = vpop.f32.mrf.mxu3  ;;  %v4459_v57 = vadd.f32 %v4458_v12, %v4345_v33  ;;  %v4129_v19 = vpop.f32.mrf.mxu0 }
 0x3f4   : >> { %v4348_v18 = vpop.f32.mrf.mxu1  ;;  %v4157_v38 = vadd.f32 %v4129_v19, %v14940_v28 }
 0x3f5   : >> { %v15166_v2 = vadd.f32 %v4591_v14, %v4459_v57  ;;  %v15227_v14 = vld [vmem:[%s13406_s29 + $0x390] sm:$0xff] }
 0x3f6   : >> { %v4177_v26 = vadd.f32 %v15014_v46, %v4157_v38  ;;  %12366 = vmatmul.msk.f32.gmra.mxu0 %vm434_vm0, %v14980_v48  ;;  %v15179_v48 = vld [vmem:[%s13406_s29 + $0x378] sm:$0xff] }
 0x3f7   : >> { %12401 = vmatmul.msk.f32.gmra.mxu1 %vm434_vm0, %v15096_v5  ;;  %12452 = vmatmul.msk.f32.gmra.mxu2 %vm434_vm0, %v15164_v34 }
 0x3f8   : >> { %12468 = vmatmul.msk.f32.gmra.mxu3 %vm434_vm0, %v15096_v5  ;;  %v4193_v28 = vmax.f32 %v4177_v26, 0.0 }
 0x3f9   : >> { %v5963_v38 = vld [vmem:[#allocation2 + $0x241] ss:$2 sm:$0xff] }
 0x3fa   : >> { %4209 = vst [vmem:[#allocation2 + $0x250] sm:$0xff] %v4193_v28  ;;  %v4461_v45 = vpop.f32.mrf.mxu2 }
 0x3fb   : >> { %v4594_v9 = vpop.f32.mrf.mxu3  ;;  %v4462_v50 = vadd.f32 %v4461_v45, %v4348_v18  ;;  %v4132_v6 = vpop.f32.mrf.mxu0  ;;  %v5959_v18 = vld [vmem:[#allocation2 + $0x240] ss:$2 sm:$0xff] }
 0x3fc   : >> { %v4351_v42 = vpop.f32.mrf.mxu1  ;;  %v4158_v43 = vadd.f32 %v4132_v6, %v14953_v3  ;;  %v5966_v45 = vmax.f32 %v5959_v18, %v5963_v38 }
 0x3fd   : >> { %v15181_v61 = vadd.f32 %v4594_v9, %v4462_v50 }
 0x3fe   : >> { %v4178_v58 = vadd.f32 %v15014_v46, %v4158_v43  ;;  %12367 = vmatmul.msk.f32.gmra.mxu0 %vm434_vm0, %v14999_v16  ;;  %v15194_v16 = vld [vmem:[%s13406_s29 + $0x380] sm:$0xff] }
 0x3ff   : >> { %12402 = vmatmul.msk.f32.gmra.mxu1 %vm434_vm0, %v15117_v11  ;;  %12453 = vmatmul.msk.f32.gmra.mxu2 %vm434_vm0, %v15179_v48 }
 0x400   : >> { %12469 = vmatmul.msk.f32.gmra.mxu3 %vm434_vm0, %v15117_v11  ;;  %v4194_v3 = vmax.f32 %v4178_v58, 0.0 }
 0x402   : >> { %4210 = vst [vmem:[#allocation2 + $0x258] sm:$0xff] %v4194_v3  ;;  %v4464_v56 = vpop.f32.mrf.mxu2 }
 0x403   : >> { %v4597_v22 = vpop.f32.mrf.mxu3  ;;  %v4465_v39 = vadd.f32 %v4464_v56, %v4351_v42  ;;  %v4135_v52 = vpop.f32.mrf.mxu0  ;;  %v15242_v56 = vld [vmem:[%s13406_s29 + $0x398] sm:$0xff] }
 0x404   : >> { %v4354_v15 = vpop.f32.mrf.mxu1  ;;  %v4159_v40 = vadd.f32 %v4135_v52, %v14969_v41 }
 0x405   : >> { %v15196_v55 = vadd.f32 %v4597_v22, %v4465_v39  ;;  %v12632_v22 = vld [vmem:[%s17027_s3 + $0x18] sm:$0xff]  ;;  %v6095_v39 = vld [vmem:[%s17027_s3] sm:$0xff] }
 0x406   : >> { %v4179_v54 = vadd.f32 %v15014_v46, %v4159_v40  ;;  %12368 = vmatmul.msk.f32.gmra.mxu0 %vm434_vm0, %v15066_v31  ;;  %6593 = vmatpush.msrb.mxu2 %v12632_v22  ;;  %v12614_v40 = vld [vmem:[%s17027_s3 + $0x10] sm:$0xff] }
 0x407   : >> { %12403 = vmatmul.msk.f32.gmra.mxu1 %vm434_vm0, %v15133_v62  ;;  %12454 = vmatmul.msk.f32.gmra.mxu2 %vm434_vm0, %v15194_v16 }
 0x408   : >> { %12470 = vmatmul.msk.f32.gmra.mxu3 %vm434_vm0, %v15133_v62  ;;  %v4195_v41 = vmax.f32 %v4179_v54, 0.0  ;;  %6300 = vmatpush.msrb.mxu0 %v6095_v39  ;;  %v6098_v39 = vld [vmem:[#allocation3 + $0x11] sm:$0xff] }
 0x409   : >> { %6438 = vmatpush.msrb.mxu1 %v12614_v40 }
 0x40a   : >> { %4211 = vst [vmem:[#allocation2 + $0x260] sm:$0xff] %v4195_v41  ;;  %v4467_v25 = vpop.f32.mrf.mxu2 }
 0x40b   : >> { %v4600_v17 = vpop.f32.mrf.mxu3  ;;  %v4468_v29 = vadd.f32 %v4467_v25, %v4354_v15  ;;  %v4138_v53 = vpop.f32.mrf.mxu0 }
 0x40c   : >> { %v4357_v27 = vpop.f32.mrf.mxu1  ;;  %v4160_v51 = vadd.f32 %v4138_v53, %v14982_v20 }
 0x40d   : >> { %v15214_v44 = vadd.f32 %v4600_v17, %v4468_v29 }
 0x40e   : >> { %v4180_v21 = vadd.f32 %v15014_v46, %v4160_v51  ;;  %12369 = vmatmul.msk.f32.gmra.mxu0 %vm434_vm0, %v15081_v47 }
 0x40f   : >> { %12404 = vmatmul.msk.f32.gmra.mxu1 %vm434_vm0, %v15148_v32  ;;  %12455 = vmatmul.msk.f32.gmra.mxu2 %vm434_vm0, %v15209_v7 }
 0x410   : >> { %12471 = vmatmul.msk.f32.gmra.mxu3 %vm434_vm0, %v15148_v32  ;;  %v4196_v20 = vmax.f32 %v4180_v21, 0.0  ;;  %v6096_v21 = vld [vmem:[#allocation3 + $0x1] sm:$0xff] }
 0x412   : >> { %4212 = vst [vmem:[#allocation2 + $0x268] sm:$0xff] %v4196_v20  ;;  %v4470_v33 = vpop.f32.mrf.mxu2  ;;  %v5961_v20 = vld [vmem:[#allocation2 + $0x250] ss:$2 sm:$0x3f] }
 0x413   : >> { %v4603_v37 = vpop.f32.mrf.mxu3  ;;  %v4471_v36 = vadd.f32 %v4470_v33, %v4357_v27  ;;  %v4141_v0 = vpop.f32.mrf.mxu0  ;;  %v15269_v27 = vld [vmem:[%s17045_s2] ss:$0 sm:$0xff]  ;;  %v5965_v33 = vld [vmem:[#allocation2 + $0x251] ss:$2 sm:$0x3f] }
 0x414   : >> { %v4360_v23 = vpop.f32.mrf.mxu1  ;;  %v4161_v12 = vadd.f32 %v4141_v0, %v15001_v8  ;;  %v5967_v0 = vmax.f32 %v5961_v20, %v5965_v33 }
 0x415   : >> { %v15229_v57 = vadd.f32 %v4603_v37, %v4471_v36 }
 0x416   : >> { %v4181_v19 = vadd.f32 %v15014_v46, %v4161_v12  ;;  %12370 = vmatmul.msk.f32.gmra.mxu0 %vm434_vm0, %v15096_v5 }
 0x417   : >> { %12405 = vmatmul.msk.f32.gmra.mxu1 %vm434_vm0, %v15164_v34  ;;  %12456 = vmatmul.msk.f32.gmra.mxu2 %vm434_vm0, %v15227_v14 }
 0x418   : >> { %12472 = vmatmul.msk.f32.gmra.mxu3 %vm434_vm0, %v15164_v34  ;;  %v4197_v8 = vmax.f32 %v4181_v19, 0.0 }
 0x419   : >> { %v5969_v26 = vld [vmem:[#allocation2 + $0x260] ss:$2 sm:$0xff]  ;;  %v5973_v28 = vld [vmem:[#allocation2 + $0x261] ss:$2 sm:$0xff] }
 0x41a   : >> { %v5976_v9 = vmax.f32 %v5969_v26, %v5973_v28  ;;  %4213 = vst [vmem:[#allocation2 + $0x270] sm:$0xff] %v4197_v8  ;;  %v4473_v50 = vpop.f32.mrf.mxu2 }
 0x41b   : >> { %v4606_v6 = vpop.f32.mrf.mxu3  ;;  %v4474_v42 = vadd.f32 %v4473_v50, %v4360_v23  ;;  %v4144_v43 = vpop.f32.mrf.mxu0 }
 0x41c   : >> { %v4363_v58 = vpop.f32.mrf.mxu1  ;;  %v4162_v3 = vadd.f32 %v4144_v43, %v15017_v13  ;;  %v5978_v52 = vmax.f32 %v5966_v45, %v5976_v9  ;;  %v6097_v9 = vld [vmem:[#allocation3 + $0x9] sm:$0xff] }
 0x41d   : >> { %v15250_v15 = vadd.f32 %v4606_v6, %v4474_v42 }
 0x41e   : >> { %v4182_v13 = vadd.f32 %v15014_v46, %v4162_v3  ;;  %12371 = vmatmul.msk.f32.gmra.mxu0 %vm434_vm0, %v15117_v11  ;;  %5980 = vst.msk [vmem:[#allocation3 + $0x7e] sm:$0xff] %vm5762_vm1, %v5978_v52 }
 0x41f   : >> { %12406 = vmatmul.msk.f32.gmra.mxu1 %vm434_vm0, %v15179_v48  ;;  %12457 = vmatmul.msk.f32.gmra.mxu2 %vm434_vm0, %v15242_v56 }
 0x420   : >> { %12473 = vmatmul.msk.f32.gmra.mxu3 %vm434_vm0, %v15179_v48  ;;  %v4198_v54 = vmax.f32 %v4182_v13, 0.0 }
 0x422   : >> { %4214 = vst [vmem:[#allocation2 + $0x278] sm:$0xff] %v4198_v54  ;;  %v4476_v41 = vpop.f32.mrf.mxu2 }
 0x423   : >> { %v4609_v25 = vpop.f32.mrf.mxu3  ;;  %v4477_v46 = vadd.f32 %v4476_v41, %v4363_v58  ;;  %v4713_v17 = vpop.f32.mrf.mxu0 }
 0x424   : >> { %v4862_v29 = vpop.f32.mrf.mxu1  ;;  %v4761_v53 = vadd.f32 %v4713_v17, %v15029_v24  ;;  %v6099_v17 = vld [vmem:[#allocation3 + $0x19] sm:$0xff] }
 0x425   : >> { %v15271_v51 = vadd.f32 %v4609_v25, %v4477_v46 }
 0x426   : >> { %v4910_v30 = vadd.f32 %v4862_v29, %v4761_v53  ;;  %12493 = vmatmul.msk.f32.vlgmr.msra.gmra.mxu0 %vm434_vm0, %v15066_v31 }
 0x427   : >> { %12528 = vmatmul.msk.f32.vlgmr.msra.gmra.mxu1 %vm434_vm0, %v15133_v62  ;;  %12563 = vmatmul.msk.f32.vlgmr.msra.gmra.mxu2 %vm434_vm0, %v15194_v16 }
 0x428   : >> { %12580 = vmatmul.msk.f32.vlgmr.msra.gmra.mxu3 %vm5762_vm1, %v6096_v21  ;;  %v4930_v24 = vadd.f32 %v15269_v27, %v4910_v30 }
 0x429   : >> { %v5971_v37 = vld [vmem:[#allocation2 + $0x270] ss:$2 sm:$0x3f]  ;;  %v5975_v36 = vld [vmem:[#allocation2 + $0x271] ss:$2 sm:$0x3f] }
 0x42a   : >> { %v5977_v23 = vmax.f32 %v5971_v37, %v5975_v36  ;;  %v4946_v12 = vmax.f32 %v4930_v24, 0.0  ;;  %v5081_v19 = vpop.f32.mrf.mxu2  ;;  %v15319_v24 = vld [vmem:[%s13406_s29 + $0x3a0] sm:$0xff] }
 0x42b   : >> { %v5194_v31 = vpop.f32.mrf.mxu3  ;;  %v4716_v38 = vpop.f32.mrf.mxu0  ;;  %v6100_v36 = vld [vmem:[#allocation3 + $0x21] sm:$0xff] }
 0x42c   : >> { %v15281_v18 = vadd.f32 %v5194_v31, %v5081_v19  ;;  %v4865_v8 = vpop.f32.mrf.mxu1  ;;  %4962 = vst [vmem:[#allocation2 + $0x280] sm:$0xff] %v4946_v12  ;;  %v4762_v26 = vadd.f32 %v4716_v38, %v15041_v35  ;;  %v5979_v28 = vmax.f32 %v5967_v0, %v5977_v23 }
 0x42e   : >> { %v4911_v45 = vadd.f32 %v4865_v8, %v4762_v26  ;;  %12494 = vmatmul.msk.f32.gmra.mxu0 %vm434_vm0, %v15081_v47  ;;  %5981 = vst.msk [vmem:[#allocation3 + $0x86] sm:$0x3f] %vm5764_vm2, %v5979_v28  ;;  %v15333_v8 = vld [vmem:[%s13406_s29 + $0x3a8] sm:$0xff] }
 0x42f   : >> { %12529 = vmatmul.msk.f32.gmra.mxu1 %vm434_vm0, %v15148_v32  ;;  %12564 = vmatmul.msk.f32.gmra.mxu2 %vm434_vm0, %v15209_v7  ;;  %v6101_v28 = vld [vmem:[#allocation3 + $0x29] sm:$0xff] }
 0x430   : >> { %12581 = vmatmul.msk.f32.gmra.mxu3 %vm5762_vm1, %v6097_v9  ;;  %v4931_v50 = vadd.f32 %v15269_v27, %v4911_v45 }
 0x432   : >> { %v4947_v6 = vmax.f32 %v4931_v50, 0.0  ;;  %v5084_v35 = vpop.f32.mrf.mxu2 }
 0x433   : >> { %v5197_v42 = vpop.f32.mrf.mxu3  ;;  %v4719_v58 = vpop.f32.mrf.mxu0 }
 0x434   : >> { %v15293_v43 = vadd.f32 %v5197_v42, %v5084_v35  ;;  %v4868_v47 = vpop.f32.mrf.mxu1  ;;  %4963 = vst [vmem:[#allocation2 + $0x288] sm:$0xff] %v4947_v6  ;;  %v4763_v3 = vadd.f32 %v4719_v58, %v15053_v59  ;;  %v15347_v58 = vld [vmem:[%s13406_s29 + $0x3b0] sm:$0xff] }
 0x436   : >> { %v4912_v22 = vadd.f32 %v4868_v47, %v4763_v3  ;;  %12495 = vmatmul.msk.f32.gmra.mxu0 %vm434_vm0, %v15096_v5  ;;  %v6102_v3 = vld [vmem:[#allocation3 + $0x31] sm:$0xff] }
 0x437   : >> { %12530 = vmatmul.msk.f32.gmra.mxu1 %vm434_vm0, %v15164_v34  ;;  %12565 = vmatmul.msk.f32.gmra.mxu2 %vm434_vm0, %v15227_v14 }
 0x438   : >> { %12582 = vmatmul.msk.f32.gmra.mxu3 %vm5762_vm1, %v6098_v39  ;;  %v4932_v52 = vadd.f32 %v15269_v27, %v4912_v22 }
 0x43a   : >> { %v4948_v40 = vmax.f32 %v4932_v52, 0.0  ;;  %v5087_v13 = vpop.f32.mrf.mxu2 }
 0x43b   : >> { %v5200_v54 = vpop.f32.mrf.mxu3  ;;  %v4722_v59 = vpop.f32.mrf.mxu0  ;;  %v5983_v39 = vld [vmem:[#allocation2 + $0x280] ss:$2 sm:$0xff] }
 0x43c   : >> { %v15304_v41 = vadd.f32 %v5200_v54, %v5087_v13  ;;  %v4871_v25 = vpop.f32.mrf.mxu1  ;;  %4964 = vst [vmem:[#allocation2 + $0x290] sm:$0xff] %v4948_v40  ;;  %v4764_v5 = vadd.f32 %v4722_v59, %v15068_v10 }
 0x43e   : >> { %v4913_v46 = vadd.f32 %v4871_v25, %v4764_v5  ;;  %12496 = vmatmul.msk.f32.gmra.mxu0 %vm434_vm0, %v15117_v11 }
 0x43f   : >> { %12531 = vmatmul.msk.f32.gmra.mxu1 %vm434_vm0, %v15179_v48  ;;  %12566 = vmatmul.msk.f32.gmra.mxu2 %vm434_vm0, %v15242_v56 }
 0x440   : >> { %12583 = vmatmul.msk.f32.gmra.mxu3 %vm5762_vm1, %v6099_v17  ;;  %v4933_v29 = vadd.f32 %v15269_v27, %v4913_v46 }
 0x442   : >> { %v4949_v53 = vmax.f32 %v4933_v29, 0.0  ;;  %v5090_v30 = vpop.f32.mrf.mxu2 }
 0x443   : >> { %v5203_v21 = vpop.f32.mrf.mxu3  ;;  %v4725_v20 = vpop.f32.mrf.mxu0 }
 0x444   : >> { %v15315_v10 = vadd.f32 %v5203_v21, %v5090_v30  ;;  %v4874_v33 = vpop.f32.mrf.mxu1  ;;  %4965 = vst [vmem:[#allocation2 + $0x298] sm:$0xff] %v4949_v53  ;;  %v4765_v11 = vadd.f32 %v4725_v20, %v15083_v1  ;;  %v15361_v53 = vld [vmem:[%s13406_s29 + $0x3b8] sm:$0xff] }
 0x445   : >> { %v6103_v21 = vld [vmem:[#allocation3 + $0x39] sm:$0xff] }
 0x446   : >> { %v4914_v37 = vadd.f32 %v4874_v33, %v4765_v11  ;;  %12497 = vmatmul.msk.f32.gmra.mxu0 %vm434_vm0, %v15133_v62 }
 0x447   : >> { %12532 = vmatmul.msk.f32.gmra.mxu1 %vm434_vm0, %v15194_v16  ;;  %12567 = vmatmul.msk.f32.gmra.mxu2 %vm434_vm0, %v15319_v24 }
 0x448   : >> { %12584 = vmatmul.msk.f32.gmra.mxu3 %vm5762_vm1, %v6100_v36  ;;  %v4934_v0 = vadd.f32 %v15269_v27, %v4914_v37 }
 0x44a   : >> { %v4950_v23 = vmax.f32 %v4934_v0, 0.0  ;;  %v5093_v1 = vpop.f32.mrf.mxu2 }
 0x44b   : >> { %v5206_v12 = vpop.f32.mrf.mxu3  ;;  %v4728_v31 = vpop.f32.mrf.mxu0 }
 0x44c   : >> { %v15329_v19 = vadd.f32 %v5206_v12, %v5093_v1  ;;  %v4877_v38 = vpop.f32.mrf.mxu1  ;;  %4966 = vst [vmem:[#allocation2 + $0x2a0] sm:$0xff] %v4950_v23  ;;  %v4766_v62 = vadd.f32 %v4728_v31, %v15098_v63  ;;  %v15376_v1 = vld [vmem:[%s13406_s29 + $0x3c0] sm:$0xff] }
 0x44d   : >> { %v6104_v31 = vld [vmem:[#allocation3 + $0x41] sm:$0xff] }
 0x44e   : >> { %v4915_v26 = vadd.f32 %v4877_v38, %v4766_v62  ;;  %12498 = vmatmul.msk.f32.gmra.mxu0 %vm434_vm0, %v15148_v32  ;;  %v5985_v62 = vld [vmem:[#allocation2 + $0x290] ss:$2 sm:$0x3f] }
 0x44f   : >> { %12533 = vmatmul.msk.f32.gmra.mxu1 %vm434_vm0, %v15209_v7  ;;  %12568 = vmatmul.msk.f32.gmra.mxu2 %vm434_vm0, %v15333_v8 }
 0x450   : >> { %12585 = vmatmul.msk.f32.gmra.mxu3 %vm5762_vm1, %v6101_v28  ;;  %v4935_v45 = vadd.f32 %v15269_v27, %v4915_v26 }
 0x452   : >> { %v4951_v9 = vmax.f32 %v4935_v45, 0.0  ;;  %v5096_v63 = vpop.f32.mrf.mxu2 }
 0x453   : >> { %v5209_v50 = vpop.f32.mrf.mxu3  ;;  %v4731_v35 = vpop.f32.mrf.mxu0 }
 0x454   : >> { %v15343_v6 = vadd.f32 %v5209_v50, %v5096_v63  ;;  %v4880_v42 = vpop.f32.mrf.mxu1  ;;  %4967 = vst [vmem:[#allocation2 + $0x2a8] sm:$0xff] %v4951_v9  ;;  %v4767_v32 = vadd.f32 %v4731_v35, %v15119_v60  ;;  %v5987_v60 = vld [vmem:[#allocation2 + $0x281] ss:$2 sm:$0xff] }
 0x455   : >> { %v5990_v46 = vmax.f32 %v5983_v39, %v5987_v60  ;;  %v6105_v39 = vld [vmem:[#allocation3 + $0x49] sm:$0xff] }
 0x456   : >> { %v4916_v47 = vadd.f32 %v4880_v42, %v4767_v32  ;;  %12499 = vmatmul.msk.f32.gmra.mxu0 %vm434_vm0, %v15164_v34 }
 0x457   : >> { %12534 = vmatmul.msk.f32.gmra.mxu1 %vm434_vm0, %v15227_v14  ;;  %12569 = vmatmul.msk.f32.gmra.mxu2 %vm434_vm0, %v15347_v58 }
 0x458   : >> { %12586 = vmatmul.msk.f32.gmra.mxu3 %vm5762_vm1, %v6102_v3  ;;  %v4936_v22 = vadd.f32 %v15269_v27, %v4916_v47  ;;  %v15390_v3 = vld [vmem:[%s13406_s29 + $0x3c8] sm:$0xff] }
 0x45a   : >> { %v4952_v52 = vmax.f32 %v4936_v22, 0.0  ;;  %v5099_v40 = vpop.f32.mrf.mxu2 }
 0x45b   : >> { %v5212_v13 = vpop.f32.mrf.mxu3  ;;  %v5993_v54 = vld [vmem:[#allocation2 + $0x2a0] ss:$2 sm:$0xff]  ;;  %v5997_v59 = vld [vmem:[#allocation2 + $0x2a1] ss:$2 sm:$0xff]  ;;  %v4734_v25 = vpop.f32.mrf.mxu0 }
 0x45c   : >> { %v15357_v34 = vadd.f32 %v5212_v13, %v5099_v40  ;;  %v4883_v5 = vpop.f32.mrf.mxu1  ;;  %v6000_v17 = vmax.f32 %v5993_v54, %v5997_v59  ;;  %4968 = vst [vmem:[#allocation2 + $0x2b0] sm:$0xff] %v4952_v52  ;;  %v4768_v29 = vadd.f32 %v4734_v25, %v15135_v4 }
 0x45e   : >> { %v4917_v30 = vadd.f32 %v4883_v5, %v4768_v29  ;;  %12500 = vmatmul.msk.f32.gmra.mxu0 %vm434_vm0, %v15179_v48  ;;  %v6002_v20 = vmax.f32 %v5990_v46, %v6000_v17  ;;  %v15405_v5 = vld [vmem:[%s13406_s29 + $0x3d0] sm:$0xff] }
 0x45f   : >> { %12535 = vmatmul.msk.f32.gmra.mxu1 %vm434_vm0, %v15242_v56  ;;  %12570 = vmatmul.msk.f32.gmra.mxu2 %vm434_vm0, %v15361_v53  ;;  %v6106_v17 = vld [vmem:[#allocation3 + $0x51] sm:$0xff] }
 0x460   : >> { %12587 = vmatmul.msk.f32.gmra.mxu3 %vm5762_vm1, %v6103_v21  ;;  %v4937_v33 = vadd.f32 %v15269_v27, %v4917_v30  ;;  %6004 = vst.msk [vmem:[#allocation3 + $0x8c] sm:$0xff] %vm5762_vm1, %v6002_v20 }
 0x462   : >> { %v4953_v4 = vmax.f32 %v4937_v33, 0.0  ;;  %v5102_v11 = vpop.f32.mrf.mxu2 }
 0x463   : >> { %v5215_v37 = vpop.f32.mrf.mxu3  ;;  %v4737_v48 = vpop.f32.mrf.mxu0 }
 0x464   : >> { %v15372_v36 = vadd.f32 %v5215_v37, %v5102_v11  ;;  %v4886_v0 = vpop.f32.mrf.mxu1  ;;  %4969 = vst [vmem:[#allocation2 + $0x2b8] sm:$0xff] %v4953_v4  ;;  %v4769_v23 = vadd.f32 %v4737_v48, %v15150_v49  ;;  %v5989_v49 = vld [vmem:[#allocation2 + $0x291] ss:$2 sm:$0x3f] }
 0x465   : >> { %v5991_v42 = vmax.f32 %v5985_v62, %v5989_v49  ;;  %v15419_v11 = vld [vmem:[%s13406_s29 + $0x3d8] sm:$0xff]  ;;  %v12557_v49 = vld [vmem:[%s13406_s29 + $0x3e0] sm:$0xff] }
 0x466   : >> { %v4918_v12 = vadd.f32 %v4886_v0, %v4769_v23  ;;  %12501 = vmatmul.msk.f32.gmra.mxu0 %vm434_vm0, %v15194_v16  ;;  %v6107_v48 = vld [vmem:[#allocation3 + $0x59] sm:$0xff] }
 0x467   : >> { %12536 = vmatmul.msk.f32.gmra.mxu1 %vm434_vm0, %v15319_v24  ;;  %12571 = vmatmul.msk.f32.gmra.mxu2 %vm434_vm0, %v15376_v1 }
 0x468   : >> { %12588 = vmatmul.msk.f32.gmra.mxu3 %vm5762_vm1, %v6104_v31  ;;  %v4938_v38 = vadd.f32 %v15269_v27, %v4918_v12 }
 0x46a   : >> { %v4954_v26 = vmax.f32 %v4938_v38, 0.0  ;;  %v5105_v28 = vpop.f32.mrf.mxu2 }
 0x46b   : >> { %v5218_v45 = vpop.f32.mrf.mxu3  ;;  %v5995_v9 = vld [vmem:[#allocation2 + $0x2b0] ss:$2 sm:$0x3f]  ;;  %v5999_v63 = vld [vmem:[#allocation2 + $0x2b1] ss:$2 sm:$0x3f]  ;;  %v4740_v50 = vpop.f32.mrf.mxu0 }
 0x46c   : >> { %v15386_v16 = vadd.f32 %v5218_v45, %v5105_v28  ;;  %v4889_v35 = vpop.f32.mrf.mxu1  ;;  %v6001_v32 = vmax.f32 %v5995_v9, %v5999_v63  ;;  %4970 = vst [vmem:[#allocation2 + $0x2c0] sm:$0xff] %v4954_v26  ;;  %v4770_v47 = vadd.f32 %v4740_v50, %v15166_v2  ;;  %v6108_v28 = vld [vmem:[#allocation3 + $0x61] sm:$0xff] }
 0x46e   : >> { %v4919_v22 = vadd.f32 %v4889_v35, %v4770_v47  ;;  %12502 = vmatmul.msk.f32.gmra.mxu0 %vm434_vm0, %v15209_v7  ;;  %v6003_v60 = vmax.f32 %v5991_v42, %v6001_v32  ;;  %v12558_v32 = vld [vmem:[%s13406_s29 + $0x3e8] sm:$0xff] }
 0x46f   : >> { %12537 = vmatmul.msk.f32.gmra.mxu1 %vm434_vm0, %v15333_v8  ;;  %12572 = vmatmul.msk.f32.gmra.mxu2 %vm434_vm0, %v15390_v3 }
 0x470   : >> { %12589 = vmatmul.msk.f32.gmra.mxu3 %vm5762_vm1, %v6105_v39  ;;  %v4939_v52 = vadd.f32 %v15269_v27, %v4919_v22  ;;  %6005 = vst.msk [vmem:[#allocation3 + $0x94] sm:$0x3f] %vm5764_vm2, %v6003_v60  ;;  %v12704_v39 = vld [vmem:[%s17027_s3 + $0x38] sm:$0xff] }
 0x471   : >> { %7213 = vmatpush.msra.mxu2 %v12704_v39 }
 0x472   : >> { %v4955_v2 = vmax.f32 %v4939_v52, 0.0  ;;  %v5108_v40 = vpop.f32.mrf.mxu2 }
 0x473   : >> { %v5221_v13 = vpop.f32.mrf.mxu3  ;;  %v4743_v7 = vpop.f32.mrf.mxu0 }
 0x474   : >> { %v15401_v54 = vadd.f32 %v5221_v13, %v5108_v40  ;;  %v4892_v59 = vpop.f32.mrf.mxu1  ;;  %4971 = vst [vmem:[#allocation2 + $0x2c8] sm:$0xff] %v4955_v2  ;;  %v4771_v25 = vadd.f32 %v4743_v7, %v15181_v61  ;;  %v12686_v2 = vld [vmem:[%s17027_s3 + $0x30] sm:$0xff] }
 0x475   : >> { %7058 = vmatpush.msra.mxu1 %v12686_v2 }
 0x476   : >> { %v4920_v46 = vadd.f32 %v4892_v59, %v4771_v25  ;;  %12503 = vmatmul.msk.f32.gmra.mxu0 %vm434_vm0, %v15227_v14  ;;  %v12559_v25 = vld [vmem:[%s13406_s29 + $0x3f0] sm:$0xff] }
 0x477   : >> { %12538 = vmatmul.msk.f32.gmra.mxu1 %vm434_vm0, %v15347_v58  ;;  %12573 = vmatmul.msk.f32.gmra.mxu2 %vm434_vm0, %v15405_v5 }
 0x478   : >> { %12590 = vmatmul.msk.f32.gmra.mxu3 %vm5762_vm1, %v6106_v17  ;;  %v4940_v29 = vadd.f32 %v15269_v27, %v4920_v46  ;;  %v6110_v17 = vld [vmem:[#allocation3 + $0x71] sm:$0xff] }
 0x47a   : >> { %v4956_v30 = vmax.f32 %v4940_v29, 0.0  ;;  %v5111_v61 = vpop.f32.mrf.mxu2 }
 0x47b   : >> { %v5224_v21 = vpop.f32.mrf.mxu3  ;;  %v4746_v33 = vpop.f32.mrf.mxu0 }
 0x47c   : >> { %v15415_v20 = vadd.f32 %v5224_v21, %v5111_v61  ;;  %v4895_v4 = vpop.f32.mrf.mxu1  ;;  %4972 = vst [vmem:[#allocation2 + $0x2d0] sm:$0xff] %v4956_v30  ;;  %v4772_v14 = vadd.f32 %v4746_v33, %v15196_v55  ;;  %v6007_v30 = vld [vmem:[#allocation2 + $0x2c0] ss:$2 sm:$0xff]  ;;  %v6011_v61 = vld [vmem:[#allocation2 + $0x2c1] ss:$2 sm:$0xff] }
 0x47e   : >> { %v4921_v37 = vadd.f32 %v4895_v4, %v4772_v14  ;;  %12504 = vmatmul.msk.f32.gmra.mxu0 %vm434_vm0, %v15242_v56 }
 0x47f   : >> { %12539 = vmatmul.msk.f32.gmra.mxu1 %vm434_vm0, %v15361_v53  ;;  %12574 = vmatmul.msk.f32.gmra.mxu2 %vm434_vm0, %v15419_v11 }
 0x480   : >> { %12591 = vmatmul.msk.f32.gmra.mxu3 %vm5762_vm1, %v6107_v48  ;;  %v4941_v0 = vadd.f32 %v15269_v27, %v4921_v37 }
 0x482   : >> { %v4957_v23 = vmax.f32 %v4941_v0, 0.0  ;;  %v5114_v55 = vpop.f32.mrf.mxu2 }
 0x483   : >> { %v5227_v12 = vpop.f32.mrf.mxu3  ;;  %v4749_v38 = vpop.f32.mrf.mxu0 }
 0x484   : >> { %v15429_v31 = vadd.f32 %v5227_v12, %v5114_v55  ;;  %v4898_v62 = vpop.f32.mrf.mxu1  ;;  %4973 = vst [vmem:[#allocation2 + $0x2d8] sm:$0xff] %v4957_v23  ;;  %v4773_v56 = vadd.f32 %v4749_v38, %v15214_v44  ;;  %v12560_v55 = vld [vmem:[%s13406_s29 + $0x3f8] sm:$0xff]  ;;  %s13028_s29 = sshll.u32 %s13242_s24, 5  ;;  %s392_s24 = sadd.s32 1, %s13242_s24  }
 0x485   : >> { %v6111_v38 = vld [vmem:[#allocation3 + $0x79] sm:$0xff]  ;;  %s16668_s22 = scalar_lea.vmem [#allocation5], %s13028_s29  ;;  %p389_p11 = scmp.ge.s32.totalorder %s392_s24, 8  }
 0x486   : >> { %v4922_v26 = vadd.f32 %v4898_v62, %v4773_v56  ;;  %12505 = vmatmul.msk.f32.gmra.mxu0 %vm434_vm0, %v15319_v24  ;;  %s13111_s26 = sshll.u32 (%p389_p11), %s13325_s21, 3  ;;  %s17046_s16 = scalar_lea.vmem (%p389_p11), [#allocation6], %s13356_s12 }
 0x487   : >> { %12540 = vmatmul.msk.f32.gmra.mxu1 %vm434_vm0, %v15376_v1  ;;  %12575 = vmatmul.msk.f32.gmra.mxu2 %vm434_vm0, %v12557_v49  ;;  %v6109_v1 = vld [vmem:[#allocation3 + $0x69] sm:$0xff]  ;;  %s11214_s14 = scalar_lea.hbm (%p389_p11), %s17035_s11, %s13111_s26  ;;  %s17047_s0 = smov (%p389_p11), %s17046_s16 }
 0x488   : >> { %12592 = vmatmul.msk.f32.gmra.mxu3 %vm5762_vm1, %v6108_v28  ;;  %v4942_v45 = vadd.f32 %v15269_v27, %v4922_v26  ;;  %s11218_s15 = sshll.u32 (%p389_p11), %s11214_s14, 4  ;;  %s17048_s25 = sand.u32 (%p389_p11), 1, %s13230_s18   ;;  %s11219_s15 = int_to_ptr.hbm [resolvable:$true] %s11218_s15 }
 0x489   : > { %s11204_s1 = scalar_lea.sflag (%p389_p11), [#allocation7], %s17048_s25  ;;  %s13186_s21 = sshra.s32 (%p389_p11), %s11219_s15, 4  ;;  %s13187_s21 = int_to_ptr.hbm [resolvable:$true] %s13186_s21 }
 0x48a   : >> { %v4958_v9 = vmax.f32 %v4942_v45, 0.0  ;;  %v5117_v63 = vpop.f32.mrf.mxu2  ;;  %s13192_s13 = scalar_lea.hbm (%p389_p11), %s17035_s11, 16  ;;  %p13193_p1 = scmp.lt.s32.totalorder (%p389_p11), %s13187_s21, %s17035_s11 }
 0x48b   : >> { %v5230_v50 = vpop.f32.mrf.mxu3  ;;  %v4752_v35 = vpop.f32.mrf.mxu0 }
 0x48c   : >> { %v15440_v44 = vadd.f32 %v5230_v50, %v5117_v63  ;;  %v4901_v42 = vpop.f32.mrf.mxu1  ;;  %4974 = vst [vmem:[#allocation2 + $0x2e0] sm:$0xff] %v4958_v9  ;;  %v4774_v24 = vadd.f32 %v4752_v35, %v15229_v57  ;;  %v12668_v57 = vld [vmem:[%s17027_s3 + $0x28] sm:$0xff]  ;;  %v6078_v9 = vld [vmem:[#allocation3] sm:$0xff]  ;;  %v6009_v35 = vld [vmem:[#allocation2 + $0x2d0] ss:$2 sm:$0x3f] }
 0x48d   : >> { %6903 = vmatpush.msra.mxu0 %v12668_v57  ;;  %v6353_v63 = vld [vmem:[#allocation3 + $0x2] sm:$0xff] }
 0x48e   : >> { %v4923_v47 = vadd.f32 %v4901_v42, %v4774_v24  ;;  %12506 = vmatmul.msk.f32.gmra.mxu0 %vm434_vm0, %v15333_v8  ;;  %v12722_v8 = vld [vmem:[%s17027_s3 + $0x40] sm:$0xff]  ;;  %v6013_v42 = vld [vmem:[#allocation2 + $0x2d1] ss:$2 sm:$0x3f] }
 0x48f   : >> { %12541 = vmatmul.msk.f32.gmra.mxu1 %vm434_vm0, %v15390_v3  ;;  %12576 = vmatmul.msk.f32.gmra.mxu2 %vm434_vm0, %v12558_v32  ;;  %v6112_v50 = vld [vmem:[#allocation3 + $0x81] sm:$0xff]  ;;  %v15496_v32 = vld [vmem:[%s17045_s2] ss:$0 sm:$0xff]  ;;  %s13188_s2 = scalar_lea.hbm (%p389_p11), %s13187_s21, 8 }
 0x490   : >> { %12593 = vmatmul.msk.f32.gmra.mxu3 %vm5762_vm1, %v6109_v1  ;;  %v4943_v22 = vadd.f32 %v15269_v27, %v4923_v47  ;;  %p13189_p12 = scmp.ne.s32.totalorder (%p389_p11), %s13187_s21, %s13188_s2  ;;  %p13194_p2 = scmp.lt.s32.totalorder (%p389_p11), %s13192_s13, %s13188_s2 }
 0x491   : >> { %7368 = vmatpush.msra.mxu3 %v12722_v8 }
 0x492   : >> { %v4959_v3 = vmax.f32 %v4943_v22, 0.0  ;;  %v5120_v60 = vpop.f32.mrf.mxu2  ;;  %p13190_p13 = pnand (%p389_p11), %p13189_p12, %p13342_p5  ;;  %p13195_p3 = por (%p389_p11), %p13194_p2, %p13193_p1 }
 0x493   : >> { %v5233_v52 = vpop.f32.mrf.mxu3  ;;  %v4755_v13 = vpop.f32.mrf.mxu0 }
 0x494   : >> { %v15463_v40 = vadd.f32 %v5233_v52, %v5120_v60  ;;  %v4904_v7 = vpop.f32.mrf.mxu1  ;;  %4975 = vst [vmem:[#allocation2 + $0x2e8] sm:$0xff] %v4959_v3  ;;  %v4775_v59 = vadd.f32 %v4755_v13, %v15250_v15  ;;  %v6015_v3 = vmax.f32 %v6009_v35, %v6013_v42  ;;  %v6079_v13 = vld [vmem:[#allocation3 + $0x8] sm:$0xff]  ;;  %p13191_p0 = pneg (%p389_p11), %p13190_p13 }
 0x496   : >> { %v4924_v46 = vadd.f32 %v4904_v7, %v4775_v59  ;;  %12507 = vmatmul.msk.f32.gmra.mxu0 %vm434_vm0, %v15347_v58  ;;  %v6354_v7 = vld [vmem:[#allocation3 + $0xa] sm:$0xff]  ;;  %p13196_p4 = pnand (%p389_p11), %p13195_p3, %p13191_p0 }
 0x497   : >> { %12542 = vmatmul.msk.f32.gmra.mxu1 %vm434_vm0, %v15405_v5  ;;  %12577 = vmatmul.msk.f32.gmra.mxu2 %vm434_vm0, %v12559_v25  ;;  %v6014_v5 = vmax.f32 %v6007_v30, %v6011_v61  ;;  %v6509_v59 = vld [vmem:[#allocation3 + $0xb] sm:$0xff] }
 0x498   : >> { %12594 = vmatmul.msk.f32.gmra.mxu3 %vm5762_vm1, %v6110_v17  ;;  %v4944_v29 = vadd.f32 %v15269_v27, %v4924_v46  ;;  %v6663_v25 = vld [vmem:[#allocation3 + $0x4] sm:$0xff] }
 0x49a   : >> { %v4960_v21 = vmax.f32 %v4944_v29, 0.0  ;;  %v5123_v15 = vpop.f32.mrf.mxu2 }
 0x49b   : >> { %v5236_v33 = vpop.f32.mrf.mxu3  ;;  %v6017_v4 = vld [vmem:[#allocation2 + $0x2e0] ss:$2 sm:$0xff]  ;;  %v6021_v14 = vld [vmem:[#allocation2 + $0x2e1] ss:$2 sm:$0xff]  ;;  %v4758_v58 = vpop.f32.mrf.mxu0 }
 0x49c   : >> { %v15474_v37 = vadd.f32 %v5236_v33, %v5123_v15  ;;  %v4907_v48 = vpop.f32.mrf.mxu1  ;;  %v6024_v0 = vmax.f32 %v6017_v4, %v6021_v14  ;;  %4976 = vst [vmem:[#allocation2 + $0x2f0] sm:$0xff] %v4960_v21  ;;  %v4776_v23 = vadd.f32 %v4758_v58, %v15271_v51  ;;  %v15511_v14 = vld [vmem:[#allocation3 + $0x10] sm:$0xff] }
 0x49d   : >> { %v6355_v58 = vld [vmem:[#allocation3 + $0x12] sm:$0xff] }
 0x49e   : >> { %v4925_v12 = vadd.f32 %v4907_v48, %v4776_v23  ;;  %12508 = vmatmul.msk.f32.gmra.mxu0 %vm434_vm0, %v15361_v53  ;;  %v6026_v62 = vmax.f32 %v6014_v5, %v6024_v0  ;;  %v6510_v48 = vld [vmem:[#allocation3 + $0x13] sm:$0xff] }
 0x49f   : >> { %12543 = vmatmul.msk.f32.gmra.mxu1 %vm434_vm0, %v15419_v11  ;;  %12578 = vmatmul.msk.f32.gmra.mxu2 %vm434_vm0, %v12560_v55  ;;  %v6664_v5 = vld [vmem:[#allocation3 + $0xc] sm:$0xff] }
 0x4a0   : >> { %12595 = vmatmul.msk.f32.gmra.mxu3 %vm5762_vm1, %v6111_v38  ;;  %v4945_v56 = vadd.f32 %v15269_v27, %v4925_v12  ;;  %6028 = vst.msk [vmem:[#allocation3 + $0x9a] sm:$0xff] %vm5762_vm1, %v6026_v62  ;;  %v6508_v27 = vld [vmem:[#allocation3 + $0x3] sm:$0xff] }
 0x4a2   : >> { %v4961_v49 = vmax.f32 %v4945_v56, 0.0  ;;  %v5126_v51 = vpop.f32.mrf.mxu2 }
 0x4a3   : >> { %v5239_v26 = vpop.f32.mrf.mxu3  ;;  %v5327_v45 = vpop.f32.mrf.mxu0 }
 0x4a4   : >> { %v15486_v28 = vadd.f32 %v5239_v26, %v5126_v51  ;;  %v5476_v53 = vpop.f32.mrf.mxu1  ;;  %4977 = vst [vmem:[#allocation2 + $0x2f8] sm:$0xff] %v4961_v49  ;;  %v5375_v11 = vadd.f32 %v5327_v45, %v15281_v18  ;;  %v15522_v51 = vld [vmem:[#allocation3 + $0x18] sm:$0xff] }
 0x4a5   : >> { %v6356_v26 = vld [vmem:[#allocation3 + $0x1a] sm:$0xff] }
 0x4a6   : >> { %12597 = vmatmul.msk.f32.vlgmr.msrb.gmra.mxu0 %vm5762_vm1, %v6078_v9  ;;  %v5524_v24 = vadd.f32 %v5476_v53, %v5375_v11  ;;  %v6511_v45 = vld [vmem:[#allocation3 + $0x1b] sm:$0xff] }
 0x4a7   : >> { %12615 = vmatmul.msk.f32.vlgmr.msrb.gmra.mxu1 %vm5762_vm1, %v6353_v63  ;;  %12633 = vmatmul.msk.f32.vlgmr.msrb.gmra.mxu2 %vm5762_vm1, %v6508_v27  ;;  %v6665_v53 = vld [vmem:[#allocation3 + $0x14] sm:$0xff] }
 0x4a8   : >> { %12596 = vmatmul.msk.f32.gmra.mxu3 %vm5762_vm1, %v6112_v50 }
 0x4aa   : >> { %v5625_v18 = vpop.f32.mrf.mxu2 }
 0x4ab   : >> { %v15498_v47 = vpop.f32.mrf.mxu3  ;;  %v6019_v1 = vld [vmem:[#allocation2 + $0x2f0] ss:$2 sm:$0x3f]  ;;  %v6023_v22 = vld [vmem:[#allocation2 + $0x2f1] ss:$2 sm:$0x3f]  ;;  %v5673_v39 = vadd.f32 %v5625_v18, %v5524_v24  ;;  %v5330_v57 = vpop.f32.mrf.mxu0 }
 0x4ac   : >> { %v5479_v8 = vpop.f32.mrf.mxu1  ;;  %v6025_v60 = vmax.f32 %v6019_v1, %v6023_v22  ;;  %v5376_v2 = vadd.f32 %v5330_v57, %v15293_v43  ;;  %v15533_v18 = vld [vmem:[#allocation3 + $0x20] sm:$0xff] }
 0x4ad   : >> { %v5693_v52 = vadd.f32 %v15496_v32, %v5673_v39  ;;  %v6357_v1 = vld [vmem:[#allocation3 + $0x22] sm:$0xff] }
 0x4ae   : >> { %12598 = vmatmul.msk.f32.gmra.mxu0 %vm5762_vm1, %v6079_v13  ;;  %v6027_v46 = vmax.f32 %v6015_v3, %v6025_v60  ;;  %v5525_v29 = vadd.f32 %v5479_v8, %v5376_v2  ;;  %v6512_v22 = vld [vmem:[#allocation3 + $0x23] sm:$0xff] }
 0x4af   : >> { %12616 = vmatmul.msk.f32.gmra.mxu1 %vm5762_vm1, %v6354_v7  ;;  %v5709_v17 = vmax.f32 %v5693_v52, 0.0  ;;  %12634 = vmatmul.msk.f32.gmra.mxu2 %vm5762_vm1, %v6509_v59  ;;  %v6666_v39 = vld [vmem:[#allocation3 + $0x1c] sm:$0xff]  ;;  %v15544_v59 = vld [vmem:[#allocation3 + $0x28] sm:$0xff] }
 0x4b0   : >> { %12651 = vmatmul.msk.f32.vlgmr.msrb.gmra.mxu3 %vm5762_vm1, %v6663_v25  ;;  %6029 = vst.msk [vmem:[#allocation3 + $0xa2] sm:$0x3f] %vm5764_vm2, %v6027_v46  ;;  %v6358_v25 = vld [vmem:[#allocation3 + $0x2a] sm:$0xff] }
 0x4b1   : >> { %5725 = vst [vmem:[#allocation2 + $0x300] sm:$0xff] %v5709_v17  ;;  %v6513_v46 = vld [vmem:[#allocation3 + $0x2b] sm:$0xff] }
 0x4b2   : >> { %v5628_v30 = vpop.f32.mrf.mxu2  ;;  %v6667_v17 = vld [vmem:[#allocation3 + $0x24] sm:$0xff] }
 0x4b3   : >> { %v15507_v43 = vpop.f32.mrf.mxu3  ;;  %v5674_v61 = vadd.f32 %v5628_v30, %v5525_v29  ;;  %v5333_v21 = vpop.f32.mrf.mxu0 }
 0x4b4   : >> { %v5482_v15 = vpop.f32.mrf.mxu1  ;;  %v5377_v4 = vadd.f32 %v5333_v21, %v15304_v41 }
 0x4b5   : >> { %v5694_v33 = vadd.f32 %v15496_v32, %v5674_v61 }
 0x4b6   : >> { %12599 = vmatmul.msk.f32.gmra.mxu0 %vm5762_vm1, %v15511_v14  ;;  %v5526_v23 = vadd.f32 %v5482_v15, %v5377_v4 }
 0x4b7   : >> { %12617 = vmatmul.msk.f32.gmra.mxu1 %vm5762_vm1, %v6355_v58  ;;  %v5710_v0 = vmax.f32 %v5694_v33, 0.0  ;;  %12635 = vmatmul.msk.f32.gmra.mxu2 %vm5762_vm1, %v6510_v48  ;;  %v15555_v48 = vld [vmem:[#allocation3 + $0x30] sm:$0xff] }
 0x4b8   : >> { %12652 = vmatmul.msk.f32.gmra.mxu3 %vm5762_vm1, %v6664_v5  ;;  %v6359_v5 = vld [vmem:[#allocation3 + $0x32] sm:$0xff] }
 0x4b9   : >> { %5726 = vst [vmem:[#allocation2 + $0x308] sm:$0xff] %v5710_v0  ;;  %v6514_v0 = vld [vmem:[#allocation3 + $0x33] sm:$0xff] }
 0x4ba   : >> { %v5631_v55 = vpop.f32.mrf.mxu2 }
 0x4bb   : >> { %v15518_v12 = vpop.f32.mrf.mxu3  ;;  %v5675_v41 = vadd.f32 %v5631_v55, %v5526_v23  ;;  %v5336_v38 = vpop.f32.mrf.mxu0  ;;  %v6668_v23 = vld [vmem:[#allocation3 + $0x2c] sm:$0xff] }
 0x4bc   : >> { %v5485_v62 = vpop.f32.mrf.mxu1  ;;  %v5378_v49 = vadd.f32 %v5336_v38, %v15315_v10 }
 0x4bd   : >> { %v5695_v56 = vadd.f32 %v15496_v32, %v5675_v41 }
 0x4be   : >> { %12600 = vmatmul.msk.f32.gmra.mxu0 %vm5762_vm1, %v15522_v51  ;;  %v5527_v9 = vadd.f32 %v5485_v62, %v5378_v49 }
 0x4bf   : >> { %12618 = vmatmul.msk.f32.gmra.mxu1 %vm5762_vm1, %v6356_v26  ;;  %v5711_v11 = vmax.f32 %v5695_v56, 0.0  ;;  %12636 = vmatmul.msk.f32.gmra.mxu2 %vm5762_vm1, %v6511_v45 }
 0x4c0   : >> { %12653 = vmatmul.msk.f32.gmra.mxu3 %vm5762_vm1, %v6665_v53  ;;  %v15566_v53 = vld [vmem:[#allocation3 + $0x38] sm:$0xff] }
 0x4c1   : >> { %5727 = vst [vmem:[#allocation2 + $0x310] sm:$0xff] %v5711_v11  ;;  %v6360_v11 = vld [vmem:[#allocation3 + $0x3a] sm:$0xff] }
 0x4c2   : >> { %v5634_v63 = vpop.f32.mrf.mxu2 }
 0x4c3   : >> { %v15529_v50 = vpop.f32.mrf.mxu3  ;;  %v5676_v10 = vadd.f32 %v5634_v63, %v5527_v9  ;;  %v5339_v27 = vpop.f32.mrf.mxu0  ;;  %v6669_v9 = vld [vmem:[#allocation3 + $0x34] sm:$0xff]  ;;  %v6031_v63 = vld [vmem:[#allocation2 + $0x300] ss:$2 sm:$0xff] }
 0x4c4   : >> { %v5488_v35 = vpop.f32.mrf.mxu1  ;;  %v5379_v24 = vadd.f32 %v5339_v27, %v15329_v19  ;;  %v6515_v27 = vld [vmem:[#allocation3 + $0x3b] sm:$0xff] }
 0x4c5   : >> { %v5696_v42 = vadd.f32 %v15496_v32, %v5676_v10  ;;  %v6035_v10 = vld [vmem:[#allocation2 + $0x301] ss:$2 sm:$0xff] }
 0x4c6   : >> { %12601 = vmatmul.msk.f32.gmra.mxu0 %vm5762_vm1, %v15533_v18  ;;  %v5528_v8 = vadd.f32 %v5488_v35, %v5379_v24 }
 0x4c7   : >> { %12619 = vmatmul.msk.f32.gmra.mxu1 %vm5762_vm1, %v6357_v1  ;;  %v5712_v57 = vmax.f32 %v5696_v42, 0.0  ;;  %12637 = vmatmul.msk.f32.gmra.mxu2 %vm5762_vm1, %v6512_v22 }
 0x4c8   : >> { %12654 = vmatmul.msk.f32.gmra.mxu3 %vm5762_vm1, %v6666_v39 }
 0x4c9   : >> { %5728 = vst [vmem:[#allocation2 + $0x318] sm:$0xff] %v5712_v57 }
 0x4ca   : >> { %v5637_v3 = vpop.f32.mrf.mxu2 }
 0x4cb   : >> { %v15540_v60 = vpop.f32.mrf.mxu3  ;;  %v5677_v19 = vadd.f32 %v5637_v3, %v5528_v8  ;;  %v5342_v52 = vpop.f32.mrf.mxu0 }
 0x4cc   : >> { %v5491_v2 = vpop.f32.mrf.mxu1  ;;  %v5380_v7 = vadd.f32 %v5342_v52, %v15343_v6 }
 0x4cd   : >> { %v5697_v13 = vadd.f32 %v15496_v32, %v5677_v19 }
 0x4ce   : >> { %12602 = vmatmul.msk.f32.gmra.mxu0 %vm5762_vm1, %v15544_v59  ;;  %v5529_v30 = vadd.f32 %v5491_v2, %v5380_v7  ;;  %v15577_v7 = vld [vmem:[#allocation3 + $0x40] sm:$0xff] }
 0x4cf   : >> { %12620 = vmatmul.msk.f32.gmra.mxu1 %vm5762_vm1, %v6358_v25  ;;  %v5713_v29 = vmax.f32 %v5697_v13, 0.0  ;;  %12638 = vmatmul.msk.f32.gmra.mxu2 %vm5762_vm1, %v6513_v46  ;;  %v6361_v25 = vld [vmem:[#allocation3 + $0x42] sm:$0xff] }
 0x4d0   : >> { %12655 = vmatmul.msk.f32.gmra.mxu3 %vm5762_vm1, %v6667_v17  ;;  %v6516_v46 = vld [vmem:[#allocation3 + $0x43] sm:$0xff] }
 0x4d1   : >> { %5729 = vst [vmem:[#allocation2 + $0x320] sm:$0xff] %v5713_v29  ;;  %v6670_v17 = vld [vmem:[#allocation3 + $0x3c] sm:$0xff] }
 0x4d2   : >> { %v5640_v61 = vpop.f32.mrf.mxu2 }
 0x4d3   : >> { %v15551_v21 = vpop.f32.mrf.mxu3  ;;  %v5678_v6 = vadd.f32 %v5640_v61, %v5529_v30  ;;  %v5345_v15 = vpop.f32.mrf.mxu0 }
 0x4d4   : >> { %v5494_v33 = vpop.f32.mrf.mxu1  ;;  %v5381_v58 = vadd.f32 %v5345_v15, %v15357_v34 }
 0x4d5   : >> { %v5698_v4 = vadd.f32 %v15496_v32, %v5678_v6 }
 0x4d6   : >> { %12603 = vmatmul.msk.f32.gmra.mxu0 %vm5762_vm1, %v15555_v48  ;;  %v5530_v41 = vadd.f32 %v5494_v33, %v5381_v58 }
 0x4d7   : >> { %12621 = vmatmul.msk.f32.gmra.mxu1 %vm5762_vm1, %v6359_v5  ;;  %v5714_v55 = vmax.f32 %v5698_v4, 0.0  ;;  %12639 = vmatmul.msk.f32.gmra.mxu2 %vm5762_vm1, %v6514_v0  ;;  %v6671_v4 = vld [vmem:[#allocation3 + $0x44] sm:$0xff] }
 0x4d8   : >> { %12656 = vmatmul.msk.f32.gmra.mxu3 %vm5762_vm1, %v6668_v23  ;;  %v15589_v0 = vld [vmem:[#allocation3 + $0x48] sm:$0xff] }
 0x4d9   : >> { %5730 = vst [vmem:[#allocation2 + $0x328] sm:$0xff] %v5714_v55  ;;  %v6362_v23 = vld [vmem:[#allocation3 + $0x4a] sm:$0xff] }
 0x4da   : >> { %v5643_v38 = vpop.f32.mrf.mxu2  ;;  %v6517_v55 = vld [vmem:[#allocation3 + $0x4b] sm:$0xff] }
 0x4db   : >> { %v15562_v62 = vpop.f32.mrf.mxu3  ;;  %v5679_v34 = vadd.f32 %v5643_v38, %v5530_v41  ;;  %v5348_v56 = vpop.f32.mrf.mxu0  ;;  %v6033_v41 = vld [vmem:[#allocation2 + $0x310] ss:$2 sm:$0x3f]  ;;  %v6037_v38 = vld [vmem:[#allocation2 + $0x311] ss:$2 sm:$0x3f] }
 0x4dc   : >> { %v5497_v49 = vpop.f32.mrf.mxu1  ;;  %v5382_v45 = vadd.f32 %v5348_v56, %v15372_v36  ;;  %v6038_v36 = vmax.f32 %v6031_v63, %v6035_v10 }
 0x4dd   : >> { %v5699_v26 = vadd.f32 %v15496_v32, %v5679_v34 }
 0x4de   : >> { %12604 = vmatmul.msk.f32.gmra.mxu0 %vm5762_vm1, %v15566_v53  ;;  %v5531_v22 = vadd.f32 %v5497_v49, %v5382_v45 }
 0x4df   : >> { %12622 = vmatmul.msk.f32.gmra.mxu1 %vm5762_vm1, %v6360_v11  ;;  %v5715_v35 = vmax.f32 %v5699_v26, 0.0  ;;  %12640 = vmatmul.msk.f32.gmra.mxu2 %vm5762_vm1, %v6515_v27  ;;  %v6039_v26 = vmax.f32 %v6033_v41, %v6037_v38  ;;  %v15623_v41 = vld [vmem:[#allocation3 + $0x60] sm:$0xff] }
 0x4e0   : >> { %12657 = vmatmul.msk.f32.gmra.mxu3 %vm5762_vm1, %v6669_v9  ;;  %v6041_v42 = vld [vmem:[#allocation2 + $0x320] ss:$2 sm:$0xff]  ;;  %v6045_v24 = vld [vmem:[#allocation2 + $0x321] ss:$2 sm:$0xff] }
 0x4e1   : >> { %v6048_v1 = vmax.f32 %v6041_v42, %v6045_v24  ;;  %5731 = vst [vmem:[#allocation2 + $0x330] sm:$0xff] %v5715_v35  ;;  %v6365_v38 = vld [vmem:[#allocation3 + $0x62] sm:$0xff] }
 0x4e2   : >> { %v5646_v39 = vpop.f32.mrf.mxu2 }
 0x4e3   : >> { %v15573_v57 = vpop.f32.mrf.mxu3  ;;  %v5680_v8 = vadd.f32 %v5646_v39, %v5531_v22  ;;  %v5351_v3 = vpop.f32.mrf.mxu0  ;;  %v6050_v52 = vmax.f32 %v6038_v36, %v6048_v1  ;;  %v15600_v36 = vld [vmem:[#allocation3 + $0x50] sm:$0xff] }
 0x4e4   : >> { %v5500_v19 = vpop.f32.mrf.mxu1  ;;  %v5383_v13 = vadd.f32 %v5351_v3, %v15386_v16  ;;  %v6363_v1 = vld [vmem:[#allocation3 + $0x52] sm:$0xff] }
 0x4e5   : >> { %v5700_v2 = vadd.f32 %v15496_v32, %v5680_v8  ;;  %6052 = vst.msk [vmem:[#allocation3 + $0xa8] sm:$0xff] %vm5762_vm1, %v6050_v52  ;;  %v6518_v22 = vld [vmem:[#allocation3 + $0x53] sm:$0xff] }
 0x4e6   : >> { %12605 = vmatmul.msk.f32.gmra.mxu0 %vm5762_vm1, %v15577_v7  ;;  %v5532_v30 = vadd.f32 %v5500_v19, %v5383_v13  ;;  %v6672_v39 = vld [vmem:[#allocation3 + $0x4c] sm:$0xff] }
 0x4e7   : >> { %12623 = vmatmul.msk.f32.gmra.mxu1 %vm5762_vm1, %v6361_v25  ;;  %v5716_v29 = vmax.f32 %v5700_v2, 0.0  ;;  %12641 = vmatmul.msk.f32.gmra.mxu2 %vm5762_vm1, %v6516_v46 }
 0x4e8   : >> { %12658 = vmatmul.msk.f32.gmra.mxu3 %vm5762_vm1, %v6670_v17  ;;  %v15612_v17 = vld [vmem:[#allocation3 + $0x58] sm:$0xff] }
 0x4e9   : >> { %5732 = vst [vmem:[#allocation2 + $0x338] sm:$0xff] %v5716_v29  ;;  %v6364_v29 = vld [vmem:[#allocation3 + $0x5a] sm:$0xff] }
 0x4ea   : >> { %v5649_v16 = vpop.f32.mrf.mxu2 }
 0x4eb   : >> { %v15585_v61 = vpop.f32.mrf.mxu3  ;;  %v5681_v6 = vadd.f32 %v5649_v16, %v5532_v30  ;;  %v5354_v15 = vpop.f32.mrf.mxu0  ;;  %v6519_v30 = vld [vmem:[#allocation3 + $0x5b] sm:$0xff] }
 0x4ec   : >> { %v5503_v33 = vpop.f32.mrf.mxu1  ;;  %v5384_v5 = vadd.f32 %v5354_v15, %v15401_v54  ;;  %v6673_v16 = vld [vmem:[#allocation3 + $0x54] sm:$0xff] }
 0x4ed   : >> { %v5701_v58 = vadd.f32 %v15496_v32, %v5681_v6 }
 0x4ee   : >> { %12606 = vmatmul.msk.f32.gmra.mxu0 %vm5762_vm1, %v15589_v0  ;;  %v5533_v45 = vadd.f32 %v5503_v33, %v5384_v5 }
 0x4ef   : >> { %12624 = vmatmul.msk.f32.gmra.mxu1 %vm5762_vm1, %v6362_v23  ;;  %v5717_v34 = vmax.f32 %v5701_v58, 0.0  ;;  %12642 = vmatmul.msk.f32.gmra.mxu2 %vm5762_vm1, %v6517_v55 }
 0x4f0   : >> { %12659 = vmatmul.msk.f32.gmra.mxu3 %vm5762_vm1, %v6671_v4  ;;  %v6043_v56 = vld [vmem:[#allocation2 + $0x330] ss:$2 sm:$0x3f]  ;;  %v6047_v49 = vld [vmem:[#allocation2 + $0x331] ss:$2 sm:$0x3f] }
 0x4f1   : >> { %v6049_v54 = vmax.f32 %v6043_v56, %v6047_v49  ;;  %5733 = vst [vmem:[#allocation2 + $0x340] sm:$0xff] %v5717_v34  ;;  %v6520_v34 = vld [vmem:[#allocation3 + $0x63] sm:$0xff] }
 0x4f2   : >> { %v5652_v11 = vpop.f32.mrf.mxu2  ;;  %v15628_v56 = vld [vmem:[#allocation3 + $0x5c] sm:$0xff] }
 0x4f3   : >> { %v15596_v9 = vpop.f32.mrf.mxu3  ;;  %v5682_v63 = vadd.f32 %v5652_v11, %v5533_v45  ;;  %v5357_v10 = vpop.f32.mrf.mxu0  ;;  %v6051_v35 = vmax.f32 %v6039_v26, %v6049_v54 }
 0x4f4   : >> { %v5506_v27 = vpop.f32.mrf.mxu1  ;;  %v5385_v24 = vadd.f32 %v5357_v10, %v15415_v20 }
 0x4f5   : >> { %v5702_v42 = vadd.f32 %v15496_v32, %v5682_v63  ;;  %6053 = vst.msk [vmem:[#allocation3 + $0xb0] sm:$0x3f] %vm5764_vm2, %v6051_v35  ;;  %v15637_v35 = vld [vmem:[#allocation3 + $0x68] sm:$0xff] }
 0x4f6   : >> { %12607 = vmatmul.msk.f32.gmra.mxu0 %vm5762_vm1, %v15600_v36  ;;  %v5534_v3 = vadd.f32 %v5506_v27, %v5385_v24  ;;  %v6521_v24 = vld [vmem:[#allocation3 + $0x6b] sm:$0xff] }
 0x4f7   : >> { %12625 = vmatmul.msk.f32.gmra.mxu1 %vm5762_vm1, %v6363_v1  ;;  %v5718_v8 = vmax.f32 %v5702_v42, 0.0  ;;  %12643 = vmatmul.msk.f32.gmra.mxu2 %vm5762_vm1, %v6518_v22  ;;  %v6366_v42 = vld [vmem:[#allocation3 + $0x6a] sm:$0xff] }
 0x4f8   : >> { %12660 = vmatmul.msk.f32.gmra.mxu3 %vm5762_vm1, %v6672_v39  ;;  %v15642_v1 = vld [vmem:[#allocation3 + $0x64] sm:$0xff] }
 0x4f9   : >> { %5734 = vst [vmem:[#allocation2 + $0x348] sm:$0xff] %v5718_v8 }
 0x4fa   : >> { %v5655_v20 = vpop.f32.mrf.mxu2 }
 0x4fb   : >> { %v15608_v19 = vpop.f32.mrf.mxu3  ;;  %v5683_v52 = vadd.f32 %v5655_v20, %v5534_v3  ;;  %v5360_v2 = vpop.f32.mrf.mxu0 }
 0x4fc   : >> { %v5509_v13 = vpop.f32.mrf.mxu1  ;;  %v5386_v46 = vadd.f32 %v5360_v2, %v15429_v31 }
 0x4fd   : >> { %v5703_v25 = vadd.f32 %v15496_v32, %v5683_v52 }
 0x4fe   : >> { %12608 = vmatmul.msk.f32.gmra.mxu0 %vm5762_vm1, %v15612_v17  ;;  %v5535_v15 = vadd.f32 %v5509_v13, %v5386_v46  ;;  %v6367_v46 = vld [vmem:[#allocation3 + $0x72] sm:$0xff] }
 0x4ff   : >> { %12626 = vmatmul.msk.f32.gmra.mxu1 %vm5762_vm1, %v6364_v29  ;;  %v5719_v6 = vmax.f32 %v5703_v25, 0.0  ;;  %12644 = vmatmul.msk.f32.gmra.mxu2 %vm5762_vm1, %v6519_v30  ;;  %v15651_v25 = vld [vmem:[#allocation3 + $0x70] sm:$0xff] }
 0x500   : >> { %12661 = vmatmul.msk.f32.gmra.mxu3 %vm5762_vm1, %v6673_v16  ;;  %v6522_v29 = vld [vmem:[#allocation3 + $0x73] sm:$0xff] }
 0x501   : >> { %5735 = vst [vmem:[#allocation2 + $0x350] sm:$0xff] %v5719_v6  ;;  %v15656_v30 = vld [vmem:[#allocation3 + $0x6c] sm:$0xff]  ;;  %v12776_v16 = vld [vmem:[%s17027_s3 + $0x58] sm:$0xff] }
 0x502   : >> { %v5658_v33 = vpop.f32.mrf.mxu2  ;;  %7833 = vmatpush.msrb.mxu2 %v12776_v16  ;;  %v15691_v16 = vld [vmem:[#allocation3 + $0x80] sm:$0xff] }
 0x503   : >> { %v15619_v4 = vpop.f32.mrf.mxu3  ;;  %v5684_v31 = vadd.f32 %v5658_v33, %v5535_v15  ;;  %v5363_v58 = vpop.f32.mrf.mxu0  ;;  %v12794_v15 = vld [vmem:[%s17027_s3 + $0x60] sm:$0xff]  ;;  %v12758_v33 = vld [vmem:[%s17027_s3 + $0x50] sm:$0xff] }
 0x504   : >> { %v5512_v5 = vpop.f32.mrf.mxu1  ;;  %v5387_v55 = vadd.f32 %v5363_v58, %v15440_v44  ;;  %7988 = vmatpush.msrb.mxu3 %v12794_v15  ;;  %7678 = vmatpush.msrb.mxu1 %v12758_v33  ;;  %v15697_v15 = vld [vmem:[#allocation3 + $0x7c] sm:$0xff] }
 0x505   : >> { %v5704_v23 = vadd.f32 %v15496_v32, %v5684_v31 }
 0x506   : >> { %12609 = vmatmul.msk.f32.gmra.mxu0 %vm5762_vm1, %v15623_v41  ;;  %v5536_v26 = vadd.f32 %v5512_v5, %v5387_v55 }
 0x507   : >> { %12627 = vmatmul.msk.f32.gmra.mxu1 %vm5762_vm1, %v6365_v38  ;;  %v5720_v49 = vmax.f32 %v5704_v23, 0.0  ;;  %12645 = vmatmul.msk.f32.gmra.mxu2 %vm5762_vm1, %v6520_v34 }
 0x508   : >> { %12662 = vmatmul.msk.f32.gmra.mxu3 %vm5762_vm1, %v15628_v56 }
 0x509   : >> { %5736 = vst [vmem:[#allocation2 + $0x358] sm:$0xff] %v5720_v49 }
 0x50a   : >> { %v5661_v44 = vpop.f32.mrf.mxu2 }
 0x50b   : >> { %v15633_v54 = vpop.f32.mrf.mxu3  ;;  %v5685_v45 = vadd.f32 %v5661_v44, %v5536_v26  ;;  %v5366_v11 = vpop.f32.mrf.mxu0  ;;  %v15677_v26 = vld [vmem:[#allocation3 + $0x78] sm:$0xff] }
 0x50c   : >> { %v5515_v63 = vpop.f32.mrf.mxu1  ;;  %v5388_v27 = vadd.f32 %v5366_v11, %v15463_v40  ;;  %v6368_v44 = vld [vmem:[#allocation3 + $0x7a] sm:$0xff] }
 0x50d   : >> { %v5705_v10 = vadd.f32 %v15496_v32, %v5685_v45  ;;  %v15679_v45 = vld [vmem:[#allocation3 + $0x74] sm:$0xff]  ;;  %v6055_v11 = vld [vmem:[#allocation2 + $0x340] ss:$2 sm:$0xff] }
 0x50e   : >> { %12610 = vmatmul.msk.f32.gmra.mxu0 %vm5762_vm1, %v15637_v35  ;;  %v5537_v39 = vadd.f32 %v5515_v63, %v5388_v27  ;;  %v6059_v63 = vld [vmem:[#allocation2 + $0x341] ss:$2 sm:$0xff] }
 0x50f   : >> { %12628 = vmatmul.msk.f32.gmra.mxu1 %vm5762_vm1, %v6366_v42  ;;  %v5721_v22 = vmax.f32 %v5705_v10, 0.0  ;;  %12646 = vmatmul.msk.f32.gmra.mxu2 %vm5762_vm1, %v6521_v24  ;;  %v6523_v10 = vld [vmem:[#allocation3 + $0x7b] sm:$0xff]  ;;  %v6062_v24 = vmax.f32 %v6055_v11, %v6059_v63 }
 0x510   : >> { %12663 = vmatmul.msk.f32.gmra.mxu3 %vm5762_vm1, %v15642_v1  ;;  %v6057_v11 = vld [vmem:[#allocation2 + $0x350] ss:$2 sm:$0x3f]  ;;  %v6061_v63 = vld [vmem:[#allocation2 + $0x351] ss:$2 sm:$0x3f] }
 0x511   : >> { %5737 = vst [vmem:[#allocation2 + $0x360] sm:$0xff] %v5721_v22 }
 0x512   : >> { %v5664_v40 = vpop.f32.mrf.mxu2 }
 0x513   : >> { %v15647_v8 = vpop.f32.mrf.mxu3  ;;  %v5686_v3 = vadd.f32 %v5664_v40, %v5537_v39  ;;  %v5369_v20 = vpop.f32.mrf.mxu0 }
 0x514   : >> { %v5518_v52 = vpop.f32.mrf.mxu1  ;;  %v5389_v13 = vadd.f32 %v5369_v20, %v15474_v37  ;;  %v12740_v37 = vld [vmem:[%s17027_s3 + $0x48] sm:$0xff] }
 0x515   : >> { %v5706_v2 = vadd.f32 %v15496_v32, %v5686_v3  ;;  %7523 = vmatpush.msrb.mxu0 %v12740_v37  ;;  %v6524_v37 = vld [vmem:[#allocation3 + $0x83] sm:$0xff] }
 0x516   : >> { %12611 = vmatmul.msk.f32.gmra.mxu0 %vm5762_vm1, %v15651_v25  ;;  %v5538_v31 = vadd.f32 %v5518_v52, %v5389_v13 }
 0x517   : >> { %12629 = vmatmul.msk.f32.gmra.mxu1 %vm5762_vm1, %v6367_v46  ;;  %v5722_v6 = vmax.f32 %v5706_v2, 0.0  ;;  %12647 = vmatmul.msk.f32.gmra.mxu2 %vm5762_vm1, %v6522_v29 }
 0x518   : >> { %12664 = vmatmul.msk.f32.gmra.mxu3 %vm5762_vm1, %v15656_v30 }
 0x519   : >> { %5738 = vst [vmem:[#allocation2 + $0x368] sm:$0xff] %v5722_v6  ;;  %v6369_v6 = vld [vmem:[#allocation3 + $0x82] sm:$0xff] }
 0x51a   : >> { %v5667_v58 = vpop.f32.mrf.mxu2 }
 0x51b   : >> { %v15673_v5 = vpop.f32.mrf.mxu3  ;;  %v5687_v23 = vadd.f32 %v5667_v58, %v5538_v31  ;;  %v5372_v55 = vpop.f32.mrf.mxu0 }
 0x51c   : >> { %v5521_v38 = vpop.f32.mrf.mxu1  ;;  %v5390_v49 = vadd.f32 %v5372_v55, %v15486_v28 }
 0x51d   : >> { %v5707_v34 = vadd.f32 %v15496_v32, %v5687_v23 }
 0x51e   : >> { %12612 = vmatmul.msk.f32.gmra.mxu0 %vm5762_vm1, %v15677_v26  ;;  %v5539_v39 = vadd.f32 %v5521_v38, %v5390_v49  ;;  %v6818_v49 = vld [vmem:[#allocation3 + $0xe] sm:$0xff] }
 0x51f   : >> { %12630 = vmatmul.msk.f32.gmra.mxu1 %vm5762_vm1, %v6368_v44  ;;  %v5723_v27 = vmax.f32 %v5707_v34, 0.0  ;;  %12648 = vmatmul.msk.f32.gmra.mxu2 %vm5762_vm1, %v6523_v10  ;;  %v15705_v34 = vld [vmem:[#allocation3 + $0x84] sm:$0xff]  ;;  %v6973_v44 = vld [vmem:[#allocation3 + $0xf] sm:$0xff] }
 0x520   : >> { %12665 = vmatmul.msk.f32.gmra.mxu3 %vm5762_vm1, %v15679_v45  ;;  %v6065_v28 = vld [vmem:[#allocation2 + $0x360] ss:$2 sm:$0xff]  ;;  %v6069_v42 = vld [vmem:[#allocation2 + $0x361] ss:$2 sm:$0xff] }
 0x521   : >> { %v6072_v22 = vmax.f32 %v6065_v28, %v6069_v42  ;;  %5739 = vst [vmem:[#allocation2 + $0x370] sm:$0xff] %v5723_v27  ;;  %v6063_v28 = vmax.f32 %v6057_v11, %v6061_v63 }
 0x522   : >> { %v5670_v40 = vpop.f32.mrf.mxu2 }
 0x523   : >> { %v15687_v3 = vpop.f32.mrf.mxu3  ;;  %v5688_v20 = vadd.f32 %v5670_v40, %v5539_v39  ;;  %v6302_v52 = vpop.f32.mrf.mxu0  ;;  %v6074_v13 = vmax.f32 %v6062_v24, %v6072_v22 }
 0x524   : >> { %v6440_v2 = vpop.f32.mrf.mxu1  ;;  %v6303_v29 = vadd.f32 %v6302_v52, %v15498_v47 }
 0x525   : >> { %v5708_v46 = vadd.f32 %v15496_v32, %v5688_v20  ;;  %6076 = vst.msk [vmem:[#allocation3 + $0xb6] sm:$0xff] %vm5762_vm1, %v6074_v13 }
 0x526   : >> { %12613 = vmatmul.msk.f32.gmra.mxu0 %vm5762_vm1, %v15691_v16  ;;  %v6491_v32 = vadd.f32 %v6440_v2, %v6303_v29  ;;  %v6974_v29 = vld [vmem:[#allocation3 + $0x17] sm:$0xff] }
 0x527   : >> { %12631 = vmatmul.msk.f32.gmra.mxu1 %vm5762_vm1, %v6369_v6  ;;  %v5724_v33 = vmax.f32 %v5708_v46, 0.0  ;;  %12649 = vmatmul.msk.f32.gmra.mxu2 %vm5762_vm1, %v6524_v37  ;;  %v6819_v46 = vld [vmem:[#allocation3 + $0x16] sm:$0xff] }
 0x528   : >> { %12666 = vmatmul.msk.f32.gmra.mxu3 %vm5762_vm1, %v15697_v15 }
 0x529   : >> { %5740 = vst [vmem:[#allocation2 + $0x378] sm:$0xff] %v5724_v33 }
 0x52a   : >> { %v6595_v31 = vpop.f32.mrf.mxu2 }
 0x52b   : >> { %v15702_v47 = vpop.f32.mrf.mxu3  ;;  %v6646_v58 = vadd.f32 %v6595_v31, %v6491_v32  ;;  %v6305_v23 = vpop.f32.mrf.mxu0 }
 0x52c   : >> { %v6443_v55 = vpop.f32.mrf.mxu1  ;;  %v6306_v38 = vadd.f32 %v6305_v23, %v15507_v43 }
 0x52e   : >> { %12669 = vmatmul.msk.f32.vlgmr.msra.gmra.mxu0 %vm5762_vm1, %v6818_v49  ;;  %v6492_v42 = vadd.f32 %v6443_v55, %v6306_v38  ;;  %v15725_v55 = vld [vmem:[#allocation3 + $0x1e] sm:$0xff] }
 0x52f   : >> { %12687 = vmatmul.msk.f32.vlgmr.msra.gmra.mxu1 %vm5762_vm1, %v6973_v44  ;;  %12705 = vmatmul.msk.f32.vlgmr.msra.gmra.mxu2 %vm5762_vm1, %v15511_v14  ;;  %v7283_v14 = vld [vmem:[#allocation3 + $0x11] sm:$0xff]  ;;  %v6975_v38 = vld [vmem:[#allocation3 + $0x1f] sm:$0xff] }
 0x530   : >> { %12667 = vmatmul.msk.f32.gmra.mxu3 %vm5762_vm1, %v15705_v34  ;;  %v6067_v10 = vld [vmem:[#allocation2 + $0x370] ss:$2 sm:$0x3f]  ;;  %v6071_v27 = vld [vmem:[#allocation2 + $0x371] ss:$2 sm:$0x3f] }
 0x531   : >> { %v6073_v43 = vmax.f32 %v6067_v10, %v6071_v27 }
 0x532   : >> { %v6598_v24 = vpop.f32.mrf.mxu2 }
 0x533   : >> { %v6750_v22 = vpop.f32.mrf.mxu3  ;;  %v6647_v39 = vadd.f32 %v6598_v24, %v6492_v42  ;;  %v6308_v20 = vpop.f32.mrf.mxu0  ;;  %v6075_v2 = vmax.f32 %v6063_v28, %v6073_v43  ;;  %v15736_v43 = vld [vmem:[#allocation3 + $0x26] sm:$0xff] }
 0x534   : >> { %v15713_v40 = vadd.f32 %v6750_v22, %v6646_v58  ;;  %v6446_v52 = vpop.f32.mrf.mxu1  ;;  %v6309_v13 = vadd.f32 %v6308_v20, %v15518_v12  ;;  %v6976_v42 = vld [vmem:[#allocation3 + $0x27] sm:$0xff] }
 0x535   : >> { %6077 = vst.msk [vmem:[#allocation3 + $0xbe] sm:$0x3f] %vm5764_vm2, %v6075_v2 }
 0x536   : >> { %12670 = vmatmul.msk.f32.gmra.mxu0 %vm5762_vm1, %v6819_v46  ;;  %v6493_v6 = vadd.f32 %v6446_v52, %v6309_v13  ;;  %v15747_v46 = vld [vmem:[#allocation3 + $0x2e] sm:$0xff] }
 0x537   : >> { %12688 = vmatmul.msk.f32.gmra.mxu1 %vm5762_vm1, %v6974_v29  ;;  %12706 = vmatmul.msk.f32.gmra.mxu2 %vm5762_vm1, %v15522_v51  ;;  %v7284_v51 = vld [vmem:[#allocation3 + $0x19] sm:$0xff]  ;;  %v6977_v29 = vld [vmem:[#allocation3 + $0x2f] sm:$0xff] }
 0x538   : >> { %12723 = vmatmul.msk.f32.vlgmr.msra.gmra.mxu3 %vm5762_vm1, %v7283_v14 }
 0x53a   : >> { %v6601_v37 = vpop.f32.mrf.mxu2 }
 0x53b   : >> { %v6753_v33 = vpop.f32.mrf.mxu3  ;;  %v6648_v32 = vadd.f32 %v6601_v37, %v6493_v6  ;;  %v6311_v12 = vpop.f32.mrf.mxu0 }
 0x53c   : >> { %v15722_v31 = vadd.f32 %v6753_v33, %v6647_v39  ;;  %v6449_v58 = vpop.f32.mrf.mxu1  ;;  %v6312_v23 = vadd.f32 %v6311_v12, %v15529_v50 }
 0x53e   : >> { %12671 = vmatmul.msk.f32.gmra.mxu0 %vm5762_vm1, %v15725_v55  ;;  %v6494_v49 = vadd.f32 %v6449_v58, %v6312_v23  ;;  %v15758_v23 = vld [vmem:[#allocation3 + $0x36] sm:$0xff] }
 0x53f   : >> { %12689 = vmatmul.msk.f32.gmra.mxu1 %vm5762_vm1, %v6975_v38  ;;  %12707 = vmatmul.msk.f32.gmra.mxu2 %vm5762_vm1, %v15533_v18  ;;  %v7285_v18 = vld [vmem:[#allocation3 + $0x21] sm:$0xff]  ;;  %v6978_v38 = vld [vmem:[#allocation3 + $0x37] sm:$0xff] }
 0x540   : >> { %12724 = vmatmul.msk.f32.gmra.mxu3 %vm5762_vm1, %v7284_v51 }
 0x542   : >> { %v6604_v44 = vpop.f32.mrf.mxu2 }
 0x543   : >> { %v6756_v11 = vpop.f32.mrf.mxu3  ;;  %v6649_v63 = vadd.f32 %v6604_v44, %v6494_v49  ;;  %v6314_v50 = vpop.f32.mrf.mxu0 }
 0x544   : >> { %v15733_v10 = vadd.f32 %v6756_v11, %v6648_v32  ;;  %v6452_v27 = vpop.f32.mrf.mxu1  ;;  %v6315_v28 = vadd.f32 %v6314_v50, %v15540_v60 }
 0x546   : >> { %12672 = vmatmul.msk.f32.gmra.mxu0 %vm5762_vm1, %v15736_v43  ;;  %v6495_v24 = vadd.f32 %v6452_v27, %v6315_v28  ;;  %v15769_v28 = vld [vmem:[#allocation3 + $0x3e] sm:$0xff] }
 0x547   : >> { %12690 = vmatmul.msk.f32.gmra.mxu1 %vm5762_vm1, %v6976_v42  ;;  %12708 = vmatmul.msk.f32.gmra.mxu2 %vm5762_vm1, %v15544_v59  ;;  %v7286_v59 = vld [vmem:[#allocation3 + $0x29] sm:$0xff]  ;;  %v6979_v42 = vld [vmem:[#allocation3 + $0x3f] sm:$0xff] }
 0x548   : >> { %12725 = vmatmul.msk.f32.gmra.mxu3 %vm5762_vm1, %v7285_v18 }
 0x54a   : >> { %v6607_v22 = vpop.f32.mrf.mxu2 }
 0x54b   : >> { %v6759_v39 = vpop.f32.mrf.mxu3  ;;  %v6650_v20 = vadd.f32 %v6607_v22, %v6495_v24  ;;  %v6317_v60 = vpop.f32.mrf.mxu0 }
 0x54c   : >> { %v15744_v52 = vadd.f32 %v6759_v39, %v6649_v63  ;;  %v6455_v2 = vpop.f32.mrf.mxu1  ;;  %v6318_v13 = vadd.f32 %v6317_v60, %v15551_v21 }
 0x54e   : >> { %12673 = vmatmul.msk.f32.gmra.mxu0 %vm5762_vm1, %v15747_v46  ;;  %v6496_v14 = vadd.f32 %v6455_v2, %v6318_v13  ;;  %v15780_v13 = vld [vmem:[#allocation3 + $0x46] sm:$0xff] }
 0x54f   : >> { %12691 = vmatmul.msk.f32.gmra.mxu1 %vm5762_vm1, %v6977_v29  ;;  %12709 = vmatmul.msk.f32.gmra.mxu2 %vm5762_vm1, %v15555_v48  ;;  %v7287_v48 = vld [vmem:[#allocation3 + $0x31] sm:$0xff]  ;;  %v6980_v29 = vld [vmem:[#allocation3 + $0x47] sm:$0xff] }
 0x550   : >> { %12726 = vmatmul.msk.f32.gmra.mxu3 %vm5762_vm1, %v7286_v59 }
 0x552   : >> { %v6610_v6 = vpop.f32.mrf.mxu2 }
 0x553   : >> { %v6762_v37 = vpop.f32.mrf.mxu3  ;;  %v6651_v33 = vadd.f32 %v6610_v6, %v6496_v14  ;;  %v6320_v21 = vpop.f32.mrf.mxu0 }
 0x554   : >> { %v15755_v32 = vadd.f32 %v6762_v37, %v6650_v20  ;;  %v6458_v12 = vpop.f32.mrf.mxu1  ;;  %v6321_v58 = vadd.f32 %v6320_v21, %v15562_v62 }
 0x556   : >> { %12674 = vmatmul.msk.f32.gmra.mxu0 %vm5762_vm1, %v15758_v23  ;;  %v6497_v51 = vadd.f32 %v6458_v12, %v6321_v58  ;;  %v15791_v58 = vld [vmem:[#allocation3 + $0x4e] sm:$0xff] }
 0x557   : >> { %12692 = vmatmul.msk.f32.gmra.mxu1 %vm5762_vm1, %v6978_v38  ;;  %12710 = vmatmul.msk.f32.gmra.mxu2 %vm5762_vm1, %v15566_v53  ;;  %v7288_v53 = vld [vmem:[#allocation3 + $0x39] sm:$0xff]  ;;  %v6981_v38 = vld [vmem:[#allocation3 + $0x4f] sm:$0xff] }
 0x558   : >> { %12727 = vmatmul.msk.f32.gmra.mxu3 %vm5762_vm1, %v7287_v48 }
 0x55a   : >> { %v6613_v49 = vpop.f32.mrf.mxu2 }
 0x55b   : >> { %v6765_v44 = vpop.f32.mrf.mxu3  ;;  %v6652_v11 = vadd.f32 %v6613_v49, %v6497_v51  ;;  %v6323_v62 = vpop.f32.mrf.mxu0 }
 0x55c   : >> { %v15766_v63 = vadd.f32 %v6765_v44, %v6651_v33  ;;  %v6461_v50 = vpop.f32.mrf.mxu1  ;;  %v6324_v27 = vadd.f32 %v6323_v62, %v15573_v57 }
 0x55e   : >> { %12675 = vmatmul.msk.f32.gmra.mxu0 %vm5762_vm1, %v15769_v28  ;;  %v6498_v18 = vadd.f32 %v6461_v50, %v6324_v27  ;;  %v15802_v27 = vld [vmem:[#allocation3 + $0x56] sm:$0xff] }
 0x55f   : >> { %12693 = vmatmul.msk.f32.gmra.mxu1 %vm5762_vm1, %v6979_v42  ;;  %12711 = vmatmul.msk.f32.gmra.mxu2 %vm5762_vm1, %v15577_v7  ;;  %v7289_v7 = vld [vmem:[#allocation3 + $0x41] sm:$0xff]  ;;  %v6982_v42 = vld [vmem:[#allocation3 + $0x57] sm:$0xff] }
 0x560   : >> { %12728 = vmatmul.msk.f32.gmra.mxu3 %vm5762_vm1, %v7288_v53 }
 0x562   : >> { %v6616_v24 = vpop.f32.mrf.mxu2 }
 0x563   : >> { %v6768_v22 = vpop.f32.mrf.mxu3  ;;  %v6653_v39 = vadd.f32 %v6616_v24, %v6498_v18  ;;  %v6326_v57 = vpop.f32.mrf.mxu0 }
 0x564   : >> { %v15777_v20 = vadd.f32 %v6768_v22, %v6652_v11  ;;  %v6464_v60 = vpop.f32.mrf.mxu1  ;;  %v6327_v2 = vadd.f32 %v6326_v57, %v15585_v61 }
 0x566   : >> { %12676 = vmatmul.msk.f32.gmra.mxu0 %vm5762_vm1, %v15780_v13  ;;  %v6499_v59 = vadd.f32 %v6464_v60, %v6327_v2  ;;  %v15813_v2 = vld [vmem:[#allocation3 + $0x5e] sm:$0xff] }
 0x567   : >> { %12694 = vmatmul.msk.f32.gmra.mxu1 %vm5762_vm1, %v6980_v29  ;;  %12712 = vmatmul.msk.f32.gmra.mxu2 %vm5762_vm1, %v15589_v0  ;;  %v7290_v0 = vld [vmem:[#allocation3 + $0x49] sm:$0xff]  ;;  %v6983_v29 = vld [vmem:[#allocation3 + $0x5f] sm:$0xff] }
 0x568   : >> { %12729 = vmatmul.msk.f32.gmra.mxu3 %vm5762_vm1, %v7289_v7 }
 0x56a   : >> { %v6619_v14 = vpop.f32.mrf.mxu2 }
 0x56b   : >> { %v6771_v6 = vpop.f32.mrf.mxu3  ;;  %v6654_v37 = vadd.f32 %v6619_v14, %v6499_v59  ;;  %v6329_v61 = vpop.f32.mrf.mxu0 }
 0x56c   : >> { %v15788_v33 = vadd.f32 %v6771_v6, %v6653_v39  ;;  %v6467_v21 = vpop.f32.mrf.mxu1  ;;  %v6330_v12 = vadd.f32 %v6329_v61, %v15596_v9 }
 0x56e   : >> { %12677 = vmatmul.msk.f32.gmra.mxu0 %vm5762_vm1, %v15791_v58  ;;  %v6500_v48 = vadd.f32 %v6467_v21, %v6330_v12  ;;  %v15824_v12 = vld [vmem:[#allocation3 + $0x66] sm:$0xff] }
 0x56f   : >> { %12695 = vmatmul.msk.f32.gmra.mxu1 %vm5762_vm1, %v6981_v38  ;;  %12713 = vmatmul.msk.f32.gmra.mxu2 %vm5762_vm1, %v15600_v36  ;;  %v7291_v36 = vld [vmem:[#allocation3 + $0x51] sm:$0xff]  ;;  %v6984_v38 = vld [vmem:[#allocation3 + $0x67] sm:$0xff] }
 0x570   : >> { %12730 = vmatmul.msk.f32.gmra.mxu3 %vm5762_vm1, %v7290_v0 }
 0x572   : >> { %v6622_v51 = vpop.f32.mrf.mxu2 }
 0x573   : >> { %v6774_v49 = vpop.f32.mrf.mxu3  ;;  %v6655_v44 = vadd.f32 %v6622_v51, %v6500_v48  ;;  %v6332_v9 = vpop.f32.mrf.mxu0 }
 0x574   : >> { %v15799_v11 = vadd.f32 %v6774_v49, %v6654_v37  ;;  %v6470_v62 = vpop.f32.mrf.mxu1  ;;  %v6333_v50 = vadd.f32 %v6332_v9, %v15608_v19 }
 0x576   : >> { %12678 = vmatmul.msk.f32.gmra.mxu0 %vm5762_vm1, %v15802_v27  ;;  %v6501_v53 = vadd.f32 %v6470_v62, %v6333_v50  ;;  %v15835_v50 = vld [vmem:[#allocation3 + $0x6e] sm:$0xff] }
 0x577   : >> { %12696 = vmatmul.msk.f32.gmra.mxu1 %vm5762_vm1, %v6982_v42  ;;  %12714 = vmatmul.msk.f32.gmra.mxu2 %vm5762_vm1, %v15612_v17  ;;  %v7292_v17 = vld [vmem:[#allocation3 + $0x59] sm:$0xff]  ;;  %v6985_v42 = vld [vmem:[#allocation3 + $0x6f] sm:$0xff] }
 0x578   : >> { %12731 = vmatmul.msk.f32.gmra.mxu3 %vm5762_vm1, %v7291_v36 }
 0x57a   : >> { %v6625_v18 = vpop.f32.mrf.mxu2 }
 0x57b   : >> { %v6777_v24 = vpop.f32.mrf.mxu3  ;;  %v6656_v22 = vadd.f32 %v6625_v18, %v6501_v53  ;;  %v6335_v19 = vpop.f32.mrf.mxu0 }
 0x57c   : >> { %v15810_v39 = vadd.f32 %v6777_v24, %v6655_v44  ;;  %v6473_v57 = vpop.f32.mrf.mxu1  ;;  %v6336_v60 = vadd.f32 %v6335_v19, %v15619_v4 }
 0x57e   : >> { %12679 = vmatmul.msk.f32.gmra.mxu0 %vm5762_vm1, %v15813_v2  ;;  %v6502_v7 = vadd.f32 %v6473_v57, %v6336_v60  ;;  %v15846_v60 = vld [vmem:[#allocation3 + $0x76] sm:$0xff] }
 0x57f   : >> { %12697 = vmatmul.msk.f32.gmra.mxu1 %vm5762_vm1, %v6983_v29  ;;  %12715 = vmatmul.msk.f32.gmra.mxu2 %vm5762_vm1, %v15623_v41  ;;  %v7293_v41 = vld [vmem:[#allocation3 + $0x61] sm:$0xff]  ;;  %v6986_v29 = vld [vmem:[#allocation3 + $0x77] sm:$0xff] }
 0x580   : >> { %12732 = vmatmul.msk.f32.gmra.mxu3 %vm5762_vm1, %v7292_v17 }
 0x582   : >> { %v6628_v59 = vpop.f32.mrf.mxu2 }
 0x583   : >> { %v6780_v14 = vpop.f32.mrf.mxu3  ;;  %v6657_v6 = vadd.f32 %v6628_v59, %v6502_v7  ;;  %v6338_v4 = vpop.f32.mrf.mxu0 }
 0x584   : >> { %v15821_v37 = vadd.f32 %v6780_v14, %v6656_v22  ;;  %v6476_v61 = vpop.f32.mrf.mxu1  ;;  %v6339_v21 = vadd.f32 %v6338_v4, %v15633_v54 }
 0x586   : >> { %12680 = vmatmul.msk.f32.gmra.mxu0 %vm5762_vm1, %v15824_v12  ;;  %v6503_v0 = vadd.f32 %v6476_v61, %v6339_v21  ;;  %v15857_v21 = vld [vmem:[#allocation3 + $0x7e] sm:$0xff] }
 0x587   : >> { %12698 = vmatmul.msk.f32.gmra.mxu1 %vm5762_vm1, %v6984_v38  ;;  %12716 = vmatmul.msk.f32.gmra.mxu2 %vm5762_vm1, %v15637_v35  ;;  %v7294_v35 = vld [vmem:[#allocation3 + $0x69] sm:$0xff]  ;;  %v6987_v38 = vld [vmem:[#allocation3 + $0x7f] sm:$0xff] }
 0x588   : >> { %12733 = vmatmul.msk.f32.gmra.mxu3 %vm5762_vm1, %v7293_v41  ;;  %v12848_v41 = vld [vmem:[%s17027_s3 + $0x78] sm:$0xff] }
 0x589   : >> { %8453 = vmatpush.msra.mxu2 %v12848_v41 }
 0x58a   : >> { %v6631_v48 = vpop.f32.mrf.mxu2 }
 0x58b   : >> { %v6783_v51 = vpop.f32.mrf.mxu3  ;;  %v6658_v49 = vadd.f32 %v6631_v48, %v6503_v0  ;;  %v6341_v54 = vpop.f32.mrf.mxu0  ;;  %v12866_v0 = vld [vmem:[%s17027_s3 + $0x80] sm:$0xff]  ;;  %v12830_v48 = vld [vmem:[%s17027_s3 + $0x70] sm:$0xff] }
 0x58c   : >> { %v15832_v44 = vadd.f32 %v6783_v51, %v6657_v6  ;;  %v6479_v9 = vpop.f32.mrf.mxu1  ;;  %v6342_v62 = vadd.f32 %v6341_v54, %v15647_v8  ;;  %8608 = vmatpush.msra.mxu3 %v12866_v0  ;;  %8298 = vmatpush.msra.mxu1 %v12830_v48 }
 0x58e   : >> { %12681 = vmatmul.msk.f32.gmra.mxu0 %vm5762_vm1, %v15835_v50  ;;  %v6504_v36 = vadd.f32 %v6479_v9, %v6342_v62 }
 0x58f   : >> { %12699 = vmatmul.msk.f32.gmra.mxu1 %vm5762_vm1, %v6985_v42  ;;  %12717 = vmatmul.msk.f32.gmra.mxu2 %vm5762_vm1, %v15651_v25  ;;  %v7295_v25 = vld [vmem:[#allocation3 + $0x71] sm:$0xff] }
 0x590   : >> { %12734 = vmatmul.msk.f32.gmra.mxu3 %vm5762_vm1, %v7294_v35 }
 0x592   : >> { %v6634_v53 = vpop.f32.mrf.mxu2 }
 0x593   : >> { %v6786_v18 = vpop.f32.mrf.mxu3  ;;  %v6659_v24 = vadd.f32 %v6634_v53, %v6504_v36  ;;  %v6344_v8 = vpop.f32.mrf.mxu0  ;;  %v15880_v36 = vld [vmem:[#allocation3 + $0x86] sm:$0xff] }
 0x594   : >> { %v15843_v22 = vadd.f32 %v6786_v18, %v6658_v49  ;;  %v6482_v19 = vpop.f32.mrf.mxu1  ;;  %v6345_v57 = vadd.f32 %v6344_v8, %v15673_v5  ;;  %v6988_v53 = vld [vmem:[#allocation3 + $0x87] sm:$0xff] }
 0x595   : >> { %v7143_v18 = vld [vmem:[#allocation3 + $0x88] sm:$0xff] }
 0x596   : >> { %12682 = vmatmul.msk.f32.gmra.mxu0 %vm5762_vm1, %v15846_v60  ;;  %v6505_v17 = vadd.f32 %v6482_v19, %v6345_v57 }
 0x597   : >> { %12700 = vmatmul.msk.f32.gmra.mxu1 %vm5762_vm1, %v6986_v29  ;;  %12718 = vmatmul.msk.f32.gmra.mxu2 %vm5762_vm1, %v15677_v26  ;;  %v7296_v26 = vld [vmem:[#allocation3 + $0x79] sm:$0xff] }
 0x598   : >> { %12735 = vmatmul.msk.f32.gmra.mxu3 %vm5762_vm1, %v7295_v25 }
 0x59a   : >> { %v6637_v7 = vpop.f32.mrf.mxu2 }
 0x59b   : >> { %v6789_v59 = vpop.f32.mrf.mxu3  ;;  %v6660_v14 = vadd.f32 %v6637_v7, %v6505_v17  ;;  %v6347_v5 = vpop.f32.mrf.mxu0 }
 0x59c   : >> { %v15854_v6 = vadd.f32 %v6789_v59, %v6659_v24  ;;  %v6485_v4 = vpop.f32.mrf.mxu1  ;;  %v6348_v61 = vadd.f32 %v6347_v5, %v15687_v3  ;;  %v12812_v3 = vld [vmem:[%s17027_s3 + $0x68] sm:$0xff] }
 0x59d   : >> { %8143 = vmatpush.msra.mxu0 %v12812_v3  ;;  %v7297_v24 = vld [vmem:[#allocation3 + $0x81] sm:$0xff]  ;;  %v15890_v59 = vld [vmem:[#allocation3 + $0x8e] sm:$0xff] }
 0x59e   : >> { %12683 = vmatmul.msk.f32.gmra.mxu0 %vm5762_vm1, %v15857_v21  ;;  %v6506_v51 = vadd.f32 %v6485_v4, %v6348_v61  ;;  %v7144_v4 = vld [vmem:[#allocation3 + $0x90] sm:$0xff] }
 0x59f   : >> { %12701 = vmatmul.msk.f32.gmra.mxu1 %vm5762_vm1, %v6987_v38  ;;  %12719 = vmatmul.msk.f32.gmra.mxu2 %vm5762_vm1, %v15691_v16  ;;  %v7298_v61 = vld [vmem:[#allocation3 + $0x89] sm:$0xff] }
 0x5a0   : >> { %12736 = vmatmul.msk.f32.gmra.mxu3 %vm5762_vm1, %v7296_v26 }
 0x5a2   : >> { %v6640_v16 = vpop.f32.mrf.mxu2 }
 0x5a3   : >> { %v6792_v49 = vpop.f32.mrf.mxu3  ;;  %v6661_v54 = vadd.f32 %v6640_v16, %v6506_v51  ;;  %v6350_v62 = vpop.f32.mrf.mxu0  ;;  %v7438_v51 = vld [vmem:[#allocation3 + $0x12] sm:$0xff]  ;;  %v7593_v16 = vld [vmem:[#allocation3 + $0x1c] sm:$0xff] }
 0x5a4   : >> { %v15877_v9 = vadd.f32 %v6792_v49, %v6660_v14  ;;  %v6488_v42 = vpop.f32.mrf.mxu1  ;;  %v6351_v35 = vadd.f32 %v6350_v62, %v15702_v47  ;;  %v6989_v14 = vld [vmem:[#allocation3 + $0x8f] sm:$0xff]  ;;  %v7748_v62 = vld [vmem:[#allocation3 + $0x1d] sm:$0xff] }
 0x5a6   : >> { %12684 = vmatmul.msk.f32.gmra.mxu0 %vm5762_vm1, %v15880_v36  ;;  %v6507_v8 = vadd.f32 %v6488_v42, %v6351_v35 }
 0x5a7   : >> { %12702 = vmatmul.msk.f32.gmra.mxu1 %vm5762_vm1, %v6988_v53  ;;  %12720 = vmatmul.msk.f32.gmra.mxu2 %vm5762_vm1, %v7143_v18 }
 0x5a8   : >> { %12737 = vmatmul.msk.f32.gmra.mxu3 %vm5762_vm1, %v7297_v24 }
 0x5aa   : >> { %v6643_v19 = vpop.f32.mrf.mxu2 }
 0x5ab   : >> { %v6795_v57 = vpop.f32.mrf.mxu3  ;;  %v6662_v29 = vadd.f32 %v6643_v19, %v6507_v8  ;;  %v6905_v47 = vpop.f32.mrf.mxu0  ;;  %v7439_v19 = vld [vmem:[#allocation3 + $0x1a] sm:$0xff] }
 0x5ac   : >> { %v15887_v25 = vadd.f32 %v6795_v57, %v6661_v54  ;;  %v7060_v17 = vpop.f32.mrf.mxu1  ;;  %v6956_v7 = vadd.f32 %v6905_v47, %v15713_v40  ;;  %v7299_v54 = vld [vmem:[#allocation3 + $0x91] sm:$0xff]  ;;  %v7594_v57 = vld [vmem:[#allocation3 + $0x24] sm:$0xff] }
 0x5ad   : >> { %v7749_v47 = vld [vmem:[#allocation3 + $0x25] sm:$0xff] }
 0x5ae   : >> { %v7111_v5 = vadd.f32 %v7060_v17, %v6956_v7  ;;  %12685 = vmatmul.msk.f32.gmra.mxu0 %vm5762_vm1, %v15890_v59 }
 0x5af   : >> { %12703 = vmatmul.msk.f32.gmra.mxu1 %vm5762_vm1, %v6989_v14  ;;  %12721 = vmatmul.msk.f32.gmra.mxu2 %vm5762_vm1, %v7144_v4 }
 0x5b0   : >> { %12738 = vmatmul.msk.f32.gmra.mxu3 %vm5762_vm1, %v7298_v61 }
 0x5b2   : >> { %v7215_v26 = vpop.f32.mrf.mxu2 }
 0x5b3   : >> { %v6798_v38 = vpop.f32.mrf.mxu3  ;;  %v7266_v40 = vadd.f32 %v7215_v26, %v7111_v5  ;;  %v6908_v3 = vpop.f32.mrf.mxu0  ;;  %v7595_v26 = vld [vmem:[#allocation3 + $0x2c] sm:$0xff] }
 0x5b4   : >> { %v15897_v41 = vadd.f32 %v6798_v38, %v6662_v29  ;;  %v7063_v0 = vpop.f32.mrf.mxu1  ;;  %v6957_v48 = vadd.f32 %v6908_v3, %v15722_v31  ;;  %v7440_v38 = vld [vmem:[#allocation3 + $0x22] sm:$0xff]  ;;  %v7750_v3 = vld [vmem:[#allocation3 + $0x2d] sm:$0xff] }
 0x5b6   : >> { %v7112_v49 = vadd.f32 %v7063_v0, %v6957_v48  ;;  %12741 = vmatmul.msk.f32.vlgmr.msrb.gmra.mxu0 %vm5762_vm1, %v7438_v51 }
 0x5b7   : >> { %12759 = vmatmul.msk.f32.vlgmr.msrb.gmra.mxu1 %vm5762_vm1, %v7593_v16  ;;  %12777 = vmatmul.msk.f32.vlgmr.msrb.gmra.mxu2 %vm5762_vm1, %v7748_v62  ;;  %v7596_v62 = vld [vmem:[#allocation3 + $0x34] sm:$0xff] }
 0x5b8   : >> { %12739 = vmatmul.msk.f32.gmra.mxu3 %vm5762_vm1, %v7299_v54  ;;  %v15923_v54 = vld [vmem:[#allocation3 + $0x2a] sm:$0xff] }
 0x5ba   : >> { %v7218_v42 = vpop.f32.mrf.mxu2 }
 0x5bb   : >> { %v7370_v35 = vpop.f32.mrf.mxu3  ;;  %v7267_v53 = vadd.f32 %v7218_v42, %v7112_v49  ;;  %v6911_v24 = vpop.f32.mrf.mxu0 }
 0x5bc   : >> { %v15904_v18 = vadd.f32 %v7370_v35, %v7266_v40  ;;  %v7066_v31 = vpop.f32.mrf.mxu1  ;;  %v6958_v8 = vadd.f32 %v6911_v24, %v15733_v10  ;;  %v7751_v35 = vld [vmem:[#allocation3 + $0x35] sm:$0xff] }
 0x5be   : >> { %v7113_v29 = vadd.f32 %v7066_v31, %v6958_v8  ;;  %12742 = vmatmul.msk.f32.gmra.mxu0 %vm5762_vm1, %v7439_v19 }
 0x5bf   : >> { %12760 = vmatmul.msk.f32.gmra.mxu1 %vm5762_vm1, %v7594_v57  ;;  %12778 = vmatmul.msk.f32.gmra.mxu2 %vm5762_vm1, %v7749_v47  ;;  %v15934_v57 = vld [vmem:[#allocation3 + $0x32] sm:$0xff] }
 0x5c0   : >> { %12795 = vmatmul.msk.f32.vlgmr.msrb.gmra.mxu3 %vm5762_vm1, %v15725_v55 }
 0x5c2   : >> { %v7221_v17 = vpop.f32.mrf.mxu2 }
 0x5c3   : >> { %v7373_v7 = vpop.f32.mrf.mxu3  ;;  %v7268_v14 = vadd.f32 %v7221_v17, %v7113_v29  ;;  %v6914_v4 = vpop.f32.mrf.mxu0  ;;  %v7597_v29 = vld [vmem:[#allocation3 + $0x3c] sm:$0xff] }
 0x5c4   : >> { %v15912_v5 = vadd.f32 %v7373_v7, %v7267_v53  ;;  %v7069_v10 = vpop.f32.mrf.mxu1  ;;  %v6959_v61 = vadd.f32 %v6914_v4, %v15744_v52  ;;  %v7752_v17 = vld [vmem:[#allocation3 + $0x3d] sm:$0xff] }
 0x5c6   : >> { %v7114_v40 = vadd.f32 %v7069_v10, %v6959_v61  ;;  %12743 = vmatmul.msk.f32.gmra.mxu0 %vm5762_vm1, %v7440_v38  ;;  %v15945_v38 = vld [vmem:[#allocation3 + $0x3a] sm:$0xff] }
 0x5c7   : >> { %12761 = vmatmul.msk.f32.gmra.mxu1 %vm5762_vm1, %v7595_v26  ;;  %12779 = vmatmul.msk.f32.gmra.mxu2 %vm5762_vm1, %v7750_v3  ;;  %v7598_v26 = vld [vmem:[#allocation3 + $0x44] sm:$0xff] }
 0x5c8   : >> { %12796 = vmatmul.msk.f32.gmra.mxu3 %vm5762_vm1, %v15736_v43  ;;  %v7753_v3 = vld [vmem:[#allocation3 + $0x45] sm:$0xff] }
 0x5ca   : >> { %v7224_v55 = vpop.f32.mrf.mxu2 }
 0x5cb   : >> { %v7376_v0 = vpop.f32.mrf.mxu3  ;;  %v7269_v48 = vadd.f32 %v7224_v55, %v7114_v40  ;;  %v6917_v16 = vpop.f32.mrf.mxu0 }
 0x5cc   : >> { %v15920_v51 = vadd.f32 %v7376_v0, %v7268_v14  ;;  %v7072_v52 = vpop.f32.mrf.mxu1  ;;  %v6960_v49 = vadd.f32 %v6917_v16, %v15755_v32 }
 0x5ce   : >> { %v7115_v42 = vadd.f32 %v7072_v52, %v6960_v49  ;;  %12744 = vmatmul.msk.f32.gmra.mxu0 %vm5762_vm1, %v15923_v54  ;;  %v15956_v49 = vld [vmem:[#allocation3 + $0x42] sm:$0xff] }
 0x5cf   : >> { %12762 = vmatmul.msk.f32.gmra.mxu1 %vm5762_vm1, %v7596_v62  ;;  %12780 = vmatmul.msk.f32.gmra.mxu2 %vm5762_vm1, %v7751_v35  ;;  %v7599_v62 = vld [vmem:[#allocation3 + $0x4c] sm:$0xff] }
 0x5d0   : >> { %12797 = vmatmul.msk.f32.gmra.mxu3 %vm5762_vm1, %v15747_v46  ;;  %v7754_v35 = vld [vmem:[#allocation3 + $0x4d] sm:$0xff] }
 0x5d2   : >> { %v7227_v43 = vpop.f32.mrf.mxu2 }
 0x5d3   : >> { %v7379_v53 = vpop.f32.mrf.mxu3  ;;  %v7270_v24 = vadd.f32 %v7227_v43, %v7115_v42  ;;  %v6920_v32 = vpop.f32.mrf.mxu0 }
 0x5d4   : >> { %v15931_v31 = vadd.f32 %v7379_v53, %v7269_v48  ;;  %v7075_v8 = vpop.f32.mrf.mxu1  ;;  %v6961_v19 = vadd.f32 %v6920_v32, %v15766_v63 }
 0x5d6   : >> { %v7116_v47 = vadd.f32 %v7075_v8, %v6961_v19  ;;  %12745 = vmatmul.msk.f32.gmra.mxu0 %vm5762_vm1, %v15934_v57  ;;  %v15967_v19 = vld [vmem:[#allocation3 + $0x4a] sm:$0xff] }
 0x5d7   : >> { %12763 = vmatmul.msk.f32.gmra.mxu1 %vm5762_vm1, %v7597_v29  ;;  %12781 = vmatmul.msk.f32.gmra.mxu2 %vm5762_vm1, %v7752_v17  ;;  %v7600_v29 = vld [vmem:[#allocation3 + $0x54] sm:$0xff] }
 0x5d8   : >> { %12798 = vmatmul.msk.f32.gmra.mxu3 %vm5762_vm1, %v15758_v23  ;;  %v7755_v17 = vld [vmem:[#allocation3 + $0x55] sm:$0xff] }
 0x5da   : >> { %v7230_v46 = vpop.f32.mrf.mxu2 }
 0x5db   : >> { %v7382_v7 = vpop.f32.mrf.mxu3  ;;  %v7271_v14 = vadd.f32 %v7230_v46, %v7116_v47  ;;  %v6923_v63 = vpop.f32.mrf.mxu0 }
 0x5dc   : >> { %v15942_v4 = vadd.f32 %v7382_v7, %v7270_v24  ;;  %v7078_v10 = vpop.f32.mrf.mxu1  ;;  %v6962_v61 = vadd.f32 %v6923_v63, %v15777_v20 }
 0x5de   : >> { %v7117_v40 = vadd.f32 %v7078_v10, %v6962_v61  ;;  %12746 = vmatmul.msk.f32.gmra.mxu0 %vm5762_vm1, %v15945_v38  ;;  %v15978_v61 = vld [vmem:[#allocation3 + $0x52] sm:$0xff] }
 0x5df   : >> { %12764 = vmatmul.msk.f32.gmra.mxu1 %vm5762_vm1, %v7598_v26  ;;  %12782 = vmatmul.msk.f32.gmra.mxu2 %vm5762_vm1, %v7753_v3 }
 0x5e0   : >> { %12799 = vmatmul.msk.f32.gmra.mxu3 %vm5762_vm1, %v15769_v28 }
 0x5e2   : >> { %v7233_v23 = vpop.f32.mrf.mxu2 }
 0x5e3   : >> { %v7385_v55 = vpop.f32.mrf.mxu3  ;;  %v7272_v0 = vadd.f32 %v7233_v23, %v7117_v40  ;;  %v6926_v20 = vpop.f32.mrf.mxu0  ;;  %v7756_v40 = vld [vmem:[#allocation3 + $0x5d] sm:$0xff] }
 0x5e4   : >> { %v15953_v48 = vadd.f32 %v7385_v55, %v7271_v14  ;;  %v7081_v16 = vpop.f32.mrf.mxu1  ;;  %v6963_v52 = vadd.f32 %v6926_v20, %v15788_v33 }
 0x5e6   : >> { %v7118_v42 = vadd.f32 %v7081_v16, %v6963_v52  ;;  %12747 = vmatmul.msk.f32.gmra.mxu0 %vm5762_vm1, %v15956_v49  ;;  %v15990_v16 = vld [vmem:[#allocation3 + $0x5a] sm:$0xff] }
 0x5e7   : >> { %12765 = vmatmul.msk.f32.gmra.mxu1 %vm5762_vm1, %v7599_v62  ;;  %12783 = vmatmul.msk.f32.gmra.mxu2 %vm5762_vm1, %v7754_v35 }
 0x5e8   : >> { %12800 = vmatmul.msk.f32.gmra.mxu3 %vm5762_vm1, %v15780_v13 }
 0x5ea   : >> { %v7236_v28 = vpop.f32.mrf.mxu2 }
 0x5eb   : >> { %v7388_v43 = vpop.f32.mrf.mxu3  ;;  %v7273_v53 = vadd.f32 %v7236_v28, %v7118_v42  ;;  %v6929_v33 = vpop.f32.mrf.mxu0 }
 0x5ec   : >> { %v15964_v24 = vadd.f32 %v7388_v43, %v7272_v0  ;;  %v7084_v32 = vpop.f32.mrf.mxu1  ;;  %v6964_v8 = vadd.f32 %v6929_v33, %v15799_v11 }
 0x5ee   : >> { %v7119_v47 = vadd.f32 %v7084_v32, %v6964_v8  ;;  %12748 = vmatmul.msk.f32.gmra.mxu0 %vm5762_vm1, %v15967_v19 }
 0x5ef   : >> { %12766 = vmatmul.msk.f32.gmra.mxu1 %vm5762_vm1, %v7600_v29  ;;  %12784 = vmatmul.msk.f32.gmra.mxu2 %vm5762_vm1, %v7755_v17 }
 0x5f0   : >> { %12801 = vmatmul.msk.f32.gmra.mxu3 %vm5762_vm1, %v15791_v58 }
 0x5f2   : >> { %v7239_v13 = vpop.f32.mrf.mxu2 }
 0x5f3   : >> { %v7391_v46 = vpop.f32.mrf.mxu3  ;;  %v7274_v7 = vadd.f32 %v7239_v13, %v7119_v47  ;;  %v6932_v11 = vpop.f32.mrf.mxu0  ;;  %v16014_v13 = vld [vmem:[#allocation3 + $0x6a] sm:$0xff] }
 0x5f4   : >> { %v15975_v14 = vadd.f32 %v7391_v46, %v7273_v53  ;;  %v7087_v63 = vpop.f32.mrf.mxu1  ;;  %v6965_v10 = vadd.f32 %v6932_v11, %v15810_v39  ;;  %v16002_v53 = vld [vmem:[#allocation3 + $0x62] sm:$0xff] }
 0x5f6   : >> { %v7120_v26 = vadd.f32 %v7087_v63, %v6965_v10  ;;  %12749 = vmatmul.msk.f32.gmra.mxu0 %vm5762_vm1, %v15978_v61 }
 0x5f7   : >> { %12767 = vmatmul.msk.f32.gmra.mxu1 %vm5762_vm1, %v15628_v56  ;;  %12785 = vmatmul.msk.f32.gmra.mxu2 %vm5762_vm1, %v7756_v40  ;;  %v7757_v56 = vld [vmem:[#allocation3 + $0x65] sm:$0xff]  ;;  %v16026_v40 = vld [vmem:[#allocation3 + $0x72] sm:$0xff] }
 0x5f8   : >> { %12802 = vmatmul.msk.f32.gmra.mxu3 %vm5762_vm1, %v15802_v27 }
 0x5fa   : >> { %v7242_v58 = vpop.f32.mrf.mxu2 }
 0x5fb   : >> { %v7394_v3 = vpop.f32.mrf.mxu3  ;;  %v7275_v23 = vadd.f32 %v7242_v58, %v7120_v26  ;;  %v6935_v39 = vpop.f32.mrf.mxu0 }
 0x5fc   : >> { %v15987_v55 = vadd.f32 %v7394_v3, %v7274_v7  ;;  %v7090_v0 = vpop.f32.mrf.mxu1  ;;  %v6966_v20 = vadd.f32 %v6935_v39, %v15821_v37 }
 0x5fe   : >> { %v7121_v52 = vadd.f32 %v7090_v0, %v6966_v20  ;;  %12750 = vmatmul.msk.f32.gmra.mxu0 %vm5762_vm1, %v15990_v16 }
 0x5ff   : >> { %12768 = vmatmul.msk.f32.gmra.mxu1 %vm5762_vm1, %v15642_v1  ;;  %12786 = vmatmul.msk.f32.gmra.mxu2 %vm5762_vm1, %v7757_v56  ;;  %v7758_v1 = vld [vmem:[#allocation3 + $0x6d] sm:$0xff] }
 0x600   : >> { %12803 = vmatmul.msk.f32.gmra.mxu3 %vm5762_vm1, %v15813_v2 }
 0x602   : >> { %v7245_v27 = vpop.f32.mrf.mxu2 }
 0x603   : >> { %v7397_v62 = vpop.f32.mrf.mxu3  ;;  %v7276_v42 = vadd.f32 %v7245_v27, %v7121_v52  ;;  %v6938_v37 = vpop.f32.mrf.mxu0  ;;  %v16038_v52 = vld [vmem:[#allocation3 + $0x7a] sm:$0xff] }
 0x604   : >> { %v15999_v35 = vadd.f32 %v7397_v62, %v7275_v23  ;;  %v7093_v28 = vpop.f32.mrf.mxu1  ;;  %v6967_v43 = vadd.f32 %v6938_v37, %v15832_v44 }
 0x606   : >> { %v7122_v33 = vadd.f32 %v7093_v28, %v6967_v43  ;;  %12751 = vmatmul.msk.f32.gmra.mxu0 %vm5762_vm1, %v16002_v53  ;;  %v16050_v43 = vld [vmem:[#allocation3 + $0x82] sm:$0xff] }
 0x607   : >> { %12769 = vmatmul.msk.f32.gmra.mxu1 %vm5762_vm1, %v15656_v30  ;;  %12787 = vmatmul.msk.f32.gmra.mxu2 %vm5762_vm1, %v7758_v1  ;;  %v7759_v30 = vld [vmem:[#allocation3 + $0x75] sm:$0xff] }
 0x608   : >> { %12804 = vmatmul.msk.f32.gmra.mxu3 %vm5762_vm1, %v15824_v12 }
 0x60a   : >> { %v7248_v2 = vpop.f32.mrf.mxu2 }
 0x60b   : >> { %v7400_v32 = vpop.f32.mrf.mxu3  ;;  %v7277_v8 = vadd.f32 %v7248_v2, %v7122_v33  ;;  %v6941_v44 = vpop.f32.mrf.mxu0  ;;  %v7607_v33 = vld [vmem:[#allocation3 + $0x8c] sm:$0xff]  ;;  %v12938_v2 = vld [vmem:[%s17027_s3 + $0xa0] sm:$0xff] }
 0x60c   : >> { %v16011_v29 = vadd.f32 %v7400_v32, %v7276_v42  ;;  %v7096_v47 = vpop.f32.mrf.mxu1  ;;  %v6968_v17 = vadd.f32 %v6941_v44, %v15843_v22  ;;  %v12902_v32 = vld [vmem:[%s17027_s3 + $0x90] sm:$0xff]  ;;  %9228 = vmatpush.msrb.mxu3 %v12938_v2 }
 0x60d   : >> { %8918 = vmatpush.msrb.mxu1 %v12902_v32 }
 0x60e   : >> { %v7123_v46 = vadd.f32 %v7096_v47, %v6968_v17  ;;  %12752 = vmatmul.msk.f32.gmra.mxu0 %vm5762_vm1, %v16014_v13 }
 0x60f   : >> { %12770 = vmatmul.msk.f32.gmra.mxu1 %vm5762_vm1, %v15679_v45  ;;  %12788 = vmatmul.msk.f32.gmra.mxu2 %vm5762_vm1, %v7759_v30  ;;  %v7760_v45 = vld [vmem:[#allocation3 + $0x7d] sm:$0xff] }
 0x610   : >> { %12805 = vmatmul.msk.f32.gmra.mxu3 %vm5762_vm1, %v15835_v50 }
 0x612   : >> { %v7251_v12 = vpop.f32.mrf.mxu2 }
 0x613   : >> { %v7403_v7 = vpop.f32.mrf.mxu3  ;;  %v7278_v11 = vadd.f32 %v7251_v12, %v7123_v46  ;;  %v6944_v22 = vpop.f32.mrf.mxu0  ;;  %v16073_v12 = vld [vmem:[#allocation3 + $0x8a] sm:$0xff] }
 0x614   : >> { %v16023_v63 = vadd.f32 %v7403_v7, %v7277_v8  ;;  %v7099_v10 = vpop.f32.mrf.mxu1  ;;  %v6969_v26 = vadd.f32 %v6944_v22, %v15854_v6  ;;  %v7608_v7 = vld [vmem:[#allocation3 + $0x94] sm:$0xff] }
 0x615   : >> { %v7763_v22 = vld [vmem:[#allocation3 + $0x95] sm:$0xff] }
 0x616   : >> { %v7124_v58 = vadd.f32 %v7099_v10, %v6969_v26  ;;  %12753 = vmatmul.msk.f32.gmra.mxu0 %vm5762_vm1, %v16026_v40 }
 0x617   : >> { %12771 = vmatmul.msk.f32.gmra.mxu1 %vm5762_vm1, %v15697_v15  ;;  %12789 = vmatmul.msk.f32.gmra.mxu2 %vm5762_vm1, %v7760_v45  ;;  %v7761_v15 = vld [vmem:[#allocation3 + $0x85] sm:$0xff] }
 0x618   : >> { %12806 = vmatmul.msk.f32.gmra.mxu3 %vm5762_vm1, %v15846_v60 }
 0x61a   : >> { %v7254_v50 = vpop.f32.mrf.mxu2 }
 0x61b   : >> { %v7406_v3 = vpop.f32.mrf.mxu3  ;;  %v7279_v23 = vadd.f32 %v7254_v50, %v7124_v58  ;;  %v6947_v6 = vpop.f32.mrf.mxu0 }
 0x61c   : >> { %v16035_v39 = vadd.f32 %v7406_v3, %v7278_v11  ;;  %v7102_v0 = vpop.f32.mrf.mxu1  ;;  %v6970_v20 = vadd.f32 %v6947_v6, %v15877_v9  ;;  %v7609_v6 = vld [vmem:[#allocation3 + $0x9c] sm:$0xff] }
 0x61e   : >> { %v7125_v56 = vadd.f32 %v7102_v0, %v6970_v20  ;;  %12754 = vmatmul.msk.f32.gmra.mxu0 %vm5762_vm1, %v16038_v52  ;;  %v7764_v20 = vld [vmem:[#allocation3 + $0x9d] sm:$0xff] }
 0x61f   : >> { %12772 = vmatmul.msk.f32.gmra.mxu1 %vm5762_vm1, %v15705_v34  ;;  %12790 = vmatmul.msk.f32.gmra.mxu2 %vm5762_vm1, %v7761_v15  ;;  %v7762_v34 = vld [vmem:[#allocation3 + $0x8d] sm:$0xff] }
 0x620   : >> { %12807 = vmatmul.msk.f32.gmra.mxu3 %vm5762_vm1, %v15857_v21  ;;  %v12920_v21 = vld [vmem:[%s17027_s3 + $0x98] sm:$0xff] }
 0x621   : >> { %9073 = vmatpush.msrb.mxu2 %v12920_v21 }
 0x622   : >> { %v7257_v60 = vpop.f32.mrf.mxu2 }
 0x623   : >> { %v7409_v27 = vpop.f32.mrf.mxu3  ;;  %v7280_v62 = vadd.f32 %v7257_v60, %v7125_v56  ;;  %v6950_v9 = vpop.f32.mrf.mxu0 }
 0x624   : >> { %v16047_v42 = vadd.f32 %v7409_v27, %v7279_v23  ;;  %v7105_v37 = vpop.f32.mrf.mxu1  ;;  %v6971_v28 = vadd.f32 %v6950_v9, %v15887_v25  ;;  %v12884_v25 = vld [vmem:[%s17027_s3 + $0x88] sm:$0xff]  ;;  %v16084_v23 = vld [vmem:[#allocation3 + $0x92] sm:$0xff] }
 0x625   : >> { %8763 = vmatpush.msrb.mxu0 %v12884_v25 }
 0x626   : >> { %v7126_v1 = vadd.f32 %v7105_v37, %v6971_v28  ;;  %12755 = vmatmul.msk.f32.gmra.mxu0 %vm5762_vm1, %v16050_v43  ;;  %v8058_v37 = vld [vmem:[#allocation3 + $0x1f] sm:$0xff] }
 0x627   : >> { %12773 = vmatmul.msk.f32.gmra.mxu1 %vm5762_vm1, %v7607_v33  ;;  %12791 = vmatmul.msk.f32.gmra.mxu2 %vm5762_vm1, %v7762_v34  ;;  %v8213_v28 = vld [vmem:[#allocation3 + $0x20] sm:$0xff] }
 0x628   : >> { %12808 = vmatmul.msk.f32.gmra.mxu3 %vm5762_vm1, %v15880_v36 }
 0x62a   : >> { %v7260_v8 = vpop.f32.mrf.mxu2 }
 0x62b   : >> { %v7412_v44 = vpop.f32.mrf.mxu3  ;;  %v7281_v47 = vadd.f32 %v7260_v8, %v7126_v1  ;;  %v6953_v17 = vpop.f32.mrf.mxu0  ;;  %v7919_v1 = vld [vmem:[#allocation3 + $0x9e] sm:$0xff] }
 0x62c   : >> { %v16070_v36 = vadd.f32 %v7412_v44, %v7280_v62  ;;  %v7108_v46 = vpop.f32.mrf.mxu1  ;;  %v6972_v30 = vadd.f32 %v6953_v17, %v15897_v41  ;;  %v8059_v44 = vld [vmem:[#allocation3 + $0x27] sm:$0xff] }
 0x62e   : >> { %v7127_v11 = vadd.f32 %v7108_v46, %v6972_v30  ;;  %12756 = vmatmul.msk.f32.gmra.mxu0 %vm5762_vm1, %v16073_v12  ;;  %v8523_v46 = vld [vmem:[#allocation3 + $0x2b] sm:$0xff] }
 0x62f   : >> { %12774 = vmatmul.msk.f32.gmra.mxu1 %vm5762_vm1, %v7608_v7  ;;  %12792 = vmatmul.msk.f32.gmra.mxu2 %vm5762_vm1, %v7763_v22 }
 0x630   : >> { %12809 = vmatmul.msk.f32.gmra.mxu3 %vm5762_vm1, %v15890_v59  ;;  %v7918_v59 = vld [vmem:[#allocation3 + $0x96] sm:$0xff] }
 0x632   : >> { %v7263_v10 = vpop.f32.mrf.mxu2 }
 0x633   : >> { %v7415_v26 = vpop.f32.mrf.mxu3  ;;  %v7282_v58 = vadd.f32 %v7263_v10, %v7127_v11  ;;  %v7525_v41 = vpop.f32.mrf.mxu0 }
 0x634   : >> { %v16081_v45 = vadd.f32 %v7415_v26, %v7281_v47  ;;  %v7680_v50 = vpop.f32.mrf.mxu1  ;;  %v7576_v3 = vadd.f32 %v7525_v41, %v15904_v18  ;;  %v8214_v47 = vld [vmem:[#allocation3 + $0x28] sm:$0xff] }
 0x635   : >> { %v8060_v26 = vld [vmem:[#allocation3 + $0x2f] sm:$0xff] }
 0x636   : >> { %v7731_v0 = vadd.f32 %v7680_v50, %v7576_v3  ;;  %12757 = vmatmul.msk.f32.gmra.mxu0 %vm5762_vm1, %v16084_v23  ;;  %v8524_v50 = vld [vmem:[#allocation3 + $0x33] sm:$0xff] }
 0x637   : >> { %12775 = vmatmul.msk.f32.gmra.mxu1 %vm5762_vm1, %v7609_v6  ;;  %12793 = vmatmul.msk.f32.gmra.mxu2 %vm5762_vm1, %v7764_v20 }
 0x638   : >> { %12810 = vmatmul.msk.f32.gmra.mxu3 %vm5762_vm1, %v7918_v59 }
 0x63a   : >> { %v7835_v15 = vpop.f32.mrf.mxu2 }
 0x63b   : >> { %v7418_v56 = vpop.f32.mrf.mxu3  ;;  %v7886_v18 = vadd.f32 %v7835_v15, %v7731_v0  ;;  %v7528_v27 = vpop.f32.mrf.mxu0  ;;  %v16118_v15 = vld [vmem:[#allocation3 + $0x38] sm:$0xff] }
 0x63c   : >> { %v16091_v60 = vadd.f32 %v7418_v56, %v7282_v58  ;;  %v7683_v62 = vpop.f32.mrf.mxu1  ;;  %v7577_v9 = vadd.f32 %v7528_v27, %v15912_v5  ;;  %v8215_v58 = vld [vmem:[#allocation3 + $0x30] sm:$0xff] }
 0x63d   : >> { %v8061_v56 = vld [vmem:[#allocation3 + $0x37] sm:$0xff] }
 0x63e   : >> { %v7732_v33 = vadd.f32 %v7683_v62, %v7577_v9  ;;  %12813 = vmatmul.msk.f32.vlgmr.msra.gmra.mxu0 %vm5762_vm1, %v8058_v37 }
 0x63f   : >> { %12831 = vmatmul.msk.f32.vlgmr.msra.gmra.mxu1 %vm5762_vm1, %v8213_v28  ;;  %12849 = vmatmul.msk.f32.vlgmr.msra.gmra.mxu2 %vm5762_vm1, %v15923_v54 }
 0x640   : >> { %12811 = vmatmul.msk.f32.gmra.mxu3 %vm5762_vm1, %v7919_v1  ;;  %v8062_v1 = vld [vmem:[#allocation3 + $0x3f] sm:$0xff] }
 0x642   : >> { %v7838_v34 = vpop.f32.mrf.mxu2 }
 0x643   : >> { %v7990_v21 = vpop.f32.mrf.mxu3  ;;  %v7887_v25 = vadd.f32 %v7838_v34, %v7732_v33  ;;  %v7531_v32 = vpop.f32.mrf.mxu0  ;;  %v16132_v34 = vld [vmem:[#allocation3 + $0x40] sm:$0xff] }
 0x644   : >> { %v16099_v2 = vadd.f32 %v7990_v21, %v7886_v18  ;;  %v7686_v5 = vpop.f32.mrf.mxu1  ;;  %v7578_v8 = vadd.f32 %v7531_v32, %v15920_v51 }
 0x646   : >> { %v7733_v17 = vadd.f32 %v7686_v5, %v7578_v8  ;;  %12814 = vmatmul.msk.f32.gmra.mxu0 %vm5762_vm1, %v8059_v44 }
 0x647   : >> { %12832 = vmatmul.msk.f32.gmra.mxu1 %vm5762_vm1, %v8214_v47  ;;  %12850 = vmatmul.msk.f32.gmra.mxu2 %vm5762_vm1, %v15934_v57 }
 0x648   : >> { %12867 = vmatmul.msk.f32.vlgmr.msra.gmra.mxu3 %vm5762_vm1, %v8523_v46  ;;  %v16146_v46 = vld [vmem:[#allocation3 + $0x48] sm:$0xff] }
 0x64a   : >> { %v7841_v54 = vpop.f32.mrf.mxu2 }
 0x64b   : >> { %v7993_v30 = vpop.f32.mrf.mxu3  ;;  %v7888_v7 = vadd.f32 %v7841_v54, %v7733_v17  ;;  %v7534_v22 = vpop.f32.mrf.mxu0  ;;  %v8063_v17 = vld [vmem:[#allocation3 + $0x47] sm:$0xff] }
 0x64c   : >> { %v16107_v11 = vadd.f32 %v7993_v30, %v7887_v25  ;;  %v7689_v51 = vpop.f32.mrf.mxu1  ;;  %v7579_v10 = vadd.f32 %v7534_v22, %v15931_v31 }
 0x64e   : >> { %v7734_v41 = vadd.f32 %v7689_v51, %v7579_v10  ;;  %12815 = vmatmul.msk.f32.gmra.mxu0 %vm5762_vm1, %v8060_v26 }
 0x64f   : >> { %12833 = vmatmul.msk.f32.gmra.mxu1 %vm5762_vm1, %v8215_v58  ;;  %12851 = vmatmul.msk.f32.gmra.mxu2 %vm5762_vm1, %v15945_v38  ;;  %v16123_v38 = vld [vmem:[#allocation3 + $0x3b] sm:$0xff]  ;;  %v8064_v58 = vld [vmem:[#allocation3 + $0x4f] sm:$0xff] }
 0x650   : >> { %12868 = vmatmul.msk.f32.gmra.mxu3 %vm5762_vm1, %v8524_v50 }
 0x652   : >> { %v7844_v57 = vpop.f32.mrf.mxu2 }
 0x653   : >> { %v7996_v3 = vpop.f32.mrf.mxu3  ;;  %v7889_v6 = vadd.f32 %v7844_v57, %v7734_v41  ;;  %v7537_v20 = vpop.f32.mrf.mxu0  ;;  %v16160_v41 = vld [vmem:[#allocation3 + $0x50] sm:$0xff] }
 0x654   : >> { %v16115_v0 = vadd.f32 %v7996_v3, %v7888_v7  ;;  %v7692_v31 = vpop.f32.mrf.mxu1  ;;  %v7580_v59 = vadd.f32 %v7537_v20, %v15942_v4 }
 0x656   : >> { %v7735_v18 = vadd.f32 %v7692_v31, %v7580_v59  ;;  %12816 = vmatmul.msk.f32.gmra.mxu0 %vm5762_vm1, %v8061_v56  ;;  %v8065_v56 = vld [vmem:[#allocation3 + $0x57] sm:$0xff] }
 0x657   : >> { %12834 = vmatmul.msk.f32.gmra.mxu1 %vm5762_vm1, %v16118_v15  ;;  %12852 = vmatmul.msk.f32.gmra.mxu2 %vm5762_vm1, %v15956_v49  ;;  %v16137_v49 = vld [vmem:[#allocation3 + $0x43] sm:$0xff] }
 0x658   : >> { %12869 = vmatmul.msk.f32.gmra.mxu3 %vm5762_vm1, %v16123_v38 }
 0x65a   : >> { %v7847_v27 = vpop.f32.mrf.mxu2 }
 0x65b   : >> { %v7999_v62 = vpop.f32.mrf.mxu3  ;;  %v7890_v4 = vadd.f32 %v7847_v27, %v7735_v18  ;;  %v7540_v37 = vpop.f32.mrf.mxu0  ;;  %v16174_v18 = vld [vmem:[#allocation3 + $0x58] sm:$0xff] }
 0x65c   : >> { %v16129_v9 = vadd.f32 %v7999_v62, %v7889_v6  ;;  %v7695_v28 = vpop.f32.mrf.mxu1  ;;  %v7581_v33 = vadd.f32 %v7540_v37, %v15953_v48 }
 0x65e   : >> { %v7736_v21 = vadd.f32 %v7695_v28, %v7581_v33  ;;  %12817 = vmatmul.msk.f32.gmra.mxu0 %vm5762_vm1, %v8062_v1 }
 0x65f   : >> { %12835 = vmatmul.msk.f32.gmra.mxu1 %vm5762_vm1, %v16132_v34  ;;  %12853 = vmatmul.msk.f32.gmra.mxu2 %vm5762_vm1, %v15967_v19  ;;  %v16151_v19 = vld [vmem:[#allocation3 + $0x4b] sm:$0xff] }
 0x660   : >> { %12870 = vmatmul.msk.f32.gmra.mxu3 %vm5762_vm1, %v16137_v49 }
 0x662   : >> { %v7850_v25 = vpop.f32.mrf.mxu2 }
 0x663   : >> { %v8002_v32 = vpop.f32.mrf.mxu3  ;;  %v7891_v48 = vadd.f32 %v7850_v25, %v7736_v21  ;;  %v7543_v8 = vpop.f32.mrf.mxu0  ;;  %v8066_v21 = vld [vmem:[#allocation3 + $0x5f] sm:$0xff] }
 0x664   : >> { %v16143_v5 = vadd.f32 %v8002_v32, %v7890_v4  ;;  %v7698_v44 = vpop.f32.mrf.mxu1  ;;  %v7582_v47 = vadd.f32 %v7543_v8, %v15964_v24  ;;  %v16188_v25 = vld [vmem:[#allocation3 + $0x60] sm:$0xff] }
 0x666   : >> { %v7737_v54 = vadd.f32 %v7698_v44, %v7582_v47  ;;  %12818 = vmatmul.msk.f32.gmra.mxu0 %vm5762_vm1, %v8063_v17 }
 0x667   : >> { %12836 = vmatmul.msk.f32.gmra.mxu1 %vm5762_vm1, %v16146_v46  ;;  %12854 = vmatmul.msk.f32.gmra.mxu2 %vm5762_vm1, %v15978_v61  ;;  %v16165_v61 = vld [vmem:[#allocation3 + $0x53] sm:$0xff] }
 0x668   : >> { %12871 = vmatmul.msk.f32.gmra.mxu3 %vm5762_vm1, %v16151_v19 }
 0x66a   : >> { %v7853_v30 = vpop.f32.mrf.mxu2 }
 0x66b   : >> { %v8005_v7 = vpop.f32.mrf.mxu3  ;;  %v7892_v24 = vadd.f32 %v7853_v30, %v7737_v54  ;;  %v7546_v51 = vpop.f32.mrf.mxu0  ;;  %v8067_v30 = vld [vmem:[#allocation3 + $0x67] sm:$0xff] }
 0x66c   : >> { %v16157_v22 = vadd.f32 %v8005_v7, %v7891_v48  ;;  %v7701_v10 = vpop.f32.mrf.mxu1  ;;  %v7583_v26 = vadd.f32 %v7546_v51, %v15975_v14  ;;  %v16202_v7 = vld [vmem:[#allocation3 + $0x68] sm:$0xff] }
 0x66e   : >> { %v7738_v50 = vadd.f32 %v7701_v10, %v7583_v26  ;;  %12819 = vmatmul.msk.f32.gmra.mxu0 %vm5762_vm1, %v8064_v58 }
 0x66f   : >> { %12837 = vmatmul.msk.f32.gmra.mxu1 %vm5762_vm1, %v16160_v41  ;;  %12855 = vmatmul.msk.f32.gmra.mxu2 %vm5762_vm1, %v15990_v16  ;;  %v16179_v16 = vld [vmem:[#allocation3 + $0x5b] sm:$0xff] }
 0x670   : >> { %12872 = vmatmul.msk.f32.gmra.mxu3 %vm5762_vm1, %v16165_v61 }
 0x672   : >> { %v7856_v57 = vpop.f32.mrf.mxu2 }
 0x673   : >> { %v8008_v3 = vpop.f32.mrf.mxu3  ;;  %v7893_v14 = vadd.f32 %v7856_v57, %v7738_v50  ;;  %v7549_v20 = vpop.f32.mrf.mxu0 }
 0x674   : >> { %v16171_v6 = vadd.f32 %v8008_v3, %v7892_v24  ;;  %v7704_v31 = vpop.f32.mrf.mxu1  ;;  %v7584_v59 = vadd.f32 %v7549_v20, %v15987_v55  ;;  %v8068_v3 = vld [vmem:[#allocation3 + $0x6f] sm:$0xff] }
 0x676   : >> { %v7739_v27 = vadd.f32 %v7704_v31, %v7584_v59  ;;  %12820 = vmatmul.msk.f32.gmra.mxu0 %vm5762_vm1, %v8065_v56 }
 0x677   : >> { %12838 = vmatmul.msk.f32.gmra.mxu1 %vm5762_vm1, %v16174_v18  ;;  %12856 = vmatmul.msk.f32.gmra.mxu2 %vm5762_vm1, %v16002_v53  ;;  %v16193_v53 = vld [vmem:[#allocation3 + $0x63] sm:$0xff] }
 0x678   : >> { %12873 = vmatmul.msk.f32.gmra.mxu3 %vm5762_vm1, %v16179_v16 }
 0x67a   : >> { %v7859_v62 = vpop.f32.mrf.mxu2 }
 0x67b   : >> { %v8011_v4 = vpop.f32.mrf.mxu3  ;;  %v7894_v55 = vadd.f32 %v7859_v62, %v7739_v27  ;;  %v7552_v28 = vpop.f32.mrf.mxu0 }
 0x67c   : >> { %v16185_v37 = vadd.f32 %v8011_v4, %v7893_v14  ;;  %v7707_v33 = vpop.f32.mrf.mxu1  ;;  %v7585_v1 = vadd.f32 %v7552_v28, %v15999_v35  ;;  %v16216_v14 = vld [vmem:[#allocation3 + $0x70] sm:$0xff]  ;;  %v16230_v28 = vld [vmem:[#allocation3 + $0x78] sm:$0xff] }
 0x67e   : >> { %v7740_v32 = vadd.f32 %v7707_v33, %v7585_v1  ;;  %12821 = vmatmul.msk.f32.gmra.mxu0 %vm5762_vm1, %v8066_v21 }
 0x67f   : >> { %12839 = vmatmul.msk.f32.gmra.mxu1 %vm5762_vm1, %v16188_v25  ;;  %12857 = vmatmul.msk.f32.gmra.mxu2 %vm5762_vm1, %v16014_v13  ;;  %v16207_v13 = vld [vmem:[#allocation3 + $0x6b] sm:$0xff] }
 0x680   : >> { %12874 = vmatmul.msk.f32.gmra.mxu3 %vm5762_vm1, %v16193_v53 }
 0x682   : >> { %v7862_v48 = vpop.f32.mrf.mxu2 }
 0x683   : >> { %v8014_v8 = vpop.f32.mrf.mxu3  ;;  %v7895_v35 = vadd.f32 %v7862_v48, %v7740_v32  ;;  %v7555_v47 = vpop.f32.mrf.mxu0 }
 0x684   : >> { %v16199_v44 = vadd.f32 %v8014_v8, %v7894_v55  ;;  %v7710_v17 = vpop.f32.mrf.mxu1  ;;  %v7586_v54 = vadd.f32 %v7555_v47, %v16011_v29  ;;  %v8069_v55 = vld [vmem:[#allocation3 + $0x77] sm:$0xff]  ;;  %v8070_v47 = vld [vmem:[#allocation3 + $0x7f] sm:$0xff] }
 0x686   : >> { %v7741_v24 = vadd.f32 %v7710_v17, %v7586_v54  ;;  %12822 = vmatmul.msk.f32.gmra.mxu0 %vm5762_vm1, %v8067_v30  ;;  %v16244_v17 = vld [vmem:[#allocation3 + $0x80] sm:$0xff] }
 0x687   : >> { %12840 = vmatmul.msk.f32.gmra.mxu1 %vm5762_vm1, %v16202_v7  ;;  %12858 = vmatmul.msk.f32.gmra.mxu2 %vm5762_vm1, %v16026_v40  ;;  %v16221_v40 = vld [vmem:[#allocation3 + $0x73] sm:$0xff] }
 0x688   : >> { %12875 = vmatmul.msk.f32.gmra.mxu3 %vm5762_vm1, %v16207_v13 }
 0x68a   : >> { %v7865_v51 = vpop.f32.mrf.mxu2 }
 0x68b   : >> { %v8017_v10 = vpop.f32.mrf.mxu3  ;;  %v7896_v29 = vadd.f32 %v7865_v51, %v7741_v24  ;;  %v7558_v58 = vpop.f32.mrf.mxu0 }
 0x68c   : >> { %v16213_v26 = vadd.f32 %v8017_v10, %v7895_v35  ;;  %v7713_v50 = vpop.f32.mrf.mxu1  ;;  %v7587_v57 = vadd.f32 %v7558_v58, %v16023_v63 }
 0x68e   : >> { %v7742_v20 = vadd.f32 %v7713_v50, %v7587_v57  ;;  %12823 = vmatmul.msk.f32.gmra.mxu0 %vm5762_vm1, %v8068_v3  ;;  %v8071_v50 = vld [vmem:[#allocation3 + $0x87] sm:$0xff] }
 0x68f   : >> { %12841 = vmatmul.msk.f32.gmra.mxu1 %vm5762_vm1, %v16216_v14  ;;  %12859 = vmatmul.msk.f32.gmra.mxu2 %vm5762_vm1, %v16038_v52  ;;  %v16235_v52 = vld [vmem:[#allocation3 + $0x7b] sm:$0xff]  ;;  %v16258_v57 = vld [vmem:[#allocation3 + $0x88] sm:$0xff] }
 0x690   : >> { %12876 = vmatmul.msk.f32.gmra.mxu3 %vm5762_vm1, %v16221_v40 }
 0x692   : >> { %v7868_v31 = vpop.f32.mrf.mxu2 }
 0x693   : >> { %v8020_v59 = vpop.f32.mrf.mxu3  ;;  %v7897_v63 = vadd.f32 %v7868_v31, %v7742_v20  ;;  %v7561_v27 = vpop.f32.mrf.mxu0 }
 0x694   : >> { %v16227_v56 = vadd.f32 %v8020_v59, %v7896_v29  ;;  %v7716_v62 = vpop.f32.mrf.mxu1  ;;  %v7588_v4 = vadd.f32 %v7561_v27, %v16035_v39 }
 0x696   : >> { %v7743_v33 = vadd.f32 %v7716_v62, %v7588_v4  ;;  %12824 = vmatmul.msk.f32.gmra.mxu0 %vm5762_vm1, %v8069_v55  ;;  %v8072_v4 = vld [vmem:[#allocation3 + $0x8f] sm:$0xff] }
 0x697   : >> { %12842 = vmatmul.msk.f32.gmra.mxu1 %vm5762_vm1, %v16230_v28  ;;  %12860 = vmatmul.msk.f32.gmra.mxu2 %vm5762_vm1, %v16050_v43  ;;  %v16249_v43 = vld [vmem:[#allocation3 + $0x83] sm:$0xff]  ;;  %v16272_v55 = vld [vmem:[#allocation3 + $0x90] sm:$0xff] }
 0x698   : >> { %12877 = vmatmul.msk.f32.gmra.mxu3 %vm5762_vm1, %v16235_v52 }
 0x69a   : >> { %v7871_v1 = vpop.f32.mrf.mxu2 }
 0x69b   : >> { %v8023_v21 = vpop.f32.mrf.mxu3  ;;  %v7898_v39 = vadd.f32 %v7871_v1, %v7743_v33  ;;  %v7564_v48 = vpop.f32.mrf.mxu0  ;;  %v16277_v1 = vld [vmem:[#allocation3 + $0x93] sm:$0xff] }
 0x69c   : >> { %v16241_v32 = vadd.f32 %v8023_v21, %v7897_v63  ;;  %v7719_v8 = vpop.f32.mrf.mxu1  ;;  %v7589_v35 = vadd.f32 %v7564_v48, %v16047_v42  ;;  %v12992_v21 = vld [vmem:[%s17027_s3 + $0xb8] sm:$0xff]  ;;  %v12974_v48 = vld [vmem:[%s17027_s3 + $0xb0] sm:$0xff] }
 0x69d   : >> { %9693 = vmatpush.msra.mxu2 %v12992_v21  ;;  %9538 = vmatpush.msra.mxu1 %v12974_v48  ;;  %v8384_v21 = vld [vmem:[#allocation3 + $0xaa] sm:$0xff] }
 0x69e   : >> { %v7744_v54 = vadd.f32 %v7719_v8, %v7589_v35  ;;  %12825 = vmatmul.msk.f32.gmra.mxu0 %vm5762_vm1, %v8070_v47 }
 0x69f   : >> { %12843 = vmatmul.msk.f32.gmra.mxu1 %vm5762_vm1, %v16244_v17  ;;  %12861 = vmatmul.msk.f32.gmra.mxu2 %vm5762_vm1, %v16073_v12  ;;  %v16263_v12 = vld [vmem:[#allocation3 + $0x8b] sm:$0xff] }
 0x6a0   : >> { %12878 = vmatmul.msk.f32.gmra.mxu3 %vm5762_vm1, %v16249_v43 }
 0x6a2   : >> { %v7874_v30 = vpop.f32.mrf.mxu2 }
 0x6a3   : >> { %v8026_v24 = vpop.f32.mrf.mxu3  ;;  %v7899_v42 = vadd.f32 %v7874_v30, %v7744_v54  ;;  %v7567_v10 = vpop.f32.mrf.mxu0 }
 0x6a4   : >> { %v16255_v51 = vadd.f32 %v8026_v24, %v7898_v39  ;;  %v7722_v29 = vpop.f32.mrf.mxu1  ;;  %v7590_v58 = vadd.f32 %v7567_v10, %v16070_v36  ;;  %v13010_v39 = vld [vmem:[%s17027_s3 + $0xc0] sm:$0xff]  ;;  %v8073_v10 = vld [vmem:[#allocation3 + $0x97] sm:$0xff] }
 0x6a5   : >> { %9848 = vmatpush.msra.mxu3 %v13010_v39 }
 0x6a6   : >> { %v7745_v3 = vadd.f32 %v7722_v29, %v7590_v58  ;;  %12826 = vmatmul.msk.f32.gmra.mxu0 %vm5762_vm1, %v8071_v50  ;;  %v16297_v29 = vld [vmem:[#allocation3 + $0x98] sm:$0xff]  ;;  %v8383_v50 = vld [vmem:[#allocation3 + $0xa2] sm:$0xff] }
 0x6a7   : >> { %12844 = vmatmul.msk.f32.gmra.mxu1 %vm5762_vm1, %v16258_v57  ;;  %12862 = vmatmul.msk.f32.gmra.mxu2 %vm5762_vm1, %v16084_v23  ;;  %v8382_v23 = vld [vmem:[#allocation3 + $0x9a] sm:$0xff] }
 0x6a8   : >> { %12879 = vmatmul.msk.f32.gmra.mxu3 %vm5762_vm1, %v16263_v12 }
 0x6aa   : >> { %v7877_v20 = vpop.f32.mrf.mxu2 }
 0x6ab   : >> { %v8029_v31 = vpop.f32.mrf.mxu3  ;;  %v7900_v36 = vadd.f32 %v7877_v20, %v7745_v3  ;;  %v7570_v63 = vpop.f32.mrf.mxu0  ;;  %v16302_v3 = vld [vmem:[#allocation3 + $0x9b] sm:$0xff] }
 0x6ac   : >> { %v16269_v59 = vadd.f32 %v8029_v31, %v7899_v42  ;;  %v7725_v27 = vpop.f32.mrf.mxu1  ;;  %v7591_v62 = vadd.f32 %v7570_v63, %v16081_v45  ;;  %v12956_v45 = vld [vmem:[%s17027_s3 + $0xa8] sm:$0xff] }
 0x6ad   : >> { %9383 = vmatpush.msra.mxu0 %v12956_v45  ;;  %v16315_v45 = vld [vmem:[#allocation3 + $0xa3] sm:$0xff] }
 0x6ae   : >> { %v7746_v33 = vadd.f32 %v7725_v27, %v7591_v62  ;;  %12827 = vmatmul.msk.f32.gmra.mxu0 %vm5762_vm1, %v8072_v4  ;;  %v8074_v4 = vld [vmem:[#allocation3 + $0x9f] sm:$0xff] }
 0x6af   : >> { %12845 = vmatmul.msk.f32.gmra.mxu1 %vm5762_vm1, %v16272_v55  ;;  %12863 = vmatmul.msk.f32.gmra.mxu2 %vm5762_vm1, %v8382_v23 }
 0x6b0   : >> { %12880 = vmatmul.msk.f32.gmra.mxu3 %vm5762_vm1, %v16277_v1 }
 0x6b2   : >> { %v7880_v8 = vpop.f32.mrf.mxu2 }
 0x6b3   : >> { %v8032_v35 = vpop.f32.mrf.mxu3  ;;  %v7901_v47 = vadd.f32 %v7880_v8, %v7746_v33  ;;  %v7573_v30 = vpop.f32.mrf.mxu0  ;;  %v16310_v33 = vld [vmem:[#allocation3 + $0xa0] sm:$0xff] }
 0x6b4   : >> { %v16294_v54 = vadd.f32 %v8032_v35, %v7900_v36  ;;  %v7728_v24 = vpop.f32.mrf.mxu1  ;;  %v7592_v42 = vadd.f32 %v7573_v30, %v16091_v60 }
 0x6b6   : >> { %v7747_v58 = vadd.f32 %v7728_v24, %v7592_v42  ;;  %12828 = vmatmul.msk.f32.gmra.mxu0 %vm5762_vm1, %v8073_v10  ;;  %v8678_v24 = vld [vmem:[#allocation3 + $0x2c] sm:$0xff] }
 0x6b7   : >> { %12846 = vmatmul.msk.f32.gmra.mxu1 %vm5762_vm1, %v16297_v29  ;;  %12864 = vmatmul.msk.f32.gmra.mxu2 %vm5762_vm1, %v8383_v50  ;;  %v8833_v42 = vld [vmem:[#allocation3 + $0x2d] sm:$0xff] }
 0x6b8   : >> { %12881 = vmatmul.msk.f32.gmra.mxu3 %vm5762_vm1, %v16302_v3  ;;  %v8988_v50 = vld [vmem:[#allocation3 + $0x2e] sm:$0xff] }
 0x6ba   : >> { %v7883_v20 = vpop.f32.mrf.mxu2 }
 0x6bb   : >> { %v8035_v31 = vpop.f32.mrf.mxu3  ;;  %v7902_v60 = vadd.f32 %v7883_v20, %v7747_v58  ;;  %v8145_v63 = vpop.f32.mrf.mxu0  ;;  %v16323_v58 = vld [vmem:[#allocation3 + $0xab] sm:$0xff] }
 0x6bc   : >> { %v16307_v36 = vadd.f32 %v8035_v31, %v7901_v47  ;;  %v8300_v27 = vpop.f32.mrf.mxu1  ;;  %v8196_v62 = vadd.f32 %v8145_v63, %v16099_v2 }
 0x6be   : >> { %v8351_v23 = vadd.f32 %v8300_v27, %v8196_v62  ;;  %12829 = vmatmul.msk.f32.gmra.mxu0 %vm5762_vm1, %v8074_v4  ;;  %v8679_v4 = vld [vmem:[#allocation3 + $0x34] sm:$0xff] }
 0x6bf   : >> { %12847 = vmatmul.msk.f32.gmra.mxu1 %vm5762_vm1, %v16310_v33  ;;  %12865 = vmatmul.msk.f32.gmra.mxu2 %vm5762_vm1, %v8384_v21 }
 0x6c0   : >> { %12882 = vmatmul.msk.f32.gmra.mxu3 %vm5762_vm1, %v16315_v45 }
 0x6c2   : >> { %v8455_v48 = vpop.f32.mrf.mxu2 }
 0x6c3   : >> { %v8038_v39 = vpop.f32.mrf.mxu3  ;;  %v8506_v8 = vadd.f32 %v8455_v48, %v8351_v23  ;;  %v8148_v35 = vpop.f32.mrf.mxu0  ;;  %v8834_v23 = vld [vmem:[#allocation3 + $0x35] sm:$0xff] }
 0x6c4   : >> { %v16320_v2 = vadd.f32 %v8038_v39, %v7902_v60  ;;  %v8303_v47 = vpop.f32.mrf.mxu1  ;;  %v8197_v30 = vadd.f32 %v8148_v35, %v16107_v11  ;;  %v8989_v39 = vld [vmem:[#allocation3 + $0x36] sm:$0xff] }
 0x6c6   : >> { %v8352_v10 = vadd.f32 %v8303_v47, %v8197_v30  ;;  %12885 = vmatmul.msk.f32.vlgmr.msrb.gmra.mxu0 %vm5762_vm1, %v8678_v24 }
 0x6c7   : >> { %12903 = vmatmul.msk.f32.vlgmr.msrb.gmra.mxu1 %vm5762_vm1, %v8833_v42  ;;  %12921 = vmatmul.msk.f32.vlgmr.msrb.gmra.mxu2 %vm5762_vm1, %v8988_v50  ;;  %v16341_v42 = vld [vmem:[#allocation3 + $0x3c] sm:$0xff] }
 0x6c8   : >> { %12883 = vmatmul.msk.f32.gmra.mxu3 %vm5762_vm1, %v16323_v58 }
 0x6ca   : >> { %v8458_v20 = vpop.f32.mrf.mxu2 }
 0x6cb   : >> { %v8610_v31 = vpop.f32.mrf.mxu3  ;;  %v8507_v60 = vadd.f32 %v8458_v20, %v8352_v10  ;;  %v8151_v11 = vpop.f32.mrf.mxu0  ;;  %v8835_v10 = vld [vmem:[#allocation3 + $0x3d] sm:$0xff] }
 0x6cc   : >> { %v16330_v63 = vadd.f32 %v8610_v31, %v8506_v8  ;;  %v8306_v27 = vpop.f32.mrf.mxu1  ;;  %v8198_v62 = vadd.f32 %v8151_v11, %v16115_v0  ;;  %v8990_v20 = vld [vmem:[#allocation3 + $0x3e] sm:$0xff] }
 0x6ce   : >> { %v8353_v21 = vadd.f32 %v8306_v27, %v8198_v62  ;;  %12886 = vmatmul.msk.f32.gmra.mxu0 %vm5762_vm1, %v8679_v4  ;;  %v16352_v4 = vld [vmem:[#allocation3 + $0x44] sm:$0xff] }
 0x6cf   : >> { %12904 = vmatmul.msk.f32.gmra.mxu1 %vm5762_vm1, %v8834_v23  ;;  %12922 = vmatmul.msk.f32.gmra.mxu2 %vm5762_vm1, %v8989_v39  ;;  %v8836_v23 = vld [vmem:[#allocation3 + $0x45] sm:$0xff] }
 0x6d0   : >> { %12939 = vmatmul.msk.f32.vlgmr.msrb.gmra.mxu3 %vm5762_vm1, %v16118_v15  ;;  %v8991_v39 = vld [vmem:[#allocation3 + $0x46] sm:$0xff] }
 0x6d2   : >> { %v8461_v48 = vpop.f32.mrf.mxu2 }
 0x6d3   : >> { %v8613_v8 = vpop.f32.mrf.mxu3  ;;  %v8508_v35 = vadd.f32 %v8461_v48, %v8353_v21  ;;  %v8154_v30 = vpop.f32.mrf.mxu0 }
 0x6d4   : >> { %v16338_v47 = vadd.f32 %v8613_v8, %v8507_v60  ;;  %v8309_v0 = vpop.f32.mrf.mxu1  ;;  %v8199_v24 = vadd.f32 %v8154_v30, %v16129_v9 }
 0x6d6   : >> { %v8354_v50 = vadd.f32 %v8309_v0, %v8199_v24  ;;  %12887 = vmatmul.msk.f32.gmra.mxu0 %vm5762_vm1, %v16341_v42  ;;  %v16363_v24 = vld [vmem:[#allocation3 + $0x4c] sm:$0xff] }
 0x6d7   : >> { %12905 = vmatmul.msk.f32.gmra.mxu1 %vm5762_vm1, %v8835_v10  ;;  %12923 = vmatmul.msk.f32.gmra.mxu2 %vm5762_vm1, %v8990_v20  ;;  %v8837_v10 = vld [vmem:[#allocation3 + $0x4d] sm:$0xff] }
 0x6d8   : >> { %12940 = vmatmul.msk.f32.gmra.mxu3 %vm5762_vm1, %v16132_v34  ;;  %v8992_v20 = vld [vmem:[#allocation3 + $0x4e] sm:$0xff] }
 0x6da   : >> { %v8464_v15 = vpop.f32.mrf.mxu2 }
 0x6db   : >> { %v8616_v31 = vpop.f32.mrf.mxu3  ;;  %v8509_v60 = vadd.f32 %v8464_v15, %v8354_v50  ;;  %v8157_v9 = vpop.f32.mrf.mxu0 }
 0x6dc   : >> { %v16349_v11 = vadd.f32 %v8616_v31, %v8508_v35  ;;  %v8312_v27 = vpop.f32.mrf.mxu1  ;;  %v8200_v62 = vadd.f32 %v8157_v9, %v16143_v5 }
 0x6de   : >> { %v8355_v21 = vadd.f32 %v8312_v27, %v8200_v62  ;;  %12888 = vmatmul.msk.f32.gmra.mxu0 %vm5762_vm1, %v16352_v4  ;;  %v16374_v62 = vld [vmem:[#allocation3 + $0x54] sm:$0xff] }
 0x6df   : >> { %12906 = vmatmul.msk.f32.gmra.mxu1 %vm5762_vm1, %v8836_v23  ;;  %12924 = vmatmul.msk.f32.gmra.mxu2 %vm5762_vm1, %v8991_v39  ;;  %v8838_v23 = vld [vmem:[#allocation3 + $0x55] sm:$0xff] }
 0x6e0   : >> { %12941 = vmatmul.msk.f32.gmra.mxu3 %vm5762_vm1, %v16146_v46  ;;  %v8993_v39 = vld [vmem:[#allocation3 + $0x56] sm:$0xff] }
 0x6e2   : >> { %v8467_v34 = vpop.f32.mrf.mxu2 }
 0x6e3   : >> { %v8619_v48 = vpop.f32.mrf.mxu3  ;;  %v8510_v8 = vadd.f32 %v8467_v34, %v8355_v21  ;;  %v8160_v5 = vpop.f32.mrf.mxu0 }
 0x6e4   : >> { %v16360_v35 = vadd.f32 %v8619_v48, %v8509_v60  ;;  %v8315_v30 = vpop.f32.mrf.mxu1  ;;  %v8201_v0 = vadd.f32 %v8160_v5, %v16157_v22 }
 0x6e6   : >> { %v8356_v50 = vadd.f32 %v8315_v30, %v8201_v0  ;;  %12889 = vmatmul.msk.f32.gmra.mxu0 %vm5762_vm1, %v16363_v24  ;;  %v16385_v0 = vld [vmem:[#allocation3 + $0x5c] sm:$0xff] }
 0x6e7   : >> { %12907 = vmatmul.msk.f32.gmra.mxu1 %vm5762_vm1, %v8837_v10  ;;  %12925 = vmatmul.msk.f32.gmra.mxu2 %vm5762_vm1, %v8992_v20  ;;  %v8839_v10 = vld [vmem:[#allocation3 + $0x5d] sm:$0xff] }
 0x6e8   : >> { %12942 = vmatmul.msk.f32.gmra.mxu3 %vm5762_vm1, %v16160_v41  ;;  %v8994_v20 = vld [vmem:[#allocation3 + $0x5e] sm:$0xff] }
 0x6ea   : >> { %v8470_v46 = vpop.f32.mrf.mxu2 }
 0x6eb   : >> { %v8622_v15 = vpop.f32.mrf.mxu3  ;;  %v8511_v31 = vadd.f32 %v8470_v46, %v8356_v50  ;;  %v8163_v22 = vpop.f32.mrf.mxu0 }
 0x6ec   : >> { %v16371_v60 = vadd.f32 %v8622_v15, %v8510_v8  ;;  %v8318_v9 = vpop.f32.mrf.mxu1  ;;  %v8202_v27 = vadd.f32 %v8163_v22, %v16171_v6 }
 0x6ee   : >> { %v8357_v21 = vadd.f32 %v8318_v9, %v8202_v27  ;;  %12890 = vmatmul.msk.f32.gmra.mxu0 %vm5762_vm1, %v16374_v62  ;;  %v16396_v27 = vld [vmem:[#allocation3 + $0x64] sm:$0xff] }
 0x6ef   : >> { %12908 = vmatmul.msk.f32.gmra.mxu1 %vm5762_vm1, %v8838_v23  ;;  %12926 = vmatmul.msk.f32.gmra.mxu2 %vm5762_vm1, %v8993_v39  ;;  %v8840_v23 = vld [vmem:[#allocation3 + $0x65] sm:$0xff] }
 0x6f0   : >> { %12943 = vmatmul.msk.f32.gmra.mxu3 %vm5762_vm1, %v16174_v18  ;;  %v8995_v39 = vld [vmem:[#allocation3 + $0x66] sm:$0xff] }
 0x6f2   : >> { %v8473_v41 = vpop.f32.mrf.mxu2 }
 0x6f3   : >> { %v8625_v34 = vpop.f32.mrf.mxu3  ;;  %v8512_v48 = vadd.f32 %v8473_v41, %v8357_v21  ;;  %v8166_v6 = vpop.f32.mrf.mxu0 }
 0x6f4   : >> { %v16382_v8 = vadd.f32 %v8625_v34, %v8511_v31  ;;  %v8321_v5 = vpop.f32.mrf.mxu1  ;;  %v8203_v30 = vadd.f32 %v8166_v6, %v16185_v37 }
 0x6f6   : >> { %v8358_v50 = vadd.f32 %v8321_v5, %v8203_v30  ;;  %12891 = vmatmul.msk.f32.gmra.mxu0 %vm5762_vm1, %v16385_v0  ;;  %v16407_v30 = vld [vmem:[#allocation3 + $0x6c] sm:$0xff] }
 0x6f7   : >> { %12909 = vmatmul.msk.f32.gmra.mxu1 %vm5762_vm1, %v8839_v10  ;;  %12927 = vmatmul.msk.f32.gmra.mxu2 %vm5762_vm1, %v8994_v20  ;;  %v8841_v10 = vld [vmem:[#allocation3 + $0x6d] sm:$0xff] }
 0x6f8   : >> { %12944 = vmatmul.msk.f32.gmra.mxu3 %vm5762_vm1, %v16188_v25  ;;  %v8996_v20 = vld [vmem:[#allocation3 + $0x6e] sm:$0xff] }
 0x6fa   : >> { %v8476_v18 = vpop.f32.mrf.mxu2 }
 0x6fb   : >> { %v8628_v46 = vpop.f32.mrf.mxu3  ;;  %v8513_v15 = vadd.f32 %v8476_v18, %v8358_v50  ;;  %v8169_v37 = vpop.f32.mrf.mxu0 }
 0x6fc   : >> { %v16393_v31 = vadd.f32 %v8628_v46, %v8512_v48  ;;  %v8324_v22 = vpop.f32.mrf.mxu1  ;;  %v8204_v9 = vadd.f32 %v8169_v37, %v16199_v44 }
 0x6fe   : >> { %v8359_v21 = vadd.f32 %v8324_v22, %v8204_v9  ;;  %12892 = vmatmul.msk.f32.gmra.mxu0 %vm5762_vm1, %v16396_v27  ;;  %v16418_v9 = vld [vmem:[#allocation3 + $0x74] sm:$0xff] }
 0x6ff   : >> { %12910 = vmatmul.msk.f32.gmra.mxu1 %vm5762_vm1, %v8840_v23  ;;  %12928 = vmatmul.msk.f32.gmra.mxu2 %vm5762_vm1, %v8995_v39  ;;  %v8842_v23 = vld [vmem:[#allocation3 + $0x75] sm:$0xff] }
 0x700   : >> { %12945 = vmatmul.msk.f32.gmra.mxu3 %vm5762_vm1, %v16202_v7  ;;  %v8997_v39 = vld [vmem:[#allocation3 + $0x76] sm:$0xff] }
 0x702   : >> { %v8479_v25 = vpop.f32.mrf.mxu2 }
 0x703   : >> { %v8631_v41 = vpop.f32.mrf.mxu3  ;;  %v8514_v34 = vadd.f32 %v8479_v25, %v8359_v21  ;;  %v8172_v44 = vpop.f32.mrf.mxu0 }
 0x704   : >> { %v16404_v48 = vadd.f32 %v8631_v41, %v8513_v15  ;;  %v8327_v6 = vpop.f32.mrf.mxu1  ;;  %v8205_v5 = vadd.f32 %v8172_v44, %v16213_v26 }
 0x706   : >> { %v8360_v50 = vadd.f32 %v8327_v6, %v8205_v5  ;;  %12893 = vmatmul.msk.f32.gmra.mxu0 %vm5762_vm1, %v16407_v30  ;;  %v16429_v5 = vld [vmem:[#allocation3 + $0x7c] sm:$0xff] }
 0x707   : >> { %12911 = vmatmul.msk.f32.gmra.mxu1 %vm5762_vm1, %v8841_v10  ;;  %12929 = vmatmul.msk.f32.gmra.mxu2 %vm5762_vm1, %v8996_v20  ;;  %v8843_v10 = vld [vmem:[#allocation3 + $0x7d] sm:$0xff] }
 0x708   : >> { %12946 = vmatmul.msk.f32.gmra.mxu3 %vm5762_vm1, %v16216_v14  ;;  %v8998_v20 = vld [vmem:[#allocation3 + $0x7e] sm:$0xff] }
 0x70a   : >> { %v8482_v7 = vpop.f32.mrf.mxu2 }
 0x70b   : >> { %v8634_v18 = vpop.f32.mrf.mxu3  ;;  %v8515_v46 = vadd.f32 %v8482_v7, %v8360_v50  ;;  %v8175_v26 = vpop.f32.mrf.mxu0 }
 0x70c   : >> { %v16415_v15 = vadd.f32 %v8634_v18, %v8514_v34  ;;  %v8330_v37 = vpop.f32.mrf.mxu1  ;;  %v8206_v22 = vadd.f32 %v8175_v26, %v16227_v56 }
 0x70e   : >> { %v8361_v21 = vadd.f32 %v8330_v37, %v8206_v22  ;;  %12894 = vmatmul.msk.f32.gmra.mxu0 %vm5762_vm1, %v16418_v9  ;;  %v16440_v22 = vld [vmem:[#allocation3 + $0x84] sm:$0xff] }
 0x70f   : >> { %12912 = vmatmul.msk.f32.gmra.mxu1 %vm5762_vm1, %v8842_v23  ;;  %12930 = vmatmul.msk.f32.gmra.mxu2 %vm5762_vm1, %v8997_v39  ;;  %v8844_v23 = vld [vmem:[#allocation3 + $0x85] sm:$0xff] }
 0x710   : >> { %12947 = vmatmul.msk.f32.gmra.mxu3 %vm5762_vm1, %v16230_v28  ;;  %v8999_v39 = vld [vmem:[#allocation3 + $0x86] sm:$0xff] }
 0x712   : >> { %v8485_v14 = vpop.f32.mrf.mxu2 }
 0x713   : >> { %v8637_v25 = vpop.f32.mrf.mxu3  ;;  %v8516_v41 = vadd.f32 %v8485_v14, %v8361_v21  ;;  %v8178_v56 = vpop.f32.mrf.mxu0 }
 0x714   : >> { %v16426_v34 = vadd.f32 %v8637_v25, %v8515_v46  ;;  %v8333_v44 = vpop.f32.mrf.mxu1  ;;  %v8207_v6 = vadd.f32 %v8178_v56, %v16241_v32 }
 0x716   : >> { %v8362_v50 = vadd.f32 %v8333_v44, %v8207_v6  ;;  %12895 = vmatmul.msk.f32.gmra.mxu0 %vm5762_vm1, %v16429_v5  ;;  %v16451_v6 = vld [vmem:[#allocation3 + $0x8c] sm:$0xff] }
 0x717   : >> { %12913 = vmatmul.msk.f32.gmra.mxu1 %vm5762_vm1, %v8843_v10  ;;  %12931 = vmatmul.msk.f32.gmra.mxu2 %vm5762_vm1, %v8998_v20  ;;  %v8845_v10 = vld [vmem:[#allocation3 + $0x8d] sm:$0xff] }
 0x718   : >> { %12948 = vmatmul.msk.f32.gmra.mxu3 %vm5762_vm1, %v16244_v17  ;;  %v9000_v20 = vld [vmem:[#allocation3 + $0x8e] sm:$0xff] }
 0x71a   : >> { %v8488_v28 = vpop.f32.mrf.mxu2 }
 0x71b   : >> { %v8640_v7 = vpop.f32.mrf.mxu3  ;;  %v8517_v18 = vadd.f32 %v8488_v28, %v8362_v50  ;;  %v8181_v32 = vpop.f32.mrf.mxu0 }
 0x71c   : >> { %v16437_v46 = vadd.f32 %v8640_v7, %v8516_v41  ;;  %v8336_v26 = vpop.f32.mrf.mxu1  ;;  %v8208_v37 = vadd.f32 %v8181_v32, %v16255_v51 }
 0x71e   : >> { %v8363_v21 = vadd.f32 %v8336_v26, %v8208_v37  ;;  %12896 = vmatmul.msk.f32.gmra.mxu0 %vm5762_vm1, %v16440_v22  ;;  %v16462_v37 = vld [vmem:[#allocation3 + $0x94] sm:$0xff] }
 0x71f   : >> { %12914 = vmatmul.msk.f32.gmra.mxu1 %vm5762_vm1, %v8844_v23  ;;  %12932 = vmatmul.msk.f32.gmra.mxu2 %vm5762_vm1, %v8999_v39  ;;  %v8846_v23 = vld [vmem:[#allocation3 + $0x95] sm:$0xff] }
 0x720   : >> { %12949 = vmatmul.msk.f32.gmra.mxu3 %vm5762_vm1, %v16258_v57  ;;  %v9001_v39 = vld [vmem:[#allocation3 + $0x96] sm:$0xff] }
 0x722   : >> { %v8491_v17 = vpop.f32.mrf.mxu2 }
 0x723   : >> { %v8643_v14 = vpop.f32.mrf.mxu3  ;;  %v8518_v25 = vadd.f32 %v8491_v17, %v8363_v21  ;;  %v8184_v51 = vpop.f32.mrf.mxu0 }
 0x724   : >> { %v16448_v41 = vadd.f32 %v8643_v14, %v8517_v18  ;;  %v8339_v56 = vpop.f32.mrf.mxu1  ;;  %v8209_v44 = vadd.f32 %v8184_v51, %v16269_v59 }
 0x726   : >> { %v8364_v50 = vadd.f32 %v8339_v56, %v8209_v44  ;;  %12897 = vmatmul.msk.f32.gmra.mxu0 %vm5762_vm1, %v16451_v6  ;;  %v16473_v44 = vld [vmem:[#allocation3 + $0x9c] sm:$0xff] }
 0x727   : >> { %12915 = vmatmul.msk.f32.gmra.mxu1 %vm5762_vm1, %v8845_v10  ;;  %12933 = vmatmul.msk.f32.gmra.mxu2 %vm5762_vm1, %v9000_v20  ;;  %v8847_v10 = vld [vmem:[#allocation3 + $0x9d] sm:$0xff] }
 0x728   : >> { %12950 = vmatmul.msk.f32.gmra.mxu3 %vm5762_vm1, %v16272_v55  ;;  %v9002_v20 = vld [vmem:[#allocation3 + $0x9e] sm:$0xff] }
 0x72a   : >> { %v8494_v57 = vpop.f32.mrf.mxu2 }
 0x72b   : >> { %v8646_v28 = vpop.f32.mrf.mxu3  ;;  %v8519_v7 = vadd.f32 %v8494_v57, %v8364_v50  ;;  %v8187_v59 = vpop.f32.mrf.mxu0 }
 0x72c   : >> { %v16459_v18 = vadd.f32 %v8646_v28, %v8518_v25  ;;  %v8342_v32 = vpop.f32.mrf.mxu1  ;;  %v8210_v26 = vadd.f32 %v8187_v59, %v16294_v54 }
 0x72e   : >> { %v8365_v21 = vadd.f32 %v8342_v32, %v8210_v26  ;;  %12898 = vmatmul.msk.f32.gmra.mxu0 %vm5762_vm1, %v16462_v37  ;;  %v16484_v26 = vld [vmem:[#allocation3 + $0xa4] sm:$0xff] }
 0x72f   : >> { %12916 = vmatmul.msk.f32.gmra.mxu1 %vm5762_vm1, %v8846_v23  ;;  %12934 = vmatmul.msk.f32.gmra.mxu2 %vm5762_vm1, %v9001_v39  ;;  %v8848_v23 = vld [vmem:[#allocation3 + $0xa5] sm:$0xff] }
 0x730   : >> { %12951 = vmatmul.msk.f32.gmra.mxu3 %vm5762_vm1, %v16297_v29  ;;  %v9003_v39 = vld [vmem:[#allocation3 + $0xa6] sm:$0xff] }
 0x732   : >> { %v8497_v55 = vpop.f32.mrf.mxu2 }
 0x733   : >> { %v8649_v17 = vpop.f32.mrf.mxu3  ;;  %v8520_v14 = vadd.f32 %v8497_v55, %v8365_v21  ;;  %v8190_v54 = vpop.f32.mrf.mxu0 }
 0x734   : >> { %v16470_v25 = vadd.f32 %v8649_v17, %v8519_v7  ;;  %v8345_v51 = vpop.f32.mrf.mxu1  ;;  %v8211_v56 = vadd.f32 %v8190_v54, %v16307_v36 }
 0x736   : >> { %v8366_v50 = vadd.f32 %v8345_v51, %v8211_v56  ;;  %12899 = vmatmul.msk.f32.gmra.mxu0 %vm5762_vm1, %v16473_v44 }
 0x737   : >> { %12917 = vmatmul.msk.f32.gmra.mxu1 %vm5762_vm1, %v8847_v10  ;;  %12935 = vmatmul.msk.f32.gmra.mxu2 %vm5762_vm1, %v9002_v20  ;;  %v16494_v10 = vld [vmem:[#allocation3 + $0xac] sm:$0xff] }
 0x738   : >> { %12952 = vmatmul.msk.f32.gmra.mxu3 %vm5762_vm1, %v16310_v33  ;;  %v9157_v33 = vld [vmem:[#allocation3 + $0xa8] sm:$0xff] }
 0x73a   : >> { %v8500_v29 = vpop.f32.mrf.mxu2 }
 0x73b   : >> { %v8652_v57 = vpop.f32.mrf.mxu3  ;;  %v8521_v28 = vadd.f32 %v8500_v29, %v8366_v50  ;;  %v8193_v36 = vpop.f32.mrf.mxu0  ;;  %v8849_v50 = vld [vmem:[#allocation3 + $0xad] sm:$0xff] }
 0x73c   : >> { %v16481_v7 = vadd.f32 %v8652_v57, %v8520_v14  ;;  %v8348_v59 = vpop.f32.mrf.mxu1  ;;  %v8212_v32 = vadd.f32 %v8193_v36, %v16320_v2  ;;  %v9004_v29 = vld [vmem:[#allocation3 + $0xae] sm:$0xff] }
 0x73d   : >> { %v9158_v57 = vld [vmem:[#allocation3 + $0xb0] sm:$0xff] }
 0x73e   : >> { %v8367_v21 = vadd.f32 %v8348_v59, %v8212_v32  ;;  %12900 = vmatmul.msk.f32.gmra.mxu0 %vm5762_vm1, %v16484_v26 }
 0x73f   : >> { %12918 = vmatmul.msk.f32.gmra.mxu1 %vm5762_vm1, %v8848_v23  ;;  %12936 = vmatmul.msk.f32.gmra.mxu2 %vm5762_vm1, %v9003_v39  ;;  %v9298_v39 = vld [vmem:[#allocation3 + $0x39] sm:$0xff] }
 0x740   : >> { %12953 = vmatmul.msk.f32.gmra.mxu3 %vm5762_vm1, %v9157_v33  ;;  %v9453_v33 = vld [vmem:[#allocation3 + $0x3a] sm:$0xff] }
 0x742   : >> { %v8503_v55 = vpop.f32.mrf.mxu2 }
 0x743   : >> { %v8655_v17 = vpop.f32.mrf.mxu3  ;;  %v8522_v14 = vadd.f32 %v8503_v55, %v8367_v21  ;;  %v8765_v2 = vpop.f32.mrf.mxu0 }
 0x744   : >> { %v16491_v54 = vadd.f32 %v8655_v17, %v8521_v28  ;;  %v8920_v51 = vpop.f32.mrf.mxu1  ;;  %v8816_v56 = vadd.f32 %v8765_v2, %v16330_v63  ;;  %v9159_v17 = vld [vmem:[#allocation3 + $0xb8] sm:$0xff] }
 0x746   : >> { %v8971_v20 = vadd.f32 %v8920_v51, %v8816_v56  ;;  %12901 = vmatmul.msk.f32.gmra.mxu0 %vm5762_vm1, %v16494_v10 }
 0x747   : >> { %12919 = vmatmul.msk.f32.gmra.mxu1 %vm5762_vm1, %v8849_v50  ;;  %12937 = vmatmul.msk.f32.gmra.mxu2 %vm5762_vm1, %v9004_v29  ;;  %v9299_v29 = vld [vmem:[#allocation3 + $0x41] sm:$0xff] }
 0x748   : >> { %12954 = vmatmul.msk.f32.gmra.mxu3 %vm5762_vm1, %v9158_v57  ;;  %v9454_v57 = vld [vmem:[#allocation3 + $0x42] sm:$0xff] }
 0x74a   : >> { %v9075_v36 = vpop.f32.mrf.mxu2 }
 0x74b   : >> { %v8658_v28 = vpop.f32.mrf.mxu3  ;;  %v9126_v63 = vadd.f32 %v9075_v36, %v8971_v20  ;;  %v8768_v32 = vpop.f32.mrf.mxu0 }
 0x74c   : >> { %v16501_v59 = vadd.f32 %v8658_v28, %v8522_v14  ;;  %v8923_v23 = vpop.f32.mrf.mxu1  ;;  %v8817_v21 = vadd.f32 %v8768_v32, %v16338_v47 }
 0x74e   : >> { %v8972_v55 = vadd.f32 %v8923_v23, %v8817_v21  ;;  %12957 = vmatmul.msk.f32.vlgmr.msra.gmra.mxu0 %vm5762_vm1, %v9298_v39  ;;  %v9300_v39 = vld [vmem:[#allocation3 + $0x49] sm:$0xff] }
 0x74f   : >> { %12975 = vmatmul.msk.f32.vlgmr.msra.gmra.mxu1 %vm5762_vm1, %v9453_v33  ;;  %12993 = vmatmul.msk.f32.vlgmr.msra.gmra.mxu2 %vm5762_vm1, %v16123_v38  ;;  %v9455_v33 = vld [vmem:[#allocation3 + $0x4a] sm:$0xff] }
 0x750   : >> { %12955 = vmatmul.msk.f32.gmra.mxu3 %vm5762_vm1, %v9159_v17 }
 0x752   : >> { %v9078_v14 = vpop.f32.mrf.mxu2 }
 0x753   : >> { %v9230_v2 = vpop.f32.mrf.mxu3  ;;  %v9127_v51 = vadd.f32 %v9078_v14, %v8972_v55  ;;  %v8771_v50 = vpop.f32.mrf.mxu0 }
 0x754   : >> { %v16509_v56 = vadd.f32 %v9230_v2, %v9126_v63  ;;  %v8926_v47 = vpop.f32.mrf.mxu1  ;;  %v8818_v20 = vadd.f32 %v8771_v50, %v16349_v11  ;;  %v9301_v50 = vld [vmem:[#allocation3 + $0x51] sm:$0xff] }
 0x756   : >> { %v8973_v28 = vadd.f32 %v8926_v47, %v8818_v20  ;;  %12958 = vmatmul.msk.f32.gmra.mxu0 %vm5762_vm1, %v9299_v29  ;;  %v9456_v47 = vld [vmem:[#allocation3 + $0x52] sm:$0xff] }
 0x757   : >> { %12976 = vmatmul.msk.f32.gmra.mxu1 %vm5762_vm1, %v9454_v57  ;;  %12994 = vmatmul.msk.f32.gmra.mxu2 %vm5762_vm1, %v16137_v49 }
 0x758   : >> { %13011 = vmatmul.msk.f32.vlgmr.msra.gmra.mxu3 %vm5762_vm1, %v16341_v42 }
 0x75a   : >> { %v9081_v38 = vpop.f32.mrf.mxu2 }
 0x75b   : >> { %v9233_v36 = vpop.f32.mrf.mxu3  ;;  %v9128_v63 = vadd.f32 %v9081_v38, %v8973_v28  ;;  %v8774_v23 = vpop.f32.mrf.mxu0 }
 0x75c   : >> { %v16518_v32 = vadd.f32 %v9233_v36, %v9127_v51  ;;  %v8929_v11 = vpop.f32.mrf.mxu1  ;;  %v8819_v21 = vadd.f32 %v8774_v23, %v16360_v35  ;;  %v9302_v36 = vld [vmem:[#allocation3 + $0x59] sm:$0xff] }
 0x75e   : >> { %v8974_v55 = vadd.f32 %v8929_v11, %v8819_v21  ;;  %12959 = vmatmul.msk.f32.gmra.mxu0 %vm5762_vm1, %v9300_v39 }
 0x75f   : >> { %12977 = vmatmul.msk.f32.gmra.mxu1 %vm5762_vm1, %v9455_v33  ;;  %12995 = vmatmul.msk.f32.gmra.mxu2 %vm5762_vm1, %v16151_v19 }
 0x760   : >> { %13012 = vmatmul.msk.f32.gmra.mxu3 %vm5762_vm1, %v16352_v4 }
 0x762   : >> { %v9084_v49 = vpop.f32.mrf.mxu2 }
 0x763   : >> { %v9236_v42 = vpop.f32.mrf.mxu3  ;;  %v9129_v17 = vadd.f32 %v9084_v49, %v8974_v55  ;;  %v8777_v2 = vpop.f32.mrf.mxu0  ;;  %v9303_v55 = vld [vmem:[#allocation3 + $0x61] sm:$0xff] }
 0x764   : >> { %v16527_v14 = vadd.f32 %v9236_v42, %v9128_v63  ;;  %v8932_v35 = vpop.f32.mrf.mxu1  ;;  %v8820_v51 = vadd.f32 %v8777_v2, %v16371_v60  ;;  %v9457_v63 = vld [vmem:[#allocation3 + $0x5a] sm:$0xff]  ;;  %v9458_v49 = vld [vmem:[#allocation3 + $0x62] sm:$0xff] }
 0x766   : >> { %v8975_v20 = vadd.f32 %v8932_v35, %v8820_v51  ;;  %12960 = vmatmul.msk.f32.gmra.mxu0 %vm5762_vm1, %v9301_v50  ;;  %v9304_v50 = vld [vmem:[#allocation3 + $0x69] sm:$0xff] }
 0x767   : >> { %12978 = vmatmul.msk.f32.gmra.mxu1 %vm5762_vm1, %v9456_v47  ;;  %12996 = vmatmul.msk.f32.gmra.mxu2 %vm5762_vm1, %v16165_v61  ;;  %v9459_v47 = vld [vmem:[#allocation3 + $0x6a] sm:$0xff] }
 0x768   : >> { %13013 = vmatmul.msk.f32.gmra.mxu3 %vm5762_vm1, %v16363_v24 }
 0x76a   : >> { %v9087_v19 = vpop.f32.mrf.mxu2 }
 0x76b   : >> { %v9239_v4 = vpop.f32.mrf.mxu3  ;;  %v9130_v29 = vadd.f32 %v9087_v19, %v8975_v20  ;;  %v8780_v28 = vpop.f32.mrf.mxu0 }
 0x76c   : >> { %v16536_v57 = vadd.f32 %v9239_v4, %v9129_v17  ;;  %v8935_v60 = vpop.f32.mrf.mxu1  ;;  %v8821_v38 = vadd.f32 %v8780_v28, %v16382_v8 }
 0x76e   : >> { %v8976_v23 = vadd.f32 %v8935_v60, %v8821_v38  ;;  %12961 = vmatmul.msk.f32.gmra.mxu0 %vm5762_vm1, %v9302_v36  ;;  %v9305_v60 = vld [vmem:[#allocation3 + $0x71] sm:$0xff] }
 0x76f   : >> { %12979 = vmatmul.msk.f32.gmra.mxu1 %vm5762_vm1, %v9457_v63  ;;  %12997 = vmatmul.msk.f32.gmra.mxu2 %vm5762_vm1, %v16179_v16  ;;  %v9460_v38 = vld [vmem:[#allocation3 + $0x72] sm:$0xff] }
 0x770   : >> { %13014 = vmatmul.msk.f32.gmra.mxu3 %vm5762_vm1, %v16374_v62 }
 0x772   : >> { %v9090_v61 = vpop.f32.mrf.mxu2 }
 0x773   : >> { %v9242_v24 = vpop.f32.mrf.mxu3  ;;  %v9131_v11 = vadd.f32 %v9090_v61, %v8976_v23  ;;  %v8783_v39 = vpop.f32.mrf.mxu0 }
 0x774   : >> { %v16545_v21 = vadd.f32 %v9242_v24, %v9130_v29  ;;  %v8938_v8 = vpop.f32.mrf.mxu1  ;;  %v8822_v33 = vadd.f32 %v8783_v39, %v16393_v31  ;;  %v9461_v39 = vld [vmem:[#allocation3 + $0x7a] sm:$0xff] }
 0x776   : >> { %v8977_v42 = vadd.f32 %v8938_v8, %v8822_v33  ;;  %12962 = vmatmul.msk.f32.gmra.mxu0 %vm5762_vm1, %v9303_v55 }
 0x777   : >> { %12980 = vmatmul.msk.f32.gmra.mxu1 %vm5762_vm1, %v9458_v49  ;;  %12998 = vmatmul.msk.f32.gmra.mxu2 %vm5762_vm1, %v16193_v53 }
 0x778   : >> { %13015 = vmatmul.msk.f32.gmra.mxu3 %vm5762_vm1, %v16385_v0 }
 0x77a   : >> { %v9093_v16 = vpop.f32.mrf.mxu2 }
 0x77b   : >> { %v9245_v62 = vpop.f32.mrf.mxu3  ;;  %v9132_v17 = vadd.f32 %v9093_v16, %v8977_v42  ;;  %v8786_v35 = vpop.f32.mrf.mxu0  ;;  %v9307_v16 = vld [vmem:[#allocation3 + $0x81] sm:$0xff] }
 0x77c   : >> { %v16554_v2 = vadd.f32 %v9245_v62, %v9131_v11  ;;  %v8941_v31 = vpop.f32.mrf.mxu1  ;;  %v8823_v51 = vadd.f32 %v8786_v35, %v16404_v48  ;;  %v9306_v11 = vld [vmem:[#allocation3 + $0x79] sm:$0xff]  ;;  %v9462_v62 = vld [vmem:[#allocation3 + $0x82] sm:$0xff] }
 0x77e   : >> { %v8978_v20 = vadd.f32 %v8941_v31, %v8823_v51  ;;  %12963 = vmatmul.msk.f32.gmra.mxu0 %vm5762_vm1, %v9304_v50 }
 0x77f   : >> { %12981 = vmatmul.msk.f32.gmra.mxu1 %vm5762_vm1, %v9459_v47  ;;  %12999 = vmatmul.msk.f32.gmra.mxu2 %vm5762_vm1, %v16207_v13  ;;  %v9308_v47 = vld [vmem:[#allocation3 + $0x89] sm:$0xff] }
 0x780   : >> { %13016 = vmatmul.msk.f32.gmra.mxu3 %vm5762_vm1, %v16396_v27 }
 0x782   : >> { %v9096_v53 = vpop.f32.mrf.mxu2 }
 0x783   : >> { %v9248_v0 = vpop.f32.mrf.mxu3  ;;  %v9133_v19 = vadd.f32 %v9096_v53, %v8978_v20  ;;  %v8789_v29 = vpop.f32.mrf.mxu0  ;;  %v9463_v20 = vld [vmem:[#allocation3 + $0x8a] sm:$0xff] }
 0x784   : >> { %v16563_v4 = vadd.f32 %v9248_v0, %v9132_v17  ;;  %v8944_v48 = vpop.f32.mrf.mxu1  ;;  %v8824_v28 = vadd.f32 %v8789_v29, %v16415_v15 }
 0x786   : >> { %v8979_v36 = vadd.f32 %v8944_v48, %v8824_v28  ;;  %12964 = vmatmul.msk.f32.gmra.mxu0 %vm5762_vm1, %v9305_v60  ;;  %v9309_v28 = vld [vmem:[#allocation3 + $0x91] sm:$0xff] }
 0x787   : >> { %12982 = vmatmul.msk.f32.gmra.mxu1 %vm5762_vm1, %v9460_v38  ;;  %13000 = vmatmul.msk.f32.gmra.mxu2 %vm5762_vm1, %v16221_v40  ;;  %v9464_v60 = vld [vmem:[#allocation3 + $0x92] sm:$0xff] }
 0x788   : >> { %13017 = vmatmul.msk.f32.gmra.mxu3 %vm5762_vm1, %v16407_v30 }
 0x78a   : >> { %v9099_v13 = vpop.f32.mrf.mxu2 }
 0x78b   : >> { %v9251_v27 = vpop.f32.mrf.mxu3  ;;  %v9134_v63 = vadd.f32 %v9099_v13, %v8979_v36  ;;  %v8792_v61 = vpop.f32.mrf.mxu0 }
 0x78c   : >> { %v16572_v23 = vadd.f32 %v9251_v27, %v9133_v19  ;;  %v8947_v15 = vpop.f32.mrf.mxu1  ;;  %v8825_v24 = vadd.f32 %v8792_v61, %v16426_v34  ;;  %v9310_v61 = vld [vmem:[#allocation3 + $0x99] sm:$0xff] }
 0x78e   : >> { %v8980_v8 = vadd.f32 %v8947_v15, %v8825_v24  ;;  %12965 = vmatmul.msk.f32.gmra.mxu0 %vm5762_vm1, %v9306_v11  ;;  %v9465_v15 = vld [vmem:[#allocation3 + $0x9a] sm:$0xff] }
 0x78f   : >> { %12983 = vmatmul.msk.f32.gmra.mxu1 %vm5762_vm1, %v9461_v39  ;;  %13001 = vmatmul.msk.f32.gmra.mxu2 %vm5762_vm1, %v16235_v52 }
 0x790   : >> { %13018 = vmatmul.msk.f32.gmra.mxu3 %vm5762_vm1, %v16418_v9 }
 0x792   : >> { %v9102_v40 = vpop.f32.mrf.mxu2 }
 0x793   : >> { %v9254_v30 = vpop.f32.mrf.mxu3  ;;  %v9135_v33 = vadd.f32 %v9102_v40, %v8980_v8  ;;  %v8795_v49 = vpop.f32.mrf.mxu0 }
 0x794   : >> { %v16581_v55 = vadd.f32 %v9254_v30, %v9134_v63  ;;  %v8950_v34 = vpop.f32.mrf.mxu1  ;;  %v8826_v42 = vadd.f32 %v8795_v49, %v16437_v46  ;;  %v9311_v30 = vld [vmem:[#allocation3 + $0xa1] sm:$0xff] }
 0x796   : >> { %v8981_v17 = vadd.f32 %v8950_v34, %v8826_v42  ;;  %12966 = vmatmul.msk.f32.gmra.mxu0 %vm5762_vm1, %v9307_v16 }
 0x797   : >> { %12984 = vmatmul.msk.f32.gmra.mxu1 %vm5762_vm1, %v9462_v62  ;;  %13002 = vmatmul.msk.f32.gmra.mxu2 %vm5762_vm1, %v16249_v43 }
 0x798   : >> { %13019 = vmatmul.msk.f32.gmra.mxu3 %vm5762_vm1, %v16429_v5 }
 0x79a   : >> { %v9105_v52 = vpop.f32.mrf.mxu2 }
 0x79b   : >> { %v9257_v9 = vpop.f32.mrf.mxu3  ;;  %v9136_v35 = vadd.f32 %v9105_v52, %v8981_v17  ;;  %v8798_v51 = vpop.f32.mrf.mxu0  ;;  %v9312_v17 = vld [vmem:[#allocation3 + $0xa9] sm:$0xff] }
 0x79c   : >> { %v16590_v31 = vadd.f32 %v9257_v9, %v9135_v33  ;;  %v8953_v46 = vpop.f32.mrf.mxu1  ;;  %v8827_v50 = vadd.f32 %v8798_v51, %v16448_v41  ;;  %v9466_v33 = vld [vmem:[#allocation3 + $0xa2] sm:$0xff]  ;;  %v9467_v52 = vld [vmem:[#allocation3 + $0xaa] sm:$0xff] }
 0x79e   : >> { %v8982_v53 = vadd.f32 %v8953_v46, %v8827_v50  ;;  %12967 = vmatmul.msk.f32.gmra.mxu0 %vm5762_vm1, %v9308_v47  ;;  %v9313_v47 = vld [vmem:[#allocation3 + $0xb1] sm:$0xff] }
 0x79f   : >> { %12985 = vmatmul.msk.f32.gmra.mxu1 %vm5762_vm1, %v9463_v20  ;;  %13003 = vmatmul.msk.f32.gmra.mxu2 %vm5762_vm1, %v16263_v12  ;;  %v9468_v20 = vld [vmem:[#allocation3 + $0xb2] sm:$0xff] }
 0x7a0   : >> { %13020 = vmatmul.msk.f32.gmra.mxu3 %vm5762_vm1, %v16440_v22 }
 0x7a2   : >> { %v9108_v43 = vpop.f32.mrf.mxu2 }
 0x7a3   : >> { %v9260_v5 = vpop.f32.mrf.mxu3  ;;  %v9137_v0 = vadd.f32 %v9108_v43, %v8982_v53  ;;  %v8801_v29 = vpop.f32.mrf.mxu0 }
 0x7a4   : >> { %v16599_v19 = vadd.f32 %v9260_v5, %v9136_v35  ;;  %v8956_v41 = vpop.f32.mrf.mxu1  ;;  %v8828_v48 = vadd.f32 %v8801_v29, %v16459_v18 }
 0x7a6   : >> { %v8983_v38 = vadd.f32 %v8956_v41, %v8828_v48  ;;  %12968 = vmatmul.msk.f32.gmra.mxu0 %vm5762_vm1, %v9309_v28  ;;  %v9314_v41 = vld [vmem:[#allocation3 + $0xb9] sm:$0xff] }
 0x7a7   : >> { %12986 = vmatmul.msk.f32.gmra.mxu1 %vm5762_vm1, %v9464_v60  ;;  %13004 = vmatmul.msk.f32.gmra.mxu2 %vm5762_vm1, %v16277_v1  ;;  %v9469_v48 = vld [vmem:[#allocation3 + $0xba] sm:$0xff] }
 0x7a8   : >> { %13021 = vmatmul.msk.f32.gmra.mxu3 %vm5762_vm1, %v16451_v6  ;;  %v9624_v28 = vld [vmem:[#allocation3 + $0xbb] sm:$0xff] }
 0x7a9   : >> { %v9778_v60 = vld [vmem:[#allocation3 + $0xb4] sm:$0xff] }
 0x7aa   : >> { %v9111_v12 = vpop.f32.mrf.mxu2 }
 0x7ab   : >> { %v9263_v22 = vpop.f32.mrf.mxu3  ;;  %v9138_v36 = vadd.f32 %v9111_v12, %v8983_v38  ;;  %v8804_v27 = vpop.f32.mrf.mxu0 }
 0x7ac   : >> { %v16608_v13 = vadd.f32 %v9263_v22, %v9137_v0  ;;  %v8959_v18 = vpop.f32.mrf.mxu1  ;;  %v8829_v63 = vadd.f32 %v8804_v27, %v16470_v25 }
 0x7ae   : >> { %v8984_v24 = vadd.f32 %v8959_v18, %v8829_v63  ;;  %12969 = vmatmul.msk.f32.gmra.mxu0 %vm5762_vm1, %v9310_v61  ;;  %v9779_v18 = vld [vmem:[#allocation3 + $0xbc] sm:$0xff] }
 0x7af   : >> { %12987 = vmatmul.msk.f32.gmra.mxu1 %vm5762_vm1, %v9465_v15  ;;  %13005 = vmatmul.msk.f32.gmra.mxu2 %vm5762_vm1, %v16302_v3  ;;  %v16656_v15 = vld [vmem:[%s17028_s4] ss:$0 sm:$0xff] }
 0x7b0   : >> { %13022 = vmatmul.msk.f32.gmra.mxu3 %vm5762_vm1, %v16462_v37 }
 0x7b2   : >> { %v9114_v1 = vpop.f32.mrf.mxu2 }
 0x7b3   : >> { %v9266_v6 = vpop.f32.mrf.mxu3  ;;  %v9139_v11 = vadd.f32 %v9114_v1, %v8984_v24  ;;  %v8807_v8 = vpop.f32.mrf.mxu0 }
 0x7b4   : >> { %v16617_v39 = vadd.f32 %v9266_v6, %v9138_v36  ;;  %v8962_v25 = vpop.f32.mrf.mxu1  ;;  %v8830_v40 = vadd.f32 %v8807_v8, %v16481_v7 }
 0x7b6   : >> { %v8985_v49 = vadd.f32 %v8962_v25, %v8830_v40  ;;  %12970 = vmatmul.msk.f32.gmra.mxu0 %vm5762_vm1, %v9311_v30 }
 0x7b7   : >> { %12988 = vmatmul.msk.f32.gmra.mxu1 %vm5762_vm1, %v9466_v33  ;;  %13006 = vmatmul.msk.f32.gmra.mxu2 %vm5762_vm1, %v16315_v45 }
 0x7b8   : >> { %13023 = vmatmul.msk.f32.gmra.mxu3 %vm5762_vm1, %v16473_v44 }
 0x7ba   : >> { %v9117_v3 = vpop.f32.mrf.mxu2 }
 0x7bb   : >> { %v9269_v37 = vpop.f32.mrf.mxu3  ;;  %v9140_v34 = vadd.f32 %v9117_v3, %v8985_v49  ;;  %v8810_v16 = vpop.f32.mrf.mxu0 }
 0x7bc   : >> { %v16626_v42 = vadd.f32 %v9269_v37, %v9139_v11  ;;  %v8965_v7 = vpop.f32.mrf.mxu1  ;;  %v8831_v62 = vadd.f32 %v8810_v16, %v16491_v54 }
 0x7be   : >> { %v8986_v9 = vadd.f32 %v8965_v7, %v8831_v62  ;;  %12971 = vmatmul.msk.f32.gmra.mxu0 %vm5762_vm1, %v9312_v17 }
 0x7bf   : >> { %12989 = vmatmul.msk.f32.gmra.mxu1 %vm5762_vm1, %v9467_v52  ;;  %13007 = vmatmul.msk.f32.gmra.mxu2 %vm5762_vm1, %v16323_v58  ;;  %v9623_v58 = vld [vmem:[#allocation3 + $0xb3] sm:$0xff] }
 0x7c0   : >> { %13024 = vmatmul.msk.f32.gmra.mxu3 %vm5762_vm1, %v16484_v26 }
 0x7c2   : >> { %v9120_v45 = vpop.f32.mrf.mxu2 }
 0x7c3   : >> { %v9272_v44 = vpop.f32.mrf.mxu3  ;;  %v9141_v35 = vadd.f32 %v9120_v45, %v8986_v9  ;;  %v8813_v46 = vpop.f32.mrf.mxu0 }
 0x7c4   : >> { %v16635_v51 = vadd.f32 %v9272_v44, %v9140_v34  ;;  %v8968_v54 = vpop.f32.mrf.mxu1  ;;  %v8832_v50 = vadd.f32 %v8813_v46, %v16501_v59 }
 0x7c6   : >> { %v8987_v53 = vadd.f32 %v8968_v54, %v8832_v50  ;;  %12972 = vmatmul.msk.f32.gmra.mxu0 %vm5762_vm1, %v9313_v47 }
 0x7c7   : >> { %12990 = vmatmul.msk.f32.gmra.mxu1 %vm5762_vm1, %v9468_v20  ;;  %13008 = vmatmul.msk.f32.gmra.mxu2 %vm5762_vm1, %v9623_v58 }
 0x7c8   : >> { %13025 = vmatmul.msk.f32.gmra.mxu3 %vm5762_vm1, %v16494_v10 }
 0x7ca   : >> { %v9123_v26 = vpop.f32.mrf.mxu2 }
 0x7cb   : >> { %v9275_v43 = vpop.f32.mrf.mxu3  ;;  %v9142_v5 = vadd.f32 %v9123_v26, %v8987_v53  ;;  %v9385_v29 = vpop.f32.mrf.mxu0 }
 0x7cc   : >> { %v16643_v0 = vadd.f32 %v9275_v43, %v9141_v35  ;;  %v9540_v59 = vpop.f32.mrf.mxu1  ;;  %v9436_v12 = vadd.f32 %v9385_v29, %v16509_v56 }
 0x7ce   : >> { %12973 = vmatmul.msk.f32.gmra.mxu0 %vm5762_vm1, %v9314_v41  ;;  %v9591_v63 = vadd.f32 %v9540_v59, %v9436_v12 }
 0x7cf   : >> { %12991 = vmatmul.msk.f32.gmra.mxu1 %vm5762_vm1, %v9469_v48  ;;  %13009 = vmatmul.msk.f32.gmra.mxu2 %vm5762_vm1, %v9624_v28 }
 0x7d0   : >> { %13026 = vmatmul.msk.f32.gmra.mxu3 %vm5762_vm1, %v9778_v60 }
 0x7d2   : >> { %v9695_v38 = vpop.f32.mrf.mxu2 }
 0x7d3   : >> { %v9278_v10 = vpop.f32.mrf.mxu3  ;;  %v9388_v36 = vpop.f32.mrf.mxu0  ;;  %v9746_v61 = vadd.f32 %v9695_v38, %v9591_v63 }
 0x7d4   : >> { %v16650_v22 = vadd.f32 %v9278_v10, %v9142_v5  ;;  %v9543_v27 = vpop.f32.mrf.mxu1  ;;  %v9437_v6 = vadd.f32 %v9388_v36, %v16518_v32 }
 0x7d6   : >> { %v9592_v40 = vadd.f32 %v9543_v27, %v9437_v6 }
 0x7d8   : >> { %13027 = vmatmul.msk.f32.gmra.mxu3 %vm5762_vm1, %v9779_v18 }
 0x7da   : >> { %v9698_v24 = vpop.f32.mrf.mxu2 }
 0x7db   : >> { %v9850_v1 = vpop.f32.mrf.mxu3  ;;  %v9391_v56 = vpop.f32.mrf.mxu0  ;;  %v9747_v33 = vadd.f32 %v9698_v24, %v9592_v40 }
 0x7dc   : >> { %v9901_v11 = vadd.f32 %v9850_v1, %v9746_v61  ;;  %v9546_v8 = vpop.f32.mrf.mxu1  ;;  %v9438_v37 = vadd.f32 %v9391_v56, %v16527_v14 }
 0x7de   : >> { %v9922_v25 = vadd.f32 %v16656_v15, %v9901_v11  ;;  %v9593_v17 = vadd.f32 %v9546_v8, %v9438_v37 }
 0x7e0   : >> { %v9939_v30 = vmax.f32 %v9922_v25, 0.0 }
 0x7e2   : >> { %9956 = vst [vmem:[#allocation4] sm:$0xff] %v9939_v30  ;;  %v9701_v49 = vpop.f32.mrf.mxu2 }
 0x7e3   : >> { %v9853_v3 = vpop.f32.mrf.mxu3  ;;  %v9394_v16 = vpop.f32.mrf.mxu0  ;;  %v9748_v52 = vadd.f32 %v9701_v49, %v9593_v17 }
 0x7e4   : >> { %v9902_v34 = vadd.f32 %v9853_v3, %v9747_v33  ;;  %v9549_v7 = vpop.f32.mrf.mxu1  ;;  %v9439_v44 = vadd.f32 %v9394_v16, %v16536_v57 }
 0x7e6   : >> { %v9923_v62 = vadd.f32 %v16656_v15, %v9902_v34  ;;  %v9594_v14 = vadd.f32 %v9549_v7, %v9439_v44 }
 0x7e8   : >> { %v9940_v32 = vmax.f32 %v9923_v62, 0.0 }
 0x7ea   : >> { %9957 = vst [vmem:[#allocation4 + $0x8] sm:$0xff] %v9940_v32  ;;  %v9704_v9 = vpop.f32.mrf.mxu2 }
 0x7eb   : >> { %v9856_v45 = vpop.f32.mrf.mxu3  ;;  %v9397_v46 = vpop.f32.mrf.mxu0  ;;  %v9749_v20 = vadd.f32 %v9704_v9, %v9594_v14 }
 0x7ec   : >> { %v9903_v35 = vadd.f32 %v9856_v45, %v9748_v52  ;;  %v9552_v54 = vpop.f32.mrf.mxu1  ;;  %v9440_v26 = vadd.f32 %v9397_v46, %v16545_v21 }
 0x7ee   : >> { %v9924_v50 = vadd.f32 %v16656_v15, %v9903_v35  ;;  %v9595_v48 = vadd.f32 %v9552_v54, %v9440_v26 }
 0x7f0   : >> { %v9941_v47 = vmax.f32 %v9924_v50, 0.0 }
 0x7f1   : >> { %v9973_v57 = vld [vmem:[#allocation4] ss:$2 sm:$0x1f]  ;;  %v9975_v41 = vld [vmem:[#allocation4 + $0x1] ss:$2 sm:$0x1f] }
 0x7f2   : >> { %9958 = vst [vmem:[#allocation4 + $0x10] sm:$0xff] %v9941_v47  ;;  %v9707_v53 = vpop.f32.mrf.mxu2  ;;  %v9976_v38 = vmax.f32 %v9973_v57, %v9975_v41 }
 0x7f3   : >> { %v9859_v58 = vpop.f32.mrf.mxu3  ;;  %v9400_v5 = vpop.f32.mrf.mxu0  ;;  %v9750_v36 = vadd.f32 %v9707_v53, %v9595_v48 }
 0x7f4   : >> { %v9904_v43 = vadd.f32 %v9859_v58, %v9749_v20  ;;  %v9555_v29 = vpop.f32.mrf.mxu1  ;;  %v9441_v63 = vadd.f32 %v9400_v5, %v16554_v2 }
 0x7f6   : >> { %v9925_v59 = vadd.f32 %v16656_v15, %v9904_v43  ;;  %v9596_v11 = vadd.f32 %v9555_v29, %v9441_v63 }
 0x7f8   : >> { %v9942_v28 = vmax.f32 %v9925_v59, 0.0 }
 0x7f9   : >> { %v9978_v60 = vld [vmem:[#allocation4 + $0xe] ss:$2 sm:$0x1f]  ;;  %v9980_v10 = vld [vmem:[#allocation4 + $0xf] ss:$2 sm:$0x1f] }
 0x7fa   : >> { %v9981_v12 = vmax.f32 %v9978_v60, %v9980_v10  ;;  %9959 = vst [vmem:[#allocation4 + $0x18] sm:$0xff] %v9942_v28  ;;  %v9710_v27 = vpop.f32.mrf.mxu2 }
 0x7fb   : >> { %v9862_v18 = vpop.f32.mrf.mxu3  ;;  %v9403_v24 = vpop.f32.mrf.mxu0  ;;  %v9751_v8 = vadd.f32 %v9710_v27, %v9596_v11 }
 0x7fc   : >> { %v9982_v21 = vmax.f32 %v9976_v38, %v9981_v12  ;;  %v9905_v61 = vadd.f32 %v9862_v18, %v9750_v36  ;;  %v9558_v1 = vpop.f32.mrf.mxu1  ;;  %v9442_v30 = vadd.f32 %v9403_v24, %v16563_v4 }
 0x7fe   : >> { %9986 = vst.msk [vmem:[%s16668_s22] sm:$0x1f] %vm9985_vm3, %v9982_v21  ;;  %v9926_v6 = vadd.f32 %v16656_v15, %v9905_v61  ;;  %v9597_v37 = vadd.f32 %v9558_v1, %v9442_v30 }
 0x800   : >> { %v9943_v56 = vmax.f32 %v9926_v6, 0.0 }
 0x802   : >> { %9960 = vst [vmem:[#allocation4 + $0x20] sm:$0xff] %v9943_v56  ;;  %v9713_v25 = vpop.f32.mrf.mxu2 }
 0x803   : >> { %v9865_v40 = vpop.f32.mrf.mxu3  ;;  %v9406_v2 = vpop.f32.mrf.mxu0  ;;  %v9752_v16 = vadd.f32 %v9713_v25, %v9597_v37 }
 0x804   : >> { %v9906_v33 = vadd.f32 %v9865_v40, %v9751_v8  ;;  %v9561_v49 = vpop.f32.mrf.mxu1  ;;  %v9443_v17 = vadd.f32 %v9406_v2, %v16572_v23 }
 0x806   : >> { %v9927_v3 = vadd.f32 %v16656_v15, %v9906_v33  ;;  %v9598_v44 = vadd.f32 %v9561_v49, %v9443_v17 }
 0x808   : >> { %v9944_v34 = vmax.f32 %v9927_v3, 0.0 }
 0x809   : >> { %v9988_v58 = vld [vmem:[#allocation4 + $0x1c] ss:$2 sm:$0x1f]  ;;  %v9990_v23 = vld [vmem:[#allocation4 + $0x1d] ss:$2 sm:$0x1f] }
 0x80a   : >> { %9961 = vst [vmem:[#allocation4 + $0x28] sm:$0xff] %v9944_v34  ;;  %v9716_v7 = vpop.f32.mrf.mxu2  ;;  %v9991_v59 = vmax.f32 %v9988_v58, %v9990_v23 }
 0x80b   : >> { %v9868_v62 = vpop.f32.mrf.mxu3  ;;  %v9409_v52 = vpop.f32.mrf.mxu0  ;;  %v9753_v35 = vadd.f32 %v9716_v7, %v9598_v44 }
 0x80c   : >> { %v9907_v32 = vadd.f32 %v9868_v62, %v9752_v16  ;;  %v9564_v9 = vpop.f32.mrf.mxu1  ;;  %v9444_v50 = vadd.f32 %v9409_v52, %v16581_v55 }
 0x80e   : >> { %v9928_v45 = vadd.f32 %v16656_v15, %v9907_v32  ;;  %v9599_v26 = vadd.f32 %v9564_v9, %v9444_v50 }
 0x810   : >> { %v9945_v4 = vmax.f32 %v9928_v45, 0.0 }
 0x812   : >> { %9962 = vst [vmem:[#allocation4 + $0x30] sm:$0xff] %v9945_v4  ;;  %v9719_v46 = vpop.f32.mrf.mxu2 }
 0x813   : >> { %v9871_v54 = vpop.f32.mrf.mxu3  ;;  %v9412_v47 = vpop.f32.mrf.mxu0  ;;  %v9754_v41 = vadd.f32 %v9719_v46, %v9599_v26 }
 0x814   : >> { %v9908_v14 = vadd.f32 %v9871_v54, %v9753_v35  ;;  %v9567_v20 = vpop.f32.mrf.mxu1  ;;  %v9445_v55 = vadd.f32 %v9412_v47, %v16590_v31 }
 0x816   : >> { %v9929_v53 = vadd.f32 %v16656_v15, %v9908_v14  ;;  %v9600_v27 = vadd.f32 %v9567_v20, %v9445_v55 }
 0x818   : >> { %v9946_v43 = vmax.f32 %v9929_v53, 0.0 }
 0x819   : >> { %v9993_v5 = vld [vmem:[#allocation4 + $0x2a] ss:$2 sm:$0x1f]  ;;  %v9995_v29 = vld [vmem:[#allocation4 + $0x2b] ss:$2 sm:$0x1f] }
 0x81a   : >> { %v9996_v57 = vmax.f32 %v9993_v5, %v9995_v29  ;;  %9963 = vst [vmem:[#allocation4 + $0x38] sm:$0xff] %v9946_v43  ;;  %v9722_v48 = vpop.f32.mrf.mxu2 }
 0x81b   : >> { %v9874_v28 = vpop.f32.mrf.mxu3  ;;  %v9415_v38 = vpop.f32.mrf.mxu0  ;;  %v9755_v21 = vadd.f32 %v9722_v48, %v9600_v27 }
 0x81c   : >> { %v9997_v60 = vmax.f32 %v9991_v59, %v9996_v57  ;;  %v9909_v10 = vadd.f32 %v9874_v28, %v9754_v41  ;;  %v9570_v12 = vpop.f32.mrf.mxu1  ;;  %v9446_v24 = vadd.f32 %v9415_v38, %v16599_v19 }
 0x81e   : >> { %13030 = vst.msk [vmem:[%s16668_s22 + $0x5] sm:$0x1f] %vm9985_vm3, %v9997_v60  ;;  %v9930_v36 = vadd.f32 %v16656_v15, %v9909_v10  ;;  %v9601_v56 = vadd.f32 %v9570_v12, %v9446_v24 }
 0x820   : >> { %v9947_v18 = vmax.f32 %v9930_v36, 0.0 }
 0x822   : >> { %9964 = vst [vmem:[#allocation4 + $0x40] sm:$0xff] %v9947_v18  ;;  %v9725_v63 = vpop.f32.mrf.mxu2 }
 0x823   : >> { %v9877_v61 = vpop.f32.mrf.mxu3  ;;  %v9418_v6 = vpop.f32.mrf.mxu0  ;;  %v9756_v25 = vadd.f32 %v9725_v63, %v9601_v56 }
 0x824   : >> { %v9910_v1 = vadd.f32 %v9877_v61, %v9755_v21  ;;  %v9573_v11 = vpop.f32.mrf.mxu1  ;;  %v9447_v33 = vadd.f32 %v9418_v6, %v16608_v13 }
 0x826   : >> { %v9931_v31 = vadd.f32 %v16656_v15, %v9910_v1  ;;  %v9602_v16 = vadd.f32 %v9573_v11, %v9447_v33 }
 0x828   : >> { %v9948_v8 = vmax.f32 %v9931_v31, 0.0 }
 0x829   : >> { %v10002_v34 = vld [vmem:[#allocation4 + $0x38] ss:$2 sm:$0x1f]  ;;  %v10004_v19 = vld [vmem:[#allocation4 + $0x39] ss:$2 sm:$0x1f] }
 0x82a   : >> { %9965 = vst [vmem:[#allocation4 + $0x48] sm:$0xff] %v9948_v8  ;;  %v9728_v40 = vpop.f32.mrf.mxu2  ;;  %v10005_v32 = vmax.f32 %v10002_v34, %v10004_v19 }
 0x82b   : >> { %v9880_v30 = vpop.f32.mrf.mxu3  ;;  %v9421_v49 = vpop.f32.mrf.mxu0  ;;  %v9757_v9 = vadd.f32 %v9728_v40, %v9602_v16 }
 0x82c   : >> { %v9911_v2 = vadd.f32 %v9880_v30, %v9756_v25  ;;  %v9576_v37 = vpop.f32.mrf.mxu1  ;;  %v9448_v13 = vadd.f32 %v9421_v49, %v16617_v39 }
 0x82e   : >> { %v9932_v3 = vadd.f32 %v16656_v15, %v9911_v2  ;;  %v9603_v50 = vadd.f32 %v9576_v37, %v9448_v13 }
 0x830   : >> { %v9949_v7 = vmax.f32 %v9932_v3, 0.0 }
 0x831   : >> { %v10007_v62 = vld [vmem:[#allocation4 + $0x46] ss:$2 sm:$0x1f]  ;;  %v10009_v17 = vld [vmem:[#allocation4 + $0x47] ss:$2 sm:$0x1f] }
 0x832   : >> { %v10010_v52 = vmax.f32 %v10007_v62, %v10009_v17  ;;  %9966 = vst [vmem:[#allocation4 + $0x50] sm:$0xff] %v9949_v7  ;;  %v9731_v45 = vpop.f32.mrf.mxu2 }
 0x833   : >> { %v9883_v44 = vpop.f32.mrf.mxu3  ;;  %v9424_v46 = vpop.f32.mrf.mxu0  ;;  %v9758_v20 = vadd.f32 %v9731_v45, %v9603_v50 }
 0x834   : >> { %v10011_v4 = vmax.f32 %v10005_v32, %v10010_v52  ;;  %v9912_v35 = vadd.f32 %v9883_v44, %v9757_v9  ;;  %v9579_v47 = vpop.f32.mrf.mxu1  ;;  %v9449_v23 = vadd.f32 %v9424_v46, %v16626_v42  ;;  %v13037_v46 = vld [vmem:[%s17029_s5 + $0x10] sm:$0xff] (%p389_p11) }
 0x836   : >> { %13032 = vst.msk [vmem:[%s16668_s22 + $0xa] sm:$0x1f] %vm9985_vm3, %v10011_v4  ;;  %v9933_v54 = vadd.f32 %v16656_v15, %v9912_v35  ;;  %v9604_v39 = vadd.f32 %v9579_v47, %v9449_v23  ;;  %v10059_v35 = vld [vmem:[%s17029_s5 + $0x8] sm:$0xff] (%p389_p11) }
 0x837   : > { %10120 = vmatpush.msra.mxu3 (%p389_p11), %v10059_v35 }
 0x838   : >> { %v9950_v14 = vmax.f32 %v9933_v54, 0.0  ;;  %v10058_v54 = vld [vmem:[%s17029_s5] sm:$0xff] (%p389_p11) }
 0x839   : > { %10121 = vmatpush.msra.mxu3 (%p389_p11), %v10058_v54  ;;  %v13050_v54 = vld [vmem:[%s17029_s5 + $0x50] sm:$0xff] (%p389_p11) }
 0x83a   : >> { %9967 = vst [vmem:[#allocation4 + $0x58] sm:$0xff] %v9950_v14  ;;  %v9734_v53 = vpop.f32.mrf.mxu2  ;;  %v13045_v14 = vld [vmem:[%s17029_s5 + $0x38] sm:$0xff] (%p389_p11) }
 0x83b   : >> { %v9886_v58 = vpop.f32.mrf.mxu3  ;;  %v9427_v43 = vpop.f32.mrf.mxu0  ;;  %v9759_v59 = vadd.f32 %v9734_v53, %v9604_v39  ;;  %10205 = vmatpush.msrb.mxu3 (%p389_p11), %v13045_v14 }
 0x83c   : >> { %v9913_v26 = vadd.f32 %v9886_v58, %v9758_v20  ;;  %v9582_v57 = vpop.f32.mrf.mxu1  ;;  %v9450_v28 = vadd.f32 %v9427_v43, %v16635_v51 }
 0x83e   : >> { %v9934_v5 = vadd.f32 %v16656_v15, %v9913_v26  ;;  %v9605_v38 = vadd.f32 %v9582_v57, %v9450_v28 }
 0x840   : >> { %v9951_v29 = vmax.f32 %v9934_v5, 0.0 }
 0x841   : >> { %v10016_v24 = vld [vmem:[#allocation4 + $0x54] ss:$2 sm:$0x1f]  ;;  %v10018_v1 = vld [vmem:[#allocation4 + $0x55] ss:$2 sm:$0x1f] }
 0x842   : >> { %9968 = vst [vmem:[#allocation4 + $0x60] sm:$0xff] %v9951_v29  ;;  %v9737_v41 = vpop.f32.mrf.mxu2  ;;  %v10019_v8 = vmax.f32 %v10016_v24, %v10018_v1 }
 0x843   : >> { %v9889_v48 = vpop.f32.mrf.mxu3  ;;  %v9430_v10 = vpop.f32.mrf.mxu0  ;;  %v9760_v42 = vadd.f32 %v9737_v41, %v9605_v38  ;;  %v13042_v38 = vld [vmem:[%s17029_s5 + $0x28] sm:$0xff] (%p389_p11) }
 0x844   : >> { %v9914_v60 = vadd.f32 %v9889_v48, %v9759_v59  ;;  %v9451_v27 = vadd.f32 %v9430_v10, %v16643_v0  ;;  %v9585_v21 = vpop.f32.mrf.mxu1  ;;  %v13044_v10 = vld [vmem:[%s17029_s5 + $0x30] sm:$0xff] (%p389_p11) }
 0x845   : > { %10206 = vmatpush.msrb.mxu3 (%p389_p11), %v13044_v10 }
 0x846   : >> { %v9935_v55 = vadd.f32 %v16656_v15, %v9914_v60  ;;  %v9606_v51 = vadd.f32 %v9585_v21, %v9451_v27 }
 0x848   : >> { %v9952_v12 = vmax.f32 %v9935_v55, 0.0 }
 0x84a   : >> { %9969 = vst [vmem:[#allocation4 + $0x68] sm:$0xff] %v9952_v12  ;;  %v9740_v63 = vpop.f32.mrf.mxu2  ;;  %v13041_v12 = vld [vmem:[%s17029_s5 + $0x20] sm:$0xff] (%p389_p11) }
 0x84b   : >> { %v9892_v36 = vpop.f32.mrf.mxu3  ;;  %v9433_v56 = vpop.f32.mrf.mxu0  ;;  %v9761_v40 = vadd.f32 %v9740_v63, %v9606_v51 }
 0x84c   : >> { %v9915_v18 = vadd.f32 %v9892_v36, %v9760_v42  ;;  %v9452_v0 = vadd.f32 %v9433_v56, %v16650_v22  ;;  %v9588_v3 = vpop.f32.mrf.mxu1 }
 0x84e   : >> { %v9936_v61 = vadd.f32 %v16656_v15, %v9915_v18  ;;  %v9607_v34 = vadd.f32 %v9588_v3, %v9452_v0 }
 0x850   : >> { %v9953_v6 = vmax.f32 %v9936_v61, 0.0 }
 0x851   : >> { %v10021_v11 = vld [vmem:[#allocation4 + $0x62] ss:$2 sm:$0x1f]  ;;  %v10023_v31 = vld [vmem:[#allocation4 + $0x63] ss:$2 sm:$0x1f] }
 0x852   : >> { %v10024_v25 = vmax.f32 %v10021_v11, %v10023_v31  ;;  %9970 = vst [vmem:[#allocation4 + $0x70] sm:$0xff] %v9953_v6  ;;  %v9743_v37 = vpop.f32.mrf.mxu2 }
 0x853   : >> { %v9895_v30 = vpop.f32.mrf.mxu3  ;;  %v9762_v16 = vadd.f32 %v9743_v37, %v9607_v34 }
 0x854   : >> { %v10025_v33 = vmax.f32 %v10019_v8, %v10024_v25  ;;  %v9916_v2 = vadd.f32 %v9895_v30, %v9761_v40 }
 0x856   : >> { %13034 = vst.msk [vmem:[%s16668_s22 + $0xf] sm:$0x1f] %vm9985_vm3, %v10025_v33  ;;  %v9937_v49 = vadd.f32 %v16656_v15, %v9916_v2 }
 0x858   : >> { %v9954_v19 = vmax.f32 %v9937_v49, 0.0 }
 0x85a   : >> { %9971 = vst [vmem:[#allocation4 + $0x78] sm:$0xff] %v9954_v19 }
 0x85b   : >> { %v9898_v7 = vpop.f32.mrf.mxu3 }
 0x85c   : >> { %v9917_v62 = vadd.f32 %v9898_v7, %v9762_v16 }
 0x85e   : >> { %v9938_v17 = vadd.f32 %v16656_v15, %v9917_v62  ;;  %v13038_v15 = vld [vmem:[%s17029_s5 + $0x18] sm:$0xff] (%p389_p11) }
 0x85f   : > { %10097 = vmatpush.msra.mxu0 (%p389_p11), %v13038_v15 }
 0x860   : >> { %v9955_v32 = vmax.f32 %v9938_v17, 0.0  ;;  %v13051_v17 = vld [vmem:[%s17029_s5 + $0x58] sm:$0xff] (%p389_p11) }
 0x861   : >> { %v10030_v52 = vld [vmem:[#allocation4 + $0x70] ss:$2 sm:$0x1f]  ;;  %v10032_v22 = vld [vmem:[#allocation4 + $0x71] ss:$2 sm:$0x1f]  ;;  %10098 = vmatpush.msra.mxu0 (%p389_p11), %v13037_v46 }
 0x862   : >> { %9972 = vst [vmem:[#allocation4 + $0x80] sm:$0xff] %v9955_v32  ;;  %v10033_v44 = vmax.f32 %v10030_v52, %v10032_v22  ;;  %v13048_v32 = vld [vmem:[%s17029_s5 + $0x48] sm:$0xff] (%p389_p11) }
 0x863   : > { %10162 = vmatpush.msrb.mxu0 (%p389_p11), %v13042_v38 }
 0x865   : > { %10163 = vmatpush.msrb.mxu0 (%p389_p11), %v13041_v12 }
 0x869   : >> { %v10035_v9 = vld [vmem:[#allocation4 + $0x7e] ss:$2 sm:$0x1f]  ;;  %v10037_v45 = vld [vmem:[#allocation4 + $0x7f] ss:$2 sm:$0x1f] }
 0x86a   : >> { %v10038_v4 = vmax.f32 %v10035_v9, %v10037_v45  ;;  %391 = sbr.rel (!%p389_p11) target bundleno = 27 (0x1b), region = 346  ;;  %v13047_v9 = vld [vmem:[%s17029_s5 + $0x40] sm:$0xff] (%p389_p11)  ;;  %v13054_v45 = vld [vmem:[%s17029_s5 + $0x68] sm:$0xff] (%p389_p11) }
 0x86b   : > { %10334 = vmatpush.msra.mxu2 (%p389_p11), %v13054_v45 }
 0x86c   : >> { %v10039_v13 = vmax.f32 %v10033_v44, %v10038_v4 }
 0x86e   : >> { %13036 = vst.msk [vmem:[%s16668_s22 + $0x14] sm:$0x1f] %vm9985_vm3, %v10039_v13  ;;  %s11216_s22 = sshll.u32 (%p389_p11), %s17046_s16, 4  ;;  %s11217_s22 = int_to_ptr.vmem [resolvable:$true] %s11216_s22 }
 0x875   : > { %v10061_v50 = vld [vmem:[#allocation5 + $0x1] ss:$32 sm:$0x1]  ;;  %v10043_v43 = vld [vmem:[#allocation5] ss:$32 sm:$0x1] }
 0x876   : > { %v10062_v47 = vld [vmem:[#allocation5 + $0x1] ss:$32 sm:$0x2]  ;;  %v10044_v5 = vld [vmem:[#allocation5] ss:$32 sm:$0x2] }
 0x877   : > { %v10064_v20 = vld [vmem:[#allocation5 + $0x1] ss:$32 sm:$0x4]  ;;  %v10063_v53 = vor.u32 %v10062_v47, %v10061_v50  ;;  %v10046_v39 = vld [vmem:[#allocation5] ss:$32 sm:$0x4]  ;;  %v10045_v57 = vor.u32 %v10044_v5, %v10043_v43 }
 0x878   : > { %v10066_v58 = vld [vmem:[#allocation5 + $0x1] ss:$32 sm:$0x8]  ;;  %v10048_v48 = vld [vmem:[#allocation5] ss:$32 sm:$0x8] }
 0x879   : > { %v10065_v23 = vor.u32 %v10064_v20, %v10063_v53  ;;  %v10068_v26 = vld [vmem:[#allocation5 + $0x1] ss:$32 sm:$0x10]  ;;  %v10047_v60 = vor.u32 %v10046_v39, %v10045_v57  ;;  %v10050_v55 = vld [vmem:[#allocation5] ss:$32 sm:$0x10] }
 0x87a   : > { %v10070_v59 = vld [vmem:[#allocation5 + $0x1] ss:$32 sm:$0x20]  ;;  %v10127_v42 = vld [vmem:[#allocation5 + $0x2] ss:$32 sm:$0x1] }
 0x87b   : > { %v10067_v29 = vor.u32 %v10066_v58, %v10065_v23  ;;  %v10072_v41 = vld [vmem:[#allocation5 + $0x1] ss:$32 sm:$0x40]  ;;  %v10049_v27 = vor.u32 %v10048_v48, %v10047_v60  ;;  %v10128_v18 = vld [vmem:[#allocation5 + $0x2] ss:$32 sm:$0x2] }
 0x87c   : > { %v10130_v21 = vld [vmem:[#allocation5 + $0x2] ss:$32 sm:$0x4]  ;;  %v10074_v63 = vld [vmem:[#allocation5 + $0x1] ss:$32 sm:$0x80]  ;;  %v10129_v24 = vor.u32 %v10128_v18, %v10127_v42 }
 0x87d   : > { %v10069_v28 = vor.u32 %v10068_v26, %v10067_v29  ;;  %v10052_v61 = vld [vmem:[#allocation5] ss:$32 sm:$0x20]  ;;  %v10051_v51 = vor.u32 %v10050_v55, %v10049_v27  ;;  %v10132_v11 = vld [vmem:[#allocation5 + $0x2] ss:$32 sm:$0x8] }
 0x87e   : > { %v10054_v6 = vld [vmem:[#allocation5] ss:$32 sm:$0x40]  ;;  %v10131_v31 = vor.u32 %v10130_v21, %v10129_v24  ;;  %v10134_v56 = vld [vmem:[#allocation5 + $0x2] ss:$32 sm:$0x10] }
 0x87f   : > { %v10071_v36 = vor.u32 %v10070_v59, %v10069_v28  ;;  %v10170_v8 = vld [vmem:[#allocation5 + $0x3] ss:$32 sm:$0x1]  ;;  %v10053_v40 = vor.u32 %v10052_v61, %v10051_v51  ;;  %v10056_v0 = vld [vmem:[#allocation5] ss:$32 sm:$0x80] }
 0x880   : > { %v10171_v30 = vld [vmem:[#allocation5 + $0x3] ss:$32 sm:$0x2]  ;;  %v10133_v2 = vor.u32 %v10132_v11, %v10131_v31  ;;  %v10136_v49 = vld [vmem:[#allocation5 + $0x2] ss:$32 sm:$0x20] }
 0x881   : > { %v10073_v1 = vor.u32 %v10072_v41, %v10071_v36  ;;  %v10173_v33 = vld [vmem:[#allocation5 + $0x3] ss:$32 sm:$0x4]  ;;  %v10172_v3 = vor.u32 %v10171_v30, %v10170_v8  ;;  %v10055_v37 = vor.u32 %v10054_v6, %v10053_v40  ;;  %v10138_v34 = vld [vmem:[#allocation5 + $0x2] ss:$32 sm:$0x40] }
 0x882   : > { %v10175_v19 = vld [vmem:[#allocation5 + $0x3] ss:$32 sm:$0x8]  ;;  %v10135_v16 = vor.u32 %v10134_v56, %v10133_v2  ;;  %v10140_v22 = vld [vmem:[#allocation5 + $0x2] ss:$32 sm:$0x80] }
 0x883   : > { %v10075_v25 = vor.u32 %v10074_v63, %v10073_v1  ;;  %v10174_v7 = vor.u32 %v10173_v33, %v10172_v3  ;;  %v10177_v62 = vld [vmem:[#allocation5 + $0x3] ss:$32 sm:$0x10]  ;;  %v10057_v52 = vor.u32 %v10056_v0, %v10055_v37  ;;  %v10213_v44 = vld [vmem:[#allocation5 + $0x4] ss:$32 sm:$0x1] }
 0x884   : > { %v10137_v4 = vor.u32 %v10136_v49, %v10135_v16  ;;  %v10214_v15 = vld [vmem:[#allocation5 + $0x4] ss:$32 sm:$0x2]  ;;  %v10179_v46 = vld [vmem:[#allocation5 + $0x3] ss:$32 sm:$0x20] }
 0x885   : > { %13039 = vmatmul.msk.f32.vlgmr.msra.gmra.mxu0 %vm434_vm0, %v10075_v25  ;;  %v10176_v13 = vor.u32 %v10175_v19, %v10174_v7  ;;  %v10216_v35 = vld [vmem:[#allocation5 + $0x4] ss:$32 sm:$0x4]  ;;  %13040 = vmatmul.msk.f32.vlgmr.msra.gmra.mxu3 %vm434_vm0, %v10057_v52  ;;  %v10215_v50 = vor.u32 %v10214_v15, %v10213_v44  ;;  %v10181_v20 = vld [vmem:[#allocation5 + $0x3] ss:$32 sm:$0x40] }
 0x886   : > { %10248 = vmatpush.msra.mxu0 %v13048_v32  ;;  %v10139_v14 = vor.u32 %v10138_v34, %v10137_v4  ;;  %10291 = vmatpush.msra.mxu3 %v13051_v17  ;;  %v10218_v53 = vld [vmem:[#allocation5 + $0x4] ss:$32 sm:$0x8]  ;;  %v10256_v26 = vld [vmem:[#allocation5 + $0x5] ss:$32 sm:$0x1] }
 0x887   : > { %v10178_v47 = vor.u32 %v10177_v62, %v10176_v13  ;;  %v10217_v58 = vor.u32 %v10216_v35, %v10215_v50  ;;  %v10220_v23 = vld [vmem:[#allocation5 + $0x4] ss:$32 sm:$0x10]  ;;  %v10257_v39 = vld [vmem:[#allocation5 + $0x5] ss:$32 sm:$0x2] }
 0x888   : > { %10249 = vmatpush.msra.mxu0 %v13047_v9  ;;  %v10141_v43 = vor.u32 %v10140_v22, %v10139_v14  ;;  %10292 = vmatpush.msra.mxu3 %v13050_v54  ;;  %v10259_v29 = vld [vmem:[#allocation5 + $0x5] ss:$32 sm:$0x4]  ;;  %v10183_v59 = vld [vmem:[#allocation5 + $0x3] ss:$32 sm:$0x80]  ;;  %v10258_v48 = vor.u32 %v10257_v39, %v10256_v26 }
 0x889   : > { %v10180_v5 = vor.u32 %v10179_v46, %v10178_v47  ;;  %v10219_v57 = vor.u32 %v10218_v53, %v10217_v58  ;;  %v10222_v41 = vld [vmem:[#allocation5 + $0x4] ss:$32 sm:$0x20]  ;;  %v10261_v55 = vld [vmem:[#allocation5 + $0x5] ss:$32 sm:$0x8] }
 0x88a   : > { %v10224_v60 = vld [vmem:[#allocation5 + $0x4] ss:$32 sm:$0x40]  ;;  %v10260_v38 = vor.u32 %v10259_v29, %v10258_v48  ;;  %v10263_v12 = vld [vmem:[#allocation5 + $0x5] ss:$32 sm:$0x10] }
 0x88b   : > { %v10182_v28 = vor.u32 %v10181_v20, %v10180_v5  ;;  %v10221_v10 = vor.u32 %v10220_v23, %v10219_v57  ;;  %v13057_v42 = vld [vmem:[%s17029_s5 + $0x78] sm:$0xff]  ;;  %v13053_v36 = vld [vmem:[%s17029_s5 + $0x60] sm:$0xff]  ;;  %v10299_v18 = vld [vmem:[#allocation5 + $0x6] ss:$32 sm:$0x1] }
 0x88c   : > { %10335 = vmatpush.msra.mxu2 %v13053_v36  ;;  %v10300_v21 = vld [vmem:[#allocation5 + $0x6] ss:$32 sm:$0x2]  ;;  %v10226_v61 = vld [vmem:[#allocation5 + $0x4] ss:$32 sm:$0x80]  ;;  %v10262_v24 = vor.u32 %v10261_v55, %v10260_v38 }
 0x88d   : > { %13043 = vmatmul.msk.f32.vlgmr.msrb.gmra.mxu0 %vm434_vm0, %v10141_v43  ;;  %v10184_v27 = vor.u32 %v10183_v59, %v10182_v28  ;;  %v10223_v63 = vor.u32 %v10222_v41, %v10221_v10  ;;  %v10301_v1 = vor.u32 %v10300_v21, %v10299_v18  ;;  %v10302_v51 = vld [vmem:[#allocation5 + $0x6] ss:$32 sm:$0x4]  ;;  %v10265_v6 = vld [vmem:[#allocation5 + $0x5] ss:$32 sm:$0x20] }
 0x88e   : > { %v10304_v11 = vld [vmem:[#allocation5 + $0x6] ss:$32 sm:$0x8]  ;;  %v10264_v56 = vor.u32 %v10263_v12, %v10262_v24  ;;  %v10267_v8 = vld [vmem:[#allocation5 + $0x5] ss:$32 sm:$0x40] }
 0x88f   : > { %13046 = vmatmul.msk.f32.vlgmr.msrb.gmra.mxu3 %vm434_vm0, %v10184_v27  ;;  %v10225_v31 = vor.u32 %v10224_v60, %v10223_v63  ;;  %v10303_v25 = vor.u32 %v10302_v51, %v10301_v1  ;;  %v10306_v40 = vld [vmem:[#allocation5 + $0x6] ss:$32 sm:$0x10]  ;;  %v13066_v33 = vld [vmem:[%s17029_s5 + $0xa8] sm:$0xff]  ;;  %v13069_v35 = vld [vmem:[%s17029_s5 + $0xb8] sm:$0xff] }
 0x890   : > { %10377 = vmatpush.msrb.mxu3 %v13057_v42  ;;  %v13056_v30 = vld [vmem:[%s17029_s5 + $0x70] sm:$0xff]  ;;  %v10266_v49 = vor.u32 %v10265_v6, %v10264_v56  ;;  %10506 = vmatpush.msrb.mxu2 %v13066_v33  ;;  %v13060_v44 = vld [vmem:[%s17029_s5 + $0x88] sm:$0xff]  ;;  %v13065_v46 = vld [vmem:[%s17029_s5 + $0xa0] sm:$0xff] }
 0x891   : > { %v10342_v0 = vld [vmem:[#allocation5 + $0x7] ss:$32 sm:$0x1]  ;;  %v10227_v2 = vor.u32 %v10226_v61, %v10225_v31  ;;  %v10305_v3 = vor.u32 %v10304_v11, %v10303_v25  ;;  %v10269_v19 = vld [vmem:[#allocation5 + $0x5] ss:$32 sm:$0x80]  ;;  %10420 = vmatpush.msrb.mxu0 %v13060_v44 }
 0x892   : > { %10378 = vmatpush.msrb.mxu3 %v13056_v30  ;;  %v10343_v37 = vld [vmem:[#allocation5 + $0x7] ss:$32 sm:$0x2]  ;;  %v10308_v16 = vld [vmem:[#allocation5 + $0x6] ss:$32 sm:$0x20]  ;;  %v10268_v62 = vor.u32 %v10267_v8, %v10266_v49  ;;  %10507 = vmatpush.msrb.mxu2 %v13065_v46 }
 0x893   : > { %v10345_v34 = vld [vmem:[#allocation5 + $0x7] ss:$32 sm:$0x4]  ;;  %v10344_v7 = vor.u32 %v10343_v37, %v10342_v0  ;;  %v10307_v17 = vor.u32 %v10306_v40, %v10305_v3  ;;  %v10310_v32 = vld [vmem:[#allocation5 + $0x6] ss:$32 sm:$0x40] }
 0x894   : > { %v10347_v52 = vld [vmem:[#allocation5 + $0x7] ss:$32 sm:$0x8]  ;;  %v10312_v22 = vld [vmem:[#allocation5 + $0x6] ss:$32 sm:$0x80]  ;;  %v10270_v4 = vor.u32 %v10269_v19, %v10268_v62 }
 0x895   : > { %13049 = vmatmul.msk.f32.vlgmr.msra.gmra.mxu0 %vm434_vm0, %v10227_v2  ;;  %v10346_v9 = vor.u32 %v10345_v34, %v10344_v7  ;;  %v10349_v45 = vld [vmem:[#allocation5 + $0x7] ss:$32 sm:$0x10]  ;;  %v10309_v13 = vor.u32 %v10308_v16, %v10307_v17  ;;  %v13059_v54 = vld [vmem:[%s17029_s5 + $0x80] sm:$0xff]  ;;  %v13078_v48 = vld [vmem:[%s17029_s5 + $0xe8] sm:$0xff] }
 0x896   : > { %v10351_v15 = vld [vmem:[#allocation5 + $0x7] ss:$32 sm:$0x20]  ;;  %v10471_v14 = vld [vmem:[#allocation5 + $0xa] ss:$32 sm:$0x1]  ;;  %10421 = vmatpush.msrb.mxu0 %v13059_v54 }
 0x897   : > { %v10348_v50 = vor.u32 %v10347_v52, %v10346_v9  ;;  %v10472_v47 = vld [vmem:[#allocation5 + $0xa] ss:$32 sm:$0x2]  ;;  %13052 = vmatmul.msk.f32.vlgmr.msra.gmra.mxu3 %vm434_vm0, %v10270_v4  ;;  %v10311_v20 = vor.u32 %v10310_v32, %v10309_v13  ;;  %v13068_v53 = vld [vmem:[%s17029_s5 + $0xb0] sm:$0xff]  ;;  %v13072_v3 = vld [vmem:[%s17029_s5 + $0xc8] sm:$0xff] }
 0x898   : > { %v10473_v58 = vor.u32 %v10472_v47, %v10471_v14  ;;  %v10474_v23 = vld [vmem:[#allocation5 + $0xa] ss:$32 sm:$0x4]  ;;  %v10353_v43 = vld [vmem:[#allocation5 + $0x7] ss:$32 sm:$0x40]  ;;  %10549 = vmatpush.msra.mxu3 %v13069_v35  ;;  %10592 = vmatpush.msra.mxu0 %v13072_v3 }
 0x899   : > { %v10350_v26 = vor.u32 %v10349_v45, %v10348_v50  ;;  %v10476_v5 = vld [vmem:[#allocation5 + $0xa] ss:$32 sm:$0x8]  ;;  %v10313_v39 = vor.u32 %v10312_v22, %v10311_v20  ;;  %v10355_v29 = vld [vmem:[#allocation5 + $0x7] ss:$32 sm:$0x80] }
 0x89a   : > { %v10475_v59 = vor.u32 %v10474_v23, %v10473_v58  ;;  %v10478_v57 = vld [vmem:[#allocation5 + $0xa] ss:$32 sm:$0x10]  ;;  %10550 = vmatpush.msra.mxu3 %v13068_v53  ;;  %v10385_v60 = vld [vmem:[#allocation5 + $0x8] ss:$32 sm:$0x1] }
 0x89b   : > { %v10352_v41 = vor.u32 %v10351_v15, %v10350_v26  ;;  %v13063_v28 = vld [vmem:[%s17029_s5 + $0x98] sm:$0xff]  ;;  %13055 = vmatmul.msk.f32.vlgmr.msra.gmra.mxu2 %vm434_vm0, %v10313_v39  ;;  %v13062_v19 = vld [vmem:[%s17029_s5 + $0x90] sm:$0xff]  ;;  %v13077_v50 = vld [vmem:[%s17029_s5 + $0xe0] sm:$0xff] }
 0x89c   : > { %v10477_v55 = vor.u32 %v10476_v5, %v10475_v59  ;;  %10463 = vmatpush.msra.mxu1 %v13063_v28  ;;  %v10386_v10 = vld [vmem:[#allocation5 + $0x8] ss:$32 sm:$0x2]  ;;  %v10480_v42 = vld [vmem:[#allocation5 + $0xa] ss:$32 sm:$0x20]  ;;  %10678 = vmatpush.msra.mxu2 %v13078_v48 }
 0x89d   : > { %v10388_v38 = vld [vmem:[#allocation5 + $0x8] ss:$32 sm:$0x4]  ;;  %v10354_v12 = vor.u32 %v10353_v43, %v10352_v41  ;;  %v10387_v36 = vor.u32 %v10386_v10, %v10385_v60  ;;  %v10482_v18 = vld [vmem:[#allocation5 + $0xa] ss:$32 sm:$0x40] }
 0x89e   : > { %v10479_v27 = vor.u32 %v10478_v57, %v10477_v55  ;;  %v10390_v21 = vld [vmem:[#allocation5 + $0x8] ss:$32 sm:$0x8]  ;;  %v10514_v1 = vld [vmem:[#allocation5 + $0xb] ss:$32 sm:$0x1]  ;;  %10464 = vmatpush.msra.mxu1 %v13062_v19  ;;  %10679 = vmatpush.msra.mxu2 %v13077_v50 }
 0x89f   : > { %v10356_v63 = vor.u32 %v10355_v29, %v10354_v12  ;;  %v10389_v61 = vor.u32 %v10388_v38, %v10387_v36  ;;  %v10392_v24 = vld [vmem:[#allocation5 + $0x8] ss:$32 sm:$0x10]  ;;  %v10515_v6 = vld [vmem:[#allocation5 + $0xb] ss:$32 sm:$0x2] }
 0x8a0   : > { %v10481_v51 = vor.u32 %v10480_v42, %v10479_v27  ;;  %v10517_v11 = vld [vmem:[#allocation5 + $0xb] ss:$32 sm:$0x4]  ;;  %v10484_v31 = vld [vmem:[#allocation5 + $0xa] ss:$32 sm:$0x80]  ;;  %v10516_v25 = vor.u32 %v10515_v6, %v10514_v1 }
 0x8a1   : > { %13058 = vmatmul.msk.f32.vlgmr.msrb.gmra.mxu3 %vm434_vm0, %v10356_v63  ;;  %v10391_v56 = vor.u32 %v10390_v21, %v10389_v61  ;;  %v10394_v8 = vld [vmem:[#allocation5 + $0x8] ss:$32 sm:$0x20]  ;;  %v10519_v33 = vld [vmem:[#allocation5 + $0xb] ss:$32 sm:$0x8] }
 0x8a2   : > { %v10483_v40 = vor.u32 %v10482_v18, %v10481_v51  ;;  %v10396_v30 = vld [vmem:[#allocation5 + $0x8] ss:$32 sm:$0x40]  ;;  %v10518_v2 = vor.u32 %v10517_v11, %v10516_v25  ;;  %v10521_v49 = vld [vmem:[#allocation5 + $0xb] ss:$32 sm:$0x10] }
 0x8a3   : > { %v10393_v0 = vor.u32 %v10392_v24, %v10391_v56  ;;  %v13081_v37 = vld [vmem:[%s17029_s5 + $0xf8] sm:$0xff]  ;;  %v13071_v14 = vld [vmem:[%s17029_s5 + $0xc0] sm:$0xff]  ;;  %v13080_v53 = vld [vmem:[%s17029_s5 + $0xf0] sm:$0xff] }
 0x8a4   : > { %v10485_v34 = vor.u32 %v10484_v31, %v10483_v40  ;;  %10721 = vmatpush.msrb.mxu3 %v13081_v37  ;;  %v10428_v16 = vld [vmem:[#allocation5 + $0x9] ss:$32 sm:$0x1]  ;;  %v10520_v17 = vor.u32 %v10519_v33, %v10518_v2  ;;  %v10398_v22 = vld [vmem:[#allocation5 + $0x8] ss:$32 sm:$0x80]  ;;  %10593 = vmatpush.msra.mxu0 %v13071_v14 }
 0x8a5   : > { %v13075_v7 = vld [vmem:[%s17029_s5 + $0xd8] sm:$0xff]  ;;  %v10395_v62 = vor.u32 %v10394_v8, %v10393_v0  ;;  %v13074_v58 = vld [vmem:[%s17029_s5 + $0xd0] sm:$0xff]  ;;  %v13090_v10 = vld [vmem:[%s17029_s5 + $0x128] sm:$0xff] }
 0x8a6   : > { %v10429_v32 = vld [vmem:[#allocation5 + $0x9] ss:$32 sm:$0x2]  ;;  %13067 = vmatmul.msk.f32.vlgmr.msrb.gmra.mxu2 %vm434_vm0, %v10485_v34  ;;  %v10523_v9 = vld [vmem:[#allocation5 + $0xb] ss:$32 sm:$0x20]  ;;  %10635 = vmatpush.msrb.mxu1 %v13075_v7  ;;  %v10522_v4 = vor.u32 %v10521_v49, %v10520_v17 }
 0x8a7   : > { %v10431_v52 = vld [vmem:[#allocation5 + $0x9] ss:$32 sm:$0x4]  ;;  %v10430_v45 = vor.u32 %v10429_v32, %v10428_v16  ;;  %v10397_v44 = vor.u32 %v10396_v30, %v10395_v62  ;;  %v10525_v13 = vld [vmem:[#allocation5 + $0xb] ss:$32 sm:$0x40]  ;;  %10722 = vmatpush.msrb.mxu3 %v13080_v53  ;;  %10850 = vmatpush.msrb.mxu2 %v13090_v10 }
 0x8a8   : > { %v10433_v15 = vld [vmem:[#allocation5 + $0x9] ss:$32 sm:$0x8]  ;;  %v10527_v35 = vld [vmem:[#allocation5 + $0xb] ss:$32 sm:$0x80]  ;;  %v10524_v20 = vor.u32 %v10523_v9, %v10522_v4  ;;  %10636 = vmatpush.msrb.mxu1 %v13074_v58 }
 0x8a9   : > { %v10432_v46 = vor.u32 %v10431_v52, %v10430_v45  ;;  %v10435_v54 = vld [vmem:[#allocation5 + $0x9] ss:$32 sm:$0x10]  ;;  %v10399_v47 = vor.u32 %v10398_v22, %v10397_v44  ;;  %v10643_v23 = vld [vmem:[#allocation5 + $0xe] ss:$32 sm:$0x1] }
 0x8aa   : > { %v10644_v43 = vld [vmem:[#allocation5 + $0xe] ss:$32 sm:$0x2]  ;;  %v10526_v39 = vor.u32 %v10525_v13, %v10524_v20  ;;  %v10437_v29 = vld [vmem:[#allocation5 + $0x9] ss:$32 sm:$0x20] }
 0x8ab   : > { %v10434_v26 = vor.u32 %v10433_v15, %v10432_v46  ;;  %v10646_v5 = vld [vmem:[#allocation5 + $0xe] ss:$32 sm:$0x4]  ;;  %13061 = vmatmul.msk.f32.vlgmr.msrb.gmra.mxu0 %vm434_vm0, %v10399_v47  ;;  %v10645_v59 = vor.u32 %v10644_v43, %v10643_v23  ;;  %v10439_v41 = vld [vmem:[#allocation5 + $0x9] ss:$32 sm:$0x40] }
 0x8ac   : > { %v10648_v48 = vld [vmem:[#allocation5 + $0xe] ss:$32 sm:$0x8]  ;;  %v10528_v28 = vor.u32 %v10527_v35, %v10526_v39  ;;  %v13084_v38 = vld [vmem:[%s17029_s5 + $0x108] sm:$0xff]  ;;  %v13089_v53 = vld [vmem:[%s17029_s5 + $0x120] sm:$0xff] }
 0x8ad   : > { %v10436_v57 = vor.u32 %v10435_v54, %v10434_v26  ;;  %v10647_v60 = vor.u32 %v10646_v5, %v10645_v59  ;;  %v10650_v55 = vld [vmem:[#allocation5 + $0xe] ss:$32 sm:$0x10]  ;;  %v10557_v42 = vld [vmem:[#allocation5 + $0xc] ss:$32 sm:$0x1]  ;;  %10764 = vmatpush.msrb.mxu0 %v13084_v38  ;;  %10851 = vmatpush.msrb.mxu2 %v13089_v53 }
 0x8ae   : > { %v10558_v36 = vld [vmem:[#allocation5 + $0xc] ss:$32 sm:$0x2]  ;;  %13070 = vmatmul.msk.f32.vlgmr.msra.gmra.mxu3 %vm434_vm0, %v10528_v28  ;;  %v10441_v27 = vld [vmem:[#allocation5 + $0x9] ss:$32 sm:$0x80] }
 0x8af   : > { %v10438_v12 = vor.u32 %v10437_v29, %v10436_v57  ;;  %v10649_v18 = vor.u32 %v10648_v48, %v10647_v60  ;;  %v10559_v21 = vor.u32 %v10558_v36, %v10557_v42  ;;  %v10560_v63 = vld [vmem:[#allocation5 + $0xc] ss:$32 sm:$0x4]  ;;  %v10652_v24 = vld [vmem:[#allocation5 + $0xe] ss:$32 sm:$0x20] }
 0x8b0   : > { %v10562_v1 = vld [vmem:[#allocation5 + $0xc] ss:$32 sm:$0x8]  ;;  %v10654_v6 = vld [vmem:[#allocation5 + $0xe] ss:$32 sm:$0x40] }
 0x8b1   : > { %v10440_v61 = vor.u32 %v10439_v41, %v10438_v12  ;;  %v10651_v51 = vor.u32 %v10650_v55, %v10649_v18  ;;  %v10561_v11 = vor.u32 %v10560_v63, %v10559_v21  ;;  %v10564_v31 = vld [vmem:[#allocation5 + $0xc] ss:$32 sm:$0x10]  ;;  %v10686_v8 = vld [vmem:[#allocation5 + $0xf] ss:$32 sm:$0x1] }
 0x8b2   : > { %v10687_v25 = vld [vmem:[#allocation5 + $0xf] ss:$32 sm:$0x2]  ;;  %v10656_v30 = vld [vmem:[#allocation5 + $0xe] ss:$32 sm:$0x80] }
 0x8b3   : > { %v10442_v56 = vor.u32 %v10441_v27, %v10440_v61  ;;  %v10653_v40 = vor.u32 %v10652_v24, %v10651_v51  ;;  %v10563_v33 = vor.u32 %v10562_v1, %v10561_v11  ;;  %v10688_v0 = vor.u32 %v10687_v25, %v10686_v8  ;;  %v10689_v2 = vld [vmem:[#allocation5 + $0xf] ss:$32 sm:$0x4]  ;;  %v10566_v49 = vld [vmem:[#allocation5 + $0xc] ss:$32 sm:$0x20] }
 0x8b4   : > { %v10691_v3 = vld [vmem:[#allocation5 + $0xf] ss:$32 sm:$0x8]  ;;  %v10568_v19 = vld [vmem:[#allocation5 + $0xc] ss:$32 sm:$0x40] }
 0x8b5   : > { %13064 = vmatmul.msk.f32.vlgmr.msra.gmra.mxu1 %vm434_vm0, %v10442_v56  ;;  %v10655_v37 = vor.u32 %v10654_v6, %v10653_v40  ;;  %v10565_v34 = vor.u32 %v10564_v31, %v10563_v33  ;;  %v10690_v16 = vor.u32 %v10689_v2, %v10688_v0  ;;  %v10693_v7 = vld [vmem:[#allocation5 + $0xf] ss:$32 sm:$0x10]  ;;  %v10600_v17 = vld [vmem:[#allocation5 + $0xd] ss:$32 sm:$0x1] }
 0x8b6   : > { %v13093_v62 = vld [vmem:[%s17029_s5 + $0x138] sm:$0xff]  ;;  %v13083_v58 = vld [vmem:[%s17029_s5 + $0x100] sm:$0xff]  ;;  %v13092_v43 = vld [vmem:[%s17029_s5 + $0x130] sm:$0xff] }
 0x8b7   : > { %v13087_v32 = vld [vmem:[%s17029_s5 + $0x118] sm:$0xff]  ;;  %v10657_v52 = vor.u32 %v10656_v30, %v10655_v37  ;;  %v10567_v22 = vor.u32 %v10566_v49, %v10565_v34  ;;  %v10692_v9 = vor.u32 %v10691_v3, %v10690_v16  ;;  %10893 = vmatpush.msra.mxu3 %v13093_v62  ;;  %10765 = vmatpush.msrb.mxu0 %v13083_v58  ;;  %v13086_v5 = vld [vmem:[%s17029_s5 + $0x110] sm:$0xff]  ;;  %v10815_v39 = vld [vmem:[#allocation5 + $0x12] ss:$32 sm:$0x1] }
 0x8b8   : > { %v10601_v45 = vld [vmem:[#allocation5 + $0xd] ss:$32 sm:$0x2]  ;;  %10807 = vmatpush.msra.mxu1 %v13087_v32  ;;  %v10570_v4 = vld [vmem:[#allocation5 + $0xc] ss:$32 sm:$0x80] }
 0x8b9   : > { %v10603_v44 = vld [vmem:[#allocation5 + $0xd] ss:$32 sm:$0x4]  ;;  %v10695_v13 = vld [vmem:[#allocation5 + $0xf] ss:$32 sm:$0x20]  ;;  %v10602_v15 = vor.u32 %v10601_v45, %v10600_v17  ;;  %13079 = vmatmul.msk.f32.vlgmr.msra.gmra.mxu2 %vm434_vm0, %v10657_v52  ;;  %v10569_v35 = vor.u32 %v10568_v19, %v10567_v22  ;;  %v10694_v46 = vor.u32 %v10693_v7, %v10692_v9  ;;  %10894 = vmatpush.msra.mxu3 %v13092_v43 }
 0x8ba   : > { %v10697_v54 = vld [vmem:[#allocation5 + $0xf] ss:$32 sm:$0x40]  ;;  %v10605_v50 = vld [vmem:[#allocation5 + $0xd] ss:$32 sm:$0x8]  ;;  %10808 = vmatpush.msra.mxu1 %v13086_v5 }
 0x8bb   : > { %v10699_v14 = vld [vmem:[#allocation5 + $0xf] ss:$32 sm:$0x80]  ;;  %v10604_v47 = vor.u32 %v10603_v44, %v10602_v15  ;;  %v10607_v20 = vld [vmem:[#allocation5 + $0xd] ss:$32 sm:$0x10]  ;;  %v10571_v23 = vor.u32 %v10570_v4, %v10569_v35  ;;  %v10696_v26 = vor.u32 %v10695_v13, %v10694_v46 }
 0x8bc   : > { %v10816_v59 = vld [vmem:[#allocation5 + $0x12] ss:$32 sm:$0x2]  ;;  %v10609_v48 = vld [vmem:[#allocation5 + $0xd] ss:$32 sm:$0x20] }
 0x8bd   : > { %v10606_v29 = vor.u32 %v10605_v50, %v10604_v47  ;;  %v10818_v57 = vld [vmem:[#allocation5 + $0x12] ss:$32 sm:$0x4]  ;;  %13073 = vmatmul.msk.f32.vlgmr.msra.gmra.mxu0 %vm434_vm0, %v10571_v23  ;;  %v10698_v41 = vor.u32 %v10697_v54, %v10696_v26  ;;  %v10817_v28 = vor.u32 %v10816_v59, %v10815_v39  ;;  %v10611_v55 = vld [vmem:[#allocation5 + $0xd] ss:$32 sm:$0x40] }
 0x8be   : > { %v10820_v10 = vld [vmem:[#allocation5 + $0x12] ss:$32 sm:$0x8]  ;;  %v13102_v36 = vld [vmem:[%s17029_s5 + $0x168] sm:$0xff]  ;;  %v13105_v22 = vld [vmem:[%s17029_s5 + $0x178] sm:$0xff] }
 0x8bf   : > { %v10608_v60 = vor.u32 %v10607_v20, %v10606_v29  ;;  %v10700_v38 = vor.u32 %v10699_v14, %v10698_v41  ;;  %v10819_v12 = vor.u32 %v10818_v57, %v10817_v28  ;;  %v10822_v42 = vld [vmem:[#allocation5 + $0x12] ss:$32 sm:$0x10]  ;;  %v13096_v27 = vld [vmem:[%s17029_s5 + $0x148] sm:$0xff]  ;;  %11022 = vmatpush.msra.mxu2 %v13102_v36  ;;  %v13099_v45 = vld [vmem:[%s17029_s5 + $0x158] sm:$0xff] }
 0x8c0   : > { %v10729_v21 = vld [vmem:[#allocation5 + $0x10] ss:$32 sm:$0x1]  ;;  %10936 = vmatpush.msra.mxu0 %v13096_v27  ;;  %v10613_v61 = vld [vmem:[#allocation5 + $0xd] ss:$32 sm:$0x80] }
 0x8c1   : > { %v10610_v18 = vor.u32 %v10609_v48, %v10608_v60  ;;  %v10730_v63 = vld [vmem:[#allocation5 + $0x10] ss:$32 sm:$0x2]  ;;  %13082 = vmatmul.msk.f32.vlgmr.msrb.gmra.mxu3 %vm434_vm0, %v10700_v38  ;;  %v10821_v24 = vor.u32 %v10820_v10, %v10819_v12  ;;  %v10824_v11 = vld [vmem:[#allocation5 + $0x12] ss:$32 sm:$0x20] }
 0x8c2   : > { %v10731_v1 = vor.u32 %v10730_v63, %v10729_v21  ;;  %v10732_v51 = vld [vmem:[#allocation5 + $0x10] ss:$32 sm:$0x4]  ;;  %v10826_v8 = vld [vmem:[#allocation5 + $0x12] ss:$32 sm:$0x40]  ;;  %11065 = vmatpush.msrb.mxu3 %v13105_v22 }
 0x8c3   : > { %v10612_v6 = vor.u32 %v10611_v55, %v10610_v18  ;;  %v10734_v31 = vld [vmem:[#allocation5 + $0x10] ss:$32 sm:$0x8]  ;;  %v10823_v56 = vor.u32 %v10822_v42, %v10821_v24  ;;  %v10858_v33 = vld [vmem:[#allocation5 + $0x13] ss:$32 sm:$0x1] }
 0x8c4   : > { %v10733_v25 = vor.u32 %v10732_v51, %v10731_v1  ;;  %v10736_v40 = vld [vmem:[#allocation5 + $0x10] ss:$32 sm:$0x10]  ;;  %v10859_v0 = vld [vmem:[#allocation5 + $0x13] ss:$32 sm:$0x2] }
 0x8c5   : > { %v10614_v30 = vor.u32 %v10613_v61, %v10612_v6  ;;  %v10825_v2 = vor.u32 %v10824_v11, %v10823_v56  ;;  %v10828_v49 = vld [vmem:[#allocation5 + $0x12] ss:$32 sm:$0x80]  ;;  %v10860_v37 = vor.u32 %v10859_v0, %v10858_v33  ;;  %v10861_v34 = vld [vmem:[#allocation5 + $0x13] ss:$32 sm:$0x4] }
 0x8c6   : > { %v10735_v3 = vor.u32 %v10734_v31, %v10733_v25  ;;  %v10738_v19 = vld [vmem:[#allocation5 + $0x10] ss:$32 sm:$0x20]  ;;  %v10863_v16 = vld [vmem:[#allocation5 + $0x13] ss:$32 sm:$0x8] }
 0x8c7   : > { %13076 = vmatmul.msk.f32.vlgmr.msrb.gmra.mxu1 %vm434_vm0, %v10614_v30  ;;  %v10827_v7 = vor.u32 %v10826_v8, %v10825_v2  ;;  %v10740_v17 = vld [vmem:[#allocation5 + $0x10] ss:$32 sm:$0x40]  ;;  %v10862_v32 = vor.u32 %v10861_v34, %v10860_v37  ;;  %v10865_v52 = vld [vmem:[#allocation5 + $0x13] ss:$32 sm:$0x10] }
 0x8c8   : > { %v10737_v62 = vor.u32 %v10736_v40, %v10735_v3  ;;  %v10772_v9 = vld [vmem:[#allocation5 + $0x11] ss:$32 sm:$0x1]  ;;  %10979 = vmatpush.msrb.mxu1 %v13099_v45  ;;  %v10742_v46 = vld [vmem:[#allocation5 + $0x10] ss:$32 sm:$0x80] }
 0x8c9   : > { %v10829_v44 = vor.u32 %v10828_v49, %v10827_v7  ;;  %v10864_v13 = vor.u32 %v10863_v16, %v10862_v32  ;;  %v10773_v15 = vld [vmem:[#allocation5 + $0x11] ss:$32 sm:$0x2]  ;;  %v10867_v54 = vld [vmem:[#allocation5 + $0x13] ss:$32 sm:$0x20] }
 0x8ca   : > { %v10739_v4 = vor.u32 %v10738_v19, %v10737_v62  ;;  %v10775_v35 = vld [vmem:[#allocation5 + $0x11] ss:$32 sm:$0x4]  ;;  %v10774_v50 = vor.u32 %v10773_v15, %v10772_v9  ;;  %v10869_v20 = vld [vmem:[#allocation5 + $0x13] ss:$32 sm:$0x40] }
 0x8cb   : > { %13091 = vmatmul.msk.f32.vlgmr.msrb.gmra.mxu2 %vm434_vm0, %v10829_v44  ;;  %v10866_v47 = vor.u32 %v10865_v52, %v10864_v13  ;;  %v10777_v53 = vld [vmem:[#allocation5 + $0x11] ss:$32 sm:$0x8]  ;;  %v10871_v58 = vld [vmem:[#allocation5 + $0x13] ss:$32 sm:$0x80] }
 0x8cc   : > { %v10741_v14 = vor.u32 %v10740_v17, %v10739_v4  ;;  %v10776_v23 = vor.u32 %v10775_v35, %v10774_v50  ;;  %v10779_v26 = vld [vmem:[#allocation5 + $0x11] ss:$32 sm:$0x10]  ;;  %v13104_v59 = vld [vmem:[%s17029_s5 + $0x170] sm:$0xff]  ;;  %v13108_v45 = vld [vmem:[%s17029_s5 + $0x188] sm:$0xff] }
 0x8cd   : > { %v13101_v43 = vld [vmem:[%s17029_s5 + $0x160] sm:$0xff]  ;;  %v10868_v29 = vor.u32 %v10867_v54, %v10866_v47  ;;  %v13098_v57 = vld [vmem:[%s17029_s5 + $0x150] sm:$0xff]  ;;  %11066 = vmatpush.msrb.mxu3 %v13104_v59 }
 0x8ce   : > { %v13095_v5 = vld [vmem:[%s17029_s5 + $0x140] sm:$0xff]  ;;  %v10743_v39 = vor.u32 %v10742_v46, %v10741_v14  ;;  %11023 = vmatpush.msra.mxu2 %v13101_v43  ;;  %v10778_v48 = vor.u32 %v10777_v53, %v10776_v23  ;;  %10980 = vmatpush.msrb.mxu1 %v13098_v57 }
 0x8cf   : > { %10937 = vmatpush.msra.mxu0 %v13095_v5  ;;  %v10987_v41 = vld [vmem:[#allocation5 + $0x16] ss:$32 sm:$0x1]  ;;  %v10870_v55 = vor.u32 %v10869_v20, %v10868_v29  ;;  %v10781_v10 = vld [vmem:[#allocation5 + $0x11] ss:$32 sm:$0x20] }
 0x8d0   : > { %v10988_v28 = vld [vmem:[#allocation5 + $0x16] ss:$32 sm:$0x2]  ;;  %13085 = vmatmul.msk.f32.vlgmr.msrb.gmra.mxu0 %vm434_vm0, %v10743_v39  ;;  %v10780_v12 = vor.u32 %v10779_v26, %v10778_v48  ;;  %v10783_v42 = vld [vmem:[#allocation5 + $0x11] ss:$32 sm:$0x40] }
 0x8d1   : > { %v10990_v60 = vld [vmem:[#allocation5 + $0x16] ss:$32 sm:$0x4]  ;;  %v10989_v38 = vor.u32 %v10988_v28, %v10987_v41  ;;  %v10872_v27 = vor.u32 %v10871_v58, %v10870_v55  ;;  %v10901_v63 = vld [vmem:[#allocation5 + $0x14] ss:$32 sm:$0x1]  ;;  %11108 = vmatpush.msrb.mxu0 %v13108_v45 }
 0x8d2   : > { %v10992_v36 = vld [vmem:[#allocation5 + $0x16] ss:$32 sm:$0x8]  ;;  %v10782_v61 = vor.u32 %v10781_v10, %v10780_v12  ;;  %v10902_v24 = vld [vmem:[#allocation5 + $0x14] ss:$32 sm:$0x2] }
 0x8d3   : > { %v10991_v18 = vor.u32 %v10990_v60, %v10989_v38  ;;  %v10994_v21 = vld [vmem:[#allocation5 + $0x16] ss:$32 sm:$0x10]  ;;  %v10904_v1 = vld [vmem:[#allocation5 + $0x14] ss:$32 sm:$0x4]  ;;  %13094 = vmatmul.msk.f32.vlgmr.msra.gmra.mxu3 %vm434_vm0, %v10872_v27  ;;  %v10903_v31 = vor.u32 %v10902_v24, %v10901_v63 }
 0x8d4   : > { %v10785_v51 = vld [vmem:[#allocation5 + $0x11] ss:$32 sm:$0x80]  ;;  %v10996_v11 = vld [vmem:[#allocation5 + $0x16] ss:$32 sm:$0x20]  ;;  %v10784_v56 = vor.u32 %v10783_v42, %v10782_v61 }
 0x8d5   : > { %v10993_v6 = vor.u32 %v10992_v36, %v10991_v18  ;;  %v10998_v8 = vld [vmem:[#allocation5 + $0x16] ss:$32 sm:$0x40]  ;;  %v10906_v25 = vld [vmem:[#allocation5 + $0x14] ss:$32 sm:$0x8]  ;;  %v10905_v30 = vor.u32 %v10904_v1, %v10903_v31 }
 0x8d6   : > { %v10908_v33 = vld [vmem:[#allocation5 + $0x14] ss:$32 sm:$0x10]  ;;  %v11030_v0 = vld [vmem:[#allocation5 + $0x17] ss:$32 sm:$0x1]  ;;  %v10786_v2 = vor.u32 %v10785_v51, %v10784_v56 }
 0x8d7   : > { %v10995_v40 = vor.u32 %v10994_v21, %v10993_v6  ;;  %v11031_v49 = vld [vmem:[#allocation5 + $0x17] ss:$32 sm:$0x2]  ;;  %v11000_v34 = vld [vmem:[#allocation5 + $0x16] ss:$32 sm:$0x80]  ;;  %v10907_v19 = vor.u32 %v10906_v25, %v10905_v30 }
 0x8d8   : > { %v11033_v3 = vld [vmem:[#allocation5 + $0x17] ss:$32 sm:$0x4]  ;;  %v10910_v16 = vld [vmem:[#allocation5 + $0x14] ss:$32 sm:$0x20]  ;;  %v11032_v7 = vor.u32 %v11031_v49, %v11030_v0  ;;  %13088 = vmatmul.msk.f32.vlgmr.msra.gmra.mxu1 %vm434_vm0, %v10786_v2 }
 0x8d9   : > { %v10997_v37 = vor.u32 %v10996_v11, %v10995_v40  ;;  %v10912_v62 = vld [vmem:[#allocation5 + $0x14] ss:$32 sm:$0x40]  ;;  %v11035_v17 = vld [vmem:[#allocation5 + $0x17] ss:$32 sm:$0x8]  ;;  %v10909_v52 = vor.u32 %v10908_v33, %v10907_v19 }
 0x8da   : > { %v11034_v22 = vor.u32 %v11033_v3, %v11032_v7  ;;  %v11037_v9 = vld [vmem:[#allocation5 + $0x17] ss:$32 sm:$0x10]  ;;  %v10944_v4 = vld [vmem:[#allocation5 + $0x15] ss:$32 sm:$0x1] }
 0x8db   : > { %v10999_v32 = vor.u32 %v10998_v8, %v10997_v37  ;;  %v13107_v44 = vld [vmem:[%s17029_s5 + $0x180] sm:$0xff]  ;;  %v10911_v35 = vor.u32 %v10910_v16, %v10909_v52  ;;  %v11073_v5 = vld [vmem:[#allocation5 + $0x18] ss:$32 sm:$0x1]  ;;  %v11136_v0 = vld [vmem:[%s17031_s7 + $0x78] sm:$0xff] }
 0x8dc   : > { %v10945_v13 = vld [vmem:[#allocation5 + $0x15] ss:$32 sm:$0x2]  ;;  %v10914_v46 = vld [vmem:[#allocation5 + $0x14] ss:$32 sm:$0x80]  ;;  %v11036_v54 = vor.u32 %v11035_v17, %v11034_v22  ;;  %11109 = vmatpush.msrb.mxu0 %v13107_v44  ;;  %11141 = vmatpush.msra.mxu1 %v11136_v0 }
 0x8dd   : > { %v11001_v15 = vor.u32 %v11000_v34, %v10999_v32  ;;  %v10946_v50 = vor.u32 %v10945_v13, %v10944_v4  ;;  %v10947_v14 = vld [vmem:[#allocation5 + $0x15] ss:$32 sm:$0x4]  ;;  %v11039_v47 = vld [vmem:[#allocation5 + $0x17] ss:$32 sm:$0x20]  ;;  %v10913_v53 = vor.u32 %v10912_v62, %v10911_v35 }
 0x8de   : > { %v10949_v20 = vld [vmem:[#allocation5 + $0x15] ss:$32 sm:$0x8]  ;;  %v11038_v58 = vor.u32 %v11037_v9, %v11036_v54  ;;  %v11041_v23 = vld [vmem:[#allocation5 + $0x17] ss:$32 sm:$0x40] }
 0x8df   : > { %13103 = vmatmul.msk.f32.vlgmr.msra.gmra.mxu2 %vm434_vm0, %v11001_v15  ;;  %v10948_v26 = vor.u32 %v10947_v14, %v10946_v50  ;;  %v10951_v43 = vld [vmem:[#allocation5 + $0x15] ss:$32 sm:$0x10]  ;;  %v11074_v39 = vld [vmem:[#allocation5 + $0x18] ss:$32 sm:$0x2]  ;;  %v10915_v29 = vor.u32 %v10914_v46, %v10913_v53 }
 0x8e0   : > { %v11040_v59 = vor.u32 %v11039_v47, %v11038_v58  ;;  %v11043_v57 = vld [vmem:[#allocation5 + $0x17] ss:$32 sm:$0x80]  ;;  %v11075_v48 = vor.u32 %v11074_v39, %v11073_v5  ;;  %v11076_v28 = vld [vmem:[#allocation5 + $0x18] ss:$32 sm:$0x4] }
 0x8e1   : > { %v10950_v41 = vor.u32 %v10949_v20, %v10948_v26  ;;  %v10953_v60 = vld [vmem:[#allocation5 + $0x15] ss:$32 sm:$0x20]  ;;  %v11078_v55 = vld [vmem:[#allocation5 + $0x18] ss:$32 sm:$0x8]  ;;  %13097 = vmatmul.msk.f32.vlgmr.msra.gmra.mxu0 %vm434_vm0, %v10915_v29 }
 0x8e2   : > { %v11042_v10 = vor.u32 %v11041_v23, %v11040_v59  ;;  %v10955_v12 = vld [vmem:[#allocation5 + $0x15] ss:$32 sm:$0x40]  ;;  %v11077_v42 = vor.u32 %v11076_v28, %v11075_v48  ;;  %v11080_v36 = vld [vmem:[#allocation5 + $0x18] ss:$32 sm:$0x10] }
 0x8e3   : > { %v10952_v38 = vor.u32 %v10951_v43, %v10950_v41  ;;  %v10957_v63 = vld [vmem:[#allocation5 + $0x15] ss:$32 sm:$0x80]  ;;  %v11082_v61 = vld [vmem:[#allocation5 + $0x18] ss:$32 sm:$0x20] }
 0x8e4   : > { %v11044_v27 = vor.u32 %v11043_v57, %v11042_v10  ;;  %v11079_v21 = vor.u32 %v11078_v55, %v11077_v42  ;;  %v11084_v51 = vld [vmem:[#allocation5 + $0x18] ss:$32 sm:$0x40]  ;;  %v11135_v19 = vld [vmem:[%s17031_s7 + $0x70] sm:$0xff]  ;;  %v11133_v62 = vld [vmem:[%s17031_s7 + $0x60] sm:$0xff] }
 0x8e5   : > { %v10954_v18 = vor.u32 %v10953_v60, %v10952_v38  ;;  %v11086_v31 = vld [vmem:[#allocation5 + $0x18] ss:$32 sm:$0x80]  ;;  %11142 = vmatpush.msra.mxu1 %v11135_v19  ;;  %v11132_v9 = vld [vmem:[%s17031_s7 + $0x58] sm:$0xff]  ;;  %v11131_v15 = vld [vmem:[%s17031_s7 + $0x50] sm:$0xff] }
 0x8e6   : > { %13106 = vmatmul.msk.f32.vlgmr.msrb.gmra.mxu3 %vm434_vm0, %v11044_v27  ;;  %v11081_v1 = vor.u32 %v11080_v36, %v11079_v21  ;;  %v11134_v16 = vld [vmem:[%s17031_s7 + $0x68] sm:$0xff]  ;;  %v11129_v50 = vld [vmem:[%s17031_s7 + $0x40] sm:$0xff]  ;;  %v11128_v53 = vld [vmem:[%s17031_s7 + $0x38] sm:$0xff] }
 0x8e7   : > { %v10956_v24 = vor.u32 %v10955_v12, %v10954_v18  ;;  %11143 = vmatpush.msra.mxu1 %v11134_v16  ;;  %v11130_v54 = vld [vmem:[%s17031_s7 + $0x48] sm:$0xff]  ;;  %v11127_v43 = vld [vmem:[%s17031_s7 + $0x30] sm:$0xff]  ;;  %v11125_v59 = vld [vmem:[%s17031_s7 + $0x20] sm:$0xff] }
 0x8e8   : > { %v11083_v11 = vor.u32 %v11082_v61, %v11081_v1  ;;  %v11126_v39 = vld [vmem:[%s17031_s7 + $0x28] sm:$0xff]  ;;  %v11124_v41 = vld [vmem:[%s17031_s7 + $0x18] sm:$0xff]  ;;  %v11123_v28 = vld [vmem:[%s17031_s7 + $0x10] sm:$0xff] }
 0x8e9   : > { %v10958_v6 = vor.u32 %v10957_v63, %v10956_v24  ;;  %11144 = vmatpush.msra.mxu1 %v11133_v62  ;;  %v11122_v55 = vld [vmem:[%s17031_s7 + $0x8] sm:$0xff]  ;;  %v11121_v38 = vld [vmem:[%s17031_s7] sm:$0xff]  ;;  %v11177_v42 = vld [vmem:[%s17033_s9 + $0x78] sm:$0xff] }
 0x8ea   : > { %v11085_v56 = vor.u32 %v11084_v51, %v11083_v11  ;;  %v11176_v36 = vld [vmem:[%s17033_s9 + $0x70] sm:$0xff]  ;;  %11182 = vmatpush.msrb.mxu2 %v11177_v42  ;;  %v11175_v18 = vld [vmem:[%s17033_s9 + $0x68] sm:$0xff]  ;;  %v11174_v63 = vld [vmem:[%s17033_s9 + $0x60] sm:$0xff] }
 0x8eb   : > { %13100 = vmatmul.msk.f32.vlgmr.msrb.gmra.mxu1 %vm434_vm0, %v10958_v6  ;;  %v11173_v24 = vld [vmem:[%s17033_s9 + $0x58] sm:$0xff]  ;;  %v11172_v51 = vld [vmem:[%s17033_s9 + $0x50] sm:$0xff]  ;;  %v11171_v11 = vld [vmem:[%s17033_s9 + $0x48] sm:$0xff] }
 0x8ec   : > { %v11087_v8 = vor.u32 %v11086_v31, %v11085_v56  ;;  %11145 = vmatpush.msra.mxu1 %v11132_v9  ;;  %11183 = vmatpush.msrb.mxu2 %v11176_v36  ;;  %v11170_v56 = vld [vmem:[%s17033_s9 + $0x40] sm:$0xff]  ;;  %v11165_v19 = vld [vmem:[%s17033_s9 + $0x18] sm:$0xff]  ;;  %v11163_v9 = vld [vmem:[%s17033_s9 + $0x8] sm:$0xff] }
 0x8ed   : > { %v13169_v62 = vld [vmem:[%s17030_s6] ss:$0 sm:$0xff] }
 0x8ee   : > { %13109 = vmatmul.msk.f32.vlgmr.msrb.gmra.mxu0 %vm434_vm0, %v11087_v8  ;;  %11146 = vmatpush.msra.mxu1 %v11131_v15 }
 0x8ef   : > { %11184 = vmatpush.msrb.mxu2 %v11175_v18 }
 0x8f0   : > { %11147 = vmatpush.msra.mxu1 %v11130_v54 }
 0x8f1   : > { %11185 = vmatpush.msrb.mxu2 %v11174_v63 }
 0x8f2   : > { %11148 = vmatpush.msra.mxu1 %v11129_v50 }
 0x8f3   : > { %11186 = vmatpush.msrb.mxu2 %v11173_v24 }
 0x8f4   : > { %11149 = vmatpush.msra.mxu1 %v11128_v53 }
 0x8f5   : > { %11187 = vmatpush.msrb.mxu2 %v11172_v51 }
 0x8f6   : > { %11150 = vmatpush.msra.mxu1 %v11127_v43 }
 0x8f7   : > { %11188 = vmatpush.msrb.mxu2 %v11171_v11 }
 0x8f8   : > { %11151 = vmatpush.msra.mxu1 %v11126_v39 }
 0x8f9   : > { %11189 = vmatpush.msrb.mxu2 %v11170_v56 }
 0x8fa   : > { %11152 = vmatpush.msra.mxu1 %v11125_v59 }
 0x8fc   : > { %11153 = vmatpush.msra.mxu1 %v11124_v41 }
 0x8fe   : > { %11154 = vmatpush.msra.mxu1 %v11123_v28 }
 0x900   : > { %11155 = vmatpush.msra.mxu1 %v11122_v55 }
 0x902   : > { %v10100_v40 = vpop.f32.mrf.mxu0  ;;  %11156 = vmatpush.msra.mxu1 %v11121_v38 }
 0x908   : > { %v10123_v25 = vpop.f32.mrf.mxu3 }
 0x909   : > { %v10124_v2 = vadd.f32 %v10123_v25, %v10100_v40  ;;  %v11169_v25 = vld [vmem:[%s17033_s9 + $0x38] sm:$0xff] }
 0x90a   : > { %v10165_v33 = vpop.f32.mrf.mxu0  ;;  %11190 = vmatpush.msrb.mxu2 %v11169_v25 }
 0x90b   : > { %v10168_v49 = vadd.f32 %v10165_v33, %v10124_v2  ;;  %v11167_v33 = vld [vmem:[%s17033_s9 + $0x28] sm:$0xff] }
 0x912   : > { %v10208_v30 = vpop.f32.mrf.mxu3  ;;  %v10251_v34 = vpop.f32.mrf.mxu0 }
 0x913   : > { %v10211_v37 = vadd.f32 %v10208_v30, %v10168_v49  ;;  %v11168_v30 = vld [vmem:[%s17033_s9 + $0x30] sm:$0xff] }
 0x914   : > { %11191 = vmatpush.msrb.mxu2 %v11168_v30 }
 0x915   : > { %v10254_v7 = vadd.f32 %v10251_v34, %v10211_v37 }
 0x916   : > { %11192 = vmatpush.msrb.mxu2 %v11167_v33 }
 0x91a   : > { %v10294_v3 = vpop.f32.mrf.mxu3 }
 0x91b   : > { %v10297_v17 = vadd.f32 %v10294_v3, %v10254_v7  ;;  %v11166_v3 = vld [vmem:[%s17033_s9 + $0x20] sm:$0xff] }
 0x91c   : > { %11193 = vmatpush.msrb.mxu2 %v11166_v3 }
 0x91e   : > { %v10337_v32 = vpop.f32.mrf.mxu2  ;;  %11194 = vmatpush.msrb.mxu2 %v11165_v19 }
 0x91f   : > { %v10340_v22 = vadd.f32 %v10337_v32, %v10297_v17 }
 0x924   : > { %v10380_v52 = vpop.f32.mrf.mxu3 }
 0x925   : > { %v10383_v45 = vadd.f32 %v10380_v52, %v10340_v22  ;;  %v11164_v22 = vld [vmem:[%s17033_s9 + $0x10] sm:$0xff] }
 0x926   : > { %11195 = vmatpush.msrb.mxu2 %v11164_v22 }
 0x928   : > { %v10423_v44 = vpop.f32.mrf.mxu0  ;;  %11196 = vmatpush.msrb.mxu2 %v11163_v9 }
 0x929   : > { %v10426_v4 = vadd.f32 %v10423_v44, %v10383_v45  ;;  %v10509_v46 = vpop.f32.mrf.mxu2  ;;  %v11162_v45 = vld [vmem:[%s17033_s9] sm:$0xff] }
 0x92a   : > { %11197 = vmatpush.msrb.mxu2 %v11162_v45  ;;  %v13170_v44 = vld [vmem:[%s17032_s8] ss:$0 sm:$0xff] }
 0x931   : > { %v10552_v47 = vpop.f32.mrf.mxu3 }
 0x932   : > { %v10466_v13 = vpop.f32.mrf.mxu1 }
 0x933   : > { %v10469_v35 = vadd.f32 %v10466_v13, %v10426_v4 }
 0x935   : > { %v10512_v14 = vadd.f32 %v10509_v46, %v10469_v35  ;;  %v13171_v35 = vld [vmem:[%s17034_s10] ss:$0 sm:$0xff] }
 0x937   : > { %v10555_v20 = vadd.f32 %v10552_v47, %v10512_v14 }
 0x93a   : > { %v10595_v58 = vpop.f32.mrf.mxu0 }
 0x93b   : > { %v10598_v23 = vadd.f32 %v10595_v58, %v10555_v20 }
 0x93c   : > { %v10681_v29 = vpop.f32.mrf.mxu2 }
 0x944   : > { %v10638_v26 = vpop.f32.mrf.mxu1  ;;  %v10724_v48 = vpop.f32.mrf.mxu3 }
 0x945   : > { %v10641_v5 = vadd.f32 %v10638_v26, %v10598_v23 }
 0x947   : > { %v10684_v57 = vadd.f32 %v10681_v29, %v10641_v5 }
 0x949   : > { %v10727_v60 = vadd.f32 %v10724_v48, %v10684_v57 }
 0x94d   : > { %v10767_v10 = vpop.f32.mrf.mxu0 }
 0x94e   : > { %v10770_v12 = vadd.f32 %v10767_v10, %v10727_v60  ;;  %v10853_v61 = vpop.f32.mrf.mxu2 }
 0x955   : > { %v10810_v27 = vpop.f32.mrf.mxu1 }
 0x956   : > { %v10813_v21 = vadd.f32 %v10810_v27, %v10770_v12  ;;  %v10896_v6 = vpop.f32.mrf.mxu3 }
 0x958   : > { %v10856_v1 = vadd.f32 %v10853_v61, %v10813_v21 }
 0x95a   : > { %v10899_v31 = vadd.f32 %v10896_v6, %v10856_v1 }
 0x95e   : > { %v10939_v8 = vpop.f32.mrf.mxu0 }
 0x95f   : > { %v10942_v40 = vadd.f32 %v10939_v8, %v10899_v31 }
 0x962   : > { %v11025_v2 = vpop.f32.mrf.mxu2 }
 0x968   : > { %v10982_v0 = vpop.f32.mrf.mxu1 }
 0x969   : > { %v10985_v49 = vadd.f32 %v10982_v0, %v10942_v40  ;;  %v11068_v37 = vpop.f32.mrf.mxu3 }
 0x96b   : > { %v11028_v34 = vadd.f32 %v11025_v2, %v10985_v49  ;;  %v11111_v16 = vpop.f32.mrf.mxu0 }
 0x96d   : > { %v11071_v7 = vadd.f32 %v11068_v37, %v11028_v34 }
 0x96f   : > { %v11114_v17 = vadd.f32 %v11111_v16, %v11071_v7 }
 0x971   : > { %v11119_v32 = vadd.f32 %v13169_v62, %v11114_v17 }
 0x973   : > { %v11120_v52 = vmax.f32 %v11119_v32, 0.0 }
 0x975   : > { %11157 = vmatmul.f32.vlgmr.msra.gmra.mxu1 %v11120_v52 }
 0x9f2   : > { %v11158_v4 = vpop.f32.mrf.mxu1 }
 0x9f3   : > { %v11159_v13 = vadd.f32 %v13170_v44, %v11158_v4 }
 0x9f5   : > { %v11161_v15 = vmax.f32 %v11159_v13, 0.0 }
 0x9f7   : > { %11198 = vmatmul.f32.vlgmr.msrb.gmra.mxu2 %v11161_v15 }
 0xa7a   : > { %v11199_v46 = vpop.f32.mrf.mxu2 }
 0xa7b   : > { %v11200_v54 = vadd.f32 %v13171_v35, %v11199_v46 }
 0xa7d   : > { %11202 = vst [vmem:[%s17047_s0] sm:$0xff] %v11200_v54 }
 0xa7e   : > { %13199 = shalt.err (!%p13196_p4)
}
 0xa7f   : > { %13114 = dma.vmem_to_hbm [thread:$0]  (%p13342_p5), %s11217_s22, 128, %s11219_s15, %s11204_s1  }
 0xa80 PF: > { %p13120_p7 = scmp.ge.s32.totalorder %s13238_s20, 2  ;;  %s11230_s12 = sand.u32 1, %s13226_s17  }
 0xa81   : > { %s11231_s24 = scalar_lea.sflag [#allocation7], %s11230_s12 }
 0xa82   : > { %p13117_p8 = pnand %p13120_p7, %p13346_p6 }
 0xa84   : > { %p13118_p9 = pneg %p13117_p8 }
 0xa86   : > { %13221 = dma.done.wait (%p13118_p9), %s11231_s24, 128  }
 0xa87   : > { %13223 = vsyncadd (%p13118_p9), %s11231_s24, 4294967168  ;;  %s17049_s2 = sld [smem:[#allocation9_spill]]  ;;  %p21_p10 = scmp.ge.s32.totalorder %s13329_s23, 4  }
 0xa88   : > { %s17050_s17 = smov %s13230_s18  ;;  %s17051_s18 = smov %s13234_s19 }
 0xa89   : > { %s17053_s20 = smov %s13329_s23  ;;  %23 = sbr.rel (!%p21_p10) target bundleno = 7 (0x7), region = 357 }
 0xa8d   : > { %s17052_s19 = smov %s17049_s2 }
 0xa8e   :  { %11237 = vsyncpa [#allocation7], 1 }
 0xa8f   :  { %11239 = vsyncpa [#allocation7 + $0x1], 1 }

</bundles_post_ra>
